<compile_context>
chip_gen: v7x
topology: tpu7x:2x2x1
jax: 0.10.0
libtpu: 0.0.40
codegen_flags: <defaults>
</compile_context>

<pallas_src>
import functools

import jax
import jax.numpy as jnp
from jax.experimental import pallas as pl
from jax.experimental.pallas import tpu as pltpu

EPS = 1e-5
LANE = 128      # TPU lane width (minor-most dim)
WALIGN = 16     # bf16 sublane tile; keeps all reshapes/slices layout-preserving


def _basic_block_kernel(w_valid, x_ref, w1_ref, b1_ref, w2_ref, b2_ref,
                        out_ref, mid_ref):
    # x_ref : (Hp, Wp, Cp) bf16   zero-padded image (spatial pad=1 + alignment
    #                             pad, channels zero-padded to Cp = 128k)
    # w*_ref: (3, 3*Cp, Cp) bf16  conv weights packed [kh, kw*Cp + cin, cout],
    #                             BN scale pre-folded
    # b*_ref: (1, Cp) f32         folded BN bias
    # out_ref: (H, Wp, Cp) bf16   block output in padded-column coordinates
    # mid_ref: (Hp*Wp, Cp) bf16   VMEM scratch: re-padded conv1 activation
    Hp, Wp, Cp = x_ref.shape
    H = Hp - 2
    M = Hp * Wp

    def conv3x3(flat, w_ref):
        # flat: (M, Cp) bf16, zero everywhere outside the valid interior.
        # Returns (H*Wp, Cp) f32; flat index q = i*Wp + c is the conv output at
        # image row i, padded column c (only c in [1, w_valid] is meaningful).
        zrow = jnp.zeros((1, Cp), flat.dtype)
        sm1 = jnp.concatenate([zrow, flat[:M - 1]], axis=0)   # [q]=flat[q-1] (kw=0)
        sp1 = jnp.concatenate([flat[1:], zrow], axis=0)       # [q]=flat[q+1] (kw=2)
        # K-stack the three kw taps along lanes: stacked[q, kw*Cp + c].
        stacked = jnp.concatenate([sm1, flat, sp1], axis=-1)  # (M, 3*Cp) bf16
        acc = None
        for kh in range(3):
            a = stacked[kh * Wp:(kh + H) * Wp]                # aligned slice (free)
            d = jnp.dot(a, w_ref[kh], preferred_element_type=jnp.float32)
            acc = d if acc is None else acc + d
        return acc                                            # (H*Wp, Cp) f32

    xp = x_ref[...]                                           # (Hp, Wp, Cp) bf16
    flat_x = xp.reshape(M, Cp)                                # layout-preserving (Wp%16==0)

    # ---- conv1 (BN1 scale folded into w1) + bias ---------------------------
    y1 = conv3x3(flat_x, w1_ref) + b1_ref[...]                # (H*Wp, Cp) f32

    # ---- fused column-mask + ReLU + bf16 cast, re-pad into VMEM scratch ----
    col = jax.lax.broadcasted_iota(jnp.int32, (1, Wp, Cp), 1)
    keep = jnp.logical_and(col >= 1, col <= w_valid)          # (1, Wp, Cp) bool
    mid_int = jnp.where(keep, jnp.maximum(y1, 0.0).reshape(H, Wp, Cp),
                        0.0).astype(jnp.bfloat16)             # (H, Wp, Cp) bf16
    zband = jnp.zeros((Wp, Cp), jnp.bfloat16)
    mid_ref[0:Wp, :] = zband                                  # top pad row
    mid_ref[M - Wp:M, :] = zband                              # bottom pad row
    mid_ref[Wp:M - Wp, :] = mid_int.reshape(H * Wp, Cp)       # interior

    # ---- conv2 (BN2 scale folded) + bias + residual + ReLU ------------------
    y2 = conv3x3(mid_ref[...], w2_ref) + b2_ref[...]          # (H*Wp, Cp) f32
    identity = flat_x[Wp:(H + 1) * Wp].astype(jnp.float32)    # interior rows of x
    out = jnp.maximum(y2 + identity, 0.0)
    out_ref[...] = out.reshape(H, Wp, Cp).astype(out_ref.dtype)


@jax.jit
def basic_block_forward(x_nchw, w1, g1, be1, m1, v1, w2, g2, be2, m2, v2):
    """x_nchw: (N, C, H, W) f32; conv weights HWIO; BN params 1-D. Returns NCHW f32."""
    N, C, H, W = x_nchw.shape
    Cout = w1.shape[-1]
    # Default BasicBlock only: stride=1, no downsample => identity skip needs C == Cout.
    assert C == Cout and w2.shape == (3, 3, Cout, Cout)

    Cp = ((max(C, Cout) + LANE - 1) // LANE) * LANE
    Hp = H + 2
    Wp = ((W + 2 + WALIGN - 1) // WALIGN) * WALIGN

    # Fold inference BN into conv:  bn(conv(x, w)) = conv(x, w*scale) + bias
    s1 = g1 / jnp.sqrt(v1 + EPS)
    b1 = be1 - m1 * s1
    s2 = g2 / jnp.sqrt(v2 + EPS)
    b2 = be2 - m2 * s2

    def pack_w(w, s):
        # scale in f32 first, cast to bf16 after (keeps per-channel scale accurate),
        # then pack (kh, kw, cin, cout) -> (kh, kw*Cp + cin, cout) to match the
        # in-kernel lane-stacked operand layout.
        wf = jnp.zeros((3, 3, Cp, Cp), jnp.float32)
        wf = wf.at[:, :, :w.shape[2], :w.shape[3]].set(w * s[None, None, None, :])
        return wf.astype(jnp.bfloat16).reshape(3, 3 * Cp, Cp)

    w1p = pack_w(w1, s1)
    w2p = pack_w(w2, s2)
    b1p = jnp.zeros((1, Cp), jnp.float32).at[0, :Cout].set(b1)
    b2p = jnp.zeros((1, Cp), jnp.float32).at[0, :Cout].set(b2)

    # NOTE: for a full ResNet, activations should stay in this padded NHWC-Cp
    # layout across consecutive blocks (pad/transpose once per network, not per
    # block); done here per-call only because the test interface is NCHW f32.
    x_nhwc = jnp.transpose(x_nchw, (0, 2, 3, 1)).astype(jnp.bfloat16)
    xpad = jnp.zeros((N, Hp, Wp, Cp), jnp.bfloat16).at[:, 1:H + 1, 1:W + 1, :C].set(x_nhwc)

    kernel = functools.partial(_basic_block_kernel, W)

    out_p = pl.pallas_call(
        kernel,
        out_shape=jax.ShapeDtypeStruct((N, H, Wp, Cp), jnp.bfloat16),
        grid_spec=pltpu.PrefetchScalarGridSpec(
            num_scalar_prefetch=0,
            grid=(N,),
            in_specs=[
                pl.BlockSpec((None, Hp, Wp, Cp), lambda n: (n, 0, 0, 0)),
                pl.BlockSpec((3, 3 * Cp, Cp), lambda n: (0, 0, 0)),
                pl.BlockSpec((1, Cp), lambda n: (0, 0)),
                pl.BlockSpec((3, 3 * Cp, Cp), lambda n: (0, 0, 0)),
                pl.BlockSpec((1, Cp), lambda n: (0, 0)),
            ],
            out_specs=pl.BlockSpec((None, H, Wp, Cp), lambda n: (n, 0, 0, 0)),
            scratch_shapes=[pltpu.VMEM((Hp * Wp, Cp), jnp.bfloat16)],
        ),
        compiler_params=pltpu.CompilerParams(
            dimension_semantics=("parallel",)),
    )(xpad, w1p, b1p, w2p, b2p)

    out = out_p[:, :, 1:W + 1, :Cout].astype(jnp.float32)    # strip padding
    return jnp.transpose(out, (0, 3, 1, 2))                  # back to NCHW


def ref_forward(x_nchw, w1, g1, be1, m1, v1, w2, g2, be2, m2, v2):
    """Exact f32 reference of the PyTorch BasicBlock forward (eval-mode BN)."""
    x = jnp.transpose(x_nchw, (0, 2, 3, 1))

    def conv(a, w):
        return jax.lax.conv_general_dilated(
            a, w, window_strides=(1, 1), padding="SAME",
            dimension_numbers=("NHWC", "HWIO", "NHWC"),
            precision=jax.lax.Precision.HIGHEST)

    def bn(a, g, b, m, v):
        return (a - m) / jnp.sqrt(v + EPS) * g + b

    out = jax.nn.relu(bn(conv(x, w1), g1, be1, m1, v1))
    out = bn(conv(out, w2), g2, be2, m2, v2)
    out = jax.nn.relu(out + x)
    return jnp.transpose(out, (0, 3, 1, 2))


if __name__ == "__main__":
    N, C, H, W = 2, 4, 16, 16       # inplanes = planes = 4, stride = 1
    planes = C

    key = jax.random.PRNGKey(0)
    ks = jax.random.split(key, 11)

    x = jax.random.normal(ks[0], (N, C, H, W), jnp.float32)

    # conv weights, HWIO layout (deterministic synthetic init)
    w1 = jax.random.normal(ks[1], (3, 3, C, planes), jnp.float32) * 0.1
    w2 = jax.random.normal(ks[2], (3, 3, planes, planes), jnp.float32) * 0.1

    # BN parameters / running statistics
    g1 = 1.0 + 0.1 * jax.random.normal(ks[3], (planes,), jnp.float32)
    be1 = 0.1 * jax.random.normal(ks[4], (planes,), jnp.float32)
    m1 = 0.1 * jax.random.normal(ks[5], (planes,), jnp.float32)
    v1 = jax.random.uniform(ks[6], (planes,), jnp.float32, 0.5, 1.5)

    g2 = 1.0 + 0.1 * jax.random.normal(ks[7], (planes,), jnp.float32)
    be2 = 0.1 * jax.random.normal(ks[8], (planes,), jnp.float32)
    m2 = 0.1 * jax.random.normal(ks[9], (planes,), jnp.float32)
    v2 = jax.random.uniform(ks[10], (planes,), jnp.float32, 0.5, 1.5)

    out = basic_block_forward(x, w1, g1, be1, m1, v1, w2, g2, be2, m2, v2)
    out = jax.block_until_ready(out)

    ref = ref_forward(x, w1, g1, be1, m1, v1, w2, g2, be2, m2, v2)
    assert out.shape == (N, C, H, W)
    # bf16 MXU inputs + bf16 output slab -> bf16-appropriate mixed abs/rel tolerance
    # vs. the f32 reference (allclose already scales by |ref|).
    err = float(jnp.max(jnp.abs(out - ref)))
    assert jnp.allclose(out, ref, rtol=3e-2, atol=3e-2), f"max abs err {err}"

    print("KERNEL_OK")
</pallas_src>

<mosaic_0001>
module attributes {stable_mosaic.version = 11 : i64} {
  func.func @_basic_block_kernel(%arg0: i32, %arg1: memref<1x18x32x128xbf16, #tpu.memory_space<vmem>>, %arg2: memref<3x384x128xbf16, #tpu.memory_space<vmem>>, %arg3: memref<1x128xf32, #tpu.memory_space<vmem>>, %arg4: memref<3x384x128xbf16, #tpu.memory_space<vmem>>, %arg5: memref<1x128xf32, #tpu.memory_space<vmem>>, %arg6: memref<1x16x32x128xbf16, #tpu.memory_space<vmem>>, %arg7: memref<576x128xbf16, #tpu.memory_space<vmem>>) attributes {dimension_semantics = [#tpu.dimension_semantics<parallel>], iteration_bounds = array<i64: 2>, scalar_prefetch = 0 : i64, scratch_operands = 1 : i64, tpu.core_type = #tpu.core_type<tc>, window_params = [{transform_indices = @transform_0, window_bounds = array<i64: 1, 18, 32, 128>}, {pipeline_mode = #tpu.pipeline_mode<synchronous>, transform_indices = @transform_1, window_bounds = array<i64: 3, 384, 128>}, {pipeline_mode = #tpu.pipeline_mode<synchronous>, transform_indices = @transform_2, window_bounds = array<i64: 1, 128>}, {pipeline_mode = #tpu.pipeline_mode<synchronous>, transform_indices = @transform_3, window_bounds = array<i64: 3, 384, 128>}, {pipeline_mode = #tpu.pipeline_mode<synchronous>, transform_indices = @transform_4, window_bounds = array<i64: 1, 128>}, {transform_indices = @transform_5, window_bounds = array<i64: 1, 16, 32, 128>}]} {
    %c0 = arith.constant 0 : index
    %c0_0 = arith.constant 0 : index
    %c0_1 = arith.constant 0 : index
    %c0_2 = arith.constant 0 : index
    %0 = vector.load %arg1[%c0, %c0_0, %c0_1, %c0_2] : memref<1x18x32x128xbf16, #tpu.memory_space<vmem>>, vector<1x18x32x128xbf16>
    %1 = vector.shape_cast %0 : vector<1x18x32x128xbf16> to vector<18x32x128xbf16>
    %2 = vector.shape_cast %1 : vector<18x32x128xbf16> to vector<576x128xbf16>
    %cst = arith.constant 0.000000e+00 : bf16
    %3 = vector.broadcast %cst : bf16 to vector<1x128xbf16>
    %4 = vector.extract_strided_slice %2 {offsets = [0, 0], sizes = [575, 128], strides = [1, 1]} : vector<576x128xbf16> to vector<575x128xbf16>
    %5 = tpu.concatenate %3, %4 in 0 : vector<1x128xbf16>, vector<575x128xbf16> -> vector<576x128xbf16>
    %6 = vector.extract_strided_slice %2 {offsets = [1, 0], sizes = [575, 128], strides = [1, 1]} : vector<576x128xbf16> to vector<575x128xbf16>
    %7 = tpu.concatenate %6, %3 in 0 : vector<575x128xbf16>, vector<1x128xbf16> -> vector<576x128xbf16>
    %8 = tpu.concatenate %5, %2, %7 in 1 : vector<576x128xbf16>, vector<576x128xbf16>, vector<576x128xbf16> -> vector<576x384xbf16>
    %9 = vector.extract_strided_slice %8 {offsets = [0, 0], sizes = [512, 384], strides = [1, 1]} : vector<576x384xbf16> to vector<512x384xbf16>
    %c0_3 = arith.constant 0 : index
    %c0_4 = arith.constant 0 : index
    %c0_5 = arith.constant 0 : index
    %10 = vector.load %arg2[%c0_3, %c0_4, %c0_5] : memref<3x384x128xbf16, #tpu.memory_space<vmem>>, vector<1x384x128xbf16>
    %11 = vector.shape_cast %10 : vector<1x384x128xbf16> to vector<384x128xbf16>
    %cst_6 = arith.constant dense<0.000000e+00> : vector<512x128xf32>
    %12 = tpu.matmul %9, %11, %cst_6 {dimension_numbers = #tpu.dot_dimension_numbers<[1], [0], [0], [1], [0, 0, 1, 1], [], []>} : vector<512x384xbf16>, vector<384x128xbf16>, vector<512x128xf32> -> vector<512x128xf32>
    %13 = vector.extract_strided_slice %8 {offsets = [32, 0], sizes = [512, 384], strides = [1, 1]} : vector<576x384xbf16> to vector<512x384xbf16>
    %c1 = arith.constant 1 : index
    %c0_7 = arith.constant 0 : index
    %c0_8 = arith.constant 0 : index
    %14 = vector.load %arg2[%c1, %c0_7, %c0_8] : memref<3x384x128xbf16, #tpu.memory_space<vmem>>, vector<1x384x128xbf16>
    %15 = vector.shape_cast %14 : vector<1x384x128xbf16> to vector<384x128xbf16>
    %cst_9 = arith.constant dense<0.000000e+00> : vector<512x128xf32>
    %16 = tpu.matmul %13, %15, %cst_9 {dimension_numbers = #tpu.dot_dimension_numbers<[1], [0], [0], [1], [0, 0, 1, 1], [], []>} : vector<512x384xbf16>, vector<384x128xbf16>, vector<512x128xf32> -> vector<512x128xf32>
    %17 = arith.addf %12, %16 : vector<512x128xf32>
    %18 = vector.extract_strided_slice %8 {offsets = [64, 0], sizes = [512, 384], strides = [1, 1]} : vector<576x384xbf16> to vector<512x384xbf16>
    %c2 = arith.constant 2 : index
    %c0_10 = arith.constant 0 : index
    %c0_11 = arith.constant 0 : index
    %19 = vector.load %arg2[%c2, %c0_10, %c0_11] : memref<3x384x128xbf16, #tpu.memory_space<vmem>>, vector<1x384x128xbf16>
    %20 = vector.shape_cast %19 : vector<1x384x128xbf16> to vector<384x128xbf16>
    %cst_12 = arith.constant dense<0.000000e+00> : vector<512x128xf32>
    %21 = tpu.matmul %18, %20, %cst_12 {dimension_numbers = #tpu.dot_dimension_numbers<[1], [0], [0], [1], [0, 0, 1, 1], [], []>} : vector<512x384xbf16>, vector<384x128xbf16>, vector<512x128xf32> -> vector<512x128xf32>
    %22 = arith.addf %17, %21 : vector<512x128xf32>
    %c0_13 = arith.constant 0 : index
    %c0_14 = arith.constant 0 : index
    %23 = vector.load %arg3[%c0_13, %c0_14] : memref<1x128xf32, #tpu.memory_space<vmem>>, vector<1x128xf32>
    %24 = vector.broadcast %23 : vector<1x128xf32> to vector<512x128xf32>
    %25 = arith.addf %22, %24 : vector<512x128xf32>
    %26 = tpu.iota {dimensions = array<i32: 1>} : vector<1x32x128xi32>
    %c1_i32 = arith.constant 1 : i32
    %27 = vector.broadcast %c1_i32 : i32 to vector<1x32x128xi32>
    %28 = arith.cmpi sge, %26, %27 : vector<1x32x128xi32>
    %c16_i32 = arith.constant 16 : i32
    %29 = vector.broadcast %c16_i32 : i32 to vector<1x32x128xi32>
    %30 = arith.cmpi sle, %26, %29 : vector<1x32x128xi32>
    %31 = arith.andi %28, %30 : vector<1x32x128xi1>
    %cst_15 = arith.constant 0.000000e+00 : f32
    %32 = vector.broadcast %cst_15 : f32 to vector<512x128xf32>
    %33 = arith.maximumf %25, %32 : vector<512x128xf32>
    %34 = vector.shape_cast %33 : vector<512x128xf32> to vector<16x32x128xf32>
    %cst_16 = arith.constant 0.000000e+00 : f32
    %35 = vector.shape_cast %31 : vector<1x32x128xi1> to vector<1x32x128xi1>
    %36 = vector.broadcast %35 : vector<1x32x128xi1> to vector<16x32x128xi1>
    %37 = vector.broadcast %cst_16 : f32 to vector<16x32x128xf32>
    %38 = arith.select %36, %34, %37 : vector<16x32x128xi1>, vector<16x32x128xf32>
    %39 = arith.truncf %38 : vector<16x32x128xf32> to vector<16x32x128xbf16>
    %cst_17 = arith.constant 0.000000e+00 : bf16
    %40 = vector.broadcast %cst_17 : bf16 to vector<32x128xbf16>
    %c0_18 = arith.constant 0 : index
    %c0_19 = arith.constant 0 : index
    %41 = vector.load %arg7[%c0_18, %c0_19] : memref<576x128xbf16, #tpu.memory_space<vmem>>, vector<32x128xbf16>
    tpu.vector_store %arg7[%c0_18, %c0_19], %40 {strides = array<i32>} : memref<576x128xbf16, #tpu.memory_space<vmem>>, vector<32x128xbf16>,
    %c544 = arith.constant 544 : index
    %c0_20 = arith.constant 0 : index
    %42 = vector.load %arg7[%c544, %c0_20] : memref<576x128xbf16, #tpu.memory_space<vmem>>, vector<32x128xbf16>
    tpu.vector_store %arg7[%c544, %c0_20], %40 {strides = array<i32>} : memref<576x128xbf16, #tpu.memory_space<vmem>>, vector<32x128xbf16>,
    %43 = vector.shape_cast %39 : vector<16x32x128xbf16> to vector<512x128xbf16>
    %c32 = arith.constant 32 : index
    %c0_21 = arith.constant 0 : index
    %44 = vector.load %arg7[%c32, %c0_21] : memref<576x128xbf16, #tpu.memory_space<vmem>>, vector<512x128xbf16>
    tpu.vector_store %arg7[%c32, %c0_21], %43 {strides = array<i32>} : memref<576x128xbf16, #tpu.memory_space<vmem>>, vector<512x128xbf16>,
    %c0_22 = arith.constant 0 : index
    %c0_23 = arith.constant 0 : index
    %45 = vector.load %arg7[%c0_22, %c0_23] : memref<576x128xbf16, #tpu.memory_space<vmem>>, vector<576x128xbf16>
    %cst_24 = arith.constant 0.000000e+00 : bf16
    %46 = vector.broadcast %cst_24 : bf16 to vector<1x128xbf16>
    %47 = vector.extract_strided_slice %45 {offsets = [0, 0], sizes = [575, 128], strides = [1, 1]} : vector<576x128xbf16> to vector<575x128xbf16>
    %48 = tpu.concatenate %46, %47 in 0 : vector<1x128xbf16>, vector<575x128xbf16> -> vector<576x128xbf16>
    %49 = vector.extract_strided_slice %45 {offsets = [1, 0], sizes = [575, 128], strides = [1, 1]} : vector<576x128xbf16> to vector<575x128xbf16>
    %50 = tpu.concatenate %49, %46 in 0 : vector<575x128xbf16>, vector<1x128xbf16> -> vector<576x128xbf16>
    %51 = tpu.concatenate %48, %45, %50 in 1 : vector<576x128xbf16>, vector<576x128xbf16>, vector<576x128xbf16> -> vector<576x384xbf16>
    %52 = vector.extract_strided_slice %51 {offsets = [0, 0], sizes = [512, 384], strides = [1, 1]} : vector<576x384xbf16> to vector<512x384xbf16>
    %c0_25 = arith.constant 0 : index
    %c0_26 = arith.constant 0 : index
    %c0_27 = arith.constant 0 : index
    %53 = vector.load %arg4[%c0_25, %c0_26, %c0_27] : memref<3x384x128xbf16, #tpu.memory_space<vmem>>, vector<1x384x128xbf16>
    %54 = vector.shape_cast %53 : vector<1x384x128xbf16> to vector<384x128xbf16>
    %cst_28 = arith.constant dense<0.000000e+00> : vector<512x128xf32>
    %55 = tpu.matmul %52, %54, %cst_28 {dimension_numbers = #tpu.dot_dimension_numbers<[1], [0], [0], [1], [0, 0, 1, 1], [], []>} : vector<512x384xbf16>, vector<384x128xbf16>, vector<512x128xf32> -> vector<512x128xf32>
    %56 = vector.extract_strided_slice %51 {offsets = [32, 0], sizes = [512, 384], strides = [1, 1]} : vector<576x384xbf16> to vector<512x384xbf16>
    %c1_29 = arith.constant 1 : index
    %c0_30 = arith.constant 0 : index
    %c0_31 = arith.constant 0 : index
    %57 = vector.load %arg4[%c1_29, %c0_30, %c0_31] : memref<3x384x128xbf16, #tpu.memory_space<vmem>>, vector<1x384x128xbf16>
    %58 = vector.shape_cast %57 : vector<1x384x128xbf16> to vector<384x128xbf16>
    %cst_32 = arith.constant dense<0.000000e+00> : vector<512x128xf32>
    %59 = tpu.matmul %56, %58, %cst_32 {dimension_numbers = #tpu.dot_dimension_numbers<[1], [0], [0], [1], [0, 0, 1, 1], [], []>} : vector<512x384xbf16>, vector<384x128xbf16>, vector<512x128xf32> -> vector<512x128xf32>
    %60 = arith.addf %55, %59 : vector<512x128xf32>
    %61 = vector.extract_strided_slice %51 {offsets = [64, 0], sizes = [512, 384], strides = [1, 1]} : vector<576x384xbf16> to vector<512x384xbf16>
    %c2_33 = arith.constant 2 : index
    %c0_34 = arith.constant 0 : index
    %c0_35 = arith.constant 0 : index
    %62 = vector.load %arg4[%c2_33, %c0_34, %c0_35] : memref<3x384x128xbf16, #tpu.memory_space<vmem>>, vector<1x384x128xbf16>
    %63 = vector.shape_cast %62 : vector<1x384x128xbf16> to vector<384x128xbf16>
    %cst_36 = arith.constant dense<0.000000e+00> : vector<512x128xf32>
    %64 = tpu.matmul %61, %63, %cst_36 {dimension_numbers = #tpu.dot_dimension_numbers<[1], [0], [0], [1], [0, 0, 1, 1], [], []>} : vector<512x384xbf16>, vector<384x128xbf16>, vector<512x128xf32> -> vector<512x128xf32>
    %65 = arith.addf %60, %64 : vector<512x128xf32>
    %c0_37 = arith.constant 0 : index
    %c0_38 = arith.constant 0 : index
    %66 = vector.load %arg5[%c0_37, %c0_38] : memref<1x128xf32, #tpu.memory_space<vmem>>, vector<1x128xf32>
    %67 = vector.broadcast %66 : vector<1x128xf32> to vector<512x128xf32>
    %68 = arith.addf %65, %67 : vector<512x128xf32>
    %69 = vector.extract_strided_slice %2 {offsets = [32, 0], sizes = [512, 128], strides = [1, 1]} : vector<576x128xbf16> to vector<512x128xbf16>
    %70 = arith.extf %69 : vector<512x128xbf16> to vector<512x128xf32>
    %71 = arith.addf %68, %70 : vector<512x128xf32>
    %cst_39 = arith.constant 0.000000e+00 : f32
    %72 = vector.broadcast %cst_39 : f32 to vector<512x128xf32>
    %73 = arith.maximumf %71, %72 : vector<512x128xf32>
    %74 = vector.shape_cast %73 : vector<512x128xf32> to vector<16x32x128xf32>
    %75 = arith.truncf %74 : vector<16x32x128xf32> to vector<16x32x128xbf16>
    %c0_40 = arith.constant 0 : index
    %c0_41 = arith.constant 0 : index
    %c0_42 = arith.constant 0 : index
    %c0_43 = arith.constant 0 : index
    %76 = vector.load %arg6[%c0_40, %c0_41, %c0_42, %c0_43] : memref<1x16x32x128xbf16, #tpu.memory_space<vmem>>, vector<1x16x32x128xbf16>
    %77 = vector.shape_cast %76 : vector<1x16x32x128xbf16> to vector<16x32x128xbf16>
    %78 = vector.shape_cast %75 : vector<16x32x128xbf16> to vector<1x16x32x128xbf16>
    tpu.vector_store %arg6[%c0_40, %c0_41, %c0_42, %c0_43], %78 {strides = array<i32>} : memref<1x16x32x128xbf16, #tpu.memory_space<vmem>>, vector<1x16x32x128xbf16>,
    return
  }
  func.func @transform_0(%arg0: i32) -> (i32, i32, i32, i32) {
    %c0_i32 = arith.constant 0 : i32
    %c0_i32_0 = arith.constant 0 : i32
    %c0_i32_1 = arith.constant 0 : i32
    %c0_i32_2 = arith.constant 0 : i32
    return %arg0, %c0_i32, %c0_i32_0, %c0_i32_1 : i32, i32, i32, i32
  }
  func.func @transform_1(%arg0: i32) -> (i32, i32, i32) {
    %c0_i32 = arith.constant 0 : i32
    %c0_i32_0 = arith.constant 0 : i32
    %c0_i32_1 = arith.constant 0 : i32
    %c0_i32_2 = arith.constant 0 : i32
    return %c0_i32, %c0_i32_0, %c0_i32_1 : i32, i32, i32
  }
  func.func @transform_2(%arg0: i32) -> (i32, i32) {
    %c0_i32 = arith.constant 0 : i32
    %c0_i32_0 = arith.constant 0 : i32
    %c0_i32_1 = arith.constant 0 : i32
    return %c0_i32, %c0_i32_0 : i32, i32
  }
  func.func @transform_3(%arg0: i32) -> (i32, i32, i32) {
    %c0_i32 = arith.constant 0 : i32
    %c0_i32_0 = arith.constant 0 : i32
    %c0_i32_1 = arith.constant 0 : i32
    %c0_i32_2 = arith.constant 0 : i32
    return %c0_i32, %c0_i32_0, %c0_i32_1 : i32, i32, i32
  }
  func.func @transform_4(%arg0: i32) -> (i32, i32) {
    %c0_i32 = arith.constant 0 : i32
    %c0_i32_0 = arith.constant 0 : i32
    %c0_i32_1 = arith.constant 0 : i32
    return %c0_i32, %c0_i32_0 : i32, i32
  }
  func.func @transform_5(%arg0: i32) -> (i32, i32, i32, i32) {
    %c0_i32 = arith.constant 0 : i32
    %c0_i32_0 = arith.constant 0 : i32
    %c0_i32_1 = arith.constant 0 : i32
    %c0_i32_2 = arith.constant 0 : i32
    return %arg0, %c0_i32, %c0_i32_0, %c0_i32_1 : i32, i32, i32, i32
  }
}

</mosaic_0001>

<bundles_post_ra>
// kernel: basic_block_forward.1
= control target key start
LH: loop header
LB: loop body
LE: loop exit
PB: predicated region body
PF: predicated region fallthrough
CT: control target
= control target key end

     0   :  { %s9175_s18 = smov 0   ;;  %s13359_s0 = inlined_call_operand.vmem [shape: bf16[2,18,32,128], index: 0, kind: input, shape index: {}]   ;;  %s13360_s1 = inlined_call_operand.vmem [shape: bf16[3,384,128], index: 1, kind: input, shape index: {}]   ;;  %s13361_s2 = inlined_call_operand.vmem [shape: f32[1,128], index: 2, kind: input, shape index: {}]   ;;  %s13362_s3 = inlined_call_operand.vmem [shape: bf16[3,384,128], index: 3, kind: input, shape index: {}]   ;;  %s13363_s4 = inlined_call_operand.vmem [shape: f32[1,128], index: 4, kind: input, shape index: {}]   ;;  %s13364_s5 = inlined_call_operand.vmem [shape: bf16[2,16,32,128], index: 5, kind: output, shape index: {}]  }
   0x1 LB: > { %s7174_s19 = sadd.s32 4294967295, %s9140_s18   ;;  %p7178_p0 = scmp.ge.s32.totalorder %s9140_s18, 1  ;;  %s9140_s18 = sphi %s9175_s18, %s15_s18  }
   0x2   : > { %p187_p1 = scmp.lt.s32.totalorder %s9140_s18, 3 }
   0x4   : > { %p188_p2 = pnand %p7178_p0, %p187_p1 }
   0x6   : > { %191 = sbr.rel (%p188_p2) target bundleno = 1553 (0x611), region = 40 }
   0xd   : > { %v8886_v0 = vld [vmem:[%s13360_s1 + $0xc0] sm:$0xff]   ;;  %v13383_v1 = vmov 0   ;;  %p215_p3 = scmp.lt.s32.totalorder %s7174_s19, 1  ;;  %v8888_v3 = vld [vmem:[%s13360_s1 + $0xc8] sm:$0xff]   ;;  %v8891_v5 = vld [vmem:[%s13360_s1 + $0x150] sm:$0xff]   ;;  %vm802_vm2 = vcmask 1040384  }
   0xe   : > { %1229 = vmatprep.subr.bf16.mxu0 %v13383_v1  ;;  %v8887_v2 = vld [vmem:[%s13360_s1 + $0x140] sm:$0xff]   ;;  %v8889_v4 = vld [vmem:[%s13360_s1 + $0x148] sm:$0xff]   ;;  %v8890_v6 = vld [vmem:[%s13360_s1 + $0xd0] sm:$0xff]   ;;  %vm805_vm0 = vsmask.f32 7424  ;;  %vm949_vm4 = vcmask 1047552  }
   0xf   : > { %1230 = vmatpush1.bf16.msra.mxu0 %v8886_v0  ;;  %8394 = vmatprep.subr.bf16.mxu1 %v8887_v2  ;;  %s14517_s19 = smov (!%p215_p3, %s7174_s19), 1  ;;  %v8893_v7 = vld [vmem:[%s13360_s1 + $0x158] sm:$0xff]   ;;  %v8895_v9 = vld [vmem:[%s13360_s1 + $0x160] sm:$0xff]   ;;  %v8897_v13 = vld [vmem:[%s13360_s1 + $0x168] sm:$0xff]   ;;  %vm478_vm1 = vsmask.f32 256 }
  0x10   : > { %1231 = vmatprep.subr.bf16.mxu0 %v13383_v1  ;;  %8395 = vmatpush3.bf16.msra.mxu1 %v8887_v2  ;;  %s8874_s9 = smul.u32 288, %s14517_s19  ;;  %v8892_v8 = vld [vmem:[%s13360_s1 + $0xd8] sm:$0xff]   ;;  %v8894_v10 = vld [vmem:[%s13360_s1 + $0xe0] sm:$0xff]   ;;  %v8896_v15 = vld [vmem:[%s13360_s1 + $0xe8] sm:$0xff]   ;;  %vm9144_vm8 = vmmov 1   ;;  %s7622_s6 = sshll.u32 %s14517_s19, 8 }
  0x11   : > { %8396 = vmatprep.subr.bf16.mxu1 %v8889_v4  ;;  %v8899_v20 = vld [vmem:[%s13360_s1 + $0x170] sm:$0xff]   ;;  %v8900_v28 = vld [vmem:[%s13360_s1 + $0xf8] sm:$0xff]   ;;  %v8904_v38 = vld [vmem:[%s13360_s1 + $0x100] sm:$0xff]   ;;  %s13095_s8 = scalar_lea.vmem %s13364_s5, %s7622_s6 }
  0x12   : > { %s9220_s16 = scalar_lea.vmem %s13359_s0, %s8874_s9  ;;  %v8898_v23 = vld [vmem:[%s13360_s1 + $0xf0] sm:$0xff]   ;;  %v8901_v29 = vld [vmem:[%s13360_s1 + $0x178] sm:$0xff]   ;;  %v8923_v43 = vld [vmem:[%s13360_s1] sm:$0xff]  }
  0x13   : > { %1232 = vmatpush1.bf16.msra.mxu0 %v8888_v3  ;;  %v9227_v11 = vld [vmem:[%s9220_s16 + $0x10] sm:$0xff]   ;;  %v9230_v12 = vld [vmem:[%s9220_s16 + $0x18] sm:$0xff]   ;;  %v9236_v14 = vld [vmem:[%s9220_s16 + $0x20] sm:$0xff]  }
  0x14   : > { %1233 = vmatprep.subr.bf16.mxu0 %v13383_v1  ;;  %8397 = vmatpush3.bf16.msra.mxu1 %v8889_v4  ;;  %13702 = vst [vmem:[#allocation3_spill] sm:$0xff] %v9227_v11  ;;  %13703 = vst [vmem:[#allocation4_spill] sm:$0xff] %v9230_v12  ;;  %v495_v16 = vshrl.u32 %v9227_v11, 16  ;;  %v498_v17 = vshll.u32 %v9227_v11, 16  ;;  %v506_v18 = vshll.u32 %v9230_v12, 16  ;;  %v9246_v19 = vld [vmem:[%s9220_s16 + $0x28] sm:$0xff]  }
  0x15   : > { %8398 = vmatprep.subr.bf16.mxu1 %v8891_v5  ;;  %13704 = vst [vmem:[#allocation5_spill] sm:$0xff] %v9236_v14  ;;  %13705 = vst [vmem:[#allocation6_spill] sm:$0xff] %v9246_v19  ;;  %1261 = vmatprep.mubr.bf16.mxu0 %v9227_v11  ;;  %v13373_v25 = vshll.u32 %v9236_v14, 16  ;;  %v503_v26 = vshrl.u32 %v9230_v12, 16  ;;  %v9268_v27 = vld [vmem:[%s9220_s16 + $0x30] sm:$0xff]   ;;  %v511_v31 = vshrl.u32 %v9236_v14, 16 }
  0x16   : > { %v9254_v21 = vrot.slane %v498_v17, 1  ;;  %v814_v22 = vrot.slane %v506_v18, 1  ;;  %13707 = vst [vmem:[#allocation8_spill] sm:$0xff] %v9268_v27  ;;  %v13370_v32 = vshll.u32 %v9246_v19, 16  ;;  %v9283_v33 = vld [vmem:[%s9220_s16 + $0x38] sm:$0xff]   ;;  %v13369_v39 = vshll.u32 %v9268_v27, 16  ;;  %vm10126_vm3 = vmand %vm802_vm2, %vm478_vm1 }
  0x17   : > { %1234 = vmatpush1.bf16.msra.mxu0 %v8890_v6  ;;  %13709 = vst [vmem:[#allocation10_spill] sm:$0xff] %v9283_v33  ;;  %v817_v34 = vrot.slane %v13373_v25, 1  ;;  %v9300_v40 = vld [vmem:[%s9220_s16 + $0x40] sm:$0xff]   ;;  %v519_v42 = vshrl.u32 %v9246_v19, 16  ;;  %v527_v45 = vshrl.u32 %v9268_v27, 16  ;;  %v13368_v46 = vshll.u32 %v9283_v33, 16  ;;  %vm10986_vm5 = vmand %vm949_vm4, %vm805_vm0 }
  0x18   : > { %1235 = vmatprep.subr.bf16.mxu0 %v13383_v1  ;;  %8399 = vmatpush3.bf16.msra.mxu1 %v8891_v5  ;;  %13706 = vst [vmem:[#allocation7_spill] sm:$0xff] %v9254_v21  ;;  %v813_v24 = vor.u32 %v9254_v21, %v495_v16  ;;  %v816_v35 = vor.u32 %v814_v22, %v503_v26  ;;  %v820_v37 = vrot.slane %v13370_v32, 1  ;;  %13710 = vst [vmem:[#allocation11_spill] sm:$0xff] %v9300_v40  ;;  %v8906_v47 = vld [vmem:[%s13360_s1 + $0x108] sm:$0xff]   ;;  %v9336_v54 = vld [vmem:[%s9220_s16 + $0x50] sm:$0xff]  }
  0x19   : > { %8400 = vmatprep.subr.bf16.mxu1 %v8893_v7  ;;  %v819_v36 = vor.u32 %v817_v34, %v511_v31  ;;  %v9319_v48 = vld [vmem:[%s9220_s16 + $0x48] sm:$0xff]   ;;  %v823_v49 = vrot.slane %v13369_v39, 1  ;;  %v826_v53 = vrot.slane %v13368_v46, 1  ;;  %13714 = vst [vmem:[#allocation15_spill] sm:$0xff] %v9336_v54  ;;  %v8908_v55 = vld [vmem:[%s13360_s1 + $0x110] sm:$0xff]   ;;  %v13367_v56 = vshll.u32 %v9300_v40, 16 }
  0x1a   : > { %v9277_v30 = vsel %vm805_vm0, %v813_v24, %v814_v22  ;;  %v9303_v41 = vsel %vm805_vm0, %v816_v35, %v817_v34  ;;  %13713 = vst [vmem:[#allocation14_spill] sm:$0xff] %v9319_v48  ;;  %v822_v50 = vor.u32 %v820_v37, %v519_v42  ;;  %v8926_v51 = vld [vmem:[%s13360_s1 + $0x8] sm:$0xff]   ;;  %v535_v58 = vshrl.u32 %v9283_v33, 16  ;;  %v9349_v59 = vld [vmem:[%s9220_s16 + $0x58] sm:$0xff]   ;;  %v8929_v60 = vld [vmem:[%s13360_s1 + $0x10] sm:$0xff]  }
  0x1b   : > { %1236 = vmatpush1.bf16.msra.mxu0 %v8892_v8  ;;  %13708 = vst [vmem:[#allocation9_spill] sm:$0xff] %v9277_v30  ;;  %8410 = vmatprep.mubr.bf16.mxu1 %v9277_v30  ;;  %13711 = vst [vmem:[#allocation12_spill] sm:$0xff] %v9303_v41  ;;  %v9310_v44 = vsel %vm805_vm0, %v819_v36, %v820_v37  ;;  %v825_v52 = vor.u32 %v823_v49, %v527_v45  ;;  %v8910_v61 = vld [vmem:[%s13360_s1 + $0x118] sm:$0xff]   ;;  %v13376_v63 = vshrl.u32 %v9300_v40, 16  ;;  %v9363_v2 = vld [vmem:[%s9220_s16 + $0x8] sm:$0xff]  }
  0x1c   : > { %1237 = vmatprep.subr.bf16.mxu0 %v13383_v1  ;;  %8401 = vmatpush3.bf16.msra.mxu1 %v8893_v7  ;;  %13712 = vst [vmem:[#allocation13_spill] sm:$0xff] %v9310_v44  ;;  %v9345_v57 = vsel %vm805_vm0, %v822_v50, %v823_v49  ;;  %13716 = vst [vmem:[#allocation17_spill] sm:$0xff] %v9349_v59  ;;  %v13366_v0 = vshll.u32 %v9319_v48, 16  ;;  %v9367_v3 = vld [vmem:[%s9220_s16 + $0x60] sm:$0xff]   ;;  %v829_v4 = vrot.slane %v13367_v56, 1  ;;  %v9374_v5 = vld [vmem:[%s9220_s16 + $0x68] sm:$0xff]  }
  0x1d   : > { %8402 = vmatprep.subr.bf16.mxu1 %v8895_v9  ;;  %13715 = vst [vmem:[#allocation16_spill] sm:$0xff] %v9345_v57  ;;  %v9358_v62 = vsel %vm805_vm0, %v825_v52, %v826_v53  ;;  %13718 = vst [vmem:[#allocation19_spill] sm:$0xff] %v9363_v2  ;;  %v828_v6 = vor.u32 %v826_v53, %v535_v58  ;;  %v562_v7 = vshll.u32 %v9336_v54, 16  ;;  %v8932_v8 = vld [vmem:[%s13360_s1 + $0x18] sm:$0xff]   ;;  %v9397_v22 = vrot.slane %v495_v16, 7  ;;  %v8936_v36 = vld [vmem:[%s13360_s1 + $0x20] sm:$0xff]  }
  0x1e   : > { %13717 = vst [vmem:[#allocation18_spill] sm:$0xff] %v9358_v62  ;;  %13719 = vst [vmem:[#allocation20_spill] sm:$0xff] %v9367_v3  ;;  %v13379_v24 = vshll.u32 %v9349_v59, 16  ;;  %v559_v16 = vshrl.u32 %v9336_v54, 16  ;;  %v13371_v50 = vshll.u32 %v9374_v5, 16  ;;  %v13380_v52 = vshrl.u32 %v9349_v59, 16 }
  0x1f   : > { %1238 = vmatpush1.bf16.msra.mxu0 %v8894_v10  ;;  %13720 = vst [vmem:[#allocation21_spill] sm:$0xff] %v9374_v5  ;;  %v831_v10 = vor.u32 %v829_v4, %v13376_v63  ;;  %v9409_v34 = vsel %vm805_vm0, %v828_v6, %v829_v4  ;;  %v835_v35 = vrot.slane %v562_v7, 1  ;;  %v9444_v53 = vrot.slane %v511_v31, 7  ;;  %v8939_v31 = vld [vmem:[%s13360_s1 + $0x28] sm:$0xff]   ;;  %v9479_v46 = vld [vmem:[%s9220_s16 + $0xa0] sm:$0xff]   ;;  %v8918_v32 = vld [vmem:[%s13360_s1 + $0x138] sm:$0xff]  }
  0x20   : > { %1239 = vmatprep.subr.bf16.mxu0 %v13383_v1  ;;  %8403 = vmatpush3.bf16.msra.mxu1 %v8895_v9  ;;  %v8912_v9 = vld [vmem:[%s13360_s1 + $0x120] sm:$0xff]   ;;  %13724 = vst [vmem:[#allocation25_spill] sm:$0xff] %v9409_v34  ;;  %13730 = vst [vmem:[#allocation31_spill] sm:$0xff] %v9479_v46  ;;  %v9499_v25 = vld [vmem:[%s9220_s16 + $0xa8] sm:$0xff]   ;;  %v13753_v21 = vshrl.u32 %v9300_v40, 16 }
  0x21   : > { %8404 = vmatprep.subr.bf16.mxu1 %v8897_v13  ;;  %13733 = vst [vmem:[#allocation34_spill] sm:$0xff] %v9499_v25  ;;  %v9519_v63 = vld [vmem:[%s9220_s16 + $0xb0] sm:$0xff]   ;;  %v9559_v56 = vld [vmem:[%s9220_s16 + $0xc0] sm:$0xff]  }
  0x22   : > { %13734 = vst [vmem:[#allocation35_spill] sm:$0xff] %v9519_v63  ;;  %13737 = vst [vmem:[#allocation38_spill] sm:$0xff] %v9559_v56 }
  0x23   : > { %1240 = vmatpush1.bf16.msra.mxu0 %v8896_v15  ;;  %v9391_v15 = vld [vmem:[%s9220_s16 + $0x70] sm:$0xff]  }
  0x24   : > { %1241 = vmatprep.subr.bf16.mxu0 %v13383_v1  ;;  %8405 = vmatpush3.bf16.msra.mxu1 %v8897_v13  ;;  %v832_v13 = vrot.slane %v13366_v0, 1  ;;  %13721 = vst [vmem:[#allocation22_spill] sm:$0xff] %v9391_v15  ;;  %v13375_v4 = vshll.u32 %v9391_v15, 16  ;;  %v9471_v0 = vld [vmem:[%s9220_s16 + $0x98] sm:$0xff]  }
  0x25   : > { %8406 = vmatprep.subr.bf16.mxu1 %v8899_v20  ;;  %13729 = vst [vmem:[#allocation30_spill] sm:$0xff] %v9471_v0 }
  0x26   : > { %v9418_v37 = vsel %vm805_vm0, %v831_v10, %v832_v13  ;;  %v844_v10 = vrot.slane %v13371_v50, 1 }
  0x27   : > { %1242 = vmatpush1.bf16.msra.mxu0 %v8898_v23  ;;  %v13372_v23 = vshrl.u32 %v9319_v48, 16  ;;  %13725 = vst [vmem:[#allocation26_spill] sm:$0xff] %v9418_v37 }
  0x28   : > { %1243 = vmatprep.subr.bf16.mxu0 %v13383_v1  ;;  %8407 = vmatpush3.bf16.msra.mxu1 %v8899_v20  ;;  %v13365_v20 = vshrl.u32 %v9363_v2, 16  ;;  %v9634_v2 = vrot.slane %v13753_v21, 7 }
  0x29   : > { %8408 = vmatprep.subr.bf16.mxu1 %v8901_v29 }
  0x2a   : > { %v9431_v49 = vrot.slane %v13365_v20, 7 }
  0x2b   : > { %1244 = vmatpush1.bf16.msra.mxu0 %v8900_v28  ;;  %v9403_v28 = vld [vmem:[%s9220_s16 + $0x78] sm:$0xff]  }
  0x2c   : > { %1245 = vmatprep.subr.bf16.mxu0 %v13383_v1  ;;  %8409 = vmatpush3.bf16.msra.mxu1 %v8901_v29  ;;  %13722 = vst [vmem:[#allocation23_spill] sm:$0xff] %v9403_v28  ;;  %v9406_v29 = vld [vmem:[%s9220_s16 + $0x80] sm:$0xff]   ;;  %13726 = vst [vmem:[#allocation27_spill] sm:$0xff] %v9431_v49 }
  0x2d   : > { %1951 = vmatprep.subr.bf16.mxu1 %v13383_v1  ;;  %13723 = vst [vmem:[#allocation24_spill] sm:$0xff] %v9406_v29  ;;  %v13378_v20 = vshll.u32 %v9406_v29, 16 }
  0x2f   : > { %1246 = vmatpush1.bf16.msra.mxu0 %v8904_v38  ;;  %8411 = vmatmul.mubr.bf16.vlgmr.msra.gmra.mrb[0].mxu1 %v9303_v41  ;;  %v13374_v38 = vshll.u32 %v9367_v3, 16  ;;  %v13752_v41 = vshll.u32 %v9499_v25, 16 }
  0x30   : > { %1247 = vmatprep.subr.bf16.mxu0 %v13383_v1  ;;  %8414 = vmatprep.mubr.bf16.mxu1 %v9310_v44 }
  0x31   : > { %1952 = vmatpush1.bf16.msra.mxu1 %v8923_v43  ;;  %v9423_v43 = vrot.slane %v503_v26, 7  ;;  %v838_v26 = vrot.slane %v13379_v24, 1  ;;  %v841_v6 = vrot.slane %v13374_v38, 1  ;;  %v9540_v24 = vld [vmem:[%s9220_s16 + $0xb8] sm:$0xff]   ;;  %v9629_v30 = vrot.slane %v13752_v41, 1 }
  0x32   : > { %1953 = vmatprep.subr.bf16.mxu1 %v13383_v1  ;;  %13736 = vst [vmem:[#allocation37_spill] sm:$0xff] %v9540_v24  ;;  %v13755_v41 = vshll.u32 %v9367_v3, 16 }
  0x33   : > { %1248 = vmatpush1.bf16.msra.mxu0 %v8906_v47  ;;  %v8914_v47 = vld [vmem:[%s13360_s1 + $0x128] sm:$0xff]  }
  0x34   : > { %1249 = vmatprep.subr.bf16.mxu0 %v13383_v1 }
  0x35   : > { %1954 = vmatpush1.bf16.msra.mxu1 %v8926_v51  ;;  %v9435_v51 = vld [vmem:[%s9220_s16 + $0x88] sm:$0xff]  }
  0x36   : > { %1955 = vmatprep.subr.bf16.mxu1 %v13383_v1  ;;  %13727 = vst [vmem:[#allocation28_spill] sm:$0xff] %v9435_v51  ;;  %v13382_v38 = vshll.u32 %v9435_v51, 16 }
  0x37   : > { %1250 = vmatpush1.bf16.msra.mxu0 %v8908_v55  ;;  %8415 = vmatmul.mubr.bf16.gmra.mrb[4].mxu1 %v9345_v57  ;;  %v9447_v55 = vld [vmem:[%s9220_s16 + $0x90] sm:$0xff]  }
  0x38   : > { %1251 = vmatprep.subr.bf16.mxu0 %v13383_v1  ;;  %8418 = vmatprep.mubr.bf16.mxu1 %v9358_v62  ;;  %13728 = vst [vmem:[#allocation29_spill] sm:$0xff] %v9447_v55  ;;  %v13748_v62 = vmov 0  }
  0x39   : > { %1956 = vmatpush1.bf16.msra.mxu1 %v8929_v60  ;;  %v834_v60 = vor.u32 %v832_v13, %v13372_v23  ;;  %v9492_v23 = vrot.slane %v13375_v4, 1 }
  0x3a   : > { %1957 = vmatprep.subr.bf16.mxu1 %v13383_v1 }
  0x3b   : > { %1252 = vmatpush1.bf16.msra.mxu0 %v8910_v61  ;;  %v837_v61 = vor.u32 %v835_v35, %v559_v16  ;;  %v9482_v39 = vsel %vm805_vm0, %v834_v60, %v835_v35  ;;  %v8942_v35 = vld [vmem:[%s13360_s1 + $0x30] sm:$0xff]   ;;  %v840_v60 = vor.u32 %v838_v26, %v13380_v52  ;;  %v9552_v52 = vrot.slane %v13382_v38, 1 }
  0x3c   : > { %1253 = vmatprep.subr.bf16.mxu0 %v13383_v1  ;;  %13731 = vst [vmem:[#allocation32_spill] sm:$0xff] %v9482_v39  ;;  %v13742_v38 = vshrl.u32 %v9374_v5, 16 }
  0x3d   : > { %1958 = vmatpush1.bf16.msra.mxu1 %v8932_v8  ;;  %v13381_v8 = vshrl.u32 %v9367_v3, 16  ;;  %v9488_v50 = vsel %vm805_vm0, %v837_v61, %v838_v26  ;;  %v8921_v26 = vld [vmem:[%s13360_s1 + $0x80] sm:$0xff]  }
  0x3e   : > { %1959 = vmatprep.subr.bf16.mxu1 %v13383_v1  ;;  %13732 = vst [vmem:[#allocation33_spill] sm:$0xff] %v9488_v50 }
  0x3f   : > { %1254 = vmatpush1.bf16.msra.mxu0 %v8912_v9  ;;  %8419 = vmatmul.mubr.bf16.gmra.mrb[8].mxu1 %v9409_v34  ;;  %v8916_v9 = vld [vmem:[%s13360_s1 + $0x130] sm:$0xff]   ;;  %v843_v61 = vor.u32 %v841_v6, %v13381_v8 }
  0x40   : > { %1255 = vmatprep.subr.bf16.mxu0 %v13383_v1  ;;  %8422 = vmatprep.mubr.bf16.mxu1 %v9418_v37 }
  0x41   : > { %1960 = vmatpush1.bf16.msra.mxu1 %v8936_v36  ;;  %v13377_v36 = vshll.u32 %v9403_v28, 16 }
  0x42   : > { %1961 = vmatprep.subr.bf16.mxu1 %v13383_v1 }
  0x43   : > { %1256 = vmatpush1.bf16.msra.mxu0 %v8914_v47  ;;  %v500_v47 = vor.u32 %v498_v17, %v9397_v22  ;;  %v9496_v17 = vrot.slane %v519_v42, 7  ;;  %v9511_v42 = vrot.slane %v13377_v36, 1  ;;  %v13385_v36 = vshll.u32 %v9447_v55, 16 }
  0x44   : > { %1257 = vmatprep.subr.bf16.mxu0 %v13383_v1 }
  0x45   : > { %1962 = vmatpush1.bf16.msra.mxu1 %v8939_v31  ;;  %v9515_v31 = vrot.slane %v13378_v20, 1  ;;  %v9530_v20 = vrot.slane %v527_v45, 7  ;;  %v9534_v4 = vsel %vm478_vm1, %v9431_v49, %v500_v47  ;;  %v561_v45 = vrot.slane %v559_v16, 7  ;;  %v9585_v16 = vld [vmem:[%s9220_s16 + $0xd0] sm:$0xff]  }
  0x46   : > { %1963 = vmatprep.subr.bf16.mxu1 %v13383_v1  ;;  %13735 = vst [vmem:[#allocation36_spill] sm:$0xff] %v9534_v4  ;;  %v508_v47 = vor.u32 %v506_v18, %v9423_v43  ;;  %v9563_v18 = vsel %vm805_vm0, %v840_v60, %v841_v6  ;;  %v9573_v13 = vrot.slane %v13385_v36, 1  ;;  %v9582_v60 = vld [vmem:[%s9220_s16 + $0xc8] sm:$0xff]   ;;  %13740 = vst [vmem:[#allocation41_spill] sm:$0xff] %v9585_v16  ;;  %v8949_v6 = vld [vmem:[%s13360_s1 + $0x40] sm:$0xff]  }
  0x47   : > { %1258 = vmatpush1.bf16.msra.mxu0 %v8916_v9  ;;  %8423 = vmatmul.mubr.bf16.gmra.mrb[12].mxu1 %v9482_v39  ;;  %v8945_v9 = vld [vmem:[%s13360_s1 + $0x38] sm:$0xff]   ;;  %13738 = vst [vmem:[#allocation39_spill] sm:$0xff] %v9563_v18  ;;  %v9569_v8 = vor.u32 %v562_v7, %v561_v45  ;;  %13739 = vst [vmem:[#allocation40_spill] sm:$0xff] %v9582_v60  ;;  %v9588_v7 = vsel %vm805_vm0, %v843_v61, %v844_v10  ;;  %v13745_v39 = vshrl.u32 %v9349_v59, 16 }
  0x48   : > { %1259 = vmatprep.subr.bf16.mxu0 %v13383_v1  ;;  %8426 = vmatprep.mubr.bf16.mxu1 %v9488_v50  ;;  %13741 = vst [vmem:[#allocation42_spill] sm:$0xff] %v9588_v7  ;;  %v846_v36 = vor.u32 %v844_v10, %v13742_v38  ;;  %v13743_v50 = vshrl.u32 %v9391_v15, 16  ;;  %v13746_v61 = vshll.u32 %v9471_v0, 16  ;;  %v8947_v10 = vld [vmem:[%s13360_s1 + $0x90] sm:$0xff]   ;;  %v9648_v21 = vsel %vm478_vm1, %v9397_v22, %v508_v47 }
  0x49   : > { %1964 = vmatpush1.bf16.msra.mxu1 %v8942_v35  ;;  %v8934_v35 = vld [vmem:[%s13360_s1 + $0x88] sm:$0xff]   ;;  %v569_v37 = vrot.slane %v13745_v39, 7  ;;  %v13749_v39 = vshll.u32 %v9479_v46, 16  ;;  %13756 = vst [vmem:[#allocation46_spill] sm:$0xff] %v9648_v21  ;;  %v13759_v22 = vshrl.u32 %v9374_v5, 16 }
  0x4a   : > { %1965 = vmatprep.subr.bf16.mxu1 %v13383_v1  ;;  %v849_v1 = vor.u32 %v9492_v23, %v13743_v50  ;;  %v9606_v34 = vrot.slane %v13746_v61, 1  ;;  %v13750_v61 = vshll.u32 %v9349_v59, 16  ;;  %v13751_v50 = vshrl.u32 %v9367_v3, 16 }
  0x4b   : > { %1260 = vmatpush1.bf16.msra.mxu0 %v8918_v32  ;;  %v9578_v32 = vrot.slane %v535_v58, 7  ;;  %v9596_v58 = vld [vmem:[%s9220_s16 + $0xd8] sm:$0xff]   ;;  %v9620_v57 = vrot.slane %v13749_v39, 1  ;;  %v13757_v39 = vshll.u32 %v9519_v63, 16  ;;  %v585_v47 = vrot.slane %v13759_v22, 7 }
  0x4c   : > { %8474 = vmatprep.subr.bf16.mxu0 %v8921_v26  ;;  %13744 = vst [vmem:[#allocation43_spill] sm:$0xff] %v9596_v58  ;;  %v572_v38 = vor.u32 %v13750_v61, %v569_v37  ;;  %v577_v44 = vrot.slane %v13751_v50, 7  ;;  %v8950_v50 = vld [vmem:[%s13360_s1 + $0x48] sm:$0xff]  }
  0x4d   : > { %1966 = vmatpush1.bf16.msra.mxu1 %v8945_v9  ;;  %v9614_v9 = vld [vmem:[%s9220_s16 + $0xe0] sm:$0xff]  }
  0x4e   : > { %1262 = vmatmul.mubr.bf16.vlgmr.msra.gmra.mrb[0].mxu0 %v9534_v4  ;;  %13747 = vst [vmem:[#allocation44_spill] sm:$0xff] %v9614_v9  ;;  %1967 = vmatprep.subr.bf16.mxu1 %v13748_v62  ;;  %v9642_v61 = vsel %vm478_vm1, %v561_v45, %v572_v38  ;;  %v8953_v38 = vld [vmem:[%s13360_s1 + $0x50] sm:$0xff]   ;;  %v9674_v45 = vsel %vm805_vm0, %v849_v1, %v9511_v42  ;;  %v13767_v4 = vshll.u32 %v9540_v24, 16 }
  0x4f   : > { %8475 = vmatpush3.bf16.msra.mxu0 %v8921_v26  ;;  %1269 = vmatprep.mubr.bf16.mxu0 %v9230_v12  ;;  %13754 = vst [vmem:[#allocation45_spill] sm:$0xff] %v9642_v61  ;;  %v580_v26 = vor.u32 %v13755_v41, %v577_v44  ;;  %13762 = vst [vmem:[#allocation49_spill] sm:$0xff] %v9674_v45 }
  0x50   : > { %8427 = vmatmul.mubr.bf16.gmra.mrb[16].mxu1 %v9563_v18  ;;  %8476 = vmatprep.subr.bf16.mxu0 %v8934_v35  ;;  %v9652_v18 = vrot.slane %v13757_v39, 1  ;;  %v9667_v39 = vsel %vm805_vm0, %v846_v36, %v9492_v23  ;;  %v8964_v23 = vld [vmem:[%s13360_s1 + $0x98] sm:$0xff]   ;;  %v13765_v36 = vshrl.u32 %v9403_v28, 16  ;;  %v9696_v11 = vrot.slane %v13767_v4, 1  ;;  %v9710_v4 = vld [vmem:[%s9220_s16 + $0xf0] sm:$0xff]  }
  0x51   : > { %8430 = vmatprep.mubr.bf16.mxu1 %v9588_v7  ;;  %1968 = vmatpush1.bf16.msra.mxu1 %v8949_v6  ;;  %v9661_v41 = vsel %vm478_vm1, %v569_v37, %v580_v26  ;;  %13760 = vst [vmem:[#allocation48_spill] sm:$0xff] %v9667_v39  ;;  %v13761_v6 = vshll.u32 %v9236_v14, 16  ;;  %v13763_v7 = vshrl.u32 %v9319_v48, 16  ;;  %v9681_v37 = vld [vmem:[%s9220_s16 + $0xe8] sm:$0xff]   ;;  %13769 = vst [vmem:[#allocation51_spill] sm:$0xff] %v9710_v4 }
  0x52   : > { %1969 = vmatprep.subr.bf16.mxu1 %v13748_v62  ;;  %13758 = vst [vmem:[#allocation47_spill] sm:$0xff] %v9661_v41  ;;  %13764 = vst [vmem:[#allocation50_spill] sm:$0xff] %v9681_v37  ;;  %v852_v26 = vor.u32 %v9511_v42, %v13765_v36  ;;  %v13771_v41 = vshrl.u32 %v9406_v29, 16 }
  0x53   : > { %8477 = vmatpush3.bf16.msra.mxu0 %v8934_v35  ;;  %v516_v35 = vor.u32 %v13761_v6, %v9444_v53  ;;  %v9678_v12 = vrot.slane %v13763_v7, 7  ;;  %v13766_v7 = vshll.u32 %v9374_v5, 16  ;;  %v13772_v6 = vshrl.u32 %v9391_v15, 16 }
  0x54   : > { %8478 = vmatprep.subr.bf16.mxu0 %v8947_v10  ;;  %v855_v42 = vor.u32 %v9515_v31, %v13771_v41 }
  0x55   : > { %1970 = vmatpush1.bf16.msra.mxu1 %v8950_v50  ;;  %v588_v22 = vor.u32 %v13766_v7, %v585_v47  ;;  %v13768_v50 = vshll.u32 %v9559_v56, 16  ;;  %v8965_v7 = vld [vmem:[%s13360_s1 + $0xa0] sm:$0xff]  }
  0x56   : > { %1270 = vmatmul.mubr.bf16.gmra.mrb[4].mxu0 %v9648_v21  ;;  %1971 = vmatprep.subr.bf16.mxu1 %v13748_v62  ;;  %v13779_v21 = vshll.u32 %v9246_v19, 16 }
  0x57   : > { %1277 = vmatprep.mubr.bf16.mxu0 %v9236_v14  ;;  %v9705_v36 = vrot.slane %v13768_v50, 1  ;;  %8479 = vmatpush3.bf16.msra.mxu0 %v8947_v10  ;;  %v9713_v49 = vsel %vm478_vm1, %v577_v44, %v588_v22  ;;  %v593_v50 = vrot.slane %v13772_v6, 7  ;;  %v13773_v10 = vshll.u32 %v9582_v60, 16  ;;  %v8954_v6 = vld [vmem:[%s13360_s1 + $0x58] sm:$0xff]  }
  0x58   : > { %13770 = vst [vmem:[#allocation52_spill] sm:$0xff] %v9713_v49  ;;  %8431 = vmatmul.mubr.bf16.gmra.mrb[20].mxu1 %v9667_v39  ;;  %8480 = vmatprep.subr.bf16.mxu0 %v8964_v23  ;;  %v13774_v22 = vshll.u32 %v9585_v16, 16  ;;  %v9739_v39 = vsel %vm478_vm1, %v9423_v43, %v516_v35  ;;  %v524_v43 = vor.u32 %v13779_v21, %v9496_v17 }
  0x59   : > { %8434 = vmatprep.mubr.bf16.mxu1 %v9674_v45  ;;  %v9727_v44 = vrot.slane %v13773_v10, 1  ;;  %1972 = vmatpush1.bf16.msra.mxu1 %v8953_v38  ;;  %13775 = vst [vmem:[#allocation53_spill] sm:$0xff] %v9739_v39  ;;  %v13776_v45 = vshll.u32 %v9596_v58, 16  ;;  %v9751_v38 = vsel %vm805_vm0, %v852_v26, %v9515_v31  ;;  %v13781_v10 = vshll.u32 %v9614_v9, 16 }
  0x5a   : > { %v9731_v1 = vrot.slane %v13774_v22, 1  ;;  %1973 = vmatprep.subr.bf16.mxu1 %v13748_v62  ;;  %v13777_v22 = vshll.u32 %v9391_v15, 16  ;;  %13778 = vst [vmem:[#allocation54_spill] sm:$0xff] %v9751_v38  ;;  %v13783_v26 = vshrl.u32 %v9406_v29, 16  ;;  %v13785_v15 = vshrl.u32 %v9435_v51, 16 }
  0x5b   : > { %v9743_v14 = vrot.slane %v13776_v45, 1  ;;  %8481 = vmatpush3.bf16.msra.mxu0 %v8964_v23  ;;  %v13780_v45 = vshrl.u32 %v9403_v28, 16  ;;  %v9761_v5 = vrot.slane %v13781_v10, 1  ;;  %v9773_v23 = vsel %vm805_vm0, %v855_v42, %v9552_v52 }
  0x5c   : > { %v596_v41 = vor.u32 %v13777_v22, %v593_v50  ;;  %v8957_v22 = vld [vmem:[%s13360_s1 + $0x60] sm:$0xff]   ;;  %v609_v21 = vrot.slane %v13783_v26, 7  ;;  %8482 = vmatprep.subr.bf16.mxu0 %v8965_v7  ;;  %v13784_v10 = vshll.u32 %v9403_v28, 16  ;;  %v617_v3 = vrot.slane %v13785_v15, 7 }
  0x5d   : > { %v601_v49 = vrot.slane %v13780_v45, 7  ;;  %1974 = vmatpush1.bf16.msra.mxu1 %v8954_v6  ;;  %v13787_v42 = vshll.u32 %v9406_v29, 16  ;;  %v13788_v45 = vshrl.u32 %v9447_v55, 16  ;;  %v13789_v28 = vshrl.u32 %v9471_v0, 16 }
  0x5e   : > { %v9767_v31 = vsel %vm478_vm1, %v585_v47, %v596_v41  ;;  %1278 = vmatmul.mubr.bf16.gmra.mrb[8].mxu0 %v9739_v39  ;;  %v13786_v47 = vmov %v13785_v15  ;;  %1975 = vmatprep.subr.bf16.mxu1 %v13748_v62  ;;  %v13792_v29 = vshrl.u32 %v9479_v46, 16 }
  0x5f   : > { %13782 = vst [vmem:[#allocation55_spill] sm:$0xff] %v9767_v31  ;;  %v604_v35 = vor.u32 %v13784_v10, %v601_v49  ;;  %v858_v41 = vor.u32 %v9552_v52, %v13786_v47  ;;  %v612_v26 = vor.u32 %v13787_v42, %v609_v21  ;;  %v625_v6 = vrot.slane %v13788_v45, 7  ;;  %1285 = vmatprep.mubr.bf16.mxu0 %v9246_v19 }
  0x60   : > { %v633_v10 = vrot.slane %v13789_v28, 7  ;;  %v13791_v52 = vshll.u32 %v9435_v51, 16  ;;  %8483 = vmatpush3.bf16.msra.mxu0 %v8965_v7  ;;  %v641_v42 = vrot.slane %v13792_v29, 7  ;;  %8435 = vmatmul.mubr.bf16.gmra.mrb[24].mxu1 %v9751_v38  ;;  %v8958_v28 = vld [vmem:[%s13360_s1 + $0x68] sm:$0xff]   ;;  %v13796_v29 = vshll.u32 %v9681_v37, 16 }
  0x61   : > { %v9794_v39 = vsel %vm478_vm1, %v593_v50, %v604_v35  ;;  %v9806_v15 = vsel %vm478_vm1, %v601_v49, %v612_v26  ;;  %v13794_v50 = vshll.u32 %v9447_v55, 16  ;;  %8438 = vmatprep.mubr.bf16.mxu1 %v9773_v23  ;;  %1976 = vmatpush1.bf16.msra.mxu1 %v8957_v22  ;;  %v13798_v19 = vshll.u32 %v9479_v46, 16 }
  0x62   : > { %13790 = vst [vmem:[#allocation56_spill] sm:$0xff] %v9794_v39  ;;  %v620_v47 = vor.u32 %v13791_v52, %v617_v3  ;;  %13793 = vst [vmem:[#allocation57_spill] sm:$0xff] %v9806_v15  ;;  %v13795_v52 = vshll.u32 %v9471_v0, 16  ;;  %v9815_v38 = vrot.slane %v13796_v29, 1  ;;  %v13799_v26 = vshrl.u32 %v9499_v25, 16  ;;  %1977 = vmatprep.subr.bf16.mxu1 %v13748_v62 }
  0x63   : > { %v628_v35 = vor.u32 %v13794_v50, %v625_v6  ;;  %v644_v49 = vor.u32 %v13798_v19, %v641_v42  ;;  %v13800_v50 = vshrl.u32 %v9447_v55, 16  ;;  %v8961_v19 = vld [vmem:[%s13360_s1 + $0x70] sm:$0xff]  }
  0x64   : > { %v636_v7 = vor.u32 %v13795_v52, %v633_v10  ;;  %v9818_v45 = vsel %vm478_vm1, %v609_v21, %v620_v47  ;;  %v649_v51 = vrot.slane %v13799_v26, 7  ;;  %v9836_v21 = vsel %vm478_vm1, %v9444_v53, %v524_v43 }
  0x65   : > { %13797 = vst [vmem:[#allocation58_spill] sm:$0xff] %v9818_v45  ;;  %v861_v52 = vor.u32 %v9573_v13, %v13800_v50  ;;  %v9829_v29 = vsel %vm478_vm1, %v617_v3, %v628_v35  ;;  %13803 = vst [vmem:[#allocation61_spill] sm:$0xff] %v9836_v21  ;;  %v9842_v47 = vsel %vm478_vm1, %v633_v10, %v644_v49  ;;  %v13805_v26 = vshll.u32 %v9499_v25, 16 }
  0x66   : > { %13801 = vst [vmem:[#allocation59_spill] sm:$0xff] %v9829_v29  ;;  %v9832_v22 = vsel %vm478_vm1, %v625_v6, %v636_v7  ;;  %13804 = vst [vmem:[#allocation62_spill] sm:$0xff] %v9842_v47  ;;  %v9848_v3 = vsel %vm805_vm0, %v858_v41, %v9573_v13  ;;  %1978 = vmatpush1.bf16.msra.mxu1 %v8958_v28  ;;  %1286 = vmatmul.mubr.bf16.gmra.mrb[12].mxu0 %v9836_v21  ;;  %v13808_v43 = vshll.u32 %v9268_v27, 16  ;;  %v9864_v13 = vld [vmem:[%s9220_s16 + $0xf8] sm:$0xff]  }
  0x67   : > { %13802 = vst [vmem:[#allocation60_spill] sm:$0xff] %v9832_v22  ;;  %v652_v50 = vor.u32 %v13805_v26, %v649_v51  ;;  %v9856_v53 = vsel %vm805_vm0, %v861_v52, %v9606_v34  ;;  %1979 = vmatprep.subr.bf16.mxu1 %v13748_v62  ;;  %1293 = vmatprep.mubr.bf16.mxu0 %v9268_v27  ;;  %13809 = vst [vmem:[#allocation65_spill] sm:$0xff] %v9864_v13  ;;  %v8962_v41 = vld [vmem:[%s13360_s1 + $0x78] sm:$0xff]   ;;  %v13810_v28 = vshrl.u32 %v9519_v63, 16 }
  0x68   : > { %13807 = vst [vmem:[#allocation64_spill] sm:$0xff] %v9856_v53  ;;  %v532_v10 = vor.u32 %v13808_v43, %v9530_v20  ;;  %8439 = vmatmul.mubr.bf16.gmra.mrb[28].mxu1 %v9848_v3  ;;  %v13811_v7 = vshrl.u32 %v9471_v0, 16  ;;  %v13812_v52 = vshrl.u32 %v9479_v46, 16 }
  0x69   : > { %v9851_v6 = vsel %vm478_vm1, %v641_v42, %v652_v50  ;;  %v657_v35 = vrot.slane %v13810_v28, 7  ;;  %8442 = vmatprep.mubr.bf16.mxu1 %v9856_v53  ;;  %v13813_v50 = vshll.u32 %v9519_v63, 16 }
  0x6a   : > { %13806 = vst [vmem:[#allocation63_spill] sm:$0xff] %v9851_v6  ;;  %v864_v49 = vor.u32 %v9606_v34, %v13811_v7  ;;  %1980 = vmatpush1.bf16.msra.mxu1 %v8961_v19  ;;  %v867_v26 = vor.u32 %v9620_v57, %v13812_v52  ;;  %v9885_v42 = vsel %vm478_vm1, %v9496_v17, %v532_v10  ;;  %v13818_v7 = vshll.u32 %v9710_v4, 16 }
  0x6b   : > { %1981 = vmatprep.subr.bf16.mxu1 %v13748_v62  ;;  %v660_v43 = vor.u32 %v13813_v50, %v657_v35  ;;  %13814 = vst [vmem:[#allocation66_spill] sm:$0xff] %v9885_v42 }
  0x6c   : > { %v9892_v34 = vsel %vm805_vm0, %v864_v49, %v9620_v57  ;;  %v9897_v19 = vsel %vm805_vm0, %v867_v26, %v9629_v30  ;;  %v9901_v52 = vrot.slane %v13818_v7, 1  ;;  %v13819_v57 = vshll.u32 %v9283_v33, 16 }
  0x6d   : > { %v9888_v28 = vsel %vm478_vm1, %v649_v51, %v660_v43  ;;  %13816 = vst [vmem:[#allocation68_spill] sm:$0xff] %v9892_v34  ;;  %13817 = vst [vmem:[#allocation69_spill] sm:$0xff] %v9897_v19  ;;  %v8968_v51 = vld [vmem:[%s13360_s1 + $0xa8] sm:$0xff]   ;;  %v13821_v26 = vshrl.u32 %v9499_v25, 16  ;;  %v13822_v43 = vshrl.u32 %v9519_v63, 16 }
  0x6e   : > { %13815 = vst [vmem:[#allocation67_spill] sm:$0xff] %v9888_v28  ;;  %1982 = vmatpush1.bf16.msra.mxu1 %v8962_v41  ;;  %1294 = vmatmul.mubr.bf16.gmra.mrb[16].mxu0 %v9885_v42  ;;  %v540_v17 = vor.u32 %v13819_v57, %v9578_v32  ;;  %v13820_v41 = vshrl.u32 %v9540_v24, 16  ;;  %v13823_v57 = vshll.u32 %v9540_v24, 16 }
  0x6f   : > { %2722 = vmatprep.subr.bf16.mxu1 %v13748_v62  ;;  %1301 = vmatprep.mubr.bf16.mxu0 %v9283_v33  ;;  %v870_v50 = vor.u32 %v9629_v30, %v13821_v26  ;;  %v873_v7 = vor.u32 %v9652_v18, %v13822_v43  ;;  %v13831_v26 = vshrl.u32 %v9540_v24, 16 }
  0x70   : > { %8443 = vmatmul.mubr.bf16.gmra.mrb[32].mxu1 %v9892_v34  ;;  %8484 = vmatprep.subr.bf16.mxu0 %v8968_v51  ;;  %v665_v49 = vrot.slane %v13820_v41, 7  ;;  %v9926_v10 = vsel %vm478_vm1, %v9530_v20, %v540_v17  ;;  %v9945_v17 = vld [vmem:[%s9220_s16 + $0x100] sm:$0xff]  }
  0x71   : > { %8446 = vmatprep.mubr.bf16.mxu1 %v9897_v19  ;;  %8485 = vmatpush3.bf16.msra.mxu0 %v8968_v51  ;;  %13824 = vst [vmem:[#allocation70_spill] sm:$0xff] %v9926_v10  ;;  %v9933_v19 = vsel %vm805_vm0, %v870_v50, %v9652_v18  ;;  %v9938_v30 = vsel %vm805_vm0, %v873_v7, %v9696_v11  ;;  %v13828_v51 = vshll.u32 %v9300_v40, 16  ;;  %13829 = vst [vmem:[#allocation74_spill] sm:$0xff] %v9945_v17 }
  0x72   : > { %v668_v34 = vor.u32 %v13823_v57, %v665_v49  ;;  %13826 = vst [vmem:[#allocation72_spill] sm:$0xff] %v9933_v19  ;;  %13827 = vst [vmem:[#allocation73_spill] sm:$0xff] %v9938_v30  ;;  %v13830_v18 = vshrl.u32 %v9559_v56, 16  ;;  %v876_v50 = vor.u32 %v9696_v11, %v13831_v26  ;;  %v13833_v57 = vshll.u32 %v9559_v56, 16 }
  0x73   : > { %v548_v20 = vor.u32 %v13828_v51, %v9634_v2 }
  0x74   : > { %v9929_v41 = vsel %vm478_vm1, %v657_v35, %v668_v34  ;;  %v673_v34 = vrot.slane %v13830_v18, 7  ;;  %v13832_v43 = vmov %v13830_v18  ;;  %v9969_v18 = vsel %vm805_vm0, %v876_v50, %v9705_v36 }
  0x75   : > { %13825 = vst [vmem:[#allocation71_spill] sm:$0xff] %v9929_v41  ;;  %v879_v7 = vor.u32 %v9705_v36, %v13832_v43  ;;  %13836 = vst [vmem:[#allocation77_spill] sm:$0xff] %v9969_v18  ;;  %v13839_v36 = vshrl.u32 %v9582_v60, 16 }
  0x76   : > { %1302 = vmatmul.mubr.bf16.gmra.mrb[20].mxu0 %v9926_v10  ;;  %v676_v51 = vor.u32 %v13833_v57, %v673_v34 }
  0x77   : > { %1309 = vmatprep.mubr.bf16.mxu0 %v9300_v40  ;;  %v9974_v11 = vsel %vm805_vm0, %v879_v7, %v9727_v44  ;;  %v681_v26 = vrot.slane %v13839_v36, 7  ;;  %v13840_v50 = vmov %v13839_v36  ;;  %v13841_v7 = vshrl.u32 %v9585_v16, 16 }
  0x78   : > { %8447 = vmatmul.mubr.bf16.gmra.mrb[36].mxu1 %v9933_v19  ;;  %v9962_v19 = vsel %vm478_vm1, %v9578_v32, %v548_v20  ;;  %v9965_v35 = vsel %vm478_vm1, %v665_v49, %v676_v51  ;;  %13837 = vst [vmem:[#allocation78_spill] sm:$0xff] %v9974_v11  ;;  %v13838_v32 = vshll.u32 %v9319_v48, 16  ;;  %v882_v43 = vor.u32 %v9727_v44, %v13840_v50  ;;  %v10011_v50 = vld [vmem:[%s9220_s16 + $0x108] sm:$0xff]  }
  0x79   : > { %8450 = vmatprep.mubr.bf16.mxu1 %v9938_v30  ;;  %13834 = vst [vmem:[#allocation75_spill] sm:$0xff] %v9962_v19  ;;  %13835 = vst [vmem:[#allocation76_spill] sm:$0xff] %v9965_v35  ;;  %v885_v57 = vor.u32 %v9731_v1, %v13841_v7  ;;  %v13842_v51 = vshll.u32 %v9582_v60, 16  ;;  %v10096_v30 = vld [vmem:[%s9220_s16] sm:$0xff]  }
  0x7a   : > { %v556_v20 = vor.u32 %v13838_v32, %v9678_v12  ;;  %v10002_v36 = vsel %vm805_vm0, %v882_v43, %v9731_v1  ;;  %13847 = vst [vmem:[#allocation83_spill] sm:$0xff] %v10011_v50  ;;  %v13850_v1 = vshrl.u32 %v9596_v58, 16 }
  0x7b   : > { %v684_v32 = vor.u32 %v13842_v51, %v681_v26  ;;  %13845 = vst [vmem:[#allocation81_spill] sm:$0xff] %v10002_v36  ;;  %v10007_v44 = vsel %vm805_vm0, %v885_v57, %v9743_v14  ;;  %v13851_v57 = vshrl.u32 %v9614_v9, 16 }
  0x7c   : > { %13846 = vst [vmem:[#allocation82_spill] sm:$0xff] %v10007_v44  ;;  %v888_v43 = vor.u32 %v9743_v14, %v13850_v1 }
  0x7d   : > { %v9998_v49 = vsel %vm478_vm1, %v673_v34, %v684_v32  ;;  %v891_v51 = vor.u32 %v9761_v5, %v13851_v57  ;;  %v13852_v32 = vshll.u32 %v9585_v16, 16  ;;  %v13859_v57 = vshrl.u32 %v9710_v4, 16 }
  0x7e   : > { %1310 = vmatmul.mubr.bf16.gmra.mrb[24].mxu0 %v9962_v19  ;;  %13844 = vst [vmem:[#allocation80_spill] sm:$0xff] %v9998_v49 }
  0x7f   : > { %1317 = vmatprep.mubr.bf16.mxu0 %v9319_v48  ;;  %v10042_v14 = vsel %vm805_vm0, %v891_v51, %v9815_v38  ;;  %v897_v51 = vor.u32 %v9901_v52, %v13859_v57  ;;  %v13866_v57 = vshll.u32 %v9945_v17, 16 }
  0x80   : > { %8451 = vmatmul.mubr.bf16.gmra.mrb[40].mxu1 %v9969_v18  ;;  %v9995_v18 = vsel %vm478_vm1, %v9634_v2, %v556_v20  ;;  %v13848_v2 = vshll.u32 %v9864_v13, 16  ;;  %v13849_v20 = vmov %v13841_v7  ;;  %13856 = vst [vmem:[#allocation87_spill] sm:$0xff] %v10042_v14 }
  0x81   : > { %8454 = vmatprep.mubr.bf16.mxu1 %v9974_v11  ;;  %13843 = vst [vmem:[#allocation79_spill] sm:$0xff] %v9995_v18  ;;  %v689_v7 = vrot.slane %v13849_v20, 7 }
  0x82   : > { %v898_v34 = vrot.slane %v13848_v2, 1  ;;  %v10030_v2 = vsel %vm478_vm1, %v9678_v12, %v9569_v8  ;;  %v8971_v12 = vld [vmem:[%s13360_s1 + $0xb0] sm:$0xff]   ;;  %v13857_v8 = vmov %v13850_v1 }
  0x83   : > { %v692_v11 = vor.u32 %v13852_v32, %v689_v7  ;;  %13853 = vst [vmem:[#allocation84_spill] sm:$0xff] %v10030_v2  ;;  %8486 = vmatprep.subr.bf16.mxu0 %v8971_v12  ;;  %v13860_v32 = vshll.u32 %v9596_v58, 16 }
  0x84   : > { %8487 = vmatpush3.bf16.msra.mxu0 %v8971_v12  ;;  %v13864_v12 = vld [vmem:[#allocation20_spill] sm:$0xff] }
  0x85   : > { %v10033_v20 = vsel %vm478_vm1, %v681_v26, %v692_v11  ;;  %v10053_v11 = vrot.slane %v13857_v8, 7  ;;  %v13858_v26 = vshrl.u32 %v9681_v37, 16 }
  0x86   : > { %1318 = vmatmul.mubr.bf16.gmra.mrb[28].mxu0 %v9995_v18  ;;  %13854 = vst [vmem:[#allocation85_spill] sm:$0xff] %v10033_v20 }
  0x87   : > { %1325 = vmatprep.mubr.bf16.mxu0 %v9336_v54  ;;  %v700_v1 = vor.u32 %v13860_v32, %v10053_v11  ;;  %v901_v32 = vrot.slane %v13866_v57, 1  ;;  %v13871_v57 = vld [vmem:[#allocation47_spill] sm:$0xff] }
  0x88   : > { %8455 = vmatmul.mubr.bf16.gmra.mrb[44].mxu1 %v10002_v36  ;;  %v13468_v36 = vshrl.u32 %v10011_v50, 16 }
  0x89   : > { %8458 = vmatprep.mubr.bf16.mxu1 %v10007_v44  ;;  %v10037_v44 = vsel %vm805_vm0, %v888_v43, %v9761_v5  ;;  %v894_v43 = vor.u32 %v9815_v38, %v13858_v26  ;;  %v10066_v5 = vsel %vm478_vm1, %v689_v7, %v700_v1  ;;  %v10074_v38 = vsel %vm805_vm0, %v897_v51, %v898_v34  ;;  %v10078_v26 = vld [vmem:[%s9220_s16 + $0x110] sm:$0xff]  }
  0x8a   : > { %13855 = vst [vmem:[#allocation86_spill] sm:$0xff] %v10037_v44  ;;  %13861 = vst [vmem:[#allocation88_spill] sm:$0xff] %v10066_v5  ;;  %v13867_v7 = vshll.u32 %v10011_v50, 16  ;;  %v13869_v51 = vshrl.u32 %v9945_v17, 16 }
  0x8b   : > { %v10070_v8 = vsel %vm805_vm0, %v894_v43, %v9901_v52  ;;  %13863 = vst [vmem:[#allocation90_spill] sm:$0xff] %v10074_v38  ;;  %13865 = vst [vmem:[#allocation91_spill] sm:$0xff] %v10078_v26  ;;  %v13868_v52 = vshrl.u32 %v9864_v13, 16 }
  0x8c   : > { %13862 = vst [vmem:[#allocation89_spill] sm:$0xff] %v10070_v8  ;;  %v904_v1 = vrot.slane %v13867_v7, 1 }
  0x8d   : > { %v900_v43 = vor.u32 %v898_v34, %v13868_v52  ;;  %v13467_v52 = vshrl.u32 %v10096_v30, 16 }
  0x8e   : > { %1326 = vmatmul.mubr.bf16.gmra.mrb[32].mxu0 %v10030_v2  ;;  %v906_v34 = vor.u32 %v904_v1, %v13468_v36 }
  0x8f   : > { %1333 = vmatprep.mubr.bf16.mxu0 %v9349_v59 }
  0x90   : > { %8459 = vmatmul.mubr.bf16.gmra.mrb[48].mxu1 %v10037_v44  ;;  %v10091_v44 = vsel %vm805_vm0, %v900_v43, %v901_v32  ;;  %v13470_v43 = vshll.u32 %v10096_v30, 16 }
  0x91   : > { %8462 = vmatprep.mubr.bf16.mxu1 %v10042_v14  ;;  %v903_v14 = vor.u32 %v901_v32, %v13869_v51  ;;  %13870 = vst [vmem:[#allocation92_spill] sm:$0xff] %v10091_v44  ;;  %v482_v51 = vrot.slane %v13467_v52, 7  ;;  %v10133_v52 = vld [vmem:[%s9220_s16 + $0x8] sm:$0xff]  }
  0x92   : > { %v13476_v36 = vshll.u32 %v10133_v52, 16 }
  0x93   : > { %v10100_v7 = vsel %vm805_vm0, %v903_v14, %v904_v1  ;;  %v485_v1 = vor.u32 %v13470_v43, %v482_v51  ;;  %v8974_v43 = vld [vmem:[%s13360_s1 + $0xb8] sm:$0xff]  }
  0x94   : > { %13872 = vst [vmem:[#allocation93_spill] sm:$0xff] %v10100_v7  ;;  %8488 = vmatprep.subr.bf16.mxu0 %v8974_v43 }
  0x95   : > { %8489 = vmatpush3.bf16.msra.mxu0 %v8974_v43  ;;  %v8970_v43 = vld [vmem:[%s13360_s1 + $0x198] sm:$0xff]  }
  0x96   : > { %1334 = vmatmul.mubr.bf16.gmra.mrb[36].mxu0 %v9642_v61 }
  0x97   : > { %1341 = vmatprep.mubr.bf16.mxu0 %v13864_v12 }
  0x98   : > { %8463 = vmatmul.mubr.bf16.gmra.mrb[52].mxu1 %v10070_v8  ;;  %v13466_v8 = vshll.u32 %v10078_v26, 16  ;;  %v8966_v26 = vld [vmem:[%s13360_s1 + $0x180] sm:$0xff]  }
  0x99   : > { %8466 = vmatprep.mubr.bf16.mxu1 %v10074_v38  ;;  %v13873_v38 = vld [vmem:[#allocation21_spill] sm:$0xff] }
  0x9a   : > { %v10109_v32 = vrot.slane %v13466_v8, 1  ;;  %v804_v8 = vsel %vm10126_vm3, 0, %v485_v1  ;;  %v13882_v1 = vld [vmem:[#allocation27_spill] sm:$0xff] }
  0x9c   : > { %13874 = vst [vmem:[#allocation94_spill] sm:$0xff] %v10109_v32  ;;  %v10114_v14 = vsel %vm805_vm0, %v906_v34, %v10109_v32  ;;  %v13878_v34 = vmov 0  ;;  %v8967_v32 = vld [vmem:[%s13360_s1 + $0x188] sm:$0xff]  }
  0x9d   : > { %13875 = vst [vmem:[#allocation95_spill] sm:$0xff] %v10114_v14  ;;  %v13879_v34 = vsel %vm10126_vm3, 4294967295, %v13878_v34 }
  0x9e   : > { %1342 = vmatmul.mubr.bf16.gmra.mrb[40].mxu0 %v13871_v57  ;;  %13880 = vst [vmem:[#allocation96_spill] sm:$0xff] %v13879_v34  ;;  %v492_v34 = vor.u32 %v13476_v36, %v13882_v1  ;;  %v13883_v1 = vld [vmem:[#allocation24_spill] sm:$0xff] }
  0x9f   : > { %1349 = vmatprep.mubr.bf16.mxu0 %v13873_v38 }
  0xa0   : > { %8467 = vmatmul.mubr.bf16.gmra.mrb[56].mxu1 %v10091_v44  ;;  %v13876_v44 = vld [vmem:[#allocation52_spill] sm:$0xff]  ;;  %v493_v53 = vsel %vm478_vm1, %v482_v51, %v492_v34 }
  0xa1   : > { %8470 = vmatprep.mubr.bf16.mxu1 %v10100_v7  ;;  %v13877_v7 = vld [vmem:[#allocation22_spill] sm:$0xff]  ;;  %v13885_v51 = vld [vmem:[#allocation28_spill] sm:$0xff] }
  0xa2   : > { %v13887_v34 = vld [vmem:[#allocation4_spill] sm:$0xff] }
  0xa6   : > { %1350 = vmatmul.mubr.bf16.gmra.mrb[44].mxu0 %v13876_v44 }
  0xa7   : > { %1357 = vmatprep.mubr.bf16.mxu0 %v13877_v7 }
  0xa8   : > { %8471 = vmatmul.mubr.bf16.gmra.mrb[60].mxu1 %v10114_v14  ;;  %v13881_v14 = vld [vmem:[#allocation23_spill] sm:$0xff] }
  0xa9   : > { %1983 = vmatprep.mubr.bf16.mxu1 %v10096_v30 }
  0xae   : > { %1358 = vmatmul.mubr.bf16.gmra.mrb[48].mxu0 %v9767_v31 }
  0xaf   : > { %1365 = vmatprep.mubr.bf16.mxu0 %v13881_v14 }
  0xb0   : > { %1984 = vmatmul.mubr.bf16.vlgmr.msra.gmra.mrb[64].mxu1 %v804_v8  ;;  %v8969_v8 = vld [vmem:[%s13360_s1 + $0x190] sm:$0xff]  }
  0xb1   : > { %1991 = vmatprep.mubr.bf16.mxu1 %v10133_v52  ;;  %2723 = vmatpush1.bf16.msra.mxu1 %v8966_v26  ;;  %v13884_v26 = vld [vmem:[#allocation3_spill] sm:$0xff] }
  0xb2   : > { %2724 = vmatprep.subr.bf16.mxu1 %v13748_v62 }
  0xb5   : > { %2725 = vmatpush1.bf16.msra.mxu1 %v8967_v32  ;;  %v8972_v32 = vld [vmem:[%s13360_s1 + $0x1a0] sm:$0xff]  }
  0xb6   : > { %1366 = vmatmul.mubr.bf16.gmra.mrb[52].mxu0 %v9794_v39  ;;  %2726 = vmatprep.subr.bf16.mxu1 %v13748_v62 }
  0xb7   : > { %1373 = vmatprep.mubr.bf16.mxu0 %v13883_v1 }
  0xb8   : > { %1992 = vmatmul.mubr.bf16.gmra.mrb[68].mxu1 %v493_v53  ;;  %v13886_v53 = vld [vmem:[#allocation36_spill] sm:$0xff] }
  0xb9   : > { %1999 = vmatprep.mubr.bf16.mxu1 %v13884_v26  ;;  %2727 = vmatpush1.bf16.msra.mxu1 %v8969_v8  ;;  %v8973_v8 = vld [vmem:[%s13360_s1 + $0x1a8] sm:$0xff]   ;;  %v8975_v26 = vld [vmem:[%s13360_s1 + $0x1b0] sm:$0xff]  }
  0xba   : > { %2728 = vmatprep.subr.bf16.mxu1 %v13748_v62 }
  0xbd   : > { %2729 = vmatpush1.bf16.msra.mxu1 %v8970_v43  ;;  %v13888_v43 = vld [vmem:[#allocation46_spill] sm:$0xff] }
  0xbe   : > { %1374 = vmatmul.mubr.bf16.gmra.mrb[56].mxu0 %v9806_v15  ;;  %2730 = vmatprep.subr.bf16.mxu1 %v13748_v62 }
  0xbf   : > { %1381 = vmatprep.mubr.bf16.mxu0 %v13885_v51 }
  0xc0   : > { %2000 = vmatmul.mubr.bf16.gmra.mrb[72].mxu1 %v13886_v53  ;;  %v8976_v53 = vld [vmem:[%s13360_s1 + $0x1b8] sm:$0xff]  }
  0xc1   : > { %2007 = vmatprep.mubr.bf16.mxu1 %v13887_v34  ;;  %2731 = vmatpush1.bf16.msra.mxu1 %v8972_v32  ;;  %v13889_v32 = vld [vmem:[#allocation5_spill] sm:$0xff]  ;;  %v10192_v34 = vld [vmem:[%s13360_s1 + $0x200] sm:$0xff]  }
  0xc2   : > { %2732 = vmatprep.subr.bf16.mxu1 %v13748_v62  ;;  %8554 = vmatprep.subr.bf16.mxu0 %v10192_v34 }
  0xc5   : > { %2733 = vmatpush1.bf16.msra.mxu1 %v8973_v8  ;;  %v13890_v8 = vld [vmem:[#allocation53_spill] sm:$0xff] }
  0xc6   : > { %1382 = vmatmul.mubr.bf16.gmra.mrb[60].mxu0 %v9818_v45  ;;  %2734 = vmatprep.subr.bf16.mxu1 %v13748_v62 }
  0xc7   : > { %1389 = vmatprep.mubr.bf16.mxu0 %v9447_v55 }
  0xc8   : > { %2008 = vmatmul.mubr.bf16.gmra.mrb[76].mxu1 %v13888_v43  ;;  %v13891_v43 = vld [vmem:[#allocation6_spill] sm:$0xff] }
  0xc9   : > { %2015 = vmatprep.mubr.bf16.mxu1 %v13889_v32  ;;  %2735 = vmatpush1.bf16.msra.mxu1 %v8975_v26  ;;  %v8978_v26 = vld [vmem:[%s13360_s1 + $0x1c0] sm:$0xff]  }
  0xca   : > { %2736 = vmatprep.subr.bf16.mxu1 %v13748_v62 }
  0xcd   : > { %2737 = vmatpush1.bf16.msra.mxu1 %v8976_v53  ;;  %v8980_v53 = vld [vmem:[%s13360_s1 + $0x1c8] sm:$0xff]  }
  0xce   : > { %1390 = vmatmul.mubr.bf16.gmra.mrb[64].mxu0 %v9829_v29  ;;  %2738 = vmatprep.subr.bf16.mxu1 %v13748_v62 }
  0xcf   : > { %1397 = vmatprep.mubr.bf16.mxu0 %v9471_v0 }
  0xd0   : > { %2016 = vmatmul.mubr.bf16.gmra.mrb[80].mxu1 %v13890_v8  ;;  %v13898_v8 = vshrl.u32 %v9710_v4, 16 }
  0xd1   : > { %2023 = vmatprep.mubr.bf16.mxu1 %v13891_v43  ;;  %2739 = vmatpush1.bf16.msra.mxu1 %v8978_v26  ;;  %v8982_v26 = vld [vmem:[%s13360_s1 + $0x1d0] sm:$0xff]  }
  0xd2   : > { %2740 = vmatprep.subr.bf16.mxu1 %v13748_v62 }
  0xd5   : > { %2741 = vmatpush1.bf16.msra.mxu1 %v8980_v53  ;;  %v8984_v53 = vld [vmem:[%s13360_s1 + $0x1d8] sm:$0xff]  }
  0xd6   : > { %1398 = vmatmul.mubr.bf16.gmra.mrb[68].mxu0 %v9832_v22  ;;  %2742 = vmatprep.subr.bf16.mxu1 %v13748_v62 }
  0xd7   : > { %1405 = vmatprep.mubr.bf16.mxu0 %v9479_v46 }
  0xd8   : > { %2024 = vmatmul.mubr.bf16.gmra.mrb[84].mxu1 %v9836_v21 }
  0xd9   : > { %2031 = vmatprep.mubr.bf16.mxu1 %v9268_v27  ;;  %2743 = vmatpush1.bf16.msra.mxu1 %v8982_v26 }
  0xda   : > { %2744 = vmatprep.subr.bf16.mxu1 %v13748_v62 }
  0xdd   : > { %2745 = vmatpush1.bf16.msra.mxu1 %v8984_v53 }
  0xde   : > { %1406 = vmatmul.mubr.bf16.gmra.mrb[72].mxu0 %v9842_v47  ;;  %2746 = vmatprep.subr.bf16.mxu1 %v13748_v62 }
  0xdf   : > { %1413 = vmatprep.mubr.bf16.mxu0 %v9499_v25 }
  0xe0   : > { %2032 = vmatmul.mubr.bf16.gmra.mrb[88].mxu1 %v9885_v42 }
  0xe1   : > { %2039 = vmatprep.mubr.bf16.mxu1 %v9283_v33 }
  0xe6   : > { %1414 = vmatmul.mubr.bf16.gmra.mrb[76].mxu0 %v9851_v6 }
  0xe7   : > { %1421 = vmatprep.mubr.bf16.mxu0 %v9519_v63 }
  0xe8   : > { %2040 = vmatmul.mubr.bf16.gmra.mrb[92].mxu1 %v9926_v10  ;;  %v13893_v10 = vshll.u32 %v9614_v9, 16 }
  0xe9   : > { %2047 = vmatprep.mubr.bf16.mxu1 %v9300_v40 }
  0xee   : > { %1422 = vmatmul.mubr.bf16.gmra.mrb[80].mxu0 %v9888_v28 }
  0xef   : > { %1429 = vmatprep.mubr.bf16.mxu0 %v9540_v24 }
  0xf0   : > { %2048 = vmatmul.mubr.bf16.gmra.mrb[96].mxu1 %v9962_v19 }
  0xf1   : > { %2055 = vmatprep.mubr.bf16.mxu1 %v9319_v48 }
  0xf6   : > { %1430 = vmatmul.mubr.bf16.gmra.mrb[84].mxu0 %v9929_v41 }
  0xf7   : > { %1437 = vmatprep.mubr.bf16.mxu0 %v9559_v56 }
  0xf8   : > { %2056 = vmatmul.mubr.bf16.gmra.mrb[100].mxu1 %v9995_v18 }
  0xf9   : > { %2063 = vmatprep.mubr.bf16.mxu1 %v9336_v54 }
  0xfe   : > { %1438 = vmatmul.mubr.bf16.gmra.mrb[88].mxu0 %v9965_v35 }
  0xff   : > { %1445 = vmatprep.mubr.bf16.mxu0 %v9582_v60 }
 0x100   : > { %2064 = vmatmul.mubr.bf16.gmra.mrb[104].mxu1 %v10030_v2 }
 0x101   : > { %2071 = vmatprep.mubr.bf16.mxu1 %v9349_v59 }
 0x102   : > { %v10238_v26 = vpop.f32.mrb[0].mxu1 }
 0x103   : > { %v1552_v36 = vpop.f32.mrb[1].mxu1 }
 0x104   : > { %v8413_v18 = vpop.f32.mrb[2].mxu1 }
 0x105   : > { %v1555_v54 = vpop.f32.mrb[3].mxu1  ;;  %v8986_v18 = vld [vmem:[%s13360_s1 + $0x1e0] sm:$0xff]  }
 0x106   : > { %1446 = vmatmul.mubr.bf16.gmra.mrb[92].mxu0 %v9998_v49  ;;  %2747 = vmatpush1.bf16.msra.mxu1 %v8986_v18  ;;  %v13895_v18 = vshrl.u32 %v9681_v37, 16 }
 0x107   : > { %1453 = vmatprep.mubr.bf16.mxu0 %v9585_v16  ;;  %2748 = vmatprep.subr.bf16.mxu1 %v13748_v62 }
 0x108   : > { %2072 = vmatmul.mubr.bf16.gmra.mrb[108].mxu1 %v9642_v61 }
 0x109   : > { %2079 = vmatprep.mubr.bf16.mxu1 %v13864_v12  ;;  %v13892_v12 = vshrl.u32 %v9614_v9, 16 }
 0x10a   : > { %v10245_v2 = vpop.f32.mrb[4].mxu1 }
 0x10b   : > { %v10247_v48 = vpop.f32.mrb[5].mxu1  ;;  %v705_v61 = vrot.slane %v13892_v12, 7 }
 0x10c   : > { %v8417_v53 = vpop.f32.mrb[6].mxu1 }
 0x10d   : > { %v10250_v59 = vpop.f32.mrb[7].mxu1 }
 0x10e   : > { %1454 = vmatmul.mubr.bf16.gmra.mrb[96].mxu0 %v10033_v20 }
 0x10f   : > { %1461 = vmatprep.mubr.bf16.mxu0 %v9596_v58 }
 0x110   : > { %2080 = vmatmul.mubr.bf16.gmra.mrb[112].mxu1 %v13871_v57 }
 0x111   : > { %2087 = vmatprep.mubr.bf16.mxu1 %v13873_v38  ;;  %v708_v38 = vor.u32 %v13893_v10, %v705_v61  ;;  %v13896_v10 = vshll.u32 %v9681_v37, 16 }
 0x112   : > { %v10260_v19 = vpop.f32.mrb[8].mxu1 }
 0x113   : > { %v10263_v53 = vpop.f32.mrb[9].mxu1  ;;  %v10275_v12 = vsel %vm478_vm1, %v10053_v11, %v708_v38  ;;  %v8988_v11 = vld [vmem:[%s13360_s1 + $0x1e8] sm:$0xff]  }
 0x114   : > { %v8421_v40 = vpop.f32.mrb[10].mxu1  ;;  %13894 = vst [vmem:[#allocation27_spill] sm:$0xff] %v10275_v12  ;;  %2749 = vmatpush1.bf16.msra.mxu1 %v8988_v11 }
 0x115   : > { %v10266_v57 = vpop.f32.mrb[11].mxu1  ;;  %v713_v40 = vrot.slane %v13895_v18, 7  ;;  %2750 = vmatprep.subr.bf16.mxu1 %v13748_v62 }
 0x116   : > { %1462 = vmatmul.mubr.bf16.gmra.mrb[100].mxu0 %v10066_v5 }
 0x117   : > { %1469 = vmatprep.mubr.bf16.mxu0 %v9614_v9 }
 0x118   : > { %2088 = vmatmul.mubr.bf16.gmra.mrb[116].mxu1 %v13876_v44 }
 0x119   : > { %2095 = vmatprep.mubr.bf16.mxu1 %v13877_v7  ;;  %v716_v7 = vor.u32 %v13896_v10, %v713_v40  ;;  %v721_v10 = vrot.slane %v13898_v8, 7  ;;  %v8989_v8 = vld [vmem:[%s13360_s1 + $0x1f0] sm:$0xff]  }
 0x11a   : > { %v10279_v33 = vpop.f32.mrb[12].mxu1  ;;  %2751 = vmatpush1.bf16.msra.mxu1 %v8989_v8 }
 0x11b   : > { %v10281_v42 = vpop.f32.mrb[13].mxu1  ;;  %v10297_v43 = vsel %vm478_vm1, %v705_v61, %v716_v7  ;;  %v13899_v61 = vshll.u32 %v9710_v4, 16  ;;  %2752 = vmatprep.subr.bf16.mxu1 %v13748_v62 }
 0x11c   : > { %v8425_v27 = vpop.f32.mrb[14].mxu1  ;;  %13897 = vst [vmem:[#allocation3_spill] sm:$0xff] %v10297_v43 }
 0x11d   : > { %v10284_v21 = vpop.f32.mrb[15].mxu1  ;;  %v724_v7 = vor.u32 %v13899_v61, %v721_v10 }
 0x11e   : > { %1470 = vmatmul.mubr.bf16.gmra.mrb[104].mxu0 %v10275_v12 }
 0x11f   : > { %1477 = vmatprep.mubr.bf16.mxu0 %v9681_v37 }
 0x120   : > { %2096 = vmatmul.mubr.bf16.gmra.mrb[120].mxu1 %v9767_v31 }
 0x121   : > { %v1263_v38 = vpop.f32.mrb[0].mxu0  ;;  %2103 = vmatprep.mubr.bf16.mxu1 %v13881_v14 }
 0x122   : > { %v10294_v18 = vadd.f32 %v1552_v36, %v1263_v38  ;;  %v1265_v27 = vpop.f32.mrb[1].mxu0 }
 0x123   : > { %v1266_v44 = vpop.f32.mrb[2].mxu0  ;;  %v10301_v32 = vpop.f32.mrb[16].mxu1  ;;  %v10324_v27 = vsel %vm478_vm1, %v713_v40, %v724_v7  ;;  %v13902_v40 = vshll.u32 %v9864_v13, 16 }
 0x124   : > { %v10304_v31 = vadd.f32 %v1555_v54, %v1266_v44  ;;  %v1268_v37 = vpop.f32.mrb[3].mxu0  ;;  %v10306_v12 = vpop.f32.mrb[17].mxu1  ;;  %13900 = vst [vmem:[#allocation36_spill] sm:$0xff] %v10324_v27 }
 0x125   : > { %v8429_v36 = vpop.f32.mrb[18].mxu1 }
 0x126   : > { %1478 = vmatmul.mubr.bf16.gmra.mrb[108].mxu0 %v10297_v43  ;;  %v10309_v11 = vpop.f32.mrb[19].mxu1  ;;  %v13901_v36 = vshrl.u32 %v9864_v13, 16 }
 0x127   : > { %1485 = vmatprep.mubr.bf16.mxu0 %v9710_v4 }
 0x128   : > { %2104 = vmatmul.mubr.bf16.gmra.mrb[124].mxu1 %v9794_v39  ;;  %v729_v61 = vrot.slane %v13901_v36, 7 }
 0x129   : > { %v1271_v54 = vpop.f32.mrb[4].mxu0  ;;  %2111 = vmatprep.mubr.bf16.mxu1 %v13883_v1  ;;  %v8990_v1 = vld [vmem:[%s13360_s1 + $0x1f8] sm:$0xff]  }
 0x12a   : > { %v10320_v37 = vadd.f32 %v10238_v26, %v1271_v54  ;;  %v1273_v44 = vpop.f32.mrb[5].mxu0  ;;  %2753 = vmatpush1.bf16.msra.mxu1 %v8990_v1  ;;  %v732_v7 = vor.u32 %v13902_v40, %v729_v61 }
 0x12b   : > { %v1274_v38 = vpop.f32.mrb[6].mxu0  ;;  %v10328_v14 = vpop.f32.mrb[20].mxu1 }
 0x12c   : > { %v1276_v8 = vpop.f32.mrb[7].mxu0  ;;  %v10333_v39 = vpop.f32.mrb[21].mxu1  ;;  %v10347_v1 = vsel %vm478_vm1, %v721_v10, %v732_v7  ;;  %v13905_v10 = vshll.u32 %v9945_v17, 16 }
 0x12d   : > { %v8433_v26 = vpop.f32.mrb[22].mxu1  ;;  %13903 = vst [vmem:[#allocation4_spill] sm:$0xff] %v10347_v1 }
 0x12e   : > { %1486 = vmatmul.mubr.bf16.gmra.mrb[112].mxu0 %v10324_v27  ;;  %v10336_v54 = vpop.f32.mrb[23].mxu1  ;;  %v13904_v26 = vshrl.u32 %v9945_v17, 16 }
 0x12f   : > { %1493 = vmatprep.mubr.bf16.mxu0 %v9864_v13 }
 0x130   : > { %2112 = vmatmul.mubr.bf16.gmra.mrb[128].mxu1 %v9806_v15  ;;  %v737_v27 = vrot.slane %v13904_v26, 7 }
 0x131   : > { %v1279_v44 = vpop.f32.mrb[8].mxu0  ;;  %2119 = vmatprep.mubr.bf16.mxu1 %v13885_v51 }
 0x132   : > { %v10344_v38 = vadd.f32 %v10247_v48, %v1279_v44  ;;  %v1281_v36 = vpop.f32.mrb[9].mxu0  ;;  %v740_v7 = vor.u32 %v13905_v10, %v737_v27 }
 0x133   : > { %v1282_v8 = vpop.f32.mrb[10].mxu0  ;;  %v10351_v4 = vpop.f32.mrb[24].mxu1 }
 0x134   : > { %v10354_v40 = vadd.f32 %v10250_v59, %v1282_v8  ;;  %v1284_v15 = vpop.f32.mrb[11].mxu0  ;;  %v10356_v13 = vpop.f32.mrb[25].mxu1  ;;  %v13908_v8 = vshrl.u32 %v10011_v50, 16 }
 0x135   : > { %v8437_v51 = vpop.f32.mrb[26].mxu1 }
 0x136   : > { %1494 = vmatmul.mubr.bf16.gmra.mrb[116].mxu0 %v10347_v1  ;;  %v10359_v48 = vpop.f32.mrb[27].mxu1  ;;  %v10370_v51 = vsel %vm478_vm1, %v729_v61, %v740_v7  ;;  %v10374_v26 = vrot.slane %v13908_v8, 7  ;;  %v13911_v61 = vshll.u32 %v10011_v50, 16 }
 0x137   : > { %1501 = vmatprep.mubr.bf16.mxu0 %v9945_v17  ;;  %13907 = vst [vmem:[#allocation97_spill] sm:$0xff] %v10370_v51  ;;  %v13910_v17 = vshll.u32 %v10096_v30, 16 }
 0x138   : > { %2120 = vmatmul.mubr.bf16.gmra.mrb[132].mxu1 %v9818_v45  ;;  %13909 = vst [vmem:[#allocation98_spill] sm:$0xff] %v10374_v26  ;;  %v748_v7 = vor.u32 %v13911_v61, %v10374_v26 }
 0x139   : > { %v1287_v44 = vpop.f32.mrb[12].mxu0  ;;  %2127 = vmatprep.mubr.bf16.mxu1 %v9447_v55  ;;  %v806_v45 = vrot.slane %v13910_v17, 1  ;;  %v13913_v17 = vshll.u32 %v10133_v52, 16 }
 0x13a   : > { %v10367_v59 = vadd.f32 %v10245_v2, %v1287_v44  ;;  %v1289_v15 = vpop.f32.mrb[13].mxu0  ;;  %v13912_v44 = vshrl.u32 %v10096_v30, 16 }
 0x13b   : > { %v1290_v36 = vpop.f32.mrb[14].mxu0  ;;  %v10376_v1 = vpop.f32.mrb[28].mxu1 }
 0x13c   : > { %13906 = vst [vmem:[#allocation46_spill] sm:$0xff] %v10367_v59  ;;  %v1292_v10 = vpop.f32.mrb[15].mxu0  ;;  %v10380_v43 = vpop.f32.mrb[29].mxu1  ;;  %v807_v15 = vor.u32 %v806_v45, %v13912_v44  ;;  %v808_v36 = vrot.slane %v13913_v17, 1  ;;  %v10399_v59 = vsel %vm478_vm1, %v737_v27, %v748_v7  ;;  %v13915_v17 = vld [vmem:[#allocation19_spill] sm:$0xff] }
 0x13d   : > { %v8441_v55 = vpop.f32.mrb[30].mxu1  ;;  %13914 = vst [vmem:[#allocation99_spill] sm:$0xff] %v10399_v59 }
 0x13e   : > { %1502 = vmatmul.mubr.bf16.gmra.mrb[120].mxu0 %v10370_v51  ;;  %v10383_v2 = vpop.f32.mrb[31].mxu1  ;;  %v809_v30 = vsel %vm805_vm0, %v807_v15, %v808_v36  ;;  %v13917_v15 = vld [vmem:[#allocation7_spill] sm:$0xff] }
 0x13f   : > { %1509 = vmatprep.mubr.bf16.mxu0 %v10011_v50 }
 0x140   : > { %2128 = vmatmul.mubr.bf16.gmra.mrb[136].mxu1 %v9829_v29  ;;  %v13925_v29 = vld [vmem:[#allocation25_spill] sm:$0xff] }
 0x141   : > { %v1295_v8 = vpop.f32.mrb[16].mxu0  ;;  %2135 = vmatprep.mubr.bf16.mxu1 %v9471_v0  ;;  %v8992_v0 = vld [vmem:[%s13360_s1 + $0x238] sm:$0xff]  }
 0x142   : > { %v10396_v55 = vadd.f32 %v10263_v53, %v1295_v8  ;;  %v1297_v10 = vpop.f32.mrb[17].mxu0  ;;  %v13916_v8 = vshrl.u32 %v13915_v17, 16 }
 0x143   : > { %v1298_v51 = vpop.f32.mrb[18].mxu0  ;;  %v10401_v61 = vpop.f32.mrb[32].mxu1 }
 0x144   : > { %v10404_v26 = vadd.f32 %v10266_v57, %v1298_v51  ;;  %v1300_v45 = vpop.f32.mrb[19].mxu0  ;;  %v10407_v52 = vpop.f32.mrb[33].mxu1  ;;  %v810_v10 = vor.u32 %v808_v36, %v13916_v8  ;;  %v8979_v36 = vld [vmem:[%s13360_s1 + $0x208] sm:$0xff]  }
 0x145   : > { %v8445_v44 = vpop.f32.mrb[34].mxu1 }
 0x146   : > { %1510 = vmatmul.mubr.bf16.gmra.mrb[124].mxu0 %v10399_v59  ;;  %v10410_v53 = vpop.f32.mrb[35].mxu1  ;;  %v812_v45 = vsel %vm805_vm0, %v810_v10, %v13917_v15 }
 0x147   : > { %8490 = vmatprep.mubr.bf16.mxu0 %v809_v30 }
 0x148   : > { %2136 = vmatmul.mubr.bf16.gmra.mrb[140].mxu1 %v9832_v22 }
 0x149   : > { %v1303_v27 = vpop.f32.mrb[20].mxu0  ;;  %2143 = vmatprep.mubr.bf16.mxu1 %v9479_v46  ;;  %v13921_v46 = vld [vmem:[#allocation16_spill] sm:$0xff] }
 0x14a   : > { %v10417_v57 = vadd.f32 %v10260_v19, %v1303_v27  ;;  %v1305_v51 = vpop.f32.mrb[21].mxu0  ;;  %v13918_v19 = vld [vmem:[#allocation9_spill] sm:$0xff] }
 0x14b   : > { %v1306_v7 = vpop.f32.mrb[22].mxu0  ;;  %v10421_v44 = vpop.f32.mrb[36].mxu1 }
 0x14c   : > { %v1308_v59 = vpop.f32.mrb[23].mxu0  ;;  %v10426_v30 = vpop.f32.mrb[37].mxu1 }
 0x14d   : > { %v8449_v17 = vpop.f32.mrb[38].mxu1  ;;  %v8981_v59 = vld [vmem:[%s13360_s1 + $0x210] sm:$0xff]  }
 0x14e   : > { %8491 = vmatmul.mubr.bf16.vlgmr.msra.gmra.mrb[128].mxu0 %v812_v45  ;;  %v10428_v8 = vpop.f32.mrb[39].mxu1 }
 0x14f   : > { %8555 = vmatpush3.bf16.msra.mxu0 %v10192_v34  ;;  %8494 = vmatprep.mubr.bf16.mxu0 %v13918_v19  ;;  %v8983_v19 = vld [vmem:[%s13360_s1 + $0x218] sm:$0xff]  }
 0x150   : > { %2144 = vmatmul.mubr.bf16.gmra.mrb[144].mxu1 %v9842_v47  ;;  %8556 = vmatprep.subr.bf16.mxu0 %v8979_v36 }
 0x151   : > { %v1311_v10 = vpop.f32.mrb[24].mxu0  ;;  %2151 = vmatprep.mubr.bf16.mxu1 %v9499_v25  ;;  %v13919_v25 = vld [vmem:[#allocation12_spill] sm:$0xff] }
 0x152   : > { %v10438_v27 = vadd.f32 %v10281_v42, %v1311_v10  ;;  %v1313_v51 = vpop.f32.mrb[25].mxu0  ;;  %v13920_v10 = vld [vmem:[#allocation13_spill] sm:$0xff] }
 0x153   : > { %v1314_v7 = vpop.f32.mrb[26].mxu0  ;;  %8557 = vmatpush3.bf16.msra.mxu0 %v8979_v36  ;;  %v10440_v15 = vpop.f32.mrb[40].mxu1 }
 0x154   : > { %v10443_v34 = vadd.f32 %v10284_v21, %v1314_v7  ;;  %v1316_v45 = vpop.f32.mrb[27].mxu0  ;;  %v10445_v17 = vpop.f32.mrb[41].mxu1  ;;  %8558 = vmatprep.subr.bf16.mxu0 %v8981_v59  ;;  %v8985_v21 = vld [vmem:[%s13360_s1 + $0x220] sm:$0xff]  }
 0x155   : > { %v8453_v50 = vpop.f32.mrb[42].mxu1 }
 0x156   : > { %8495 = vmatmul.mubr.bf16.gmra.mrb[132].mxu0 %v13919_v25  ;;  %v10451_v42 = vpop.f32.mrb[43].mxu1 }
 0x157   : > { %8498 = vmatprep.mubr.bf16.mxu0 %v13920_v10  ;;  %8559 = vmatpush3.bf16.msra.mxu0 %v8981_v59 }
 0x158   : > { %2152 = vmatmul.mubr.bf16.gmra.mrb[148].mxu1 %v9851_v6  ;;  %8560 = vmatprep.subr.bf16.mxu0 %v8983_v19  ;;  %v8987_v6 = vld [vmem:[%s13360_s1 + $0x228] sm:$0xff]  }
 0x159   : > { %v1319_v36 = vpop.f32.mrb[28].mxu0  ;;  %2159 = vmatprep.mubr.bf16.mxu1 %v9519_v63 }
 0x15a   : > { %v10460_v51 = vadd.f32 %v10279_v33, %v1319_v36  ;;  %v1321_v50 = vpop.f32.mrb[29].mxu0  ;;  %v13922_v33 = vld [vmem:[#allocation18_spill] sm:$0xff] }
 0x15b   : > { %v1322_v25 = vpop.f32.mrb[30].mxu0  ;;  %v10462_v7 = vpop.f32.mrb[44].mxu1  ;;  %8561 = vmatpush3.bf16.msra.mxu0 %v8983_v19  ;;  %v8991_v19 = vld [vmem:[%s13360_s1 + $0x230] sm:$0xff]  }
 0x15c   : > { %v1324_v45 = vpop.f32.mrb[31].mxu0  ;;  %v10464_v59 = vpop.f32.mrb[45].mxu1  ;;  %8562 = vmatprep.subr.bf16.mxu0 %v8985_v21 }
 0x15d   : > { %v8457_v47 = vpop.f32.mrb[46].mxu1 }
 0x15e   : > { %8499 = vmatmul.mubr.bf16.gmra.mrb[136].mxu0 %v13921_v46  ;;  %v10470_v63 = vpop.f32.mrb[47].mxu1 }
 0x15f   : > { %8502 = vmatprep.mubr.bf16.mxu0 %v13922_v33  ;;  %8563 = vmatpush3.bf16.msra.mxu0 %v8985_v21 }
 0x160   : > { %2160 = vmatmul.mubr.bf16.gmra.mrb[152].mxu1 %v9888_v28  ;;  %8564 = vmatprep.subr.bf16.mxu0 %v8987_v6 }
 0x161   : > { %v1327_v36 = vpop.f32.mrb[32].mxu0  ;;  %2167 = vmatprep.mubr.bf16.mxu1 %v9540_v24 }
 0x162   : > { %v10479_v50 = vadd.f32 %v10306_v12, %v1327_v36  ;;  %v1329_v47 = vpop.f32.mrb[33].mxu0  ;;  %v13927_v36 = vld [vmem:[#allocation26_spill] sm:$0xff] }
 0x163   : > { %v1330_v25 = vpop.f32.mrb[34].mxu0  ;;  %v10481_v45 = vpop.f32.mrb[48].mxu1  ;;  %8565 = vmatpush3.bf16.msra.mxu0 %v8987_v6 }
 0x164   : > { %13923 = vst [vmem:[#allocation19_spill] sm:$0xff] %v10481_v45  ;;  %v10484_v21 = vadd.f32 %v10309_v11, %v1330_v25  ;;  %v1332_v28 = vpop.f32.mrb[35].mxu0  ;;  %v10486_v22 = vpop.f32.mrb[49].mxu1  ;;  %8566 = vmatprep.subr.bf16.mxu0 %v8991_v19 }
 0x165   : > { %13924 = vst [vmem:[#allocation7_spill] sm:$0xff] %v10486_v22  ;;  %v8461_v24 = vpop.f32.mrb[50].mxu1  ;;  %v13932_v22 = vld [vmem:[#allocation33_spill] sm:$0xff] }
 0x166   : > { %8503 = vmatmul.mubr.bf16.gmra.mrb[140].mxu0 %v13925_v29  ;;  %v10492_v12 = vpop.f32.mrb[51].mxu1 }
 0x167   : > { %13926 = vst [vmem:[#allocation9_spill] sm:$0xff] %v10492_v12  ;;  %8506 = vmatprep.mubr.bf16.mxu0 %v13927_v36  ;;  %8567 = vmatpush3.bf16.msra.mxu0 %v8991_v19  ;;  %v13930_v12 = vld [vmem:[#allocation32_spill] sm:$0xff] }
 0x168   : > { %2168 = vmatmul.mubr.bf16.gmra.mrb[156].mxu1 %v9929_v41  ;;  %8568 = vmatprep.subr.bf16.mxu0 %v8992_v0 }
 0x169   : > { %v1335_v6 = vpop.f32.mrb[36].mxu0  ;;  %2175 = vmatprep.mubr.bf16.mxu1 %v9559_v56 }
 0x16a   : > { %v10498_v28 = vadd.f32 %v10301_v32, %v1335_v6  ;;  %v1337_v11 = vpop.f32.mrb[37].mxu0 }
 0x16b   : > { %v1338_v47 = vpop.f32.mrb[38].mxu0  ;;  %v10500_v25 = vpop.f32.mrb[52].mxu1  ;;  %8569 = vmatpush3.bf16.msra.mxu0 %v8992_v0 }
 0x16c   : > { %13928 = vst [vmem:[#allocation12_spill] sm:$0xff] %v10500_v25  ;;  %v1340_v24 = vpop.f32.mrb[39].mxu0  ;;  %v10502_v45 = vpop.f32.mrb[53].mxu1  ;;  %4401 = vmatprep.subr.bf16.mxu0 %v13748_v62 }
 0x16d   : > { %13929 = vst [vmem:[#allocation13_spill] sm:$0xff] %v10502_v45  ;;  %v8465_v19 = vpop.f32.mrb[54].mxu1  ;;  %v13937_v45 = vld [vmem:[#allocation42_spill] sm:$0xff] }
 0x16e   : > { %8507 = vmatmul.mubr.bf16.gmra.mrb[144].mxu0 %v13930_v12  ;;  %v10506_v41 = vpop.f32.mrb[55].mxu1 }
 0x16f   : > { %13931 = vst [vmem:[#allocation16_spill] sm:$0xff] %v10506_v41  ;;  %8510 = vmatprep.mubr.bf16.mxu0 %v13932_v22  ;;  %v13935_v41 = vld [vmem:[#allocation39_spill] sm:$0xff] }
 0x170   : > { %2176 = vmatmul.mubr.bf16.gmra.mrb[160].mxu1 %v9965_v35 }
 0x171   : > { %v1343_v32 = vpop.f32.mrb[40].mxu0  ;;  %2183 = vmatprep.mubr.bf16.mxu1 %v9582_v60 }
 0x172   : > { %v10512_v6 = vadd.f32 %v10333_v39, %v1343_v32  ;;  %v1345_v0 = vpop.f32.mrb[41].mxu0 }
 0x173   : > { %v1346_v11 = vpop.f32.mrb[42].mxu0  ;;  %v10514_v47 = vpop.f32.mrb[56].mxu1 }
 0x174   : > { %13933 = vst [vmem:[#allocation18_spill] sm:$0xff] %v10514_v47  ;;  %v10517_v24 = vadd.f32 %v10336_v54, %v1346_v11  ;;  %v1348_v19 = vpop.f32.mrb[43].mxu0  ;;  %v10519_v56 = vpop.f32.mrb[57].mxu1  ;;  %v13940_v47 = vld [vmem:[#allocation48_spill] sm:$0xff] }
 0x175   : > { %13934 = vst [vmem:[#allocation25_spill] sm:$0xff] %v10519_v56  ;;  %v8469_v25 = vpop.f32.mrb[58].mxu1  ;;  %v13942_v56 = vld [vmem:[#allocation49_spill] sm:$0xff] }
 0x176   : > { %8511 = vmatmul.mubr.bf16.gmra.mrb[148].mxu0 %v13935_v41  ;;  %v10522_v35 = vpop.f32.mrb[59].mxu1 }
 0x177   : > { %13936 = vst [vmem:[#allocation26_spill] sm:$0xff] %v10522_v35  ;;  %8514 = vmatprep.mubr.bf16.mxu0 %v13937_v45 }
 0x178   : > { %2184 = vmatmul.mubr.bf16.gmra.mrb[164].mxu1 %v9998_v49 }
 0x179   : > { %v1351_v39 = vpop.f32.mrb[44].mxu0  ;;  %2191 = vmatprep.mubr.bf16.mxu1 %v9585_v16 }
 0x17a   : > { %v10528_v32 = vadd.f32 %v10328_v14, %v1351_v39  ;;  %v1353_v54 = vpop.f32.mrb[45].mxu0 }
 0x17b   : > { %v1354_v0 = vpop.f32.mrb[46].mxu0  ;;  %v10530_v11 = vpop.f32.mrb[60].mxu1 }
 0x17c   : > { %13938 = vst [vmem:[#allocation32_spill] sm:$0xff] %v10530_v11  ;;  %v1356_v19 = vpop.f32.mrb[47].mxu0  ;;  %v10532_v25 = vpop.f32.mrb[61].mxu1 }
 0x17d   : > { %13939 = vst [vmem:[#allocation33_spill] sm:$0xff] %v10532_v25  ;;  %v8473_v60 = vpop.f32.mrb[62].mxu1  ;;  %v13945_v25 = vld [vmem:[#allocation54_spill] sm:$0xff] }
 0x17e   : > { %8515 = vmatmul.mubr.bf16.gmra.mrb[152].mxu0 %v13940_v47  ;;  %v10535_v35 = vpop.f32.mrb[63].mxu1 }
 0x17f   : > { %13941 = vst [vmem:[#allocation39_spill] sm:$0xff] %v10535_v35  ;;  %8518 = vmatprep.mubr.bf16.mxu0 %v13942_v56 }
 0x180   : > { %2192 = vmatmul.mubr.bf16.gmra.mrb[168].mxu1 %v10033_v20 }
 0x181   : > { %v1359_v16 = vpop.f32.mrb[48].mxu0  ;;  %2199 = vmatprep.mubr.bf16.mxu1 %v9596_v58 }
 0x182   : > { %v10541_v14 = vadd.f32 %v10356_v13, %v1359_v16  ;;  %v1361_v39 = vpop.f32.mrb[49].mxu0 }
 0x183   : > { %v1985_v54 = vpop.f32.mrb[64].mxu1  ;;  %v1362_v0 = vpop.f32.mrb[50].mxu0 }
 0x184   : > { %v10544_v19 = vadd.f32 %v1985_v54, %v10294_v18  ;;  %v10547_v60 = vadd.f32 %v10359_v48, %v1362_v0  ;;  %v1987_v49 = vpop.f32.mrb[65].mxu1  ;;  %v1364_v11 = vpop.f32.mrb[51].mxu0  ;;  %v13947_v54 = vld [vmem:[#allocation64_spill] sm:$0xff]  ;;  %v13948_v0 = vld [vmem:[#allocation27_spill] sm:$0xff] }
 0x185   : > { %v1988_v35 = vpop.f32.mrb[66].mxu1 }
 0x186   : > { %13943 = vst [vmem:[#allocation42_spill] sm:$0xff] %v10544_v19  ;;  %v10550_v20 = vadd.f32 %v1988_v35, %v10304_v31  ;;  %8519 = vmatmul.mubr.bf16.gmra.mrb[156].mxu0 %v13945_v25  ;;  %v1990_v58 = vpop.f32.mrb[67].mxu1  ;;  %v13959_v19 = vld [vmem:[#allocation73_spill] sm:$0xff] }
 0x187   : > { %8522 = vmatprep.mubr.bf16.mxu0 %v9773_v23 }
 0x188   : > { %13944 = vst [vmem:[#allocation48_spill] sm:$0xff] %v10550_v20  ;;  %2200 = vmatmul.mubr.bf16.gmra.mrb[172].mxu1 %v10066_v5  ;;  %v13949_v5 = vld [vmem:[#allocation50_spill] sm:$0xff]  ;;  %v13955_v20 = vld [vmem:[#allocation51_spill] sm:$0xff] }
 0x189   : > { %v1367_v16 = vpop.f32.mrb[52].mxu0  ;;  %2207 = vmatprep.mubr.bf16.mxu1 %v9614_v9 }
 0x18a   : > { %v10557_v13 = vadd.f32 %v10351_v4, %v1367_v16  ;;  %v1369_v18 = vpop.f32.mrb[53].mxu0 }
 0x18b   : > { %v1993_v49 = vpop.f32.mrb[68].mxu1  ;;  %v1370_v48 = vpop.f32.mrb[54].mxu0 }
 0x18c   : > { %v10560_v11 = vadd.f32 %v1993_v49, %v10320_v37  ;;  %v1372_v31 = vpop.f32.mrb[55].mxu0  ;;  %v1995_v35 = vpop.f32.mrb[69].mxu1 }
 0x18d   : > { %v1996_v39 = vpop.f32.mrb[70].mxu1 }
 0x18e   : > { %13946 = vst [vmem:[#allocation49_spill] sm:$0xff] %v10560_v11  ;;  %8523 = vmatmul.mubr.bf16.gmra.mrb[160].mxu0 %v9848_v3  ;;  %v1998_v58 = vpop.f32.mrb[71].mxu1  ;;  %v13961_v11 = vld [vmem:[#allocation65_spill] sm:$0xff] }
 0x18f   : > { %8526 = vmatprep.mubr.bf16.mxu0 %v13947_v54 }
 0x190   : > { %2208 = vmatmul.mubr.bf16.gmra.mrb[176].mxu1 %v13948_v0  ;;  %v13952_v0 = vld [vmem:[#allocation68_spill] sm:$0xff] }
 0x191   : > { %v1375_v9 = vpop.f32.mrb[56].mxu0  ;;  %2215 = vmatprep.mubr.bf16.mxu1 %v13949_v5 }
 0x192   : > { %v10567_v4 = vadd.f32 %v10380_v43, %v1375_v9  ;;  %v1377_v16 = vpop.f32.mrb[57].mxu0  ;;  %v13953_v9 = vld [vmem:[#allocation69_spill] sm:$0xff]  ;;  %v13954_v43 = vld [vmem:[#allocation3_spill] sm:$0xff] }
 0x193   : > { %v2001_v18 = vpop.f32.mrb[72].mxu1  ;;  %v1378_v37 = vpop.f32.mrb[58].mxu0 }
 0x194   : > { %v10570_v49 = vadd.f32 %v2001_v18, %v10344_v38  ;;  %v10573_v48 = vadd.f32 %v10383_v2, %v1378_v37  ;;  %v2003_v31 = vpop.f32.mrb[73].mxu1  ;;  %v1380_v35 = vpop.f32.mrb[59].mxu0 }
 0x195   : > { %v2004_v39 = vpop.f32.mrb[74].mxu1  ;;  %v13956_v31 = vld [vmem:[#allocation46_spill] sm:$0xff] }
 0x196   : > { %13950 = vst [vmem:[#allocation54_spill] sm:$0xff] %v10570_v49  ;;  %v10576_v58 = vadd.f32 %v2004_v39, %v10354_v40  ;;  %8527 = vmatmul.mubr.bf16.gmra.mrb[164].mxu0 %v13952_v0  ;;  %v2006_v5 = vpop.f32.mrb[75].mxu1 }
 0x197   : > { %8530 = vmatprep.mubr.bf16.mxu0 %v13953_v9  ;;  %v13958_v5 = vld [vmem:[#allocation72_spill] sm:$0xff] }
 0x198   : > { %13951 = vst [vmem:[#allocation64_spill] sm:$0xff] %v10576_v58  ;;  %2216 = vmatmul.mubr.bf16.gmra.mrb[180].mxu1 %v13954_v43  ;;  %v13960_v43 = vld [vmem:[#allocation36_spill] sm:$0xff] }
 0x199   : > { %v1383_v16 = vpop.f32.mrb[60].mxu0  ;;  %2223 = vmatprep.mubr.bf16.mxu1 %v13955_v20 }
 0x19a   : > { %v10583_v38 = vadd.f32 %v10376_v1, %v1383_v16  ;;  %v1385_v2 = vpop.f32.mrb[61].mxu0 }
 0x19b   : > { %v2009_v18 = vpop.f32.mrb[76].mxu1  ;;  %v1386_v37 = vpop.f32.mrb[62].mxu0 }
 0x19c   : > { %v10586_v35 = vadd.f32 %v2009_v18, %v13956_v31  ;;  %v1388_v40 = vpop.f32.mrb[63].mxu0  ;;  %v2011_v39 = vpop.f32.mrb[77].mxu1 }
 0x19d   : > { %v2012_v58 = vpop.f32.mrb[78].mxu1 }
 0x19e   : > { %13957 = vst [vmem:[#allocation68_spill] sm:$0xff] %v10586_v35  ;;  %8531 = vmatmul.mubr.bf16.gmra.mrb[168].mxu0 %v13958_v5  ;;  %v2014_v49 = vpop.f32.mrb[79].mxu1  ;;  %v13967_v35 = vld [vmem:[#allocation5_spill] sm:$0xff] }
 0x19f   : > { %8534 = vmatprep.mubr.bf16.mxu0 %v13959_v19 }
 0x1a0   : > { %2224 = vmatmul.mubr.bf16.gmra.mrb[184].mxu1 %v13960_v43  ;;  %v13964_v43 = vld [vmem:[#allocation77_spill] sm:$0xff] }
 0x1a1   : > { %v1391_v20 = vpop.f32.mrb[64].mxu0  ;;  %2231 = vmatprep.mubr.bf16.mxu1 %v13961_v11 }
 0x1a2   : > { %v10593_v1 = vadd.f32 %v10407_v52, %v1391_v20  ;;  %v1393_v16 = vpop.f32.mrb[65].mxu0  ;;  %v13965_v20 = vld [vmem:[#allocation78_spill] sm:$0xff]  ;;  %v13966_v52 = vld [vmem:[#allocation4_spill] sm:$0xff] }
 0x1a3   : > { %v2017_v2 = vpop.f32.mrb[80].mxu1  ;;  %v1394_v18 = vpop.f32.mrb[66].mxu0 }
 0x1a4   : > { %v10596_v37 = vadd.f32 %v2017_v2, %v10396_v55  ;;  %v10599_v58 = vadd.f32 %v10410_v53, %v1394_v18  ;;  %v2019_v49 = vpop.f32.mrb[81].mxu1  ;;  %v1396_v31 = vpop.f32.mrb[67].mxu0 }
 0x1a5   : > { %v2020_v40 = vpop.f32.mrb[82].mxu1 }
 0x1a6   : > { %13962 = vst [vmem:[#allocation69_spill] sm:$0xff] %v10596_v37  ;;  %v10602_v39 = vadd.f32 %v2020_v40, %v10404_v26  ;;  %8535 = vmatmul.mubr.bf16.gmra.mrb[172].mxu0 %v13964_v43  ;;  %v2022_v11 = vpop.f32.mrb[83].mxu1  ;;  %v13970_v37 = vld [vmem:[#allocation82_spill] sm:$0xff] }
 0x1a7   : > { %8538 = vmatprep.mubr.bf16.mxu0 %v13965_v20  ;;  %v13969_v11 = vld [vmem:[#allocation81_spill] sm:$0xff]  ;;  %v13972_v20 = vld [vmem:[#allocation6_spill] sm:$0xff] }
 0x1a8   : > { %13963 = vst [vmem:[#allocation46_spill] sm:$0xff] %v10602_v39  ;;  %2232 = vmatmul.mubr.bf16.gmra.mrb[188].mxu1 %v13966_v52  ;;  %v13971_v52 = vld [vmem:[#allocation53_spill] sm:$0xff] }
 0x1a9   : > { %v1399_v16 = vpop.f32.mrb[68].mxu0  ;;  %2754 = vmatprep.mubr.bf16.mxu1 %v13967_v35 }
 0x1aa   : > { %v10609_v55 = vadd.f32 %v10401_v61, %v1399_v16  ;;  %v1401_v53 = vpop.f32.mrb[69].mxu0 }
 0x1ab   : > { %v2025_v2 = vpop.f32.mrb[84].mxu1  ;;  %v1402_v18 = vpop.f32.mrb[70].mxu0 }
 0x1ac   : > { %v10612_v49 = vadd.f32 %v2025_v2, %v10417_v57  ;;  %v1404_v26 = vpop.f32.mrb[71].mxu0  ;;  %v2027_v31 = vpop.f32.mrb[85].mxu1 }
 0x1ad   : > { %v2028_v40 = vpop.f32.mrb[86].mxu1 }
 0x1ae   : > { %13968 = vst [vmem:[#allocation72_spill] sm:$0xff] %v10612_v49  ;;  %8539 = vmatmul.mubr.bf16.gmra.mrb[176].mxu0 %v13969_v11  ;;  %v2030_v39 = vpop.f32.mrb[87].mxu1  ;;  %v13975_v40 = vld [vmem:[#allocation86_spill] sm:$0xff] }
 0x1af   : > { %8542 = vmatprep.mubr.bf16.mxu0 %v13970_v37  ;;  %v13980_v49 = vld [vmem:[#allocation90_spill] sm:$0xff] }
 0x1b0   : > { %2755 = vmatmul.mubr.bf16.vlgmr.msra.gmra.mrb[192].mxu1 %v13971_v52 }
 0x1b1   : > { %v1407_v35 = vpop.f32.mrb[72].mxu0  ;;  %2762 = vmatprep.mubr.bf16.mxu1 %v13972_v20 }
 0x1b2   : > { %v10619_v61 = vadd.f32 %v10426_v30, %v1407_v35  ;;  %v1409_v16 = vpop.f32.mrb[73].mxu0  ;;  %v8993_v30 = vld [vmem:[%s13362_s3 + $0x140] sm:$0xff]  }
 0x1b3   : > { %v2033_v53 = vpop.f32.mrb[88].mxu1  ;;  %v1410_v57 = vpop.f32.mrb[74].mxu0  ;;  %v13976_v35 = vld [vmem:[#allocation87_spill] sm:$0xff]  ;;  %8634 = vmatprep.subr.bf16.mxu1 %v8993_v30  ;;  %v13978_v16 = vld [vmem:[#allocation8_spill] sm:$0xff] }
 0x1b4   : > { %v10622_v2 = vadd.f32 %v2033_v53, %v10438_v27  ;;  %v10625_v18 = vadd.f32 %v10428_v8, %v1410_v57  ;;  %v2035_v39 = vpop.f32.mrb[89].mxu1  ;;  %v1412_v26 = vpop.f32.mrb[75].mxu0  ;;  %v13977_v27 = vld [vmem:[#allocation61_spill] sm:$0xff]  ;;  %8635 = vmatpush3.bf16.msra.mxu1 %v8993_v30 }
 0x1b5   : > { %v2036_v31 = vpop.f32.mrb[90].mxu1 }
 0x1b6   : > { %13973 = vst [vmem:[#allocation73_spill] sm:$0xff] %v10622_v2  ;;  %v10628_v52 = vadd.f32 %v2036_v31, %v10443_v34  ;;  %8543 = vmatmul.mubr.bf16.gmra.mrb[180].mxu0 %v13975_v40  ;;  %v2038_v20 = vpop.f32.mrb[91].mxu1  ;;  %v13979_v2 = vld [vmem:[#allocation89_spill] sm:$0xff] }
 0x1b7   : > { %8546 = vmatprep.mubr.bf16.mxu0 %v13976_v35  ;;  %v13981_v35 = vld [vmem:[#allocation66_spill] sm:$0xff] }
 0x1b8   : > { %13974 = vst [vmem:[#allocation77_spill] sm:$0xff] %v10628_v52  ;;  %2763 = vmatmul.mubr.bf16.gmra.mrb[196].mxu1 %v13977_v27 }
 0x1b9   : > { %v1415_v8 = vpop.f32.mrb[76].mxu0  ;;  %2770 = vmatprep.mubr.bf16.mxu1 %v13978_v16  ;;  %v13982_v16 = vld [vmem:[#allocation10_spill] sm:$0xff] }
 0x1ba   : > { %v10638_v53 = vadd.f32 %v10421_v44, %v1415_v8  ;;  %v1417_v34 = vpop.f32.mrb[77].mxu0 }
 0x1bb   : > { %v2041_v57 = vpop.f32.mrb[92].mxu1  ;;  %v1418_v39 = vpop.f32.mrb[78].mxu0 }
 0x1bc   : > { %v10641_v26 = vadd.f32 %v2041_v57, %v10460_v51  ;;  %v1420_v31 = vpop.f32.mrb[79].mxu0  ;;  %v2043_v20 = vpop.f32.mrb[93].mxu1 }
 0x1bd   : > { %v2044_v52 = vpop.f32.mrb[94].mxu1 }
 0x1be   : > { %8547 = vmatmul.mubr.bf16.gmra.mrb[184].mxu0 %v13979_v2  ;;  %v2046_v27 = vpop.f32.mrb[95].mxu1 }
 0x1bf   : > { %8550 = vmatprep.mubr.bf16.mxu0 %v13980_v49  ;;  %v13983_v27 = vld [vmem:[#allocation92_spill] sm:$0xff] }
 0x1c0   : > { %2771 = vmatmul.mubr.bf16.gmra.mrb[200].mxu1 %v13981_v35 }
 0x1c1   : > { %v1423_v30 = vpop.f32.mrb[80].mxu0  ;;  %2778 = vmatprep.mubr.bf16.mxu1 %v13982_v16 }
 0x1c2   : > { %v10648_v44 = vadd.f32 %v10445_v17, %v1423_v30  ;;  %v1425_v8 = vpop.f32.mrb[81].mxu0  ;;  %v13984_v17 = vld [vmem:[#allocation70_spill] sm:$0xff] }
 0x1c3   : > { %v2049_v34 = vpop.f32.mrb[96].mxu1  ;;  %v1426_v51 = vpop.f32.mrb[82].mxu0  ;;  %v13985_v8 = vld [vmem:[#allocation11_spill] sm:$0xff] }
 0x1c4   : > { %v10651_v57 = vadd.f32 %v2049_v34, %v10479_v50  ;;  %v10654_v52 = vadd.f32 %v10451_v42, %v1426_v51  ;;  %v2051_v39 = vpop.f32.mrb[97].mxu1  ;;  %v1428_v31 = vpop.f32.mrb[83].mxu0 }
 0x1c5   : > { %v2052_v20 = vpop.f32.mrb[98].mxu1 }
 0x1c6   : > { %v10657_v35 = vadd.f32 %v2052_v20, %v10484_v21  ;;  %8551 = vmatmul.mubr.bf16.gmra.mrb[188].mxu0 %v13983_v27  ;;  %v2054_v16 = vpop.f32.mrb[99].mxu1  ;;  %v8994_v21 = vld [vmem:[%s13362_s3 + $0xc0] sm:$0xff]  }
 0x1c7   : > { %8570 = vmatprep.mubr.bf16.mxu0 %v13920_v10 }
 0x1c8   : > { %2779 = vmatmul.mubr.bf16.gmra.mrb[204].mxu1 %v13984_v17  ;;  %v13986_v17 = vld [vmem:[#allocation75_spill] sm:$0xff] }
 0x1c9   : > { %v1431_v30 = vpop.f32.mrb[84].mxu0  ;;  %2786 = vmatprep.mubr.bf16.mxu1 %v13985_v8 }
 0x1ca   : > { %v10664_v50 = vadd.f32 %v10440_v15, %v1431_v30  ;;  %v1433_v42 = vpop.f32.mrb[85].mxu0  ;;  %v8995_v15 = vld [vmem:[%s13362_s3 + $0xc8] sm:$0xff]  }
 0x1cb   : > { %v2057_v34 = vpop.f32.mrb[100].mxu1  ;;  %v1434_v51 = vpop.f32.mrb[86].mxu0 }
 0x1cc   : > { %v10670_v39 = vadd.f32 %v2057_v34, %v10498_v28  ;;  %v1436_v31 = vpop.f32.mrb[87].mxu0  ;;  %v2059_v10 = vpop.f32.mrb[101].mxu1  ;;  %v13987_v28 = vld [vmem:[#allocation14_spill] sm:$0xff] }
 0x1cd   : > { %v2060_v20 = vpop.f32.mrb[102].mxu1 }
 0x1ce   : > { %8571 = vmatmul.mubr.bf16.vlgmr.msra.gmra.mrb[192].mxu0 %v13921_v46  ;;  %v2062_v16 = vpop.f32.mrb[103].mxu1 }
 0x1cf   : > { %8574 = vmatprep.mubr.bf16.mxu0 %v13922_v33  ;;  %4402 = vmatpush1.bf16.msra.mxu0 %v8994_v21  ;;  %v8996_v33 = vld [vmem:[%s13362_s3 + $0xd0] sm:$0xff]  }
 0x1d0   : > { %2787 = vmatmul.mubr.bf16.gmra.mrb[208].mxu1 %v13986_v17  ;;  %4403 = vmatprep.subr.bf16.mxu0 %v13748_v62  ;;  %v13989_v17 = vld [vmem:[#allocation15_spill] sm:$0xff] }
 0x1d1   : > { %v1439_v30 = vpop.f32.mrb[88].mxu0  ;;  %2794 = vmatprep.mubr.bf16.mxu1 %v13987_v28 }
 0x1d2   : > { %v10681_v8 = vadd.f32 %v10464_v59, %v1439_v30  ;;  %v1441_v42 = vpop.f32.mrb[89].mxu0 }
 0x1d3   : > { %v2065_v46 = vpop.f32.mrb[104].mxu1  ;;  %v1442_v34 = vpop.f32.mrb[90].mxu0  ;;  %4404 = vmatpush1.bf16.msra.mxu0 %v8995_v15  ;;  %v8998_v15 = vld [vmem:[%s13362_s3 + $0x148] sm:$0xff]   ;;  %v8999_v42 = vld [vmem:[%s13362_s3 + $0xe0] sm:$0xff]  }
 0x1d4   : > { %v10687_v51 = vadd.f32 %v2065_v46, %v10512_v6  ;;  %v10690_v21 = vadd.f32 %v10470_v63, %v1442_v34  ;;  %v2067_v31 = vpop.f32.mrb[105].mxu1  ;;  %v1444_v10 = vpop.f32.mrb[91].mxu0  ;;  %4405 = vmatprep.subr.bf16.mxu0 %v13748_v62  ;;  %v8997_v63 = vld [vmem:[%s13362_s3 + $0xd8] sm:$0xff]   ;;  %v13988_v6 = vld [vmem:[#allocation79_spill] sm:$0xff]  ;;  %8636 = vmatprep.subr.bf16.mxu1 %v8998_v15 }
 0x1d5   : > { %v2068_v59 = vpop.f32.mrb[106].mxu1  ;;  %8637 = vmatpush3.bf16.msra.mxu1 %v8998_v15  ;;  %v13990_v10 = vld [vmem:[#allocation84_spill] sm:$0xff]  ;;  %v13992_v15 = vld [vmem:[#allocation7_spill] sm:$0xff] }
 0x1d6   : > { %v10694_v20 = vadd.f32 %v2068_v59, %v10517_v24  ;;  %8575 = vmatmul.mubr.bf16.gmra.mrb[196].mxu0 %v13925_v29  ;;  %v2070_v16 = vpop.f32.mrb[107].mxu1 }
 0x1d7   : > { %8578 = vmatprep.mubr.bf16.mxu0 %v13927_v36  ;;  %4406 = vmatpush1.bf16.msra.mxu0 %v8996_v33  ;;  %v13991_v16 = vld [vmem:[#allocation17_spill] sm:$0xff] }
 0x1d8   : > { %2795 = vmatmul.mubr.bf16.gmra.mrb[212].mxu1 %v13988_v6  ;;  %4407 = vmatprep.subr.bf16.mxu0 %v13748_v62 }
 0x1d9   : > { %v1447_v24 = vpop.f32.mrb[92].mxu0  ;;  %2802 = vmatprep.mubr.bf16.mxu1 %v13989_v17  ;;  %v13993_v17 = vld [vmem:[#allocation9_spill] sm:$0xff] }
 0x1da   : > { %v10708_v29 = vadd.f32 %v10462_v7, %v1447_v24  ;;  %v1449_v30 = vpop.f32.mrb[93].mxu0 }
 0x1db   : > { %v2073_v28 = vpop.f32.mrb[108].mxu1  ;;  %v1450_v36 = vpop.f32.mrb[94].mxu0  ;;  %4408 = vmatpush1.bf16.msra.mxu0 %v8997_v63 }
 0x1dc   : > { %v10714_v46 = vadd.f32 %v2073_v28, %v10528_v32  ;;  %v1452_v34 = vpop.f32.mrb[95].mxu0  ;;  %v2075_v33 = vpop.f32.mrb[109].mxu1  ;;  %4409 = vmatprep.subr.bf16.mxu0 %v13748_v62  ;;  %v9000_v32 = vld [vmem:[%s13362_s3 + $0xe8] sm:$0xff]  }
 0x1dd   : > { %v2076_v31 = vpop.f32.mrb[110].mxu1 }
 0x1de   : > { %8579 = vmatmul.mubr.bf16.gmra.mrb[200].mxu0 %v13930_v12  ;;  %v2078_v7 = vpop.f32.mrb[111].mxu1  ;;  %v13994_v31 = vld [vmem:[#allocation45_spill] sm:$0xff] }
 0x1df   : > { %8582 = vmatprep.mubr.bf16.mxu0 %v13932_v22  ;;  %4410 = vmatpush1.bf16.msra.mxu0 %v8999_v42 }
 0x1e0   : > { %2803 = vmatmul.mubr.bf16.gmra.mrb[216].mxu1 %v13990_v10  ;;  %4411 = vmatprep.subr.bf16.mxu0 %v13748_v62  ;;  %v13995_v10 = vld [vmem:[#allocation20_spill] sm:$0xff] }
 0x1e1   : > { %v1455_v59 = vpop.f32.mrb[96].mxu0  ;;  %2810 = vmatprep.mubr.bf16.mxu1 %v13991_v16 }
 0x1e2   : > { %v10726_v63 = vadd.f32 %v13992_v15, %v1455_v59  ;;  %v1457_v6 = vpop.f32.mrb[97].mxu0 }
 0x1e3   : > { %v2081_v12 = vpop.f32.mrb[112].mxu1  ;;  %v1458_v24 = vpop.f32.mrb[98].mxu0  ;;  %4412 = vmatpush1.bf16.msra.mxu0 %v9000_v32  ;;  %v13996_v32 = vld [vmem:[#allocation19_spill] sm:$0xff] }
 0x1e4   : > { %v10729_v22 = vadd.f32 %v2081_v12, %v10541_v14  ;;  %v10732_v30 = vadd.f32 %v13993_v17, %v1458_v24  ;;  %v2083_v28 = vpop.f32.mrb[113].mxu1  ;;  %v1460_v36 = vpop.f32.mrb[99].mxu0  ;;  %4413 = vmatprep.subr.bf16.mxu0 %v13748_v62  ;;  %v9001_v14 = vld [vmem:[%s13362_s3 + $0xf0] sm:$0xff]   ;;  %v13997_v17 = vld [vmem:[#allocation47_spill] sm:$0xff] }
 0x1e5   : > { %v2084_v42 = vpop.f32.mrb[114].mxu1  ;;  %v9002_v28 = vld [vmem:[%s13362_s3 + $0xf8] sm:$0xff]  }
 0x1e6   : > { %v10736_v34 = vadd.f32 %v2084_v42, %v10547_v60  ;;  %8583 = vmatmul.mubr.bf16.gmra.mrb[204].mxu0 %v13935_v41  ;;  %v2086_v33 = vpop.f32.mrb[115].mxu1  ;;  %v13998_v42 = vld [vmem:[#allocation21_spill] sm:$0xff] }
 0x1e7   : > { %8586 = vmatprep.mubr.bf16.mxu0 %v13937_v45  ;;  %4414 = vmatpush1.bf16.msra.mxu0 %v9001_v14  ;;  %v13999_v33 = vld [vmem:[#allocation13_spill] sm:$0xff] }
 0x1e8   : > { %2811 = vmatmul.mubr.bf16.gmra.mrb[220].mxu1 %v13994_v31  ;;  %4415 = vmatprep.subr.bf16.mxu0 %v13748_v62 }
 0x1e9   : > { %v1463_v7 = vpop.f32.mrb[100].mxu0  ;;  %2818 = vmatprep.mubr.bf16.mxu1 %v13995_v10 }
 0x1ea   : > { %v10746_v59 = vadd.f32 %v13996_v32, %v1463_v7  ;;  %v1465_v16 = vpop.f32.mrb[101].mxu0 }
 0x1eb   : > { %v2089_v60 = vpop.f32.mrb[116].mxu1  ;;  %v1466_v15 = vpop.f32.mrb[102].mxu0  ;;  %4416 = vmatpush1.bf16.msra.mxu0 %v9002_v28 }
 0x1ec   : > { %v10750_v41 = vadd.f32 %v2089_v60, %v10557_v13  ;;  %v1468_v45 = vpop.f32.mrb[103].mxu0  ;;  %v2091_v6 = vpop.f32.mrb[117].mxu1  ;;  %4417 = vmatprep.subr.bf16.mxu0 %v13748_v62 }
 0x1ed   : > { %v2092_v12 = vpop.f32.mrb[118].mxu1  ;;  %v9003_v6 = vld [vmem:[%s13362_s3 + $0x150] sm:$0xff]  }
 0x1ee   : > { %8587 = vmatmul.mubr.bf16.gmra.mrb[208].mxu0 %v13940_v47  ;;  %v2094_v24 = vpop.f32.mrb[119].mxu1  ;;  %v14000_v47 = vld [vmem:[#allocation16_spill] sm:$0xff]  ;;  %8638 = vmatprep.subr.bf16.mxu1 %v9003_v6  ;;  %v9004_v12 = vld [vmem:[%s13362_s3 + $0x100] sm:$0xff]  }
 0x1ef   : > { %8590 = vmatprep.mubr.bf16.mxu0 %v13942_v56  ;;  %8639 = vmatpush3.bf16.msra.mxu1 %v9003_v6 }
 0x1f0   : > { %2819 = vmatmul.mubr.bf16.gmra.mrb[224].mxu1 %v13997_v17  ;;  %v14002_v17 = vld [vmem:[#allocation22_spill] sm:$0xff]  ;;  %4418 = vmatpush1.bf16.msra.mxu0 %v9004_v12 }
 0x1f1   : > { %v1471_v36 = vpop.f32.mrb[104].mxu0  ;;  %2826 = vmatprep.mubr.bf16.mxu1 %v13998_v42  ;;  %4419 = vmatprep.subr.bf16.mxu0 %v13748_v62 }
 0x1f2   : > { %v10760_v13 = vadd.f32 %v13999_v33, %v1471_v36  ;;  %v1473_v31 = vpop.f32.mrb[105].mxu0 }
 0x1f3   : > { %v2097_v14 = vpop.f32.mrb[120].mxu1  ;;  %v1474_v7 = vpop.f32.mrb[106].mxu0 }
 0x1f4   : > { %v10764_v56 = vadd.f32 %v2097_v14, %v10567_v4  ;;  %v10767_v10 = vadd.f32 %v14000_v47, %v1474_v7  ;;  %v2099_v32 = vpop.f32.mrb[121].mxu1  ;;  %v1476_v16 = vpop.f32.mrb[107].mxu0  ;;  %v14001_v4 = vld [vmem:[#allocation52_spill] sm:$0xff]  ;;  %v14004_v47 = vld [vmem:[#allocation55_spill] sm:$0xff] }
 0x1f5   : > { %v2100_v60 = vpop.f32.mrb[122].mxu1  ;;  %v9005_v32 = vld [vmem:[%s13362_s3 + $0x108] sm:$0xff]  }
 0x1f6   : > { %v10770_v15 = vadd.f32 %v2100_v60, %v10573_v48  ;;  %v2102_v45 = vpop.f32.mrb[123].mxu1  ;;  %8591 = vmatmul.mubr.bf16.gmra.mrb[212].mxu0 %v13945_v25  ;;  %v14003_v48 = vld [vmem:[#allocation12_spill] sm:$0xff]  ;;  %v14005_v60 = vld [vmem:[#allocation23_spill] sm:$0xff] }
 0x1f7   : > { %8594 = vmatprep.mubr.bf16.mxu0 %v9773_v23  ;;  %v14006_v45 = vld [vmem:[#allocation25_spill] sm:$0xff]  ;;  %4420 = vmatpush1.bf16.msra.mxu0 %v9005_v32 }
 0x1f8   : > { %2827 = vmatmul.mubr.bf16.gmra.mrb[228].mxu1 %v14001_v4  ;;  %4421 = vmatprep.subr.bf16.mxu0 %v13748_v62 }
 0x1f9   : > { %v1479_v24 = vpop.f32.mrb[108].mxu0  ;;  %2834 = vmatprep.mubr.bf16.mxu1 %v14002_v17 }
 0x1fa   : > { %v10783_v28 = vadd.f32 %v14003_v48, %v1479_v24  ;;  %v1481_v25 = vpop.f32.mrb[109].mxu0 }
 0x1fb   : > { %v2105_v36 = vpop.f32.mrb[124].mxu1  ;;  %v1482_v42 = vpop.f32.mrb[110].mxu0 }
 0x1fc   : > { %v10787_v23 = vadd.f32 %v2105_v36, %v10583_v38  ;;  %v1484_v33 = vpop.f32.mrb[111].mxu0  ;;  %v2107_v31 = vpop.f32.mrb[125].mxu1 }
 0x1fd   : > { %v2108_v14 = vpop.f32.mrb[126].mxu1  ;;  %v14008_v33 = vld [vmem:[#allocation56_spill] sm:$0xff] }
 0x1fe   : > { %v2110_v7 = vpop.f32.mrb[127].mxu1  ;;  %8595 = vmatmul.mubr.bf16.gmra.mrb[216].mxu0 %v9848_v3  ;;  %v14009_v14 = vld [vmem:[#allocation24_spill] sm:$0xff] }
 0x1ff   : > { %8598 = vmatprep.mubr.bf16.mxu0 %v13947_v54  ;;  %v14007_v54 = vld [vmem:[#allocation26_spill] sm:$0xff] }
 0x200   : > { %2835 = vmatmul.mubr.bf16.gmra.mrb[232].mxu1 %v14004_v47  ;;  %v14010_v7 = vld [vmem:[#allocation18_spill] sm:$0xff] }
 0x201   : > { %v1487_v16 = vpop.f32.mrb[112].mxu0  ;;  %2842 = vmatprep.mubr.bf16.mxu1 %v14005_v60 }
 0x202   : > { %v10797_v38 = vadd.f32 %v14006_v45, %v1487_v16  ;;  %v1489_v6 = vpop.f32.mrb[113].mxu0 }
 0x203   : > { %v2113_v4 = vpop.f32.mrb[128].mxu1  ;;  %v1490_v12 = vpop.f32.mrb[114].mxu0 }
 0x204   : > { %v10801_v3 = vadd.f32 %v2113_v4, %v10593_v1  ;;  %v10804_v24 = vadd.f32 %v14007_v54, %v1490_v12  ;;  %v2115_v17 = vpop.f32.mrb[129].mxu1  ;;  %v1492_v48 = vpop.f32.mrb[115].mxu0  ;;  %v9006_v1 = vld [vmem:[%s13362_s3 + $0x110] sm:$0xff]   ;;  %v9007_v12 = vld [vmem:[%s13362_s3 + $0x118] sm:$0xff]  }
 0x205   : > { %v2116_v25 = vpop.f32.mrb[130].mxu1  ;;  %4422 = vmatpush1.bf16.msra.mxu0 %v9006_v1  ;;  %v14011_v4 = vld [vmem:[#allocation57_spill] sm:$0xff]  ;;  %v14012_v17 = vld [vmem:[#allocation28_spill] sm:$0xff] }
 0x206   : > { %v10807_v36 = vadd.f32 %v2116_v25, %v10599_v58  ;;  %v2118_v42 = vpop.f32.mrb[131].mxu1  ;;  %8599 = vmatmul.mubr.bf16.gmra.mrb[220].mxu0 %v13952_v0  ;;  %4423 = vmatprep.subr.bf16.mxu0 %v13748_v62  ;;  %v14013_v48 = vld [vmem:[#allocation33_spill] sm:$0xff] }
 0x207   : > { %8602 = vmatprep.mubr.bf16.mxu0 %v13953_v9 }
 0x208   : > { %2843 = vmatmul.mubr.bf16.gmra.mrb[236].mxu1 %v14008_v33 }
 0x209   : > { %v1495_v31 = vpop.f32.mrb[116].mxu0  ;;  %2850 = vmatprep.mubr.bf16.mxu1 %v14009_v14  ;;  %4424 = vmatpush1.bf16.msra.mxu0 %v9007_v12 }
 0x20a   : > { %v10817_v47 = vadd.f32 %v14010_v7, %v1495_v31  ;;  %v1497_v32 = vpop.f32.mrb[117].mxu0  ;;  %4425 = vmatprep.subr.bf16.mxu0 %v13748_v62 }
 0x20b   : > { %v2121_v58 = vpop.f32.mrb[132].mxu1  ;;  %v1498_v16 = vpop.f32.mrb[118].mxu0  ;;  %v9008_v32 = vld [vmem:[%s13362_s3 + $0x158] sm:$0xff]  }
 0x20c   : > { %v10821_v0 = vadd.f32 %v2121_v58, %v10609_v55  ;;  %v1500_v9 = vpop.f32.mrb[119].mxu0  ;;  %v2123_v60 = vpop.f32.mrb[133].mxu1  ;;  %8640 = vmatprep.subr.bf16.mxu1 %v9008_v32 }
 0x20d   : > { %v2124_v45 = vpop.f32.mrb[134].mxu1  ;;  %v14015_v9 = vld [vmem:[#allocation78_spill] sm:$0xff]  ;;  %v9009_v60 = vld [vmem:[%s13362_s3 + $0x120] sm:$0xff]   ;;  %8641 = vmatpush3.bf16.msra.mxu1 %v9008_v32 }
 0x20e   : > { %v2126_v6 = vpop.f32.mrb[135].mxu1  ;;  %8603 = vmatmul.mubr.bf16.gmra.mrb[224].mxu0 %v13958_v5  ;;  %v14014_v5 = vld [vmem:[#allocation39_spill] sm:$0xff] }
 0x20f   : > { %8606 = vmatprep.mubr.bf16.mxu0 %v13959_v19  ;;  %v14017_v6 = vld [vmem:[#allocation29_spill] sm:$0xff]  ;;  %4426 = vmatpush1.bf16.msra.mxu0 %v9009_v60 }
 0x210   : > { %2851 = vmatmul.mubr.bf16.gmra.mrb[240].mxu1 %v14011_v4  ;;  %v10854_v4 = vld [vmem:[%s9220_s16 + $0x118] sm:$0xff]   ;;  %4427 = vmatprep.subr.bf16.mxu0 %v13748_v62  ;;  %v10877_v60 = vld [vmem:[%s9220_s16 + $0x110] sm:$0xff]  }
 0x211   : > { %v1503_v54 = vpop.f32.mrb[120].mxu0  ;;  %2858 = vmatprep.mubr.bf16.mxu1 %v14012_v17 }
 0x212   : > { %v10831_v55 = vadd.f32 %v14013_v48, %v1503_v54  ;;  %v1505_v25 = vpop.f32.mrb[121].mxu0  ;;  %v13542_v48 = vshrl.u32 %v10854_v4, 16 }
 0x213   : > { %v2129_v42 = vpop.f32.mrb[136].mxu1  ;;  %v1506_v33 = vpop.f32.mrb[122].mxu0 }
 0x214   : > { %v10835_v19 = vadd.f32 %v2129_v42, %v10619_v61  ;;  %v10838_v1 = vadd.f32 %v14014_v5, %v1506_v33  ;;  %v2131_v31 = vpop.f32.mrb[137].mxu1  ;;  %v1508_v14 = vpop.f32.mrb[123].mxu0  ;;  %v14016_v61 = vld [vmem:[#allocation58_spill] sm:$0xff] }
 0x215   : > { %v2132_v7 = vpop.f32.mrb[138].mxu1  ;;  %v13543_v31 = vshll.u32 %v10854_v4, 16  ;;  %v761_v14 = vrot.slane %v13542_v48, 7  ;;  %v14029_v48 = vld [vmem:[#allocation64_spill] sm:$0xff] }
 0x216   : > { %v10844_v58 = vadd.f32 %v2132_v7, %v10625_v18  ;;  %v2134_v16 = vpop.f32.mrb[139].mxu1  ;;  %8607 = vmatmul.mubr.bf16.gmra.mrb[228].mxu0 %v13964_v43  ;;  %v14018_v18 = vld [vmem:[#allocation32_spill] sm:$0xff] }
 0x217   : > { %8610 = vmatprep.mubr.bf16.mxu0 %v14015_v9  ;;  %v764_v32 = vor.u32 %v13543_v31, %v761_v14  ;;  %v14019_v16 = vld [vmem:[#allocation59_spill] sm:$0xff]  ;;  %v14036_v31 = vld [vmem:[#allocation46_spill] sm:$0xff] }
 0x218   : > { %2859 = vmatmul.mubr.bf16.gmra.mrb[244].mxu1 %v14016_v61  ;;  %v14020_v61 = vld [vmem:[#allocation30_spill] sm:$0xff] }
 0x219   : > { %v1511_v45 = vpop.f32.mrb[124].mxu0  ;;  %2866 = vmatprep.mubr.bf16.mxu1 %v14017_v6  ;;  %v14021_v6 = vld [vmem:[#allocation49_spill] sm:$0xff] }
 0x21a   : > { %v10857_v12 = vadd.f32 %v14018_v18, %v1511_v45  ;;  %v1513_v54 = vpop.f32.mrb[125].mxu0  ;;  %v13544_v45 = vshrl.u32 %v10877_v60, 16 }
 0x21b   : > { %v2137_v43 = vpop.f32.mrb[140].mxu1  ;;  %v1514_v17 = vpop.f32.mrb[126].mxu0  ;;  %v14022_v54 = vld [vmem:[#allocation42_spill] sm:$0xff] }
 0x21c   : > { %v10862_v25 = vadd.f32 %v2137_v43, %v10638_v53  ;;  %v1516_v42 = vpop.f32.mrb[127].mxu0  ;;  %v2139_v33 = vpop.f32.mrb[141].mxu1  ;;  %v9011_v53 = vld [vmem:[%s13362_s3 + $0x128] sm:$0xff]  }
 0x21d   : > { %v2140_v5 = vpop.f32.mrb[142].mxu1  ;;  %4428 = vmatpush1.bf16.msra.mxu0 %v9011_v53 }
 0x21e   : > { %v2142_v7 = vpop.f32.mrb[143].mxu1  ;;  %8611 = vmatmul.mubr.bf16.gmra.mrb[232].mxu0 %v13969_v11  ;;  %4429 = vmatprep.subr.bf16.mxu0 %v13748_v62 }
 0x21f   : > { %8614 = vmatprep.mubr.bf16.mxu0 %v13970_v37  ;;  %v14023_v7 = vld [vmem:[#allocation48_spill] sm:$0xff] }
 0x220   : > { %2867 = vmatmul.mubr.bf16.gmra.mrb[248].mxu1 %v14019_v16 }
 0x221   : > { %v8492_v9 = vpop.f32.mrb[128].mxu0  ;;  %2874 = vmatprep.mubr.bf16.mxu1 %v14020_v61 }
 0x222   : > { %v10881_v11 = vadd.f32 %v8492_v9, %v14021_v6  ;;  %v2274_v37 = vpop.f32.mrb[129].mxu0  ;;  %v10895_v9 = vrot.slane %v13544_v45, 7  ;;  %v14024_v6 = vld [vmem:[#allocation87_spill] sm:$0xff] }
 0x223   : > { %v2145_v18 = vpop.f32.mrb[144].mxu1  ;;  %v10884_v43 = vadd.f32 %v2274_v37, %v14022_v54  ;;  %v8493_v17 = vpop.f32.mrb[130].mxu0  ;;  %v14025_v37 = vld [vmem:[#allocation60_spill] sm:$0xff]  ;;  %v14026_v54 = vld [vmem:[#allocation31_spill] sm:$0xff] }
 0x224   : > { %v10888_v42 = vadd.f32 %v2145_v18, %v10648_v44  ;;  %v2147_v33 = vpop.f32.mrb[145].mxu1  ;;  %v2277_v5 = vpop.f32.mrb[131].mxu0  ;;  %v10904_v44 = vsel %vm478_vm1, %v10895_v9, %v764_v32  ;;  %v14027_v17 = vld [vmem:[#allocation68_spill] sm:$0xff] }
 0x225   : > { %v2148_v14 = vpop.f32.mrb[146].mxu1  ;;  %v10891_v16 = vadd.f32 %v2277_v5, %v14023_v7 }
 0x226   : > { %v10898_v53 = vadd.f32 %v2148_v14, %v10654_v52  ;;  %v2150_v61 = vpop.f32.mrb[147].mxu1  ;;  %8615 = vmatmul.mubr.bf16.gmra.mrb[236].mxu0 %v13975_v40  ;;  %v14028_v14 = vld [vmem:[#allocation54_spill] sm:$0xff] }
 0x227   : > { %8618 = vmatprep.mubr.bf16.mxu0 %v14024_v6  ;;  %v9013_v61 = vld [vmem:[%s13362_s3 + $0x160] sm:$0xff]  }
 0x228   : > { %2875 = vmatmul.mubr.bf16.gmra.mrb[252].mxu1 %v14025_v37  ;;  %8642 = vmatprep.subr.bf16.mxu1 %v9013_v61 }
 0x229   : > { %v8496_v18 = vpop.f32.mrb[132].mxu0  ;;  %2882 = vmatprep.mubr.bf16.mxu1 %v14026_v54  ;;  %8643 = vmatpush3.bf16.msra.mxu1 %v9013_v61 }
 0x22a   : > { %v10909_v33 = vadd.f32 %v8496_v18, %v14027_v17  ;;  %v2290_v5 = vpop.f32.mrb[133].mxu0 }
 0x22b   : > { %v2153_v52 = vpop.f32.mrb[148].mxu1  ;;  %v10912_v7 = vadd.f32 %v2290_v5, %v14028_v14  ;;  %v8497_v40 = vpop.f32.mrb[134].mxu0  ;;  %v9012_v5 = vld [vmem:[%s13362_s3 + $0x130] sm:$0xff]   ;;  %v14031_v14 = vld [vmem:[#allocation34_spill] sm:$0xff] }
 0x22c   : > { %v10918_v32 = vadd.f32 %v2153_v52, %v10664_v50  ;;  %v2293_v6 = vpop.f32.mrb[135].mxu0  ;;  %v2155_v37 = vpop.f32.mrb[149].mxu1  ;;  %v9015_v50 = vld [vmem:[%s13362_s3 + $0x168] sm:$0xff]   ;;  %v14030_v52 = vld [vmem:[#allocation62_spill] sm:$0xff]  ;;  %4430 = vmatpush1.bf16.msra.mxu0 %v9012_v5  ;;  %v9016_v5 = vld [vmem:[%s13362_s3 + $0x170] sm:$0xff]  }
 0x22d   : > { %v10921_v54 = vadd.f32 %v2293_v6, %v14029_v48  ;;  %v2156_v18 = vpop.f32.mrb[150].mxu1  ;;  %4431 = vmatprep.subr.bf16.mxu0 %v13748_v62  ;;  %8644 = vmatprep.subr.bf16.mxu1 %v9015_v50  ;;  %v14034_v37 = vld [vmem:[#allocation69_spill] sm:$0xff] }
 0x22e   : > { %v2158_v17 = vpop.f32.mrb[151].mxu1  ;;  %8619 = vmatmul.mubr.bf16.gmra.mrb[240].mxu0 %v13979_v2  ;;  %v14032_v2 = vld [vmem:[#allocation72_spill] sm:$0xff]  ;;  %8645 = vmatpush3.bf16.msra.mxu1 %v9015_v50  ;;  %v14038_v50 = vld [vmem:[#allocation93_spill] sm:$0xff] }
 0x22f   : > { %8622 = vmatprep.mubr.bf16.mxu0 %v13980_v49  ;;  %v9014_v49 = vld [vmem:[%s13362_s3 + $0x138] sm:$0xff]   ;;  %8646 = vmatprep.subr.bf16.mxu1 %v9016_v5 }
 0x230   : > { %2883 = vmatmul.mubr.bf16.gmra.mrb[0].mxu1 %v14030_v52  ;;  %4432 = vmatpush1.bf16.msra.mxu0 %v9014_v49  ;;  %v14040_v49 = vshrl.u32 %v10877_v60, 16 }
 0x231   : > { %v8500_v48 = vpop.f32.mrb[136].mxu0  ;;  %2890 = vmatprep.mubr.bf16.mxu1 %v14031_v14 }
 0x232   : > { %v10935_v40 = vadd.f32 %v8500_v48, %v14032_v2  ;;  %v2306_v6 = vpop.f32.mrb[137].mxu0  ;;  %8647 = vmatpush3.bf16.msra.mxu1 %v9016_v5 }
 0x233   : > { %v2161_v61 = vpop.f32.mrb[152].mxu1  ;;  %v10941_v18 = vadd.f32 %v2306_v6, %v14034_v37  ;;  %v8501_v17 = vpop.f32.mrb[138].mxu0 }
 0x234   : > { %14033 = vst [vmem:[#allocation5_spill] sm:$0xff] %v10935_v40  ;;  %v10947_v52 = vadd.f32 %v2161_v61, %v10681_v8  ;;  %v2163_v48 = vpop.f32.mrb[153].mxu1  ;;  %v2309_v14 = vpop.f32.mrb[139].mxu0  ;;  %v9018_v8 = vld [vmem:[%s13362_s3 + $0x178] sm:$0xff]   ;;  %v14039_v61 = vld [vmem:[#allocation63_spill] sm:$0xff] }
 0x235   : > { %14035 = vst [vmem:[#allocation81_spill] sm:$0xff] %v10941_v18  ;;  %v2164_v2 = vpop.f32.mrb[154].mxu1  ;;  %v10950_v45 = vadd.f32 %v2309_v14, %v14036_v31  ;;  %v14041_v31 = vld [vmem:[#allocation94_spill] sm:$0xff]  ;;  %v14042_v48 = vshll.u32 %v10854_v4, 16  ;;  %8648 = vmatprep.subr.bf16.mxu1 %v9018_v8 }
 0x236   : > { %v10953_v6 = vadd.f32 %v2164_v2, %v10690_v21  ;;  %v2166_v37 = vpop.f32.mrb[155].mxu1  ;;  %8623 = vmatmul.mubr.bf16.gmra.mrb[244].mxu0 %v13983_v27  ;;  %v909_v17 = vor.u32 %v14041_v31, %v14040_v49  ;;  %v14043_v2 = vld [vmem:[#allocation35_spill] sm:$0xff]  ;;  %8649 = vmatpush3.bf16.msra.mxu1 %v9018_v8  ;;  %v14048_v8 = vshrl.u32 %v10854_v4, 16 }
 0x237   : > { %14037 = vst [vmem:[#allocation82_spill] sm:$0xff] %v10950_v45  ;;  %8626 = vmatprep.mubr.bf16.mxu0 %v14038_v50  ;;  %v910_v21 = vrot.slane %v14042_v48, 1  ;;  %v14045_v50 = vld [vmem:[#allocation73_spill] sm:$0xff]  ;;  %5123 = vmatprep.subr.bf16.mxu1 %v13748_v62 }
 0x238   : > { %2891 = vmatmul.mubr.bf16.gmra.mrb[4].mxu1 %v14039_v61 }
 0x239   : > { %v8504_v14 = vpop.f32.mrb[140].mxu0  ;;  %2898 = vmatprep.mubr.bf16.mxu1 %v14043_v2  ;;  %v911_v48 = vsel %vm805_vm0, %v909_v17, %v910_v21  ;;  %v14046_v2 = vld [vmem:[#allocation77_spill] sm:$0xff] }
 0x23a   : > { %v10968_v27 = vadd.f32 %v8504_v14, %v10641_v26  ;;  %v2322_v5 = vpop.f32.mrb[141].mxu0 }
 0x23b   : > { %v2169_v37 = vpop.f32.mrb[156].mxu1  ;;  %v10971_v45 = vadd.f32 %v2322_v5, %v14045_v50  ;;  %v8505_v61 = vpop.f32.mrb[142].mxu0  ;;  %v912_v5 = vor.u32 %v910_v21, %v14048_v8  ;;  %v14053_v50 = vld [vmem:[#allocation37_spill] sm:$0xff] }
 0x23c   : > { %14044 = vst [vmem:[#allocation53_spill] sm:$0xff] %v10968_v27  ;;  %v10974_v18 = vadd.f32 %v2169_v37, %v10708_v29  ;;  %v2325_v49 = vpop.f32.mrb[143].mxu0  ;;  %v2171_v31 = vpop.f32.mrb[157].mxu1  ;;  %v14047_v27 = vld [vmem:[#allocation95_spill] sm:$0xff]  ;;  %v14050_v37 = vmov 0 }
 0x23d   : > { %v10979_v40 = vadd.f32 %v2325_v49, %v14046_v2  ;;  %v2172_v26 = vpop.f32.mrb[158].mxu1  ;;  %v14049_v29 = vld [vmem:[#allocation67_spill] sm:$0xff]  ;;  %v14051_v37 = vsel %vm10986_vm5, 4294967295, %v14050_v37  ;;  %v951_v2 = vsel %vm10986_vm5, %v912_v5, 0  ;;  %v14055_v5 = vld [vmem:[#allocation38_spill] sm:$0xff] }
 0x23e   : > { %v2174_v14 = vpop.f32.mrb[159].mxu1  ;;  %8627 = vmatmul.mubr.bf16.gmra.mrb[248].mxu0 %v14047_v27  ;;  %14052 = vst [vmem:[#allocation6_spill] sm:$0xff] %v14051_v37  ;;  %v10994_v61 = vld [vmem:[%s13362_s3 + $0x80] sm:$0xff]  }
 0x23f   : > { %8630 = vmatprep.mubr.bf16.mxu0 %v911_v48  ;;  %8714 = vmatprep.subr.bf16.mxu0 %v10994_v61 }
 0x240   : > { %2899 = vmatmul.mubr.bf16.gmra.mrb[8].mxu1 %v14049_v29 }
 0x241   : > { %v8508_v17 = vpop.f32.mrb[144].mxu0  ;;  %2906 = vmatprep.mubr.bf16.mxu1 %v14053_v50  ;;  %v14054_v50 = vld [vmem:[#allocation71_spill] sm:$0xff] }
 0x242   : > { %v10997_v27 = vadd.f32 %v8508_v17, %v10670_v39  ;;  %v2338_v49 = vpop.f32.mrb[145].mxu0 }
 0x243   : > { %v2177_v21 = vpop.f32.mrb[160].mxu1  ;;  %v11000_v31 = vadd.f32 %v2338_v49, %v10651_v57  ;;  %v8509_v48 = vpop.f32.mrb[146].mxu0 }
 0x244   : > { %v11006_v26 = vadd.f32 %v2177_v21, %v10726_v63  ;;  %v2179_v14 = vpop.f32.mrb[161].mxu1  ;;  %v2341_v8 = vpop.f32.mrb[147].mxu0 }
 0x245   : > { %v2180_v29 = vpop.f32.mrb[162].mxu1  ;;  %v11009_v39 = vadd.f32 %v2341_v8, %v10657_v35 }
 0x246   : > { %v11012_v17 = vadd.f32 %v2180_v29, %v10732_v30  ;;  %v2182_v57 = vpop.f32.mrb[163].mxu1  ;;  %8631 = vmatmul.mubr.bf16.gmra.mrb[252].mxu0 %v951_v2 }
 0x248   : > { %2907 = vmatmul.mubr.bf16.gmra.mrb[12].mxu1 %v14054_v50 }
 0x249   : > { %v8512_v49 = vpop.f32.mrb[148].mxu0  ;;  %2914 = vmatprep.mubr.bf16.mxu1 %v14055_v5  ;;  %v14056_v5 = vld [vmem:[#allocation76_spill] sm:$0xff] }
 0x24a   : > { %v11017_v48 = vadd.f32 %v8512_v49, %v10714_v46  ;;  %v2354_v63 = vpop.f32.mrb[149].mxu0  ;;  %v14057_v49 = vld [vmem:[#allocation40_spill] sm:$0xff] }
 0x24b   : > { %v2185_v21 = vpop.f32.mrb[164].mxu1  ;;  %v11020_v14 = vadd.f32 %v2354_v63, %v10687_v51  ;;  %v8513_v35 = vpop.f32.mrb[150].mxu0 }
 0x24c   : > { %v11023_v8 = vadd.f32 %v2185_v21, %v10746_v59  ;;  %v2357_v30 = vpop.f32.mrb[151].mxu0  ;;  %v2187_v29 = vpop.f32.mrb[165].mxu1 }
 0x24d   : > { %v11026_v2 = vadd.f32 %v2357_v30, %v10694_v20  ;;  %v2188_v57 = vpop.f32.mrb[166].mxu1 }
 0x24e   : > { %v2190_v50 = vpop.f32.mrb[167].mxu1 }
 0x250   : > { %2915 = vmatmul.mubr.bf16.gmra.mrb[16].mxu1 %v14056_v5  ;;  %v14058_v5 = vld [vmem:[#allocation80_spill] sm:$0xff] }
 0x251   : > { %v8516_v46 = vpop.f32.mrb[152].mxu0  ;;  %2922 = vmatprep.mubr.bf16.mxu1 %v14057_v49  ;;  %v14059_v49 = vld [vmem:[#allocation41_spill] sm:$0xff] }
 0x252   : > { %v11031_v37 = vadd.f32 %v8516_v46, %v10750_v41  ;;  %v2370_v51 = vpop.f32.mrb[153].mxu0 }
 0x253   : > { %v2193_v63 = vpop.f32.mrb[168].mxu1  ;;  %v11034_v59 = vadd.f32 %v2370_v51, %v10729_v22  ;;  %v8517_v21 = vpop.f32.mrb[154].mxu0 }
 0x254   : > { %v11037_v35 = vadd.f32 %v2193_v63, %v10760_v13  ;;  %v2195_v20 = vpop.f32.mrb[169].mxu1  ;;  %v2373_v30 = vpop.f32.mrb[155].mxu0 }
 0x255   : > { %v2196_v29 = vpop.f32.mrb[170].mxu1  ;;  %v11040_v57 = vadd.f32 %v2373_v30, %v10736_v34 }
 0x256   : > { %v11043_v50 = vadd.f32 %v2196_v29, %v10767_v10  ;;  %v2198_v41 = vpop.f32.mrb[171].mxu1 }
 0x258   : > { %2923 = vmatmul.mubr.bf16.gmra.mrb[20].mxu1 %v14058_v5  ;;  %v14060_v5 = vld [vmem:[#allocation85_spill] sm:$0xff] }
 0x259   : > { %v8520_v46 = vpop.f32.mrb[156].mxu0  ;;  %2930 = vmatprep.mubr.bf16.mxu1 %v14059_v49 }
 0x25a   : > { %v11048_v22 = vadd.f32 %v8520_v46, %v10787_v23  ;;  %v2386_v13 = vpop.f32.mrb[157].mxu0  ;;  %v14061_v46 = vld [vmem:[#allocation43_spill] sm:$0xff] }
 0x25b   : > { %v2201_v51 = vpop.f32.mrb[172].mxu1  ;;  %v11051_v63 = vadd.f32 %v2386_v13, %v10764_v56  ;;  %v8521_v21 = vpop.f32.mrb[158].mxu0 }
 0x25c   : > { %v11054_v34 = vadd.f32 %v2201_v51, %v10783_v28  ;;  %v2389_v10 = vpop.f32.mrb[159].mxu0  ;;  %v2203_v20 = vpop.f32.mrb[173].mxu1 }
 0x25d   : > { %v11057_v30 = vadd.f32 %v2389_v10, %v10770_v15  ;;  %v2204_v29 = vpop.f32.mrb[174].mxu1 }
 0x25e   : > { %v2206_v41 = vpop.f32.mrb[175].mxu1 }
 0x260   : > { %2931 = vmatmul.mubr.bf16.gmra.mrb[24].mxu1 %v14060_v5  ;;  %v14062_v5 = vld [vmem:[#allocation88_spill] sm:$0xff] }
 0x261   : > { %v8524_v23 = vpop.f32.mrb[160].mxu0  ;;  %2938 = vmatprep.mubr.bf16.mxu1 %v14061_v46  ;;  %v14063_v46 = vld [vmem:[#allocation44_spill] sm:$0xff] }
 0x262   : > { %v11062_v49 = vadd.f32 %v8524_v23, %v10821_v0  ;;  %v2402_v56 = vpop.f32.mrb[161].mxu0 }
 0x263   : > { %v2209_v13 = vpop.f32.mrb[176].mxu1  ;;  %v11065_v28 = vadd.f32 %v2402_v56, %v10801_v3  ;;  %v8525_v51 = vpop.f32.mrb[162].mxu0 }
 0x264   : > { %v11068_v21 = vadd.f32 %v2209_v13, %v10797_v38  ;;  %v2211_v15 = vpop.f32.mrb[177].mxu1  ;;  %v2405_v10 = vpop.f32.mrb[163].mxu0 }
 0x265   : > { %v2212_v20 = vpop.f32.mrb[178].mxu1  ;;  %v11071_v29 = vadd.f32 %v2405_v10, %v10807_v36 }
 0x266   : > { %v11074_v41 = vadd.f32 %v2212_v20, %v10804_v24  ;;  %v2214_v0 = vpop.f32.mrb[179].mxu1 }
 0x268   : > { %2939 = vmatmul.mubr.bf16.gmra.mrb[28].mxu1 %v14062_v5  ;;  %v14064_v5 = vld [vmem:[#allocation27_spill] sm:$0xff] }
 0x269   : > { %v8528_v23 = vpop.f32.mrb[164].mxu0  ;;  %2946 = vmatprep.mubr.bf16.mxu1 %v14063_v46 }
 0x26a   : > { %v11079_v3 = vadd.f32 %v8528_v23, %v10862_v25  ;;  %v2418_v38 = vpop.f32.mrb[165].mxu0  ;;  %v14065_v23 = vld [vmem:[#allocation50_spill] sm:$0xff] }
 0x26b   : > { %v2217_v56 = vpop.f32.mrb[180].mxu1  ;;  %v11082_v13 = vadd.f32 %v2418_v38, %v10835_v19  ;;  %v8529_v51 = vpop.f32.mrb[166].mxu0 }
 0x26c   : > { %v11085_v36 = vadd.f32 %v2217_v56, %v10817_v47  ;;  %v2421_v24 = vpop.f32.mrb[167].mxu0  ;;  %v2219_v15 = vpop.f32.mrb[181].mxu1 }
 0x26d   : > { %v11088_v10 = vadd.f32 %v2421_v24, %v10844_v58  ;;  %v2220_v20 = vpop.f32.mrb[182].mxu1 }
 0x26e   : > { %v2222_v0 = vpop.f32.mrb[183].mxu1 }
 0x270   : > { %2947 = vmatmul.mubr.bf16.gmra.mrb[32].mxu1 %v14064_v5  ;;  %v14069_v5 = vld [vmem:[#allocation3_spill] sm:$0xff] }
 0x271   : > { %v8532_v25 = vpop.f32.mrb[168].mxu0  ;;  %2954 = vmatprep.mubr.bf16.mxu1 %v14065_v23  ;;  %v14070_v23 = vld [vmem:[#allocation51_spill] sm:$0xff] }
 0x272   : > { %v11093_v46 = vadd.f32 %v8532_v25, %v10918_v32  ;;  %v2434_v19 = vpop.f32.mrb[169].mxu0 }
 0x273   : > { %v2225_v38 = vpop.f32.mrb[184].mxu1  ;;  %v11096_v47 = vadd.f32 %v2434_v19, %v10888_v42  ;;  %v8533_v56 = vpop.f32.mrb[170].mxu0 }
 0x274   : > { %14066 = vst [vmem:[#allocation86_spill] sm:$0xff] %v11093_v46  ;;  %v11099_v51 = vadd.f32 %v2225_v38, %v10831_v55  ;;  %v2227_v58 = vpop.f32.mrb[185].mxu1  ;;  %v2437_v24 = vpop.f32.mrb[171].mxu0  ;;  %v9020_v46 = vld [vmem:[%s13362_s3 + $0x90] sm:$0xff]  }
 0x275   : > { %14067 = vst [vmem:[#allocation61_spill] sm:$0xff] %v11096_v47  ;;  %v2228_v15 = vpop.f32.mrb[186].mxu1  ;;  %v11102_v20 = vadd.f32 %v2437_v24, %v10898_v53 }
 0x276   : > { %v11105_v0 = vadd.f32 %v2228_v15, %v10838_v1  ;;  %v2230_v32 = vpop.f32.mrb[187].mxu1 }
 0x277   : > { %14068 = vst [vmem:[#allocation8_spill] sm:$0xff] %v11102_v20 }
 0x278   : > { %2955 = vmatmul.mubr.bf16.gmra.mrb[36].mxu1 %v14069_v5  ;;  %v14074_v5 = vld [vmem:[#allocation36_spill] sm:$0xff] }
 0x279   : > { %v8536_v25 = vpop.f32.mrb[172].mxu0  ;;  %2962 = vmatprep.mubr.bf16.mxu1 %v14070_v23 }
 0x27a   : > { %v11110_v42 = vadd.f32 %v8536_v25, %v10974_v18  ;;  %v2450_v55 = vpop.f32.mrb[173].mxu0  ;;  %v14075_v18 = vld [vmem:[#allocation65_spill] sm:$0xff] }
 0x27b   : > { %v2233_v19 = vpop.f32.mrb[188].mxu1  ;;  %v11113_v38 = vadd.f32 %v2450_v55, %v10947_v52  ;;  %v8537_v56 = vpop.f32.mrb[174].mxu0 }
 0x27c   : > { %14071 = vst [vmem:[#allocation89_spill] sm:$0xff] %v11110_v42  ;;  %v2234_v53 = vadd.f32 %v2233_v19, %v10857_v12  ;;  %v2453_v58 = vpop.f32.mrb[175].mxu0  ;;  %v2235_v1 = vpop.f32.mrb[189].mxu1 }
 0x27d   : > { %14072 = vst [vmem:[#allocation90_spill] sm:$0xff] %v11113_v38  ;;  %v11117_v24 = vadd.f32 %v2453_v58, %v10953_v6  ;;  %v2236_v15 = vpop.f32.mrb[190].mxu1 }
 0x27e   : > { %v2238_v32 = vpop.f32.mrb[191].mxu1 }
 0x27f   : > { %14073 = vst [vmem:[#allocation66_spill] sm:$0xff] %v11117_v24  ;;  %v14079_v32 = vld [vmem:[#allocation4_spill] sm:$0xff] }
 0x280   : > { %2963 = vmatmul.mubr.bf16.gmra.mrb[40].mxu1 %v14074_v5 }
 0x281   : > { %v8540_v23 = vpop.f32.mrb[176].mxu0  ;;  %2970 = vmatprep.mubr.bf16.mxu1 %v14075_v18  ;;  %v14080_v18 = vld [vmem:[#allocation74_spill] sm:$0xff] }
 0x282   : > { %v11122_v25 = vadd.f32 %v8540_v23, %v11023_v8  ;;  %v2466_v52 = vpop.f32.mrb[177].mxu0 }
 0x283   : > { %v11125_v55 = vadd.f32 %v2466_v52, %v11006_v26  ;;  %v8541_v12 = vpop.f32.mrb[178].mxu0  ;;  %v2756_v19 = vpop.f32.mrb[192].mxu1 }
 0x284   : > { %14076 = vst [vmem:[#allocation10_spill] sm:$0xff] %v11122_v25  ;;  %v2469_v56 = vpop.f32.mrb[179].mxu0  ;;  %v2758_v1 = vpop.f32.mrb[193].mxu1 }
 0x285   : > { %14077 = vst [vmem:[#allocation92_spill] sm:$0xff] %v11125_v55  ;;  %v11128_v6 = vadd.f32 %v2469_v56, %v11012_v17  ;;  %v2759_v58 = vpop.f32.mrb[194].mxu1 }
 0x286   : > { %v2761_v15 = vpop.f32.mrb[195].mxu1 }
 0x287   : > { %14078 = vst [vmem:[#allocation70_spill] sm:$0xff] %v11128_v6 }
 0x288   : > { %2971 = vmatmul.mubr.bf16.gmra.mrb[44].mxu1 %v14079_v32  ;;  %v14084_v32 = vld [vmem:[#allocation97_spill] sm:$0xff] }
 0x289   : > { %v8544_v5 = vpop.f32.mrb[180].mxu0  ;;  %2978 = vmatprep.mubr.bf16.mxu1 %v14080_v18  ;;  %v14085_v18 = vld [vmem:[#allocation83_spill] sm:$0xff] }
 0x28a   : > { %v11133_v8 = vadd.f32 %v8544_v5, %v11054_v34  ;;  %v2482_v23 = vpop.f32.mrb[181].mxu0 }
 0x28b   : > { %v11136_v26 = vadd.f32 %v2482_v23, %v11037_v35  ;;  %v8545_v52 = vpop.f32.mrb[182].mxu0  ;;  %v2764_v12 = vpop.f32.mrb[196].mxu1 }
 0x28c   : > { %14081 = vst [vmem:[#allocation11_spill] sm:$0xff] %v11133_v8  ;;  %v2485_v1 = vpop.f32.mrb[183].mxu0  ;;  %v2766_v25 = vpop.f32.mrb[197].mxu1 }
 0x28d   : > { %14082 = vst [vmem:[#allocation75_spill] sm:$0xff] %v11136_v26  ;;  %v11139_v17 = vadd.f32 %v2485_v1, %v11043_v50  ;;  %v2767_v56 = vpop.f32.mrb[198].mxu1 }
 0x28e   : > { %v2769_v15 = vpop.f32.mrb[199].mxu1 }
 0x28f   : > { %14083 = vst [vmem:[#allocation14_spill] sm:$0xff] %v11139_v17  ;;  %v14089_v15 = vld [vmem:[#allocation99_spill] sm:$0xff]  ;;  %v14103_v17 = vld [vmem:[#allocation5_spill] sm:$0xff] }
 0x290   : > { %2979 = vmatmul.mubr.bf16.gmra.mrb[48].mxu1 %v14084_v32 }
 0x291   : > { %v8548_v6 = vpop.f32.mrb[184].mxu0  ;;  %2986 = vmatprep.mubr.bf16.mxu1 %v14085_v18 }
 0x292   : > { %v11144_v34 = vadd.f32 %v8548_v6, %v11085_v36  ;;  %v2498_v5 = vpop.f32.mrb[185].mxu0  ;;  %v14090_v36 = vld [vmem:[#allocation91_spill] sm:$0xff] }
 0x293   : > { %v11147_v35 = vadd.f32 %v2498_v5, %v11068_v21  ;;  %v8549_v23 = vpop.f32.mrb[186].mxu0  ;;  %v2772_v52 = vpop.f32.mrb[200].mxu1  ;;  %v14091_v6 = vshll.u32 %v14090_v36, 16 }
 0x294   : > { %14086 = vst [vmem:[#allocation79_spill] sm:$0xff] %v11144_v34  ;;  %v2501_v25 = vpop.f32.mrb[187].mxu0  ;;  %v2774_v8 = vpop.f32.mrb[201].mxu1  ;;  %v3435_v23 = vlaneseq }
 0x295   : > { %14087 = vst [vmem:[#allocation15_spill] sm:$0xff] %v11147_v35  ;;  %v11150_v50 = vadd.f32 %v2501_v25, %v11074_v41  ;;  %v11152_v1 = vpop.f32.mrb[202].mxu1  ;;  %v756_v18 = vor.u32 %v14091_v6, %v10895_v9 }
 0x296   : > { %v2777_v56 = vpop.f32.mrb[203].mxu1 }
 0x297   : > { %14088 = vst [vmem:[#allocation84_spill] sm:$0xff] %v11150_v50  ;;  %v14095_v50 = vld [vmem:[#allocation98_spill] sm:$0xff] }
 0x298   : > { %2987 = vmatmul.mubr.bf16.gmra.mrb[52].mxu1 %v14089_v15  ;;  %v757_v36 = vsel %vm478_vm1, %v14095_v50, %v756_v18 }
 0x299   : > { %v8552_v32 = vpop.f32.mrb[188].mxu0  ;;  %2994 = vmatprep.mubr.bf16.mxu1 %v10877_v60  ;;  %v11169_v60 = vshrl.u32 %v3435_v23, 7 }
 0x29a   : > { %v11159_v21 = vadd.f32 %v8552_v32, %v2234_v53  ;;  %v2514_v5 = vpop.f32.mrb[189].mxu0 }
 0x29b   : > { %v11162_v8 = vadd.f32 %v2514_v5, %v11099_v51  ;;  %v8553_v41 = vpop.f32.mrb[190].mxu0  ;;  %v2780_v25 = vpop.f32.mrb[204].mxu1  ;;  %v11175_v5 = vld [vmem:[%s13361_s2] ss:$0 sm:$0xff]  ;;  %vm3440_vm7 = vcmp.ge.s32.totalorder %v11169_v60, 1 }
 0x29c   : > { %14092 = vst [vmem:[#allocation17_spill] sm:$0xff] %v11159_v21  ;;  %v2517_v34 = vpop.f32.mrb[191].mxu0  ;;  %v2782_v56 = vpop.f32.mrb[205].mxu1  ;;  %vm11204_vm9 = vmpackc.low %vm9144_vm8, %vm3440_vm7 }
 0x29d   : > { %14093 = vst [vmem:[#allocation7_spill] sm:$0xff] %v11162_v8  ;;  %v11165_v15 = vadd.f32 %v2517_v34, %v11105_v0  ;;  %v2783_v9 = vpop.f32.mrb[206].mxu1  ;;  %v11178_v0 = vadd.s32 16, %v11169_v60 }
 0x29e   : > { %v2785_v6 = vpop.f32.mrb[207].mxu1 }
 0x29f   : > { %14094 = vst [vmem:[#allocation9_spill] sm:$0xff] %v11165_v15  ;;  %vm3446_vm6 = vcmp.le.s32.totalorder %v11178_v0, 16 }
 0x2a0   : > { %2995 = vmatmul.mubr.bf16.gmra.mrb[56].mxu1 %v757_v36  ;;  %vm11247_vm10 = vmpackc.low %vm9144_vm8, %vm3446_vm6 }
 0x2a1   : > { %v8572_v53 = vpop.f32.mrb[192].mxu0  ;;  %3002 = vmatprep.mubr.bf16.mxu1 %v10854_v4 }
 0x2a2   : > { %v3054_v51 = vadd.f32 %v8572_v53, %v2764_v12  ;;  %v3045_v32 = vpop.f32.mrb[193].mxu0 }
 0x2a3   : > { %v3046_v34 = vadd.f32 %v3045_v32, %v2756_v19  ;;  %v8573_v50 = vpop.f32.mrb[194].mxu0  ;;  %v11180_v18 = vpop.f32.mrb[208].mxu1 }
 0x2a4   : > { %v3302_v41 = vadd.f32 %v3054_v51, %v10881_v11  ;;  %v3048_v23 = vpop.f32.mrb[195].mxu0  ;;  %v2790_v56 = vpop.f32.mrb[209].mxu1 }
 0x2a5   : > { %v3300_v4 = vadd.f32 %v3046_v34, %v10884_v43  ;;  %v3049_v12 = vadd.f32 %v3048_v23, %v2759_v58  ;;  %v11184_v36 = vpop.f32.mrb[210].mxu1 }
 0x2a6   : > { %v3373_v9 = vadd.f32 %v11175_v5, %v3302_v41  ;;  %v2793_v6 = vpop.f32.mrb[211].mxu1 }
 0x2a7   : > { %v3371_v53 = vadd.f32 %v11175_v5, %v3300_v4  ;;  %v3301_v19 = vadd.f32 %v3049_v12, %v10891_v16  ;;  %v13546_v12 = vmov 0.0  }
 0x2a8   : > { %v3454_v32 = vmax.f32 %v3373_v9, 0.0  ;;  %3003 = vmatmul.mubr.bf16.gmra.mrb[60].mxu1 %v10904_v44 }
 0x2a9   : > { %v3452_v11 = vmax.f32 %v3371_v53, 0.0  ;;  %v3372_v43 = vadd.f32 %v11175_v5, %v3301_v19  ;;  %v8576_v58 = vpop.f32.mrb[196].mxu0 }
 0x2aa   : > { %v3526_v51 = vsel %vm3446_vm6, %v3454_v32, 0.0  ;;  %v3070_v34 = vadd.f32 %v8576_v58, %v2780_v25  ;;  %v3061_v50 = vpop.f32.mrb[197].mxu0 }
 0x2ab   : > { %v3524_v41 = vsel %vm3440_vm7, %v3452_v11, 0.0  ;;  %v3453_v23 = vmax.f32 %v3372_v43, 0.0  ;;  %v3062_v56 = vadd.f32 %v3061_v50, %v2772_v52  ;;  %v8577_v16 = vpop.f32.mrb[198].mxu0  ;;  %v2796_v4 = vpop.f32.mrb[212].mxu1  ;;  %v11198_v9 = vpack.c.bf16 %v13546_v12, %v3526_v51 }
 0x2ac   : > { %v3306_v44 = vadd.f32 %v3070_v34, %v10909_v33  ;;  %v3064_v6 = vpop.f32.mrb[199].mxu0  ;;  %v2798_v53 = vpop.f32.mrb[213].mxu1 }
 0x2ad   : > { %v3588_v19 = vpack.c.bf16 %v3453_v23, %v3524_v41  ;;  %v3304_v52 = vadd.f32 %v3062_v56, %v10912_v7  ;;  %v3065_v43 = vadd.f32 %v3064_v6, %v11152_v1  ;;  %v11210_v58 = vpack.c.bf16 %v3453_v23, %v3452_v11  ;;  %v2799_v51 = vpop.f32.mrb[214].mxu1 }
 0x2ae   : > { %v11213_v33 = vadd.f32 %v11175_v5, %v3306_v44  ;;  %v2801_v34 = vpop.f32.mrb[215].mxu1  ;;  %v3716_v50 = vshrl.u32 %v11198_v9, 16  ;;  %v11222_v7 = vrot.slane %v13748_v62, 7  ;;  %v3719_v41 = vshll.u32 %v11198_v9, 16 }
 0x2af   : > { %14098 = vst [vmem:[#allocation45_spill] sm:$0xff] %v11210_v58  ;;  %v3708_v16 = vshrl.u32 %v3588_v19, 16  ;;  %v3711_v12 = vshll.u32 %v3588_v19, 16  ;;  %v3375_v21 = vadd.f32 %v11175_v5, %v3304_v52  ;;  %v3305_v53 = vadd.f32 %v3065_v43, %v10921_v54  ;;  %7880 = vmatprep.mubr.msk.bf16.mxu0 %vm11204_vm9, %v11210_v58 }
 0x2b0   : > { %14099 = vst [vmem:[#allocation20_spill] sm:$0xff] %v11222_v7  ;;  %v13549_v1 = vmax.f32 %v11213_v33, 0.0  ;;  %v11225_v11 = vrot.slane %v3716_v50, 7  ;;  %v14101_v34 = vmov 0.0  }
 0x2b1   : > { %v3710_v23 = vrot.slane %v3708_v16, 7  ;;  %v3456_v56 = vmax.f32 %v3375_v21, 0.0  ;;  %v3376_v44 = vadd.f32 %v11175_v5, %v3305_v53  ;;  %v8580_v6 = vpop.f32.mrb[200].mxu0  ;;  %v11229_v19 = vrot.slane %v3711_v12, 1 }
 0x2b2   : > { %v3530_v54 = vsel %vm3446_vm6, %v13549_v1, 0.0  ;;  %v3086_v52 = vadd.f32 %v8580_v6, %v2796_v4  ;;  %v3077_v43 = vpop.f32.mrb[201].mxu0  ;;  %v3721_v51 = vor.u32 %v3719_v41, %v11225_v11  ;;  %v11237_v58 = vpack.c.bf16 %v14101_v34, %v3454_v32 }
 0x2b3   : > { %14100 = vst [vmem:[#allocation19_spill] sm:$0xff] %v11229_v19  ;;  %v3713_v9 = vor.u32 %v3711_v12, %v3710_v23  ;;  %v3528_v21 = vsel %vm3440_vm7, %v3456_v56, 0.0  ;;  %v3457_v53 = vmax.f32 %v3376_v44, 0.0  ;;  %v3078_v15 = vadd.f32 %v3077_v43, %v11180_v18  ;;  %v8581_v8 = vpop.f32.mrb[202].mxu0  ;;  %v2804_v35 = vpop.f32.mrb[216].mxu1  ;;  %v14107_v18 = vld [vmem:[#allocation81_spill] sm:$0xff] }
 0x2b4   : > { %14102 = vst [vmem:[#allocation47_spill] sm:$0xff] %v11237_v58  ;;  %v3310_v26 = vadd.f32 %v3086_v52, %v14103_v17  ;;  %v3080_v55 = vpop.f32.mrb[203].mxu0  ;;  %v4023_v4 = vor.u32 %v11229_v19, %v3708_v16  ;;  %v4024_v6 = vrot.slane %v3719_v41, 1  ;;  %v2806_v1 = vpop.f32.mrb[217].mxu1  ;;  %v11252_v12 = vsel %vm478_vm1, %v3710_v23, %v3721_v51  ;;  %v9019_v41 = vld [vmem:[%s13362_s3 + $0x88] sm:$0xff]  }
 0x2b5   : > { %v11256_v8 = vsel %vm478_vm1, %v11222_v7, %v3713_v9  ;;  %v3590_v17 = vpack.c.bf16 %v3457_v53, %v3528_v21  ;;  %v3308_v44 = vadd.f32 %v3078_v15, %v14107_v18  ;;  %v3081_v16 = vadd.f32 %v3080_v55, %v11184_v36  ;;  %v2807_v1 = vpop.f32.mrb[218].mxu1  ;;  %v14109_v36 = vld [vmem:[#allocation82_spill] sm:$0xff] }
 0x2b6   : > { %14106 = vst [vmem:[#allocation21_spill] sm:$0xff] %v11256_v8  ;;  %v11264_v52 = vadd.f32 %v11175_v5, %v3310_v26  ;;  %4434 = vmatmul.mubr.bf16.vlgmr.msra.gmra.mrb[0].mxu0 %v11256_v8  ;;  %v11268_v23 = vsel %vm805_vm0, %v4023_v4, %v4024_v6  ;;  %v2809_v43 = vpop.f32.mrb[219].mxu1  ;;  %v3591_v51 = vpack.c.bf16 %v14101_v34, %v3530_v54 }
 0x2b7   : > { %14108 = vst [vmem:[#allocation13_spill] sm:$0xff] %v11268_v23  ;;  %v11271_v9 = vpack.c.bf16 %v3457_v53, %v3456_v56  ;;  %v3727_v15 = vshll.u32 %v3590_v17, 16  ;;  %v11274_v55 = vadd.f32 %v11175_v5, %v3308_v44  ;;  %v3309_v21 = vadd.f32 %v3081_v16, %v14109_v36  ;;  %8650 = vmatprep.mubr.bf16.mxu1 %v11268_v23 }
 0x2b8   : > { %7883 = vmatprep.mubr.msk.bf16.mxu0 %vm11247_vm10, %v11237_v58  ;;  %v3724_v26 = vshrl.u32 %v3590_v17, 16  ;;  %v13556_v4 = vmax.f32 %v11264_v52, 0.0  ;;  %v4026_v18 = vor.u32 %v4024_v6, %v3716_v50  ;;  %8715 = vmatpush3.bf16.msra.mxu0 %v10994_v61  ;;  %v3732_v56 = vshrl.u32 %v3591_v51, 16 }
 0x2b9   : > { %v3735_v54 = vshll.u32 %v3591_v51, 16  ;;  %v4027_v53 = vrot.slane %v3727_v15, 1  ;;  %v3460_v44 = vmax.f32 %v11274_v55, 0.0  ;;  %v3380_v43 = vadd.f32 %v11175_v5, %v3309_v21  ;;  %v8584_v16 = vpop.f32.mrb[204].mxu0  ;;  %8716 = vmatprep.subr.bf16.mxu0 %v9019_v41 }
 0x2ba   : > { %v3726_v36 = vrot.slane %v3724_v26, 7  ;;  %v3534_v17 = vsel %vm3446_vm6, %v13556_v4, 0.0  ;;  %v3093_v23 = vpop.f32.mrb[205].mxu0  ;;  %v11289_v19 = vrot.slane %v3732_v56, 7 }
 0x2bb   : > { %v4030_v50 = vrot.slane %v3735_v54, 1  ;;  %v3532_v61 = vsel %vm3440_vm7, %v3460_v44, 0.0  ;;  %v3461_v6 = vmax.f32 %v3380_v43, 0.0  ;;  %v11294_v51 = vsel %vm805_vm0, %v4026_v18, %v4027_v53  ;;  %v2812_v55 = vpop.f32.mrb[220].mxu1  ;;  %v8585_v58 = vpop.f32.mrb[206].mxu0 }
 0x2bc   : > { %v3094_v21 = vadd.f32 %v3093_v23, %v2804_v35  ;;  %v3102_v8 = vadd.f32 %v8584_v16, %v2812_v55  ;;  %v3096_v7 = vpop.f32.mrb[207].mxu0  ;;  %8651 = vmatmul.mubr.bf16.vlgmr.msra.gmra.mrb[64].mxu1 %v11294_v51  ;;  %v3729_v42 = vor.u32 %v3727_v15, %v3726_v36  ;;  %v3737_v4 = vor.u32 %v3735_v54, %v11289_v19  ;;  %v2814_v38 = vpop.f32.mrb[221].mxu1  ;;  %v14110_v58 = vld [vmem:[#allocation53_spill] sm:$0xff] }
 0x2bd   : > { %v4029_v24 = vor.u32 %v4027_v53, %v3724_v26  ;;  %v3592_v43 = vpack.c.bf16 %v3461_v6, %v3532_v61  ;;  %v3097_v20 = vadd.f32 %v3096_v7, %v2807_v1  ;;  %v4032_v47 = vor.u32 %v4030_v50, %v3732_v56  ;;  %v2815_v35 = vpop.f32.mrb[222].mxu1  ;;  %8717 = vmatpush3.bf16.msra.mxu0 %v9019_v41 }
 0x2be   : > { %v3312_v18 = vadd.f32 %v3094_v21, %v10971_v45  ;;  %v3314_v23 = vadd.f32 %v3102_v8, %v14110_v58  ;;  %4442 = vmatmul.mubr.bf16.gmra.mrb[4].mxu0 %v11252_v12  ;;  %v2817_v26 = vpop.f32.mrb[223].mxu1  ;;  %v11309_v38 = vsel %vm478_vm1, %v11225_v11, %v3729_v42  ;;  %v11312_v54 = vpack.c.bf16 %v14101_v34, %v3534_v17  ;;  %v9021_v45 = vld [vmem:[%s13362_s3 + $0x98] sm:$0xff]  }
 0x2bf   : > { %v11305_v15 = vsel %vm805_vm0, %v4029_v24, %v4030_v50  ;;  %v3743_v7 = vshll.u32 %v3592_v43, 16  ;;  %v3313_v1 = vadd.f32 %v3097_v20, %v10979_v40  ;;  %7886 = vmatprep.mubr.msk.bf16.mxu0 %vm11204_vm9, %v11271_v9  ;;  %v3740_v42 = vshrl.u32 %v3592_v43, 16  ;;  %8718 = vmatprep.subr.bf16.mxu0 %v9020_v46 }
 0x2c0   : > { %14111 = vst [vmem:[#allocation16_spill] sm:$0xff] %v11305_v15  ;;  %v3383_v8 = vadd.f32 %v11175_v5, %v3312_v18  ;;  %8654 = vmatprep.mubr.bf16.mxu1 %v11305_v15  ;;  %v11324_v24 = vadd.f32 %v11175_v5, %v3314_v23  ;;  %v3748_v11 = vshrl.u32 %v11312_v54, 16  ;;  %v3751_v41 = vshll.u32 %v11312_v54, 16 }
 0x2c1   : > { %v11329_v56 = vsel %vm478_vm1, %v3726_v36, %v3737_v4  ;;  %v4033_v53 = vrot.slane %v3743_v7, 1  ;;  %v3384_v20 = vadd.f32 %v11175_v5, %v3313_v1  ;;  %v11332_v16 = vpop.f32.mrb[208].mxu0  ;;  %v3742_v17 = vrot.slane %v3740_v42, 7  ;;  %8719 = vmatpush3.bf16.msra.mxu0 %v9020_v46  ;;  %v9022_v1 = vld [vmem:[%s13362_s3] sm:$0xff]  }
 0x2c2   : > { %v3464_v40 = vmax.f32 %v3383_v8, 0.0  ;;  %v13557_v50 = vmax.f32 %v11324_v24, 0.0  ;;  %v3109_v61 = vpop.f32.mrb[209].mxu0  ;;  %v11335_v55 = vrot.slane %v3748_v11, 7  ;;  %v4036_v21 = vrot.slane %v3751_v41, 1  ;;  %8720 = vmatprep.subr.bf16.mxu0 %v9021_v45  ;;  %5124 = vmatpush1.bf16.msra.mxu1 %v9022_v1 }
 0x2c3   : > { %v11337_v43 = vpack.c.bf16 %v3461_v6, %v3460_v44  ;;  %v3465_v36 = vmax.f32 %v3384_v20, 0.0  ;;  %v2820_v18 = vpop.f32.mrb[224].mxu1  ;;  %v8589_v35 = vpop.f32.mrb[210].mxu0  ;;  %v11342_v58 = vsel %vm805_vm0, %v4032_v47, %v4033_v53  ;;  %v3745_v23 = vor.u32 %v3743_v7, %v3742_v17  ;;  %5125 = vmatprep.subr.bf16.mxu1 %v13748_v62 }
 0x2c4   : > { %v3536_v4 = vsel %vm3440_vm7, %v3464_v40, 0.0  ;;  %14112 = vst [vmem:[#allocation52_spill] sm:$0xff] %v11342_v58  ;;  %v3538_v46 = vsel %vm3446_vm6, %v13557_v50, 0.0  ;;  %v3110_v26 = vadd.f32 %v3109_v61, %v2820_v18  ;;  %v2822_v54 = vpop.f32.mrb[225].mxu1  ;;  %v3112_v44 = vpop.f32.mrb[211].mxu0  ;;  %8655 = vmatmul.mubr.bf16.gmra.mrb[68].mxu1 %v11342_v58  ;;  %v3753_v6 = vor.u32 %v3751_v41, %v11335_v55 }
 0x2c5   : > { %v4035_v8 = vor.u32 %v4033_v53, %v3740_v42  ;;  %v3594_v47 = vpack.c.bf16 %v3465_v36, %v3536_v4  ;;  %v2823_v20 = vpop.f32.mrb[226].mxu1  ;;  %v14113_v7 = vmax.f32 %v11213_v33, 0.0  ;;  %v11359_v61 = vpack.c.bf16 %v14101_v34, %v3538_v46  ;;  %8721 = vmatpush3.bf16.msra.mxu0 %v9021_v45  ;;  %v9023_v42 = vld [vmem:[%s13362_s3 + $0xa0] sm:$0xff]  }
 0x2c6   : > { %v11363_v18 = vsel %vm478_vm1, %v11289_v19, %v3745_v23  ;;  %v3316_v41 = vadd.f32 %v3110_v26, %v11000_v31  ;;  %v3113_v53 = vadd.f32 %v3112_v44, %v2823_v20  ;;  %4450 = vmatmul.mubr.bf16.gmra.mrb[8].mxu0 %v11309_v38  ;;  %v2825_v4 = vpop.f32.mrb[227].mxu1  ;;  %v11374_v46 = vsel %vm478_vm1, %v3742_v17, %v3753_v6 }
 0x2c7   : > { %v11356_v35 = vpack.c.bf16 %v14101_v34, %v14113_v7  ;;  %v11371_v33 = vsel %vm805_vm0, %v4035_v8, %v4036_v21  ;;  %14115 = vst [vmem:[#allocation12_spill] sm:$0xff] %v11374_v46  ;;  %v3759_v54 = vshll.u32 %v3594_v47, 16  ;;  %v3756_v19 = vshrl.u32 %v3594_v47, 16  ;;  %8722 = vmatprep.subr.bf16.mxu0 %v9023_v42  ;;  %v9024_v47 = vld [vmem:[%s13362_s3 + $0x8] sm:$0xff]  }
 0x2c8   : > { %14114 = vst [vmem:[#allocation22_spill] sm:$0xff] %v11371_v33  ;;  %8658 = vmatprep.mubr.bf16.mxu1 %v11371_v33  ;;  %v3764_v31 = vshrl.u32 %v11359_v61, 16  ;;  %v3767_v45 = vshll.u32 %v11359_v61, 16  ;;  %v3387_v23 = vadd.f32 %v11175_v5, %v3316_v41  ;;  %v3317_v26 = vadd.f32 %v3113_v53, %v11009_v39  ;;  %5126 = vmatpush1.bf16.msra.mxu1 %v9024_v47 }
 0x2c9   : > { %7889 = vmatprep.mubr.msk.bf16.mxu0 %vm11247_vm10, %v11356_v35  ;;  %v11384_v44 = vpack.c.bf16 %v3465_v36, %v3464_v40  ;;  %v4039_v17 = vrot.slane %v3759_v54, 1  ;;  %v4038_v6 = vor.u32 %v4036_v21, %v3748_v11  ;;  %v3758_v8 = vrot.slane %v3756_v19, 7  ;;  %v11388_v7 = vpop.f32.mrb[212].mxu0  ;;  %8723 = vmatpush3.bf16.msra.mxu0 %v9023_v42 }
 0x2ca   : > { %v11386_v20 = vrot.slane %v3764_v31, 7  ;;  %v3468_v61 = vmax.f32 %v3387_v23, 0.0  ;;  %v3388_v39 = vadd.f32 %v11175_v5, %v3317_v26  ;;  %v4042_v40 = vrot.slane %v3767_v45, 1  ;;  %v3125_v36 = vpop.f32.mrb[213].mxu0  ;;  %5127 = vmatprep.subr.bf16.mxu1 %v13748_v62 }
 0x2cb   : > { %14116 = vst [vmem:[#allocation55_spill] sm:$0xff] %v11384_v44  ;;  %v2828_v1 = vpop.f32.mrb[228].mxu1  ;;  %v11396_v11 = vsel %vm805_vm0, %v4038_v6, %v4039_v17  ;;  %v3761_v21 = vor.u32 %v3759_v54, %v3758_v8  ;;  %v4041_v53 = vor.u32 %v4039_v17, %v3756_v19  ;;  %v8593_v4 = vpop.f32.mrb[214].mxu0 }
 0x2cc   : > { %14117 = vst [vmem:[#allocation23_spill] sm:$0xff] %v11396_v11  ;;  %v3769_v41 = vor.u32 %v3767_v45, %v11386_v20  ;;  %v3540_v50 = vsel %vm3440_vm7, %v3468_v61, 0.0  ;;  %v3469_v33 = vmax.f32 %v3388_v39, 0.0  ;;  %v3118_v23 = vadd.f32 %v11332_v16, %v2828_v1  ;;  %8659 = vmatmul.mubr.bf16.gmra.mrb[72].mxu1 %v11396_v11  ;;  %v2830_v26 = vpop.f32.mrb[229].mxu1  ;;  %v3128_v58 = vpop.f32.mrb[215].mxu0 }
 0x2cd   : > { %v11404_v42 = vsel %vm805_vm0, %v4041_v53, %v4042_v40  ;;  %v2831_v6 = vpop.f32.mrb[230].mxu1  ;;  %v11408_v54 = vsel %vm478_vm1, %v11335_v55, %v3761_v21  ;;  %v4044_v21 = vor.u32 %v4042_v40, %v3764_v31 }
 0x2ce   : > { %14118 = vst [vmem:[#allocation25_spill] sm:$0xff] %v11404_v42  ;;  %14119 = vst [vmem:[#allocation26_spill] sm:$0xff] %v11408_v54  ;;  %v11411_v19 = vsel %vm478_vm1, %v3758_v8, %v3769_v41  ;;  %v3596_v45 = vpack.c.bf16 %v3469_v33, %v3540_v50  ;;  %v3318_v17 = vadd.f32 %v3118_v23, %v10997_v27  ;;  %4458 = vmatmul.mubr.bf16.gmra.mrb[12].mxu0 %v11329_v56  ;;  %v2833_v16 = vpop.f32.mrb[231].mxu1 }
 0x2cf   : > { %14120 = vst [vmem:[#allocation56_spill] sm:$0xff] %v11411_v19  ;;  %8662 = vmatprep.mubr.bf16.mxu1 %v11404_v42  ;;  %v11416_v39 = vpack.c.bf16 %v3469_v33, %v3468_v61  ;;  %7892 = vmatprep.mubr.msk.bf16.mxu0 %vm11204_vm9, %v11337_v43  ;;  %v9025_v61 = vld [vmem:[%s13362_s3 + $0x10] sm:$0xff]  }
 0x2d0   : > { %v3775_v55 = vshll.u32 %v3596_v45, 16  ;;  %v11423_v8 = vadd.f32 %v11175_v5, %v3318_v17  ;;  %v3772_v50 = vshrl.u32 %v3596_v45, 16  ;;  %5128 = vmatpush1.bf16.msra.mxu1 %v9025_v61  ;;  %v9026_v17 = vld [vmem:[%s13362_s3 + $0x18] sm:$0xff]  }
 0x2d1   : > { %14121 = vst [vmem:[#allocation24_spill] sm:$0xff] %v11416_v39  ;;  %v11425_v47 = vpop.f32.mrb[216].mxu0  ;;  %5129 = vmatprep.subr.bf16.mxu1 %v13748_v62 }
 0x2d2   : > { %v4045_v27 = vrot.slane %v3775_v55, 1  ;;  %v13562_v1 = vmax.f32 %v11423_v8, 0.0  ;;  %v3774_v41 = vrot.slane %v3772_v50, 7  ;;  %v11428_v33 = vpop.f32.mrb[217].mxu0 }
 0x2d3   : > { %v2836_v53 = vpop.f32.mrb[232].mxu1  ;;  %v8597_v4 = vpop.f32.mrb[218].mxu0 }
 0x2d4   : > { %v3542_v23 = vsel %vm3446_vm6, %v13562_v1, 0.0  ;;  %v3126_v26 = vadd.f32 %v3125_v36, %v2836_v53  ;;  %v2838_v6 = vpop.f32.mrb[233].mxu1  ;;  %v11438_v45 = vsel %vm805_vm0, %v4044_v21, %v4045_v27  ;;  %v3777_v31 = vor.u32 %v3775_v55, %v3774_v41  ;;  %v11440_v40 = vpop.f32.mrb[219].mxu0  ;;  %5130 = vmatpush1.bf16.msra.mxu1 %v9026_v17 }
 0x2d5   : > { %14122 = vst [vmem:[#allocation18_spill] sm:$0xff] %v11438_v45  ;;  %v2839_v16 = vpop.f32.mrb[234].mxu1  ;;  %8663 = vmatmul.mubr.bf16.gmra.mrb[76].mxu1 %v11438_v45  ;;  %v14123_v4 = vmax.f32 %v11264_v52, 0.0  ;;  %v3597_v36 = vpack.c.bf16 %v14101_v34, %v3542_v23  ;;  %5131 = vmatprep.subr.bf16.mxu1 %v13748_v62 }
 0x2d6   : > { %v3320_v55 = vadd.f32 %v3126_v26, %v11020_v14  ;;  %v3129_v21 = vadd.f32 %v3128_v58, %v2839_v16  ;;  %4466 = vmatmul.mubr.bf16.gmra.mrb[16].mxu0 %v11363_v18  ;;  %v2841_v61 = vpop.f32.mrb[235].mxu1  ;;  %v11457_v53 = vsel %vm478_vm1, %v11386_v20, %v3777_v31  ;;  %v4047_v58 = vor.u32 %v4045_v27, %v3772_v50 }
 0x2d7   : > { %v11449_v1 = vpack.c.bf16 %v14101_v34, %v14123_v4  ;;  %14124 = vst [vmem:[#allocation57_spill] sm:$0xff] %v11457_v53  ;;  %v3780_v52 = vshrl.u32 %v3597_v36, 16  ;;  %v3783_v6 = vshll.u32 %v3597_v36, 16 }
 0x2d8   : > { %v3391_v23 = vadd.f32 %v11175_v5, %v3320_v55  ;;  %v3321_v4 = vadd.f32 %v3129_v21, %v11026_v2 }
 0x2d9   : > { %7895 = vmatprep.mubr.msk.bf16.mxu0 %vm11247_vm10, %v11449_v1  ;;  %v3782_v14 = vrot.slane %v3780_v52, 7  ;;  %v4048_v26 = vrot.slane %v3783_v6, 1  ;;  %v11464_v16 = vpop.f32.mrb[220].mxu0 }
 0x2da   : > { %v3472_v20 = vmax.f32 %v3391_v23, 0.0  ;;  %v3392_v31 = vadd.f32 %v11175_v5, %v3321_v4  ;;  %v11468_v61 = vpop.f32.mrb[221].mxu0 }
 0x2db   : > { %v2844_v45 = vpop.f32.mrb[236].mxu1  ;;  %v3785_v42 = vor.u32 %v3783_v6, %v3782_v14  ;;  %v11471_v36 = vsel %vm805_vm0, %v4047_v58, %v4048_v26  ;;  %v8601_v55 = vpop.f32.mrb[222].mxu0 }
 0x2dc   : > { %14125 = vst [vmem:[#allocation28_spill] sm:$0xff] %v11471_v36  ;;  %v3544_v2 = vsel %vm3440_vm7, %v3472_v20, 0.0  ;;  %v3473_v50 = vmax.f32 %v3392_v31, 0.0  ;;  %v3134_v27 = vadd.f32 %v11388_v7, %v2844_v45  ;;  %8666 = vmatprep.mubr.bf16.mxu1 %v11471_v36  ;;  %v2846_v17 = vpop.f32.mrb[237].mxu1  ;;  %v11477_v21 = vpop.f32.mrb[223].mxu0 }
 0x2dd   : > { %v2847_v23 = vpop.f32.mrb[238].mxu1  ;;  %v11480_v4 = vsel %vm478_vm1, %v3774_v41, %v3785_v42 }
 0x2de   : > { %14126 = vst [vmem:[#allocation33_spill] sm:$0xff] %v11480_v4  ;;  %v3598_v6 = vpack.c.bf16 %v3473_v50, %v3544_v2  ;;  %v3322_v58 = vadd.f32 %v3134_v27, %v11017_v48  ;;  %4474 = vmatmul.mubr.bf16.gmra.mrb[20].mxu0 %v11374_v46  ;;  %v2849_v55 = vpop.f32.mrb[239].mxu1  ;;  %v11484_v11 = vpack.c.bf16 %v3473_v50, %v3472_v20  ;;  %v9027_v20 = vld [vmem:[%s13362_s3 + $0x20] sm:$0xff]   ;;  %v9028_v50 = vld [vmem:[%s13362_s3 + $0xa8] sm:$0xff]  }
 0x2df   : > { %7898 = vmatprep.mubr.msk.bf16.mxu0 %vm11204_vm9, %v11384_v44  ;;  %v4050_v48 = vor.u32 %v4048_v26, %v3780_v52  ;;  %5132 = vmatpush1.bf16.msra.mxu1 %v9027_v20 }
 0x2e0   : > { %14127 = vst [vmem:[#allocation39_spill] sm:$0xff] %v11484_v11  ;;  %v3791_v7 = vshll.u32 %v3598_v6, 16  ;;  %v11490_v45 = vadd.f32 %v11175_v5, %v3322_v58  ;;  %v3788_v31 = vshrl.u32 %v3598_v6, 16  ;;  %8724 = vmatprep.subr.bf16.mxu0 %v9028_v50  ;;  %5133 = vmatprep.subr.bf16.mxu1 %v13748_v62 }
 0x2e1   : > { %v11492_v17 = vpop.f32.mrb[224].mxu0  ;;  %8725 = vmatpush3.bf16.msra.mxu0 %v9028_v50 }
 0x2e2   : > { %v4051_v42 = vrot.slane %v3791_v7, 1  ;;  %v13575_v41 = vmax.f32 %v11490_v45, 0.0  ;;  %v3790_v2 = vrot.slane %v3788_v31, 7  ;;  %v11495_v27 = vpop.f32.mrb[225].mxu0 }
 0x2e3   : > { %v2852_v23 = vpop.f32.mrb[240].mxu1  ;;  %v8605_v58 = vpop.f32.mrb[226].mxu0 }
 0x2e4   : > { %v3546_v6 = vsel %vm3446_vm6, %v13575_v41, 0.0  ;;  %v3142_v52 = vadd.f32 %v11428_v33, %v2852_v23  ;;  %v2854_v26 = vpop.f32.mrb[241].mxu1  ;;  %v11509_v55 = vsel %vm805_vm0, %v4050_v48, %v4051_v42  ;;  %v3793_v36 = vor.u32 %v3791_v7, %v3790_v2  ;;  %v11511_v44 = vpop.f32.mrb[227].mxu0  ;;  %v9029_v58 = vld [vmem:[%s13362_s3 + $0x28] sm:$0xff]  }
 0x2e5   : > { %14128 = vst [vmem:[#allocation78_spill] sm:$0xff] %v11509_v55  ;;  %v2855_v46 = vpop.f32.mrb[242].mxu1  ;;  %8667 = vmatmul.mubr.bf16.gmra.mrb[80].mxu1 %v11509_v55  ;;  %v14129_v41 = vmax.f32 %v11324_v24, 0.0  ;;  %v3599_v48 = vpack.c.bf16 %v14101_v34, %v3546_v6 }
 0x2e6   : > { %v3324_v7 = vadd.f32 %v3142_v52, %v11034_v59  ;;  %v3145_v20 = vadd.f32 %v11440_v40, %v2855_v46  ;;  %4482 = vmatmul.mubr.bf16.gmra.mrb[24].mxu0 %v11408_v54  ;;  %v2857_v23 = vpop.f32.mrb[243].mxu1  ;;  %v11527_v26 = vsel %vm478_vm1, %v3782_v14, %v3793_v36  ;;  %5134 = vmatpush1.bf16.msra.mxu1 %v9029_v58 }
 0x2e7   : > { %v11520_v33 = vpack.c.bf16 %v14101_v34, %v14129_v41  ;;  %14131 = vst [vmem:[#allocation29_spill] sm:$0xff] %v11527_v26  ;;  %v3796_v24 = vshrl.u32 %v3599_v48, 16  ;;  %v3799_v41 = vshll.u32 %v3599_v48, 16  ;;  %v4053_v40 = vor.u32 %v4051_v42, %v3788_v31  ;;  %5135 = vmatprep.subr.bf16.mxu1 %v13748_v62 }
 0x2e8   : > { %v3395_v50 = vadd.f32 %v11175_v5, %v3324_v7  ;;  %v3325_v59 = vadd.f32 %v3145_v20, %v11040_v57 }
 0x2e9   : > { %14130 = vst [vmem:[#allocation58_spill] sm:$0xff] %v11520_v33  ;;  %7901 = vmatprep.mubr.msk.bf16.mxu0 %vm11247_vm10, %v11520_v33  ;;  %v3798_v46 = vrot.slane %v3796_v24, 7  ;;  %v4054_v6 = vrot.slane %v3799_v41, 1  ;;  %v11535_v52 = vpop.f32.mrb[228].mxu0 }
 0x2ea   : > { %v3476_v14 = vmax.f32 %v3395_v50, 0.0  ;;  %v3396_v36 = vadd.f32 %v11175_v5, %v3325_v59  ;;  %v11539_v23 = vpop.f32.mrb[229].mxu0 }
 0x2eb   : > { %v2860_v55 = vpop.f32.mrb[244].mxu1  ;;  %v3801_v33 = vor.u32 %v3799_v41, %v3798_v46  ;;  %v11542_v48 = vsel %vm805_vm0, %v4053_v40, %v4054_v6  ;;  %v8609_v7 = vpop.f32.mrb[230].mxu0 }
 0x2ec   : > { %14132 = vst [vmem:[#allocation32_spill] sm:$0xff] %v11542_v48  ;;  %v3548_v57 = vsel %vm3440_vm7, %v3476_v14, 0.0  ;;  %v3477_v31 = vmax.f32 %v3396_v36, 0.0  ;;  %v3150_v42 = vadd.f32 %v11425_v47, %v2860_v55  ;;  %8670 = vmatprep.mubr.bf16.mxu1 %v11542_v48  ;;  %v2862_v58 = vpop.f32.mrb[245].mxu1  ;;  %v11548_v20 = vpop.f32.mrb[231].mxu0 }
 0x2ed   : > { %v2863_v50 = vpop.f32.mrb[246].mxu1  ;;  %v11551_v59 = vsel %vm478_vm1, %v3790_v2, %v3801_v33 }
 0x2ee   : > { %14133 = vst [vmem:[#allocation59_spill] sm:$0xff] %v11551_v59  ;;  %v3600_v41 = vpack.c.bf16 %v3477_v31, %v3548_v57  ;;  %v3326_v40 = vadd.f32 %v3150_v42, %v11031_v37  ;;  %4490 = vmatmul.mubr.bf16.gmra.mrb[28].mxu0 %v11411_v19  ;;  %v2865_v7 = vpop.f32.mrb[247].mxu1  ;;  %v11555_v54 = vpack.c.bf16 %v3477_v31, %v3476_v14  ;;  %v9030_v14 = vld [vmem:[%s13362_s3 + $0x30] sm:$0xff]   ;;  %v14136_v19 = vmax.f32 %v11423_v8, 0.0 }
 0x2ef   : > { %7904 = vmatprep.mubr.msk.bf16.mxu0 %vm11204_vm9, %v11416_v39  ;;  %v4056_v37 = vor.u32 %v4054_v6, %v3796_v24  ;;  %5136 = vmatpush1.bf16.msra.mxu1 %v9030_v14  ;;  %v9031_v39 = vld [vmem:[%s13362_s3 + $0x38] sm:$0xff]  }
 0x2f0   : > { %14134 = vst [vmem:[#allocation30_spill] sm:$0xff] %v11555_v54  ;;  %v3807_v47 = vshll.u32 %v3600_v41, 16  ;;  %v11561_v55 = vadd.f32 %v11175_v5, %v3326_v40  ;;  %v3804_v36 = vshrl.u32 %v3600_v41, 16  ;;  %5137 = vmatprep.subr.bf16.mxu1 %v13748_v62 }
 0x2f1   : > { %v11563_v58 = vpop.f32.mrb[232].mxu0 }
 0x2f2   : > { %v4057_v2 = vrot.slane %v3807_v47, 1  ;;  %v13588_v33 = vmax.f32 %v11561_v55, 0.0  ;;  %v3806_v57 = vrot.slane %v3804_v36, 7  ;;  %v11566_v42 = vpop.f32.mrb[233].mxu0 }
 0x2f3   : > { %v2868_v31 = vpop.f32.mrb[248].mxu1  ;;  %v8613_v50 = vpop.f32.mrb[234].mxu0  ;;  %5138 = vmatpush1.bf16.msra.mxu1 %v9031_v39 }
 0x2f4   : > { %v3550_v41 = vsel %vm3446_vm6, %v13588_v33, 0.0  ;;  %v3158_v40 = vadd.f32 %v11468_v61, %v2868_v31  ;;  %v2870_v7 = vpop.f32.mrb[249].mxu1  ;;  %v11577_v48 = vsel %vm805_vm0, %v4056_v37, %v4057_v2  ;;  %v3809_v24 = vor.u32 %v3807_v47, %v3806_v57  ;;  %v11579_v6 = vpop.f32.mrb[235].mxu0  ;;  %5139 = vmatprep.subr.bf16.mxu1 %v13748_v62 }
 0x2f5   : > { %14135 = vst [vmem:[#allocation49_spill] sm:$0xff] %v11577_v48  ;;  %v2871_v50 = vpop.f32.mrb[250].mxu1  ;;  %8671 = vmatmul.mubr.bf16.gmra.mrb[84].mxu1 %v11577_v48  ;;  %v11588_v33 = vpack.c.bf16 %v14101_v34, %v14136_v19  ;;  %v3601_v61 = vpack.c.bf16 %v14101_v34, %v3550_v41 }
 0x2f6   : > { %v3328_v47 = vadd.f32 %v3158_v40, %v11051_v63  ;;  %v3161_v37 = vadd.f32 %v11477_v21, %v2871_v50  ;;  %4498 = vmatmul.mubr.bf16.gmra.mrb[32].mxu0 %v11457_v53  ;;  %v2873_v14 = vpop.f32.mrb[251].mxu1  ;;  %v11596_v31 = vsel %vm478_vm1, %v3798_v46, %v3809_v24  ;;  %v4059_v21 = vor.u32 %v4057_v2, %v3804_v36 }
 0x2f7   : > { %14137 = vst [vmem:[#allocation42_spill] sm:$0xff] %v11588_v33  ;;  %14138 = vst [vmem:[#allocation48_spill] sm:$0xff] %v11596_v31  ;;  %7907 = vmatprep.mubr.msk.bf16.mxu0 %vm11247_vm10, %v11588_v33  ;;  %v3812_v19 = vshrl.u32 %v3601_v61, 16  ;;  %v3815_v8 = vshll.u32 %v3601_v61, 16  ;;  %v9032_v61 = vld [vmem:[%s13362_s3 + $0x40] sm:$0xff]  }
 0x2f8   : > { %v3399_v41 = vadd.f32 %v11175_v5, %v3328_v47  ;;  %v3329_v7 = vadd.f32 %v3161_v37, %v11057_v30  ;;  %5140 = vmatpush1.bf16.msra.mxu1 %v9032_v61 }
 0x2f9   : > { %v11603_v63 = vrot.slane %v3812_v19, 7  ;;  %v4060_v40 = vrot.slane %v3815_v8, 1  ;;  %v11605_v50 = vpop.f32.mrb[236].mxu0  ;;  %5141 = vmatprep.subr.bf16.mxu1 %v13748_v62 }
 0x2fa   : > { %v3480_v46 = vmax.f32 %v3399_v41, 0.0  ;;  %v3400_v24 = vadd.f32 %v11175_v5, %v3329_v7  ;;  %v11609_v14 = vpop.f32.mrb[237].mxu0 }
 0x2fb   : > { %v2876_v47 = vpop.f32.mrb[252].mxu1  ;;  %v3817_v30 = vor.u32 %v3815_v8, %v11603_v63  ;;  %v11616_v39 = vsel %vm805_vm0, %v4059_v21, %v4060_v40  ;;  %v8617_v36 = vpop.f32.mrb[238].mxu0 }
 0x2fc   : > { %14139 = vst [vmem:[#allocation87_spill] sm:$0xff] %v11616_v39  ;;  %v3552_v2 = vsel %vm3440_vm7, %v3480_v46, 0.0  ;;  %v3481_v37 = vmax.f32 %v3400_v24, 0.0  ;;  %v3166_v41 = vadd.f32 %v11464_v16, %v2876_v47  ;;  %8674 = vmatprep.mubr.bf16.mxu1 %v11616_v39  ;;  %v2878_v7 = vpop.f32.mrb[253].mxu1  ;;  %v11622_v33 = vpop.f32.mrb[239].mxu0  ;;  %v9034_v16 = vld [vmem:[%s13362_s3 + $0x48] sm:$0xff]  }
 0x2fd   : > { %v2879_v48 = vpop.f32.mrb[254].mxu1  ;;  %v11625_v53 = vsel %vm478_vm1, %v3806_v57, %v3817_v30  ;;  %5142 = vmatpush1.bf16.msra.mxu1 %v9034_v16  ;;  %v4062_v30 = vor.u32 %v4060_v40, %v3812_v19  ;;  %v9035_v7 = vld [vmem:[%s13362_s3 + $0x50] sm:$0xff]  }
 0x2fe   : > { %14140 = vst [vmem:[#allocation60_spill] sm:$0xff] %v11625_v53  ;;  %v3602_v8 = vpack.c.bf16 %v3481_v37, %v3552_v2  ;;  %v3330_v21 = vadd.f32 %v3166_v41, %v11048_v22  ;;  %4506 = vmatmul.mubr.bf16.gmra.mrb[36].mxu0 %v11480_v4  ;;  %v2881_v24 = vpop.f32.mrb[255].mxu1  ;;  %v11630_v36 = vpack.c.bf16 %v3481_v37, %v3480_v46  ;;  %v9033_v41 = vld [vmem:[%s13362_s3 + $0xb0] sm:$0xff]  }
 0x2ff   : > { %7910 = vmatprep.mubr.msk.bf16.mxu0 %vm11204_vm9, %v11484_v11  ;;  %5143 = vmatprep.subr.bf16.mxu1 %v13748_v62 }
 0x300   : > { %14141 = vst [vmem:[#allocation31_spill] sm:$0xff] %v11630_v36  ;;  %v3823_v48 = vshll.u32 %v3602_v8, 16  ;;  %v11639_v57 = vadd.f32 %v11175_v5, %v3330_v21  ;;  %v3820_v61 = vshrl.u32 %v3602_v8, 16  ;;  %8726 = vmatprep.subr.bf16.mxu0 %v9033_v41 }
 0x301   : > { %v11641_v22 = vpop.f32.mrb[240].mxu0  ;;  %5144 = vmatpush1.bf16.msra.mxu1 %v9035_v7  ;;  %8727 = vmatpush3.bf16.msra.mxu0 %v9033_v41 }
 0x302   : > { %v4063_v46 = vrot.slane %v3823_v48, 1  ;;  %v13601_v47 = vmax.f32 %v11639_v57, 0.0  ;;  %v3822_v2 = vrot.slane %v3820_v61, 7  ;;  %v11645_v37 = vpop.f32.mrb[241].mxu0  ;;  %5145 = vmatprep.subr.bf16.mxu1 %v13748_v62 }
 0x303   : > { %v2884_v8 = vpop.f32.mrb[0].mxu1  ;;  %v8621_v21 = vpop.f32.mrb[242].mxu0 }
 0x304   : > { %v3554_v24 = vsel %vm3446_vm6, %v13601_v47, 0.0  ;;  %v3174_v19 = vadd.f32 %v11495_v27, %v2884_v8  ;;  %v2886_v40 = vpop.f32.mrb[1].mxu1  ;;  %v11659_v16 = vsel %vm805_vm0, %v4062_v30, %v4063_v46  ;;  %v3825_v11 = vor.u32 %v3823_v48, %v3822_v2  ;;  %v11661_v4 = vpop.f32.mrb[243].mxu0  ;;  %v9036_v21 = vld [vmem:[%s13362_s3 + $0x58] sm:$0xff]  }
 0x305   : > { %14142 = vst [vmem:[#allocation68_spill] sm:$0xff] %v11659_v16  ;;  %v2887_v39 = vpop.f32.mrb[2].mxu1  ;;  %8675 = vmatmul.mubr.bf16.gmra.mrb[88].mxu1 %v11659_v16  ;;  %v14143_v47 = vmax.f32 %v11490_v45, 0.0  ;;  %v3603_v30 = vpack.c.bf16 %v14101_v34, %v3554_v24 }
 0x306   : > { %v3332_v48 = vadd.f32 %v3174_v19, %v11065_v28  ;;  %v3177_v8 = vadd.f32 %v11511_v44, %v2887_v39  ;;  %4514 = vmatmul.mubr.bf16.gmra.mrb[40].mxu0 %v11527_v26  ;;  %v2889_v7 = vpop.f32.mrb[3].mxu1  ;;  %v11678_v40 = vsel %vm478_vm1, %v11603_v63, %v3825_v11  ;;  %5146 = vmatpush1.bf16.msra.mxu1 %v9036_v21  ;;  %v9037_v44 = vld [vmem:[%s13362_s3 + $0x60] sm:$0xff]  }
 0x307   : > { %v11670_v27 = vpack.c.bf16 %v14101_v34, %v14143_v47  ;;  %14145 = vst [vmem:[#allocation64_spill] sm:$0xff] %v11678_v40  ;;  %v3828_v45 = vshrl.u32 %v3603_v30, 16  ;;  %v3831_v47 = vshll.u32 %v3603_v30, 16  ;;  %v4065_v11 = vor.u32 %v4063_v46, %v3820_v61  ;;  %5147 = vmatprep.subr.bf16.mxu1 %v13748_v62 }
 0x308   : > { %v3403_v41 = vadd.f32 %v11175_v5, %v3332_v48  ;;  %v3333_v28 = vadd.f32 %v3177_v8, %v11071_v29 }
 0x309   : > { %14144 = vst [vmem:[#allocation54_spill] sm:$0xff] %v11670_v27  ;;  %7913 = vmatprep.mubr.msk.bf16.mxu0 %vm11247_vm10, %v11670_v27  ;;  %v3830_v39 = vrot.slane %v3828_v45, 7  ;;  %v4066_v63 = vrot.slane %v3831_v47, 1  ;;  %v11689_v24 = vpop.f32.mrb[244].mxu0 }
 0x30a   : > { %v3484_v19 = vmax.f32 %v3403_v41, 0.0  ;;  %v3404_v7 = vadd.f32 %v11175_v5, %v3333_v28  ;;  %v11693_v30 = vpop.f32.mrb[245].mxu0  ;;  %5148 = vmatpush1.bf16.msra.mxu1 %v9037_v44 }
 0x30b   : > { %v2892_v48 = vpop.f32.mrb[4].mxu1  ;;  %v3833_v27 = vor.u32 %v3831_v47, %v3830_v39  ;;  %v11696_v29 = vsel %vm805_vm0, %v4065_v11, %v4066_v63  ;;  %v8625_v21 = vpop.f32.mrb[246].mxu0  ;;  %v9038_v47 = vld [vmem:[%s13362_s3 + $0x68] sm:$0xff]   ;;  %5149 = vmatprep.subr.bf16.mxu1 %v13748_v62 }
 0x30c   : > { %14146 = vst [vmem:[#allocation62_spill] sm:$0xff] %v11696_v29  ;;  %v3556_v8 = vsel %vm3440_vm7, %v3484_v19, 0.0  ;;  %v3485_v61 = vmax.f32 %v3404_v7, 0.0  ;;  %v3182_v46 = vadd.f32 %v11492_v17, %v2892_v48  ;;  %8678 = vmatprep.mubr.bf16.mxu1 %v11696_v29  ;;  %v2894_v26 = vpop.f32.mrb[5].mxu1  ;;  %v11702_v41 = vpop.f32.mrb[247].mxu0 }
 0x30d   : > { %v2895_v28 = vpop.f32.mrb[6].mxu1  ;;  %v11708_v11 = vsel %vm478_vm1, %v3822_v2, %v3833_v27  ;;  %v9039_v27 = vld [vmem:[%s13362_s3 + $0x70] sm:$0xff]  }
 0x30e   : > { %v3604_v21 = vpack.c.bf16 %v3485_v61, %v3556_v8  ;;  %v3334_v7 = vadd.f32 %v3182_v46, %v11062_v49  ;;  %4522 = vmatmul.mubr.bf16.gmra.mrb[44].mxu0 %v11551_v59  ;;  %v2897_v17 = vpop.f32.mrb[7].mxu1  ;;  %v11713_v26 = vpack.c.bf16 %v3485_v61, %v3484_v19  ;;  %5150 = vmatpush1.bf16.msra.mxu1 %v9038_v47 }
 0x30f   : > { %7916 = vmatprep.mubr.msk.bf16.mxu0 %vm11204_vm9, %v11555_v54  ;;  %5151 = vmatprep.subr.bf16.mxu1 %v13748_v62  ;;  %v4068_v61 = vor.u32 %v4066_v63, %v3828_v45  ;;  %v9040_v45 = vld [vmem:[%s13362_s3 + $0x78] sm:$0xff]  }
 0x310   : > { %14147 = vst [vmem:[#allocation34_spill] sm:$0xff] %v11713_v26  ;;  %v3839_v44 = vshll.u32 %v3604_v21, 16  ;;  %v11719_v48 = vadd.f32 %v11175_v5, %v3334_v7  ;;  %v3836_v2 = vshrl.u32 %v3604_v21, 16 }
 0x311   : > { %v11724_v49 = vpop.f32.mrb[248].mxu0 }
 0x312   : > { %v4069_v19 = vrot.slane %v3839_v44, 1  ;;  %v13612_v8 = vmax.f32 %v11719_v48, 0.0  ;;  %v3838_v46 = vrot.slane %v3836_v2, 7  ;;  %v11728_v28 = vpop.f32.mrb[249].mxu0  ;;  %5152 = vmatpush1.bf16.msra.mxu1 %v9039_v27 }
 0x313   : > { %v2900_v17 = vpop.f32.mrb[8].mxu1  ;;  %v8629_v5 = vpop.f32.mrb[250].mxu0  ;;  %5153 = vmatprep.subr.bf16.mxu1 %v13748_v62 }
 0x314   : > { %v3558_v47 = vsel %vm3446_vm6, %v13612_v8, 0.0  ;;  %v3190_v21 = vadd.f32 %v11539_v23, %v2900_v17  ;;  %v2902_v7 = vpop.f32.mrb[9].mxu1  ;;  %v11736_v54 = vsel %vm805_vm0, %v4068_v61, %v4069_v19  ;;  %v3841_v59 = vor.u32 %v3839_v44, %v3838_v46  ;;  %v11738_v29 = vpop.f32.mrb[251].mxu0 }
 0x315   : > { %14148 = vst [vmem:[#allocation72_spill] sm:$0xff] %v11736_v54  ;;  %v2903_v63 = vpop.f32.mrb[10].mxu1  ;;  %8679 = vmatmul.mubr.bf16.gmra.mrb[92].mxu1 %v11736_v54  ;;  %v14149_v5 = vmax.f32 %v11561_v55, 0.0  ;;  %v3605_v23 = vpack.c.bf16 %v14101_v34, %v3558_v47  ;;  %v9041_v55 = vld [vmem:[%s13362_s3 + $0xb8] sm:$0xff]  }
 0x316   : > { %v3336_v44 = vadd.f32 %v3190_v21, %v11082_v13  ;;  %v3193_v27 = vadd.f32 %v11548_v20, %v2903_v63  ;;  %4530 = vmatmul.mubr.bf16.gmra.mrb[48].mxu0 %v11596_v31  ;;  %v2905_v61 = vpop.f32.mrb[11].mxu1  ;;  %v11755_v17 = vsel %vm478_vm1, %v3830_v39, %v3841_v59  ;;  %v11766_v13 = vld [vmem:[%s13361_s2] ss:$0 sm:$0xff]  ;;  %5154 = vmatpush1.bf16.msra.mxu1 %v9040_v45 }
 0x317   : > { %v11747_v8 = vpack.c.bf16 %v14101_v34, %v14149_v5  ;;  %14151 = vst [vmem:[#allocation46_spill] sm:$0xff] %v11755_v17  ;;  %v3844_v47 = vshrl.u32 %v3605_v23, 16  ;;  %v3847_v7 = vshll.u32 %v3605_v23, 16  ;;  %8728 = vmatprep.subr.bf16.mxu0 %v9041_v55  ;;  %v4071_v21 = vor.u32 %v4069_v19, %v3836_v2 }
 0x318   : > { %v3407_v20 = vadd.f32 %v11766_v13, %v3336_v44  ;;  %v3337_v59 = vadd.f32 %v3193_v27, %v11088_v10  ;;  %8729 = vmatpush3.bf16.msra.mxu0 %v9041_v55 }
 0x319   : > { %14150 = vst [vmem:[#allocation69_spill] sm:$0xff] %v11747_v8  ;;  %7919 = vmatprep.mubr.msk.bf16.mxu0 %vm11247_vm10, %v11747_v8  ;;  %v3846_v39 = vrot.slane %v3844_v47, 7  ;;  %v4072_v63 = vrot.slane %v3847_v7, 1  ;;  %v11770_v5 = vpop.f32.mrb[252].mxu0  ;;  %5894 = vmatprep.subr.bf16.mxu0 %v13748_v62 }
 0x31a   : > { %v3488_v61 = vmax.f32 %v3407_v20, 0.0  ;;  %v3408_v23 = vadd.f32 %v11766_v13, %v3337_v59  ;;  %v11773_v8 = vpop.f32.mrb[253].mxu0 }
 0x31b   : > { %v2908_v31 = vpop.f32.mrb[12].mxu1  ;;  %v3849_v54 = vor.u32 %v3847_v7, %v3846_v39  ;;  %v11777_v44 = vsel %vm805_vm0, %v4071_v21, %v4072_v63  ;;  %v8633_v10 = vpop.f32.mrb[254].mxu0 }
 0x31c   : > { %14152 = vst [vmem:[#allocation93_spill] sm:$0xff] %v11777_v44  ;;  %v3560_v2 = vsel %vm3440_vm7, %v3488_v61, 0.0  ;;  %v3489_v19 = vmax.f32 %v3408_v23, 0.0  ;;  %v3198_v45 = vadd.f32 %v11535_v52, %v2908_v31  ;;  %8682 = vmatprep.mubr.bf16.mxu1 %v11777_v44  ;;  %v2910_v27 = vpop.f32.mrb[13].mxu1  ;;  %v11783_v55 = vpop.f32.mrb[255].mxu0 }
 0x31d   : > { %v2911_v20 = vpop.f32.mrb[14].mxu1  ;;  %v11786_v59 = vsel %vm478_vm1, %v3838_v46, %v3849_v54  ;;  %v4074_v46 = vor.u32 %v4072_v63, %v3844_v47 }
 0x31e   : > { %14153 = vst [vmem:[#allocation63_spill] sm:$0xff] %v11786_v59  ;;  %v3606_v7 = vpack.c.bf16 %v3489_v19, %v3560_v2  ;;  %v3338_v21 = vadd.f32 %v3198_v45, %v11079_v3  ;;  %4538 = vmatmul.mubr.bf16.gmra.mrb[52].mxu0 %v11625_v53  ;;  %v2913_v10 = vpop.f32.mrb[15].mxu1  ;;  %v11790_v16 = vpack.c.bf16 %v3489_v19, %v3488_v61 }
 0x31f   : > { %7922 = vmatprep.mubr.msk.bf16.mxu0 %vm11204_vm9, %v11630_v36  ;;  %v14157_v36 = vld [vmem:[#allocation61_spill] sm:$0xff] }
 0x320   : > { %14154 = vst [vmem:[#allocation94_spill] sm:$0xff] %v11790_v16  ;;  %v3855_v52 = vshll.u32 %v3606_v7, 16  ;;  %v11796_v31 = vadd.f32 %v11766_v13, %v3338_v21  ;;  %v3852_v23 = vshrl.u32 %v3606_v7, 16  ;;  %v14155_v7 = vmax.f32 %v11639_v57, 0.0 }
 0x322   : > { %v4075_v27 = vrot.slane %v3855_v52, 1  ;;  %v13625_v54 = vmax.f32 %v11796_v31, 0.0  ;;  %v3854_v2 = vrot.slane %v3852_v23, 7  ;;  %v11811_v47 = vpack.c.bf16 %v14101_v34, %v14155_v7 }
 0x323   : > { %v2916_v3 = vpop.f32.mrb[16].mxu1 }
 0x324   : > { %v3562_v61 = vsel %vm3446_vm6, %v13625_v54, 0.0  ;;  %v3206_v19 = vadd.f32 %v11566_v42, %v2916_v3  ;;  %v2918_v45 = vpop.f32.mrb[17].mxu1  ;;  %v11805_v20 = vsel %vm805_vm0, %v4074_v46, %v4075_v27  ;;  %v3857_v21 = vor.u32 %v3855_v52, %v3854_v2  ;;  %14156 = vst [vmem:[#allocation35_spill] sm:$0xff] %v11811_v47 }
 0x325   : > { %v2919_v10 = vpop.f32.mrb[18].mxu1  ;;  %8683 = vmatmul.mubr.bf16.gmra.mrb[96].mxu1 %v11805_v20  ;;  %v3607_v63 = vpack.c.bf16 %v14101_v34, %v3562_v61  ;;  %v14159_v45 = vld [vmem:[#allocation8_spill] sm:$0xff] }
 0x326   : > { %v3340_v53 = vadd.f32 %v3206_v19, %v14157_v36  ;;  %v3209_v54 = vadd.f32 %v11579_v6, %v2919_v10  ;;  %4546 = vmatmul.mubr.bf16.gmra.mrb[56].mxu0 %v11678_v40  ;;  %v2921_v42 = vpop.f32.mrb[19].mxu1  ;;  %v11818_v46 = vsel %vm478_vm1, %v3846_v39, %v3857_v21  ;;  %v4077_v36 = vor.u32 %v4075_v27, %v3852_v23 }
 0x327   : > { %14158 = vst [vmem:[#allocation73_spill] sm:$0xff] %v11818_v46  ;;  %7925 = vmatprep.mubr.msk.bf16.mxu0 %vm11247_vm10, %v11811_v47  ;;  %v3860_v57 = vshrl.u32 %v3607_v63, 16  ;;  %v3863_v52 = vshll.u32 %v3607_v63, 16 }
 0x328   : > { %v3411_v3 = vadd.f32 %v11766_v13, %v3340_v53  ;;  %v3341_v61 = vadd.f32 %v3209_v54, %v14159_v45 }
 0x329   : > { %v3862_v7 = vrot.slane %v3860_v57, 7  ;;  %v4078_v19 = vrot.slane %v3863_v52, 1 }
 0x32a   : > { %v3492_v6 = vmax.f32 %v3411_v3, 0.0  ;;  %v3412_v10 = vadd.f32 %v11766_v13, %v3341_v61  ;;  %v14161_v3 = vld [vmem:[#allocation86_spill] sm:$0xff] }
 0x32b   : > { %v2924_v42 = vpop.f32.mrb[20].mxu1  ;;  %v3865_v40 = vor.u32 %v3863_v52, %v3862_v7  ;;  %v11827_v39 = vsel %vm805_vm0, %v4077_v36, %v4078_v19 }
 0x32c   : > { %14160 = vst [vmem:[#allocation77_spill] sm:$0xff] %v11827_v39  ;;  %v3564_v21 = vsel %vm3440_vm7, %v3492_v6, 0.0  ;;  %v3493_v47 = vmax.f32 %v3412_v10, 0.0  ;;  %v3214_v63 = vadd.f32 %v11563_v58, %v2924_v42  ;;  %8686 = vmatprep.mubr.bf16.mxu1 %v11827_v39  ;;  %v2926_v53 = vpop.f32.mrb[21].mxu1 }
 0x32d   : > { %v2927_v54 = vpop.f32.mrb[22].mxu1  ;;  %v11834_v23 = vsel %vm478_vm1, %v3854_v2, %v3865_v40  ;;  %v4080_v2 = vor.u32 %v4078_v19, %v3860_v57 }
 0x32e   : > { %v3608_v27 = vpack.c.bf16 %v3493_v47, %v3564_v21  ;;  %v3342_v45 = vadd.f32 %v3214_v63, %v14161_v3  ;;  %4554 = vmatmul.mubr.bf16.gmra.mrb[60].mxu0 %v11708_v11  ;;  %v2929_v52 = vpop.f32.mrb[23].mxu1  ;;  %v11838_v61 = vpack.c.bf16 %v3493_v47, %v3492_v6 }
 0x32f   : > { %7928 = vmatprep.mubr.msk.bf16.mxu0 %vm11204_vm9, %v11713_v26  ;;  %v14166_v52 = vld [vmem:[#allocation90_spill] sm:$0xff] }
 0x330   : > { %14162 = vst [vmem:[#allocation95_spill] sm:$0xff] %v11838_v61  ;;  %v3871_v58 = vshll.u32 %v3608_v27, 16  ;;  %v11844_v36 = vadd.f32 %v11766_v13, %v3342_v45  ;;  %v3868_v10 = vshrl.u32 %v3608_v27, 16  ;;  %v14164_v27 = vmax.f32 %v11719_v48, 0.0 }
 0x332   : > { %v4081_v42 = vrot.slane %v3871_v58, 1  ;;  %v13632_v40 = vmax.f32 %v11844_v36, 0.0  ;;  %v3870_v21 = vrot.slane %v3868_v10, 7  ;;  %v11859_v57 = vpack.c.bf16 %v14101_v34, %v14164_v27 }
 0x333   : > { %v2932_v63 = vpop.f32.mrb[24].mxu1 }
 0x334   : > { %v3566_v47 = vsel %vm3446_vm6, %v13632_v40, 0.0  ;;  %v3222_v6 = vadd.f32 %v11609_v14, %v2932_v63  ;;  %v2934_v53 = vpop.f32.mrb[25].mxu1  ;;  %v11853_v54 = vsel %vm805_vm0, %v4080_v2, %v4081_v42  ;;  %v3873_v3 = vor.u32 %v3871_v58, %v3870_v21  ;;  %14165 = vst [vmem:[#allocation37_spill] sm:$0xff] %v11859_v57  ;;  %v11871_v58 = vld [vmem:[%s13362_s3 + $0x200] sm:$0xff]  }
 0x335   : > { %14163 = vst [vmem:[#allocation67_spill] sm:$0xff] %v11853_v54  ;;  %v2935_v45 = vpop.f32.mrb[26].mxu1  ;;  %8687 = vmatmul.mubr.bf16.gmra.mrb[100].mxu1 %v11853_v54  ;;  %v3609_v19 = vpack.c.bf16 %v14101_v34, %v3566_v47  ;;  %8794 = vmatprep.subr.bf16.mxu1 %v11871_v58 }
 0x336   : > { %v3344_v26 = vadd.f32 %v3222_v6, %v14166_v52  ;;  %v3225_v40 = vadd.f32 %v11622_v33, %v2935_v45  ;;  %4562 = vmatmul.mubr.bf16.gmra.mrb[64].mxu0 %v11755_v17  ;;  %v2937_v14 = vpop.f32.mrb[27].mxu1  ;;  %v11866_v2 = vsel %vm478_vm1, %v3862_v7, %v3873_v3  ;;  %v14168_v33 = vld [vmem:[#allocation66_spill] sm:$0xff]  ;;  %v4083_v7 = vor.u32 %v4081_v42, %v3868_v10 }
 0x337   : > { %14167 = vst [vmem:[#allocation71_spill] sm:$0xff] %v11866_v2  ;;  %7931 = vmatprep.mubr.msk.bf16.mxu0 %vm11247_vm10, %v11859_v57  ;;  %v3876_v48 = vshrl.u32 %v3609_v19, 16  ;;  %v3879_v63 = vshll.u32 %v3609_v19, 16 }
 0x338   : > { %v3415_v47 = vadd.f32 %v11766_v13, %v3344_v26  ;;  %v3345_v6 = vadd.f32 %v3225_v40, %v14168_v33 }
 0x339   : > { %v3878_v53 = vrot.slane %v3876_v48, 7  ;;  %v4084_v3 = vrot.slane %v3879_v63, 1 }
 0x33a   : > { %v3496_v45 = vmax.f32 %v3415_v47, 0.0  ;;  %v3416_v27 = vadd.f32 %v11766_v13, %v3345_v6  ;;  %v14170_v47 = vld [vmem:[#allocation89_spill] sm:$0xff] }
 0x33b   : > { %v2940_v52 = vpop.f32.mrb[28].mxu1  ;;  %v3881_v14 = vor.u32 %v3879_v63, %v3878_v53  ;;  %v11881_v17 = vsel %vm805_vm0, %v4083_v7, %v4084_v3 }
 0x33c   : > { %14169 = vst [vmem:[#allocation38_spill] sm:$0xff] %v11881_v17  ;;  %v3568_v19 = vsel %vm3440_vm7, %v3496_v45, 0.0  ;;  %v3497_v57 = vmax.f32 %v3416_v27, 0.0  ;;  %v3230_v26 = vadd.f32 %v11605_v50, %v2940_v52  ;;  %8690 = vmatprep.mubr.bf16.mxu1 %v11881_v17  ;;  %v2942_v40 = vpop.f32.mrb[29].mxu1 }
 0x33d   : > { %v2943_v33 = vpop.f32.mrb[30].mxu1  ;;  %v11888_v10 = vsel %vm478_vm1, %v3870_v21, %v3881_v14  ;;  %v4086_v14 = vor.u32 %v4084_v3, %v3876_v48 }
 0x33e   : > { %v3610_v42 = vpack.c.bf16 %v3497_v57, %v3568_v19  ;;  %v3346_v6 = vadd.f32 %v3230_v26, %v14170_v47  ;;  %4570 = vmatmul.mubr.bf16.gmra.mrb[68].mxu0 %v11786_v59  ;;  %v2945_v63 = vpop.f32.mrb[31].mxu1  ;;  %v11892_v7 = vpack.c.bf16 %v3497_v57, %v3496_v45 }
 0x33f   : > { %7934 = vmatprep.mubr.msk.bf16.mxu0 %vm11204_vm9, %v11790_v16  ;;  %v14174_v16 = vld [vmem:[#allocation92_spill] sm:$0xff] }
 0x340   : > { %14171 = vst [vmem:[#allocation76_spill] sm:$0xff] %v11892_v7  ;;  %v3887_v50 = vshll.u32 %v3610_v42, 16  ;;  %v11898_v27 = vadd.f32 %v11766_v13, %v3346_v6  ;;  %v3884_v52 = vshrl.u32 %v3610_v42, 16  ;;  %v14172_v42 = vmax.f32 %v11796_v31, 0.0 }
 0x342   : > { %v4087_v40 = vrot.slane %v3887_v50, 1  ;;  %v13641_v21 = vmax.f32 %v11898_v27, 0.0  ;;  %v3886_v19 = vrot.slane %v3884_v52, 7  ;;  %v11913_v48 = vpack.c.bf16 %v14101_v34, %v14172_v42 }
 0x343   : > { %v2948_v26 = vpop.f32.mrb[32].mxu1 }
 0x344   : > { %v3570_v57 = vsel %vm3446_vm6, %v13641_v21, 0.0  ;;  %v3238_v45 = vadd.f32 %v11645_v37, %v2948_v26  ;;  %v2950_v33 = vpop.f32.mrb[33].mxu1  ;;  %v11907_v47 = vsel %vm805_vm0, %v4086_v14, %v4087_v40  ;;  %v3889_v6 = vor.u32 %v3887_v50, %v3886_v19  ;;  %14173 = vst [vmem:[#allocation40_spill] sm:$0xff] %v11913_v48 }
 0x345   : > { %v2951_v63 = vpop.f32.mrb[34].mxu1  ;;  %8691 = vmatmul.mubr.bf16.gmra.mrb[104].mxu1 %v11907_v47  ;;  %v3611_v3 = vpack.c.bf16 %v14101_v34, %v3570_v57  ;;  %v14176_v33 = vld [vmem:[#allocation70_spill] sm:$0xff] }
 0x346   : > { %v3348_v59 = vadd.f32 %v3238_v45, %v14174_v16  ;;  %v3241_v21 = vadd.f32 %v11661_v4, %v2951_v63  ;;  %4578 = vmatmul.mubr.bf16.gmra.mrb[72].mxu0 %v11818_v46  ;;  %v2953_v37 = vpop.f32.mrb[35].mxu1  ;;  %v11920_v14 = vsel %vm478_vm1, %v3878_v53, %v3889_v6  ;;  %v4089_v16 = vor.u32 %v4087_v40, %v3884_v52 }
 0x347   : > { %14175 = vst [vmem:[#allocation80_spill] sm:$0xff] %v11920_v14  ;;  %7937 = vmatprep.mubr.msk.bf16.mxu0 %vm11247_vm10, %v11913_v48  ;;  %v3892_v31 = vshrl.u32 %v3611_v3, 16  ;;  %v3895_v50 = vshll.u32 %v3611_v3, 16 }
 0x348   : > { %v3419_v26 = vadd.f32 %v11766_v13, %v3348_v59  ;;  %v3349_v57 = vadd.f32 %v3241_v21, %v14176_v33 }
 0x349   : > { %v3894_v42 = vrot.slane %v3892_v31, 7  ;;  %v4090_v45 = vrot.slane %v3895_v50, 1 }
 0x34a   : > { %v3500_v4 = vmax.f32 %v3419_v26, 0.0  ;;  %v3420_v63 = vadd.f32 %v11766_v13, %v3349_v57  ;;  %v14178_v26 = vld [vmem:[#allocation10_spill] sm:$0xff] }
 0x34b   : > { %v2956_v37 = vpop.f32.mrb[36].mxu1  ;;  %v3897_v46 = vor.u32 %v3895_v50, %v3894_v42  ;;  %v11929_v53 = vsel %vm805_vm0, %v4089_v16, %v4090_v45 }
 0x34c   : > { %14177 = vst [vmem:[#allocation41_spill] sm:$0xff] %v11929_v53  ;;  %v3572_v6 = vsel %vm3440_vm7, %v3500_v4, 0.0  ;;  %v3501_v48 = vmax.f32 %v3420_v63, 0.0  ;;  %v3246_v3 = vadd.f32 %v11641_v22, %v2956_v37  ;;  %8694 = vmatprep.mubr.bf16.mxu1 %v11929_v53  ;;  %v2958_v59 = vpop.f32.mrb[37].mxu1 }
 0x34d   : > { %v2959_v21 = vpop.f32.mrb[38].mxu1  ;;  %v11936_v52 = vsel %vm478_vm1, %v3886_v19, %v3897_v46  ;;  %v4092_v19 = vor.u32 %v4090_v45, %v3892_v31 }
 0x34e   : > { %v3612_v40 = vpack.c.bf16 %v3501_v48, %v3572_v6  ;;  %v3350_v33 = vadd.f32 %v3246_v3, %v14178_v26  ;;  %4586 = vmatmul.mubr.bf16.gmra.mrb[76].mxu0 %v11834_v23  ;;  %v2961_v50 = vpop.f32.mrb[39].mxu1  ;;  %v11940_v57 = vpack.c.bf16 %v3501_v48, %v3500_v4 }
 0x34f   : > { %7940 = vmatprep.mubr.msk.bf16.mxu0 %vm11204_vm9, %v11838_v61  ;;  %v14183_v50 = vld [vmem:[#allocation75_spill] sm:$0xff] }
 0x350   : > { %14179 = vst [vmem:[#allocation85_spill] sm:$0xff] %v11940_v57  ;;  %v3903_v22 = vshll.u32 %v3612_v40, 16  ;;  %v11946_v16 = vadd.f32 %v11766_v13, %v3350_v33  ;;  %v3900_v63 = vshrl.u32 %v3612_v40, 16  ;;  %v14181_v40 = vmax.f32 %v11844_v36, 0.0 }
 0x352   : > { %v4093_v37 = vrot.slane %v3903_v22, 1  ;;  %v13648_v46 = vmax.f32 %v11946_v16, 0.0  ;;  %v3902_v6 = vrot.slane %v3900_v63, 7  ;;  %v11961_v31 = vpack.c.bf16 %v14101_v34, %v14181_v40 }
 0x353   : > { %v2964_v3 = vpop.f32.mrb[40].mxu1 }
 0x354   : > { %v3574_v48 = vsel %vm3446_vm6, %v13648_v46, 0.0  ;;  %v3254_v4 = vadd.f32 %v11693_v30, %v2964_v3  ;;  %v2966_v59 = vpop.f32.mrb[41].mxu1  ;;  %v11955_v21 = vsel %vm805_vm0, %v4092_v19, %v4093_v37  ;;  %v3905_v26 = vor.u32 %v3903_v22, %v3902_v6  ;;  %14182 = vst [vmem:[#allocation88_spill] sm:$0xff] %v11961_v31 }
 0x355   : > { %14180 = vst [vmem:[#allocation43_spill] sm:$0xff] %v11955_v21  ;;  %v2967_v33 = vpop.f32.mrb[42].mxu1  ;;  %8695 = vmatmul.mubr.bf16.gmra.mrb[108].mxu1 %v11955_v21  ;;  %v3613_v45 = vpack.c.bf16 %v14101_v34, %v3574_v48  ;;  %v14185_v59 = vld [vmem:[#allocation14_spill] sm:$0xff] }
 0x356   : > { %v3352_v61 = vadd.f32 %v3254_v4, %v14183_v50  ;;  %v3257_v46 = vadd.f32 %v11702_v41, %v2967_v33  ;;  %4594 = vmatmul.mubr.bf16.gmra.mrb[80].mxu0 %v11866_v2  ;;  %v2969_v30 = vpop.f32.mrb[43].mxu1  ;;  %v11968_v19 = vsel %vm478_vm1, %v3894_v42, %v3905_v26  ;;  %v4095_v4 = vor.u32 %v4093_v37, %v3900_v63 }
 0x357   : > { %14184 = vst [vmem:[#allocation44_spill] sm:$0xff] %v11968_v19  ;;  %7943 = vmatprep.mubr.msk.bf16.mxu0 %vm11247_vm10, %v11961_v31  ;;  %v3908_v36 = vshrl.u32 %v3613_v45, 16  ;;  %v3911_v22 = vshll.u32 %v3613_v45, 16 }
 0x358   : > { %v3423_v3 = vadd.f32 %v11766_v13, %v3352_v61  ;;  %v3353_v48 = vadd.f32 %v3257_v46, %v14185_v59 }
 0x359   : > { %v3910_v40 = vrot.slane %v3908_v36, 7  ;;  %v4096_v50 = vrot.slane %v3911_v22, 1 }
 0x35a   : > { %v3504_v41 = vmax.f32 %v3423_v3, 0.0  ;;  %v3424_v33 = vadd.f32 %v11766_v13, %v3353_v48  ;;  %v14187_v3 = vld [vmem:[#allocation11_spill] sm:$0xff] }
 0x35b   : > { %v2972_v30 = vpop.f32.mrb[44].mxu1  ;;  %v3913_v2 = vor.u32 %v3911_v22, %v3910_v40  ;;  %v11977_v42 = vsel %vm805_vm0, %v4095_v4, %v4096_v50 }
 0x35c   : > { %14186 = vst [vmem:[#allocation27_spill] sm:$0xff] %v11977_v42  ;;  %v3576_v26 = vsel %vm3440_vm7, %v3504_v41, 0.0  ;;  %v3505_v31 = vmax.f32 %v3424_v33, 0.0  ;;  %v3262_v45 = vadd.f32 %v11689_v24, %v2972_v30  ;;  %8698 = vmatprep.mubr.bf16.mxu1 %v11977_v42  ;;  %v2974_v61 = vpop.f32.mrb[45].mxu1 }
 0x35d   : > { %v2975_v46 = vpop.f32.mrb[46].mxu1  ;;  %v11984_v63 = vsel %vm478_vm1, %v3902_v6, %v3913_v2  ;;  %v4098_v6 = vor.u32 %v4096_v50, %v3908_v36 }
 0x35e   : > { %v3614_v37 = vpack.c.bf16 %v3505_v31, %v3576_v26  ;;  %v3354_v59 = vadd.f32 %v3262_v45, %v14187_v3  ;;  %4602 = vmatmul.mubr.bf16.gmra.mrb[84].mxu0 %v11888_v10  ;;  %v2977_v22 = vpop.f32.mrb[47].mxu1  ;;  %v11988_v48 = vpack.c.bf16 %v3505_v31, %v3504_v41 }
 0x35f   : > { %7946 = vmatprep.mubr.msk.bf16.mxu0 %vm11204_vm9, %v11892_v7  ;;  %v14191_v22 = vld [vmem:[#allocation15_spill] sm:$0xff] }
 0x360   : > { %v3919_v24 = vshll.u32 %v3614_v37, 16  ;;  %v11994_v4 = vadd.f32 %v11766_v13, %v3354_v59  ;;  %v3916_v33 = vshrl.u32 %v3614_v37, 16  ;;  %v14189_v37 = vmax.f32 %v11898_v27, 0.0 }
 0x362   : > { %v4099_v30 = vrot.slane %v3919_v24, 1  ;;  %v13655_v2 = vmax.f32 %v11994_v4, 0.0  ;;  %v3918_v26 = vrot.slane %v3916_v33, 7  ;;  %v12009_v36 = vpack.c.bf16 %v14101_v34, %v14189_v37 }
 0x363   : > { %v2980_v45 = vpop.f32.mrb[48].mxu1 }
 0x364   : > { %v3578_v31 = vsel %vm3446_vm6, %v13655_v2, 0.0  ;;  %v3270_v41 = vadd.f32 %v11728_v28, %v2980_v45  ;;  %v2982_v61 = vpop.f32.mrb[49].mxu1  ;;  %v12003_v46 = vsel %vm805_vm0, %v4098_v6, %v4099_v30  ;;  %v3921_v3 = vor.u32 %v3919_v24, %v3918_v26  ;;  %14190 = vst [vmem:[#allocation3_spill] sm:$0xff] %v12009_v36 }
 0x365   : > { %14188 = vst [vmem:[#allocation50_spill] sm:$0xff] %v12003_v46  ;;  %v2983_v59 = vpop.f32.mrb[50].mxu1  ;;  %8699 = vmatmul.mubr.bf16.gmra.mrb[112].mxu1 %v12003_v46  ;;  %v3615_v50 = vpack.c.bf16 %v14101_v34, %v3578_v31  ;;  %v14192_v61 = vld [vmem:[#allocation84_spill] sm:$0xff] }
 0x366   : > { %v3356_v7 = vadd.f32 %v3270_v41, %v14191_v22  ;;  %v3273_v2 = vadd.f32 %v11738_v29, %v2983_v59  ;;  %4610 = vmatmul.mubr.bf16.gmra.mrb[88].mxu0 %v11920_v14  ;;  %v2985_v28 = vpop.f32.mrb[51].mxu1  ;;  %v12016_v6 = vsel %vm478_vm1, %v3910_v40, %v3921_v3  ;;  %v4101_v41 = vor.u32 %v4099_v30, %v3916_v33 }
 0x367   : > { %7949 = vmatprep.mubr.msk.bf16.mxu0 %vm11247_vm10, %v12009_v36  ;;  %v3924_v27 = vshrl.u32 %v3615_v50, 16  ;;  %v3927_v24 = vshll.u32 %v3615_v50, 16 }
 0x368   : > { %v3427_v45 = vadd.f32 %v11766_v13, %v3356_v7  ;;  %v3357_v31 = vadd.f32 %v3273_v2, %v14192_v61 }
 0x369   : > { %v3926_v37 = vrot.slane %v3924_v27, 7  ;;  %v4102_v22 = vrot.slane %v3927_v24, 1 }
 0x36a   : > { %v3508_v29 = vmax.f32 %v3427_v45, 0.0  ;;  %v3428_v59 = vadd.f32 %v11766_v13, %v3357_v31  ;;  %v14195_v45 = vld [vmem:[#allocation79_spill] sm:$0xff] }
 0x36b   : > { %v2988_v28 = vpop.f32.mrb[52].mxu1  ;;  %v3929_v14 = vor.u32 %v3927_v24, %v3926_v37  ;;  %v12025_v40 = vsel %vm805_vm0, %v4101_v41, %v4102_v22 }
 0x36c   : > { %14193 = vst [vmem:[#allocation51_spill] sm:$0xff] %v12025_v40  ;;  %v3580_v3 = vsel %vm3440_vm7, %v3508_v29, 0.0  ;;  %v3509_v36 = vmax.f32 %v3428_v59, 0.0  ;;  %v3278_v50 = vadd.f32 %v11724_v49, %v2988_v28  ;;  %8702 = vmatprep.mubr.bf16.mxu1 %v12025_v40  ;;  %v2990_v7 = vpop.f32.mrb[53].mxu1 }
 0x36d   : > { %v2991_v2 = vpop.f32.mrb[54].mxu1  ;;  %v12032_v33 = vsel %vm478_vm1, %v3918_v26, %v3929_v14  ;;  %v4104_v26 = vor.u32 %v4102_v22, %v3924_v27 }
 0x36e   : > { %14194 = vst [vmem:[#allocation36_spill] sm:$0xff] %v12032_v33  ;;  %v3616_v30 = vpack.c.bf16 %v3509_v36, %v3580_v3  ;;  %v3358_v61 = vadd.f32 %v3278_v50, %v14195_v45  ;;  %4618 = vmatmul.mubr.bf16.gmra.mrb[92].mxu0 %v11936_v52  ;;  %v2993_v24 = vpop.f32.mrb[55].mxu1  ;;  %v12036_v31 = vpack.c.bf16 %v3509_v36, %v3508_v29 }
 0x36f   : > { %7952 = vmatprep.mubr.msk.bf16.mxu0 %vm11204_vm9, %v11940_v57  ;;  %v14200_v24 = vld [vmem:[#allocation7_spill] sm:$0xff] }
 0x370   : > { %14196 = vst [vmem:[#allocation65_spill] sm:$0xff] %v12036_v31  ;;  %v3935_v49 = vshll.u32 %v3616_v30, 16  ;;  %v12042_v41 = vadd.f32 %v11766_v13, %v3358_v61  ;;  %v3932_v59 = vshrl.u32 %v3616_v30, 16  ;;  %v14198_v30 = vmax.f32 %v11946_v16, 0.0 }
 0x372   : > { %v4105_v28 = vrot.slane %v3935_v49, 1  ;;  %v13662_v14 = vmax.f32 %v12042_v41, 0.0  ;;  %v3934_v3 = vrot.slane %v3932_v59, 7  ;;  %v12057_v27 = vpack.c.bf16 %v14101_v34, %v14198_v30 }
 0x373   : > { %v2996_v50 = vpop.f32.mrb[56].mxu1 }
 0x374   : > { %v3582_v36 = vsel %vm3446_vm6, %v13662_v14, 0.0  ;;  %v3286_v29 = vadd.f32 %v11773_v8, %v2996_v50  ;;  %v2998_v7 = vpop.f32.mrb[57].mxu1  ;;  %v12051_v2 = vsel %vm805_vm0, %v4104_v26, %v4105_v28  ;;  %v3937_v45 = vor.u32 %v3935_v49, %v3934_v3  ;;  %14199 = vst [vmem:[#allocation74_spill] sm:$0xff] %v12057_v27 }
 0x375   : > { %14197 = vst [vmem:[#allocation4_spill] sm:$0xff] %v12051_v2  ;;  %v2999_v61 = vpop.f32.mrb[58].mxu1  ;;  %8703 = vmatmul.mubr.bf16.gmra.mrb[116].mxu1 %v12051_v2  ;;  %v3617_v22 = vpack.c.bf16 %v14101_v34, %v3582_v36  ;;  %v14202_v7 = vld [vmem:[#allocation9_spill] sm:$0xff] }
 0x376   : > { %v3360_v57 = vadd.f32 %v3286_v29, %v14200_v24  ;;  %v3289_v14 = vadd.f32 %v11783_v55, %v2999_v61  ;;  %4626 = vmatmul.mubr.bf16.gmra.mrb[96].mxu0 %v11968_v19  ;;  %v3001_v8 = vpop.f32.mrb[59].mxu1  ;;  %v12064_v26 = vsel %vm478_vm1, %v3926_v37, %v3937_v45  ;;  %v4107_v29 = vor.u32 %v4105_v28, %v3932_v59 }
 0x377   : > { %14201 = vst [vmem:[#allocation97_spill] sm:$0xff] %v12064_v26  ;;  %7955 = vmatprep.mubr.msk.bf16.mxu0 %vm11247_vm10, %v12057_v27  ;;  %v3940_v16 = vshrl.u32 %v3617_v22, 16  ;;  %v3943_v49 = vshll.u32 %v3617_v22, 16 }
 0x378   : > { %v3431_v50 = vadd.f32 %v11766_v13, %v3360_v57  ;;  %v3361_v36 = vadd.f32 %v3289_v14, %v14202_v7 }
 0x379   : > { %v3942_v30 = vrot.slane %v3940_v16, 7  ;;  %v4108_v24 = vrot.slane %v3943_v49, 1 }
 0x37a   : > { %v3512_v55 = vmax.f32 %v3431_v50, 0.0  ;;  %v3432_v61 = vadd.f32 %v11766_v13, %v3361_v36  ;;  %v14205_v50 = vld [vmem:[#allocation17_spill] sm:$0xff] }
 0x37b   : > { %v3004_v8 = vpop.f32.mrb[60].mxu1  ;;  %v3945_v19 = vor.u32 %v3943_v49, %v3942_v30  ;;  %v12073_v37 = vsel %vm805_vm0, %v4107_v29, %v4108_v24 }
 0x37c   : > { %14203 = vst [vmem:[#allocation83_spill] sm:$0xff] %v12073_v37  ;;  %v3584_v45 = vsel %vm3440_vm7, %v3512_v55, 0.0  ;;  %v3513_v27 = vmax.f32 %v3432_v61, 0.0  ;;  %v3294_v22 = vadd.f32 %v11770_v5, %v3004_v8  ;;  %8706 = vmatprep.mubr.bf16.mxu1 %v12073_v37  ;;  %v3006_v57 = vpop.f32.mrb[61].mxu1 }
 0x37d   : > { %v3007_v14 = vpop.f32.mrb[62].mxu1  ;;  %v12080_v59 = vsel %vm478_vm1, %v3934_v3, %v3945_v19  ;;  %v4110_v3 = vor.u32 %v4108_v24, %v3940_v16 }
 0x37e   : > { %14204 = vst [vmem:[#allocation99_spill] sm:$0xff] %v12080_v59  ;;  %v3618_v28 = vpack.c.bf16 %v3513_v27, %v3584_v45  ;;  %v3362_v7 = vadd.f32 %v3294_v22, %v14205_v50  ;;  %4634 = vmatmul.mubr.bf16.gmra.mrb[100].mxu0 %v11984_v63  ;;  %v3009_v49 = vpop.f32.mrb[63].mxu1  ;;  %v12084_v36 = vpack.c.bf16 %v3513_v27, %v3512_v55 }
 0x37f   : > { %7958 = vmatprep.mubr.msk.bf16.mxu0 %vm11204_vm9, %v11988_v48  ;;  %v12117_v49 = vrot.slane %v13748_v62, 1 }
 0x380   : > { %14206 = vst [vmem:[#allocation91_spill] sm:$0xff] %v12084_v36  ;;  %v3951_v60 = vshll.u32 %v3618_v28, 16  ;;  %v12090_v5 = vadd.f32 %v11766_v13, %v3362_v7  ;;  %v3948_v29 = vshrl.u32 %v3618_v28, 16  ;;  %v14208_v13 = vmax.f32 %v11994_v4, 0.0 }
 0x381   : > { %14211 = vst [vmem:[#allocation82_spill] sm:$0xff] %v12117_v49 }
 0x382   : > { %v4111_v61 = vrot.slane %v3951_v60, 1  ;;  %v13667_v19 = vmax.f32 %v12090_v5, 0.0  ;;  %v3950_v8 = vrot.slane %v3948_v29, 7  ;;  %v12104_v22 = vpack.c.bf16 %v14101_v34, %v14208_v13 }
 0x384   : > { %v3586_v27 = vsel %vm3446_vm6, %v13667_v19, 0.0  ;;  %v12098_v55 = vsel %vm805_vm0, %v4110_v3, %v4111_v61  ;;  %v3953_v45 = vor.u32 %v3951_v60, %v3950_v8  ;;  %v4113_v4 = vor.u32 %v4111_v61, %v3948_v29 }
 0x385   : > { %14207 = vst [vmem:[#allocation98_spill] sm:$0xff] %v12098_v55  ;;  %8707 = vmatmul.mubr.bf16.gmra.mrb[120].mxu1 %v12098_v55  ;;  %v3619_v57 = vpack.c.bf16 %v14101_v34, %v3586_v27 }
 0x386   : > { %4642 = vmatmul.mubr.bf16.gmra.mrb[104].mxu0 %v12016_v6  ;;  %v12109_v16 = vsel %vm478_vm1, %v3942_v30, %v3953_v45 }
 0x387   : > { %14209 = vst [vmem:[#allocation5_spill] sm:$0xff] %v12109_v16  ;;  %7961 = vmatprep.mubr.msk.bf16.mxu0 %vm11247_vm10, %v12104_v22  ;;  %v3956_v0 = vshrl.u32 %v3619_v57, 16  ;;  %v3959_v24 = vshll.u32 %v3619_v57, 16 }
 0x389   : > { %v4435_v14 = vpop.f32.mrb[0].mxu0  ;;  %v12114_v28 = vrot.slane %v3956_v0, 7  ;;  %v4114_v50 = vrot.slane %v3959_v24, 1 }
 0x38a   : > { %v4437_v7 = vpop.f32.mrb[1].mxu0 }
 0x38b   : > { %14210 = vst [vmem:[#allocation81_spill] sm:$0xff] %v12114_v28  ;;  %v4438_v60 = vpop.f32.mrb[2].mxu0  ;;  %v3961_v3 = vor.u32 %v3959_v24, %v12114_v28  ;;  %v12121_v30 = vsel %vm805_vm0, %v4113_v4, %v4114_v50  ;;  %v4116_v27 = vor.u32 %v4114_v50, %v3956_v0 }
 0x38c   : > { %14212 = vst [vmem:[#allocation53_spill] sm:$0xff] %v12121_v30  ;;  %8710 = vmatprep.mubr.bf16.mxu1 %v12121_v30  ;;  %v4440_v45 = vpop.f32.mrb[3].mxu0 }
 0x38d   : > { %v12126_v13 = vsel %vm805_vm0, %v4116_v27, %v12117_v49  ;;  %v12129_v29 = vsel %vm478_vm1, %v3950_v8, %v3961_v3  ;;  %v14215_v3 = vld [vmem:[#allocation20_spill] sm:$0xff] }
 0x38e   : > { %14213 = vst [vmem:[#allocation61_spill] sm:$0xff] %v12126_v13  ;;  %14214 = vst [vmem:[#allocation8_spill] sm:$0xff] %v12129_v29  ;;  %8711 = vmatmul.mubr.bf16.gmra.mrb[124].mxu1 %v12126_v13  ;;  %4650 = vmatmul.mubr.bf16.gmra.mrb[108].mxu0 %v12032_v33  ;;  %v4015_v45 = vsel %vm10126_vm3, 0, %v14215_v3  ;;  %v14267_v33 = vld [vmem:[#allocation68_spill] sm:$0xff] }
 0x38f   : > { %7964 = vmatprep.mubr.msk.bf16.mxu0 %vm11204_vm9, %v12036_v31  ;;  %v8652_v61 = vpop.f32.mrb[64].mxu1  ;;  %5155 = vmatprep.mubr.bf16.mxu1 %v13748_v62  ;;  %v14217_v31 = vmax.f32 %v12042_v41, 0.0 }
 0x390   : > { %v4724_v57 = vpop.f32.mrb[65].mxu1 }
 0x391   : > { %v12137_v0 = vadd.f32 %v4724_v57, %v4435_v14  ;;  %v4443_v24 = vpop.f32.mrb[4].mxu0  ;;  %v8653_v4 = vpop.f32.mrb[66].mxu1  ;;  %v12151_v14 = vpack.c.bf16 %v14101_v34, %v14217_v31 }
 0x392   : > { %v4445_v50 = vpop.f32.mrb[5].mxu0  ;;  %v4727_v7 = vpop.f32.mrb[67].mxu1  ;;  %v12139_v8 = vadd.f32 %v8652_v61, %v4443_v24  ;;  %v9047_v61 = vld [vmem:[%s13362_s3 + $0x208] sm:$0xff]  }
 0x393   : > { %v12144_v19 = vadd.f32 %v4727_v7, %v4438_v60  ;;  %v4446_v28 = vpop.f32.mrb[6].mxu0  ;;  %14218 = vst [vmem:[#allocation86_spill] sm:$0xff] %v12151_v14 }
 0x394   : > { %v4448_v13 = vpop.f32.mrb[7].mxu0  ;;  %v12146_v30 = vadd.f32 %v8653_v4, %v4446_v28 }
 0x395   : > { %v9052_v13 = vld [vmem:[%s13362_s3 + $0x210] sm:$0xff]  }
 0x396   : > { %5156 = vmatmul.mubr.bf16.vlgmr.msra.gmra.mrb[128].mxu1 %v4015_v45  ;;  %4658 = vmatmul.mubr.bf16.gmra.mrb[112].mxu0 %v12064_v26  ;;  %v14221_v45 = vld [vmem:[#allocation45_spill] sm:$0xff] }
 0x397   : > { %7967 = vmatprep.mubr.msk.bf16.mxu0 %vm11247_vm10, %v12151_v14  ;;  %v8656_v60 = vpop.f32.mrb[68].mxu1  ;;  %5163 = vmatprep.mubr.bf16.mxu1 %v13748_v62 }
 0x398   : > { %v4740_v28 = vpop.f32.mrb[69].mxu1  ;;  %8795 = vmatpush3.bf16.msra.mxu1 %v11871_v58  ;;  %v9057_v58 = vld [vmem:[%s13362_s3 + $0x218] sm:$0xff]  }
 0x399   : > { %v4451_v41 = vpop.f32.mrb[8].mxu0  ;;  %v8657_v31 = vpop.f32.mrb[70].mxu1  ;;  %8796 = vmatprep.subr.bf16.mxu1 %v9047_v61 }
 0x39a   : > { %v4453_v57 = vpop.f32.mrb[9].mxu0  ;;  %v4743_v24 = vpop.f32.mrb[71].mxu1  ;;  %v12165_v4 = vadd.f32 %v4740_v28, %v4451_v41 }
 0x39b   : > { %v4454_v50 = vpop.f32.mrb[10].mxu0 }
 0x39c   : > { %14219 = vst [vmem:[#allocation90_spill] sm:$0xff] %v12165_v4  ;;  %v4456_v7 = vpop.f32.mrb[11].mxu0  ;;  %8797 = vmatpush3.bf16.msra.mxu1 %v9047_v61  ;;  %v12167_v27 = vadd.f32 %v4743_v24, %v4454_v50  ;;  %v14278_v4 = vld [vmem:[#allocation30_spill] sm:$0xff] }
 0x39d   : > { %8798 = vmatprep.subr.bf16.mxu1 %v9052_v13 }
 0x39e   : > { %14220 = vst [vmem:[#allocation66_spill] sm:$0xff] %v12167_v27  ;;  %5164 = vmatmul.mubr.bf16.gmra.mrb[132].mxu1 %v14215_v3  ;;  %4666 = vmatmul.mubr.bf16.gmra.mrb[116].mxu0 %v12080_v59  ;;  %v14268_v27 = vld [vmem:[#allocation39_spill] sm:$0xff] }
 0x39f   : > { %7976 = vmatprep.mubr.msk.bf16.mxu1 %vm11204_vm9, %v14221_v45  ;;  %7970 = vmatprep.mubr.msk.bf16.mxu0 %vm11204_vm9, %v12084_v36  ;;  %v8660_v61 = vpop.f32.mrb[72].mxu1  ;;  %v14224_v45 = vmax.f32 %v12090_v5, 0.0  ;;  %v14226_v36 = vld [vmem:[#allocation21_spill] sm:$0xff] }
 0x3a0   : > { %v4756_v28 = vpop.f32.mrb[73].mxu1  ;;  %8799 = vmatpush3.bf16.msra.mxu1 %v9052_v13  ;;  %v14227_v13 = vld [vmem:[#allocation47_spill] sm:$0xff] }
 0x3a1   : > { %v4459_v41 = vpop.f32.mrb[12].mxu0  ;;  %v8661_v57 = vpop.f32.mrb[74].mxu1  ;;  %8800 = vmatprep.subr.bf16.mxu1 %v9057_v58  ;;  %v12187_v26 = vpack.c.bf16 %v14101_v34, %v14224_v45 }
 0x3a2   : > { %v4461_v24 = vpop.f32.mrb[13].mxu0  ;;  %v4759_v50 = vpop.f32.mrb[75].mxu1  ;;  %v12180_v7 = vadd.f32 %v8656_v60, %v4459_v41 }
 0x3a3   : > { %v4462_v3 = vpop.f32.mrb[14].mxu0  ;;  %14225 = vst [vmem:[#allocation70_spill] sm:$0xff] %v12187_v26 }
 0x3a4   : > { %14222 = vst [vmem:[#allocation89_spill] sm:$0xff] %v12180_v7  ;;  %v4464_v59 = vpop.f32.mrb[15].mxu0  ;;  %8801 = vmatpush3.bf16.msra.mxu1 %v9057_v58  ;;  %v12182_v14 = vadd.f32 %v8657_v31, %v4462_v3  ;;  %v14266_v7 = vld [vmem:[#allocation33_spill] sm:$0xff] }
 0x3a6   : > { %14223 = vst [vmem:[#allocation92_spill] sm:$0xff] %v12182_v14  ;;  %5172 = vmatmul.mubr.bf16.gmra.mrb[136].mxu1 %v14226_v36  ;;  %4674 = vmatmul.mubr.bf16.gmra.mrb[120].mxu0 %v12109_v16 }
 0x3a7   : > { %7979 = vmatprep.mubr.msk.bf16.mxu1 %vm11247_vm10, %v14227_v13  ;;  %7973 = vmatprep.mubr.msk.bf16.mxu0 %vm11247_vm10, %v12187_v26 }
 0x3a8   : > { %v8664_v59 = vpop.f32.mrb[76].mxu1 }
 0x3a9   : > { %v4772_v3 = vpop.f32.mrb[77].mxu1  ;;  %v4467_v60 = vpop.f32.mrb[16].mxu0 }
 0x3aa   : > { %v8665_v31 = vpop.f32.mrb[78].mxu1  ;;  %v4469_v5 = vpop.f32.mrb[17].mxu0  ;;  %v12197_v58 = vadd.f32 %v4756_v28, %v4467_v60 }
 0x3ab   : > { %v4775_v34 = vpop.f32.mrb[79].mxu1  ;;  %v4470_v41 = vpop.f32.mrb[18].mxu0 }
 0x3ac   : > { %14228 = vst [vmem:[#allocation10_spill] sm:$0xff] %v12197_v58  ;;  %v4472_v36 = vpop.f32.mrb[19].mxu0  ;;  %v12199_v24 = vadd.f32 %v4759_v50, %v4470_v41  ;;  %v9043_v50 = vld [vmem:[%s13362_s3 + $0x180] sm:$0xff]   ;;  %v14255_v58 = vld [vmem:[#allocation78_spill] sm:$0xff] }
 0x3ae   : > { %14229 = vst [vmem:[#allocation75_spill] sm:$0xff] %v12199_v24  ;;  %5180 = vmatmul.mubr.bf16.gmra.mrb[140].mxu1 %v11252_v12  ;;  %4682 = vmatmul.mubr.bf16.gmra.mrb[124].mxu0 %v12129_v29  ;;  %v14232_v12 = vld [vmem:[#allocation19_spill] sm:$0xff]  ;;  %v14254_v24 = vld [vmem:[#allocation56_spill] sm:$0xff] }
 0x3af   : > { %7982 = vmatprep.mubr.msk.bf16.mxu1 %vm11204_vm9, %v11271_v9  ;;  %8730 = vmatprep.mubr.bf16.mxu0 %v12117_v49  ;;  %v4022_v36 = vsel %vm805_vm0, %v12117_v49, %v14232_v12 }
 0x3b1   : > { %v4475_v45 = vpop.f32.mrb[20].mxu0 }
 0x3b2   : > { %v4477_v13 = vpop.f32.mrb[21].mxu0  ;;  %v12207_v5 = vadd.f32 %v8660_v61, %v4475_v45  ;;  %v9062_v61 = vld [vmem:[%s13362_s3 + $0x220] sm:$0xff]   ;;  %v14233_v45 = vld [vmem:[#allocation13_spill] sm:$0xff] }
 0x3b3   : > { %v4478_v28 = vpop.f32.mrb[22].mxu0  ;;  %8802 = vmatprep.subr.bf16.mxu1 %v9062_v61 }
 0x3b4   : > { %14230 = vst [vmem:[#allocation14_spill] sm:$0xff] %v12207_v5  ;;  %v4480_v60 = vpop.f32.mrb[23].mxu0  ;;  %v12212_v41 = vadd.f32 %v8661_v57, %v4478_v28  ;;  %v9044_v57 = vld [vmem:[%s13362_s3 + $0x188] sm:$0xff]   ;;  %8803 = vmatpush3.bf16.msra.mxu1 %v9062_v61 }
 0x3b6   : > { %14231 = vst [vmem:[#allocation11_spill] sm:$0xff] %v12212_v41  ;;  %5188 = vmatmul.mubr.bf16.gmra.mrb[144].mxu1 %v11309_v38  ;;  %8731 = vmatmul.mubr.bf16.vlgmr.msra.gmra.mrb[128].mxu0 %v4022_v36  ;;  %v14244_v41 = vld [vmem:[#allocation55_spill] sm:$0xff] }
 0x3b7   : > { %7985 = vmatprep.mubr.msk.bf16.mxu1 %vm11247_vm10, %v11356_v35  ;;  %8734 = vmatprep.mubr.bf16.mxu0 %v14233_v45 }
 0x3b8   : > { %v12225_v13 = vpop.f32.mrb[80].mxu1  ;;  %5895 = vmatpush1.bf16.msra.mxu0 %v9043_v50  ;;  %v9045_v50 = vld [vmem:[%s13362_s3 + $0x190] sm:$0xff]  }
 0x3b9   : > { %v4788_v28 = vpop.f32.mrb[81].mxu1  ;;  %v4483_v60 = vpop.f32.mrb[24].mxu0  ;;  %5896 = vmatprep.subr.bf16.mxu0 %v13748_v62 }
 0x3ba   : > { %v8669_v12 = vpop.f32.mrb[82].mxu1  ;;  %v4485_v36 = vpop.f32.mrb[25].mxu0  ;;  %v12231_v29 = vadd.f32 %v4772_v3, %v4483_v60  ;;  %v9046_v3 = vld [vmem:[%s13362_s3 + $0x198] sm:$0xff]  }
 0x3bb   : > { %v4791_v26 = vpop.f32.mrb[83].mxu1  ;;  %v4486_v16 = vpop.f32.mrb[26].mxu0 }
 0x3bc   : > { %14234 = vst [vmem:[#allocation15_spill] sm:$0xff] %v12231_v29  ;;  %v4488_v45 = vpop.f32.mrb[27].mxu0  ;;  %5897 = vmatpush1.bf16.msra.mxu0 %v9044_v57  ;;  %v12236_v49 = vadd.f32 %v4775_v34, %v4486_v16 }
 0x3bd   : > { %5898 = vmatprep.subr.bf16.mxu0 %v13748_v62  ;;  %v14238_v45 = vld [vmem:[#allocation52_spill] sm:$0xff] }
 0x3be   : > { %14235 = vst [vmem:[#allocation84_spill] sm:$0xff] %v12236_v49  ;;  %5196 = vmatmul.mubr.bf16.gmra.mrb[148].mxu1 %v11329_v56  ;;  %8735 = vmatmul.mubr.bf16.gmra.mrb[132].mxu0 %v11294_v51  ;;  %v9048_v51 = vld [vmem:[%s13362_s3 + $0x1a0] sm:$0xff]  }
 0x3bf   : > { %7988 = vmatprep.mubr.msk.bf16.mxu1 %vm11204_vm9, %v11337_v43  ;;  %8738 = vmatprep.mubr.bf16.mxu0 %v11305_v15 }
 0x3c0   : > { %5899 = vmatpush1.bf16.msra.mxu0 %v9045_v50 }
 0x3c1   : > { %v4491_v61 = vpop.f32.mrb[28].mxu0  ;;  %5900 = vmatprep.subr.bf16.mxu0 %v13748_v62 }
 0x3c2   : > { %v4493_v16 = vpop.f32.mrb[29].mxu0  ;;  %v12249_v34 = vadd.f32 %v8664_v59, %v4491_v61  ;;  %v14239_v59 = vld [vmem:[#allocation22_spill] sm:$0xff] }
 0x3c3   : > { %v4494_v57 = vpop.f32.mrb[30].mxu0 }
 0x3c4   : > { %14236 = vst [vmem:[#allocation79_spill] sm:$0xff] %v12249_v34  ;;  %v4496_v60 = vpop.f32.mrb[31].mxu0  ;;  %5901 = vmatpush1.bf16.msra.mxu0 %v9046_v3  ;;  %v12254_v36 = vadd.f32 %v8665_v31, %v4494_v57  ;;  %v9049_v31 = vld [vmem:[%s13362_s3 + $0x1a8] sm:$0xff]  }
 0x3c5   : > { %5902 = vmatprep.subr.bf16.mxu0 %v13748_v62 }
 0x3c6   : > { %14237 = vst [vmem:[#allocation7_spill] sm:$0xff] %v12254_v36  ;;  %5204 = vmatmul.mubr.bf16.gmra.mrb[152].mxu1 %v11363_v18  ;;  %8739 = vmatmul.mubr.bf16.gmra.mrb[136].mxu0 %v14238_v45  ;;  %v14243_v45 = vld [vmem:[#allocation23_spill] sm:$0xff] }
 0x3c7   : > { %7991 = vmatprep.mubr.msk.bf16.mxu1 %vm11247_vm10, %v11449_v1  ;;  %8742 = vmatprep.mubr.bf16.mxu0 %v14239_v59  ;;  %v14242_v59 = vld [vmem:[#allocation12_spill] sm:$0xff] }
 0x3c8   : > { %v12263_v50 = vpop.f32.mrb[84].mxu1  ;;  %5903 = vmatpush1.bf16.msra.mxu0 %v9048_v51  ;;  %v9050_v51 = vld [vmem:[%s13362_s3 + $0x1b0] sm:$0xff]  }
 0x3c9   : > { %v4804_v3 = vpop.f32.mrb[85].mxu1  ;;  %v4499_v61 = vpop.f32.mrb[32].mxu0  ;;  %5904 = vmatprep.subr.bf16.mxu0 %v13748_v62 }
 0x3ca   : > { %v12269_v16 = vpop.f32.mrb[86].mxu1  ;;  %v4501_v57 = vpop.f32.mrb[33].mxu0  ;;  %v12271_v60 = vadd.f32 %v4788_v28, %v4499_v61  ;;  %v14245_v28 = vld [vmem:[#allocation25_spill] sm:$0xff] }
 0x3cb   : > { %v4807_v36 = vpop.f32.mrb[87].mxu1  ;;  %v4502_v34 = vpop.f32.mrb[34].mxu0 }
 0x3cc   : > { %14240 = vst [vmem:[#allocation9_spill] sm:$0xff] %v12271_v60  ;;  %v4504_v49 = vpop.f32.mrb[35].mxu0  ;;  %5905 = vmatpush1.bf16.msra.mxu0 %v9049_v31  ;;  %v12276_v29 = vadd.f32 %v4791_v26, %v4502_v34 }
 0x3cd   : > { %5906 = vmatprep.subr.bf16.mxu0 %v13748_v62  ;;  %v9051_v49 = vld [vmem:[%s13362_s3 + $0x1b8] sm:$0xff]  }
 0x3ce   : > { %14241 = vst [vmem:[#allocation17_spill] sm:$0xff] %v12276_v29  ;;  %5212 = vmatmul.mubr.bf16.gmra.mrb[156].mxu1 %v14242_v59  ;;  %8743 = vmatmul.mubr.bf16.gmra.mrb[140].mxu0 %v14243_v45  ;;  %v9053_v29 = vld [vmem:[%s13362_s3 + $0x1c0] sm:$0xff]  }
 0x3cf   : > { %7994 = vmatprep.mubr.msk.bf16.mxu1 %vm11204_vm9, %v14244_v41  ;;  %8746 = vmatprep.mubr.bf16.mxu0 %v14245_v28  ;;  %v14249_v28 = vld [vmem:[#allocation18_spill] sm:$0xff] }
 0x3d0   : > { %5907 = vmatpush1.bf16.msra.mxu0 %v9050_v51  ;;  %v14248_v51 = vld [vmem:[#allocation26_spill] sm:$0xff] }
 0x3d1   : > { %v4507_v31 = vpop.f32.mrb[36].mxu0  ;;  %5908 = vmatprep.subr.bf16.mxu0 %v13748_v62 }
 0x3d2   : > { %v4509_v26 = vpop.f32.mrb[37].mxu0  ;;  %v12290_v34 = vadd.f32 %v12225_v13, %v4507_v31  ;;  %v9063_v13 = vld [vmem:[%s13362_s3 + $0x228] sm:$0xff]   ;;  %v14250_v31 = vld [vmem:[#allocation58_spill] sm:$0xff] }
 0x3d3   : > { %v4510_v61 = vpop.f32.mrb[38].mxu0  ;;  %8804 = vmatprep.subr.bf16.mxu1 %v9063_v13 }
 0x3d4   : > { %14246 = vst [vmem:[#allocation96_spill] sm:$0xff] %v12290_v34  ;;  %v4512_v57 = vpop.f32.mrb[39].mxu0  ;;  %5909 = vmatpush1.bf16.msra.mxu0 %v9051_v49  ;;  %v12295_v60 = vadd.f32 %v8669_v12, %v4510_v61  ;;  %v14251_v49 = vld [vmem:[#allocation28_spill] sm:$0xff]  ;;  %8805 = vmatpush3.bf16.msra.mxu1 %v9063_v13 }
 0x3d5   : > { %5910 = vmatprep.subr.bf16.mxu0 %v13748_v62  ;;  %v9054_v12 = vld [vmem:[%s13362_s3 + $0x1c8] sm:$0xff]  }
 0x3d6   : > { %14247 = vst [vmem:[#allocation45_spill] sm:$0xff] %v12295_v60  ;;  %5220 = vmatmul.mubr.bf16.gmra.mrb[160].mxu1 %v14248_v51  ;;  %8747 = vmatmul.mubr.bf16.gmra.mrb[144].mxu0 %v14249_v28  ;;  %v14256_v13 = vld [vmem:[#allocation24_spill] sm:$0xff] }
 0x3d7   : > { %7997 = vmatprep.mubr.msk.bf16.mxu1 %vm11247_vm10, %v14250_v31  ;;  %8750 = vmatprep.mubr.bf16.mxu0 %v14251_v49 }
 0x3d8   : > { %v12307_v26 = vpop.f32.mrb[88].mxu1  ;;  %5911 = vmatpush1.bf16.msra.mxu0 %v9053_v29  ;;  %v9055_v29 = vld [vmem:[%s13362_s3 + $0x1d0] sm:$0xff]  }
 0x3d9   : > { %v4820_v61 = vpop.f32.mrb[89].mxu1  ;;  %v4515_v57 = vpop.f32.mrb[40].mxu0  ;;  %5912 = vmatprep.subr.bf16.mxu0 %v13748_v62 }
 0x3da   : > { %v8677_v60 = vpop.f32.mrb[90].mxu1  ;;  %v4517_v34 = vpop.f32.mrb[41].mxu0  ;;  %v12313_v28 = vadd.f32 %v4804_v3, %v4515_v57  ;;  %v14257_v3 = vld [vmem:[#allocation32_spill] sm:$0xff] }
 0x3db   : > { %v4823_v45 = vpop.f32.mrb[91].mxu1  ;;  %v4518_v5 = vpop.f32.mrb[42].mxu0  ;;  %v9056_v34 = vld [vmem:[%s13362_s3 + $0x1d8] sm:$0xff]  }
 0x3dc   : > { %14252 = vst [vmem:[#allocation21_spill] sm:$0xff] %v12313_v28  ;;  %v4520_v49 = vpop.f32.mrb[43].mxu0  ;;  %5913 = vmatpush1.bf16.msra.mxu0 %v9054_v12  ;;  %v12318_v15 = vadd.f32 %v4807_v36, %v4518_v5  ;;  %v14260_v28 = vld [vmem:[#allocation57_spill] sm:$0xff] }
 0x3dd   : > { %5914 = vmatprep.subr.bf16.mxu0 %v13748_v62 }
 0x3de   : > { %14253 = vst [vmem:[#allocation47_spill] sm:$0xff] %v12318_v15  ;;  %5228 = vmatmul.mubr.bf16.gmra.mrb[164].mxu1 %v14254_v24  ;;  %8751 = vmatmul.mubr.bf16.gmra.mrb[148].mxu0 %v14255_v58  ;;  %v9058_v15 = vld [vmem:[%s13362_s3 + $0x1e0] sm:$0xff]  }
 0x3df   : > { %8000 = vmatprep.mubr.msk.bf16.mxu1 %vm11204_vm9, %v14256_v13  ;;  %8754 = vmatprep.mubr.bf16.mxu0 %v14257_v3  ;;  %v14261_v3 = vld [vmem:[#allocation49_spill] sm:$0xff] }
 0x3e0   : > { %5915 = vmatpush1.bf16.msra.mxu0 %v9055_v29 }
 0x3e1   : > { %v4523_v49 = vpop.f32.mrb[44].mxu0  ;;  %5916 = vmatprep.subr.bf16.mxu0 %v13748_v62 }
 0x3e2   : > { %v4525_v5 = vpop.f32.mrb[45].mxu0  ;;  %v12332_v36 = vadd.f32 %v12263_v50, %v4523_v49  ;;  %v14263_v50 = vld [vmem:[#allocation87_spill] sm:$0xff]  ;;  %v9059_v49 = vld [vmem:[%s13362_s3 + $0x1e8] sm:$0xff]  }
 0x3e3   : > { %v4526_v12 = vpop.f32.mrb[46].mxu0  ;;  %v14262_v5 = vld [vmem:[#allocation42_spill] sm:$0xff] }
 0x3e4   : > { %14258 = vst [vmem:[#allocation19_spill] sm:$0xff] %v12332_v36  ;;  %v4528_v57 = vpop.f32.mrb[47].mxu0  ;;  %5917 = vmatpush1.bf16.msra.mxu0 %v9056_v34  ;;  %v12338_v29 = vadd.f32 %v12269_v16, %v4526_v12 }
 0x3e5   : > { %5918 = vmatprep.subr.bf16.mxu0 %v13748_v62 }
 0x3e6   : > { %14259 = vst [vmem:[#allocation13_spill] sm:$0xff] %v12338_v29  ;;  %5236 = vmatmul.mubr.bf16.gmra.mrb[168].mxu1 %v14260_v28  ;;  %8755 = vmatmul.mubr.bf16.gmra.mrb[152].mxu0 %v14261_v3 }
 0x3e7   : > { %8003 = vmatprep.mubr.msk.bf16.mxu1 %vm11247_vm10, %v14262_v5  ;;  %8758 = vmatprep.mubr.bf16.mxu0 %v14263_v50 }
 0x3e8   : > { %v8680_v34 = vpop.f32.mrb[92].mxu1  ;;  %5919 = vmatpush1.bf16.msra.mxu0 %v9058_v15  ;;  %v9060_v15 = vld [vmem:[%s13362_s3 + $0x1f0] sm:$0xff]  }
 0x3e9   : > { %v4836_v16 = vpop.f32.mrb[93].mxu1  ;;  %v4531_v12 = vpop.f32.mrb[48].mxu0  ;;  %5920 = vmatprep.subr.bf16.mxu0 %v13748_v62 }
 0x3ea   : > { %v8681_v57 = vpop.f32.mrb[94].mxu1  ;;  %v4533_v29 = vpop.f32.mrb[49].mxu0  ;;  %v12351_v36 = vadd.f32 %v4820_v61, %v4531_v12  ;;  %v14269_v61 = vld [vmem:[#allocation62_spill] sm:$0xff] }
 0x3eb   : > { %v4839_v3 = vpop.f32.mrb[95].mxu1  ;;  %v4534_v58 = vpop.f32.mrb[50].mxu0 }
 0x3ec   : > { %14264 = vst [vmem:[#allocation12_spill] sm:$0xff] %v12351_v36  ;;  %v4536_v14 = vpop.f32.mrb[51].mxu0  ;;  %5921 = vmatpush1.bf16.msra.mxu0 %v9059_v49  ;;  %v12356_v50 = vadd.f32 %v4823_v45, %v4534_v58  ;;  %v14272_v36 = vld [vmem:[#allocation29_spill] sm:$0xff] }
 0x3ed   : > { %5922 = vmatprep.subr.bf16.mxu0 %v13748_v62  ;;  %v9061_v14 = vld [vmem:[%s13362_s3 + $0x1f8] sm:$0xff]  }
 0x3ee   : > { %14265 = vst [vmem:[#allocation55_spill] sm:$0xff] %v12356_v50  ;;  %5244 = vmatmul.mubr.bf16.gmra.mrb[172].mxu1 %v14266_v7  ;;  %8759 = vmatmul.mubr.bf16.gmra.mrb[156].mxu0 %v14267_v33  ;;  %v14274_v33 = vld [vmem:[#allocation54_spill] sm:$0xff] }
 0x3ef   : > { %8006 = vmatprep.mubr.msk.bf16.mxu1 %vm11204_vm9, %v14268_v27  ;;  %8762 = vmatprep.mubr.bf16.mxu0 %v14269_v61  ;;  %v14273_v61 = vld [vmem:[#allocation72_spill] sm:$0xff] }
 0x3f0   : > { %5923 = vmatpush1.bf16.msra.mxu0 %v9060_v15  ;;  %v9064_v15 = vld [vmem:[%s13362_s3 + $0x230] sm:$0xff]  }
 0x3f1   : > { %v4539_v29 = vpop.f32.mrb[52].mxu0  ;;  %5924 = vmatprep.subr.bf16.mxu0 %v13748_v62  ;;  %8806 = vmatprep.subr.bf16.mxu1 %v9064_v15 }
 0x3f2   : > { %v4541_v58 = vpop.f32.mrb[53].mxu0  ;;  %v12370_v45 = vadd.f32 %v12307_v26, %v4539_v29  ;;  %8807 = vmatpush3.bf16.msra.mxu1 %v9064_v15 }
 0x3f3   : > { %v4542_v49 = vpop.f32.mrb[54].mxu0 }
 0x3f4   : > { %14270 = vst [vmem:[#allocation26_spill] sm:$0xff] %v12370_v45  ;;  %v4544_v12 = vpop.f32.mrb[55].mxu0  ;;  %5925 = vmatpush1.bf16.msra.mxu0 %v9061_v14  ;;  %v12372_v50 = vadd.f32 %v8677_v60, %v4542_v49 }
 0x3f6   : > { %14271 = vst [vmem:[#allocation58_spill] sm:$0xff] %v12372_v50  ;;  %5252 = vmatmul.mubr.bf16.gmra.mrb[176].mxu1 %v14272_v36  ;;  %8763 = vmatmul.mubr.bf16.gmra.mrb[160].mxu0 %v14273_v61  ;;  %v14277_v61 = vld [vmem:[#allocation59_spill] sm:$0xff] }
 0x3f7   : > { %8009 = vmatprep.mubr.msk.bf16.mxu1 %vm11247_vm10, %v14274_v33  ;;  %8766 = vmatprep.mubr.bf16.mxu0 %v11777_v44 }
 0x3f8   : > { %v8684_v26 = vpop.f32.mrb[96].mxu1 }
 0x3f9   : > { %v4852_v29 = vpop.f32.mrb[97].mxu1  ;;  %v4547_v14 = vpop.f32.mrb[56].mxu0 }
 0x3fa   : > { %v8685_v60 = vpop.f32.mrb[98].mxu1  ;;  %v4549_v58 = vpop.f32.mrb[57].mxu0  ;;  %v12383_v49 = vadd.f32 %v4836_v16, %v4547_v14 }
 0x3fb   : > { %v4855_v12 = vpop.f32.mrb[99].mxu1  ;;  %v4550_v62 = vpop.f32.mrb[58].mxu0 }
 0x3fc   : > { %14275 = vst [vmem:[#allocation56_spill] sm:$0xff] %v12383_v49  ;;  %v4552_v50 = vpop.f32.mrb[59].mxu0  ;;  %v12385_v45 = vadd.f32 %v4839_v3, %v4550_v62  ;;  %v14281_v62 = vld [vmem:[#allocation48_spill] sm:$0xff]  ;;  %v14282_v3 = vld [vmem:[#allocation69_spill] sm:$0xff] }
 0x3fe   : > { %14276 = vst [vmem:[#allocation24_spill] sm:$0xff] %v12385_v45  ;;  %5260 = vmatmul.mubr.bf16.gmra.mrb[180].mxu1 %v14277_v61  ;;  %8767 = vmatmul.mubr.bf16.gmra.mrb[164].mxu0 %v11805_v20 }
 0x3ff   : > { %8012 = vmatprep.mubr.msk.bf16.mxu1 %vm11204_vm9, %v14278_v4  ;;  %8770 = vmatprep.mubr.bf16.mxu0 %v11827_v39 }
 0x401   : > { %v4555_v15 = vpop.f32.mrb[60].mxu0 }
 0x402   : > { %v4557_v44 = vpop.f32.mrb[61].mxu0  ;;  %v12393_v58 = vadd.f32 %v8680_v34, %v4555_v15 }
 0x403   : > { %v4558_v16 = vpop.f32.mrb[62].mxu0 }
 0x404   : > { %14279 = vst [vmem:[#allocation57_spill] sm:$0xff] %v12393_v58  ;;  %v4560_v14 = vpop.f32.mrb[63].mxu0  ;;  %v12395_v49 = vadd.f32 %v8681_v57, %v4558_v16  ;;  %v14285_v58 = vld [vmem:[#allocation60_spill] sm:$0xff] }
 0x406   : > { %14280 = vst [vmem:[#allocation42_spill] sm:$0xff] %v12395_v49  ;;  %5268 = vmatmul.mubr.bf16.gmra.mrb[184].mxu1 %v14281_v62  ;;  %8771 = vmatmul.mubr.bf16.gmra.mrb[168].mxu0 %v11853_v54  ;;  %v14286_v54 = vld [vmem:[#allocation31_spill] sm:$0xff] }
 0x407   : > { %8015 = vmatprep.mubr.msk.bf16.mxu1 %vm11247_vm10, %v14282_v3  ;;  %8774 = vmatprep.mubr.bf16.mxu0 %v11881_v17 }
 0x408   : > { %v8688_v50 = vpop.f32.mrb[100].mxu1 }
 0x409   : > { %v4868_v45 = vpop.f32.mrb[101].mxu1  ;;  %v4563_v39 = vpop.f32.mrb[64].mxu0 }
 0x40a   : > { %v12403_v44 = vadd.f32 %v4852_v29, %v4563_v39  ;;  %v8689_v34 = vpop.f32.mrb[102].mxu1  ;;  %v4565_v15 = vpop.f32.mrb[65].mxu0 }
 0x40b   : > { %v4871_v14 = vpop.f32.mrb[103].mxu1  ;;  %v4566_v57 = vpop.f32.mrb[66].mxu0 }
 0x40c   : > { %14283 = vst [vmem:[#allocation33_spill] sm:$0xff] %v12403_v44  ;;  %v12405_v16 = vadd.f32 %v4855_v12, %v4566_v57  ;;  %v4568_v49 = vpop.f32.mrb[67].mxu0  ;;  %v9065_v12 = vld [vmem:[%s13362_s3 + $0x238] sm:$0xff]   ;;  %v14290_v44 = vld [vmem:[#allocation35_spill] sm:$0xff] }
 0x40d   : > { %8808 = vmatprep.subr.bf16.mxu1 %v9065_v12 }
 0x40e   : > { %14284 = vst [vmem:[#allocation39_spill] sm:$0xff] %v12405_v16  ;;  %5276 = vmatmul.mubr.bf16.gmra.mrb[188].mxu1 %v14285_v58  ;;  %8775 = vmatmul.mubr.bf16.gmra.mrb[172].mxu0 %v11907_v47  ;;  %v14289_v16 = vld [vmem:[#allocation64_spill] sm:$0xff] }
 0x40f   : > { %8018 = vmatprep.mubr.msk.bf16.mxu1 %vm11204_vm9, %v14286_v54  ;;  %8778 = vmatprep.mubr.bf16.mxu0 %v11929_v53 }
 0x410   : > { %8809 = vmatpush3.bf16.msra.mxu1 %v9065_v12 }
 0x411   : > { %v4571_v17 = vpop.f32.mrb[68].mxu0 }
 0x412   : > { %v12413_v39 = vadd.f32 %v8684_v26, %v4571_v17  ;;  %v4573_v29 = vpop.f32.mrb[69].mxu0 }
 0x413   : > { %v4574_v15 = vpop.f32.mrb[70].mxu0 }
 0x414   : > { %14287 = vst [vmem:[#allocation29_spill] sm:$0xff] %v12413_v39  ;;  %v12418_v49 = vadd.f32 %v8685_v60, %v4574_v15  ;;  %v4576_v57 = vpop.f32.mrb[71].mxu0 }
 0x416   : > { %14288 = vst [vmem:[#allocation54_spill] sm:$0xff] %v12418_v49  ;;  %5284 = vmatmul.mubr.bf16.gmra.mrb[192].mxu1 %v14289_v16  ;;  %8779 = vmatmul.mubr.bf16.gmra.mrb[176].mxu0 %v11955_v21  ;;  %v14293_v21 = vld [vmem:[#allocation34_spill] sm:$0xff] }
 0x417   : > { %8021 = vmatprep.mubr.msk.bf16.mxu1 %vm11247_vm10, %v14290_v44  ;;  %8782 = vmatprep.mubr.bf16.mxu0 %v11977_v42 }
 0x418   : > { %v8692_v17 = vpop.f32.mrb[104].mxu1 }
 0x419   : > { %v4884_v26 = vpop.f32.mrb[105].mxu1  ;;  %v4579_v29 = vpop.f32.mrb[72].mxu0 }
 0x41a   : > { %v12426_v39 = vadd.f32 %v4868_v45, %v4579_v29  ;;  %v8693_v60 = vpop.f32.mrb[106].mxu1  ;;  %v4581_v15 = vpop.f32.mrb[73].mxu0 }
 0x41b   : > { %v4887_v57 = vpop.f32.mrb[107].mxu1  ;;  %v4582_v49 = vpop.f32.mrb[74].mxu0 }
 0x41c   : > { %14291 = vst [vmem:[#allocation59_spill] sm:$0xff] %v12426_v39  ;;  %v12428_v12 = vadd.f32 %v4871_v14, %v4582_v49  ;;  %v4584_v53 = vpop.f32.mrb[75].mxu0  ;;  %v14296_v49 = vld [vmem:[#allocation46_spill] sm:$0xff] }
 0x41d   : > { %v14297_v53 = vld [vmem:[#allocation37_spill] sm:$0xff] }
 0x41e   : > { %14292 = vst [vmem:[#allocation30_spill] sm:$0xff] %v12428_v12  ;;  %5292 = vmatmul.mubr.bf16.gmra.mrb[196].mxu1 %v11708_v11  ;;  %8783 = vmatmul.mubr.bf16.gmra.mrb[180].mxu0 %v12003_v46 }
 0x41f   : > { %8024 = vmatprep.mubr.msk.bf16.mxu1 %vm11204_vm9, %v14293_v21  ;;  %8786 = vmatprep.mubr.bf16.mxu0 %v12025_v40 }
 0x421   : > { %v4587_v42 = vpop.f32.mrb[76].mxu0 }
 0x422   : > { %v12436_v45 = vadd.f32 %v8688_v50, %v4587_v42  ;;  %v4589_v29 = vpop.f32.mrb[77].mxu0 }
 0x423   : > { %v4590_v15 = vpop.f32.mrb[78].mxu0 }
 0x424   : > { %14294 = vst [vmem:[#allocation48_spill] sm:$0xff] %v12436_v45  ;;  %v12438_v39 = vadd.f32 %v8689_v34, %v4590_v15  ;;  %v4592_v14 = vpop.f32.mrb[79].mxu0  ;;  %v14300_v45 = vld [vmem:[#allocation63_spill] sm:$0xff] }
 0x426   : > { %14295 = vst [vmem:[#allocation69_spill] sm:$0xff] %v12438_v39  ;;  %5300 = vmatmul.mubr.bf16.gmra.mrb[200].mxu1 %v14296_v49  ;;  %8787 = vmatmul.mubr.bf16.gmra.mrb[184].mxu0 %v12051_v2  ;;  %v14301_v2 = vld [vmem:[#allocation94_spill] sm:$0xff] }
 0x427   : > { %8027 = vmatprep.mubr.msk.bf16.mxu1 %vm11247_vm10, %v14297_v53  ;;  %8790 = vmatprep.mubr.bf16.mxu0 %v12073_v37 }
 0x428   : > { %v8696_v12 = vpop.f32.mrb[108].mxu1 }
 0x429   : > { %v4900_v40 = vpop.f32.mrb[109].mxu1  ;;  %v4595_v46 = vpop.f32.mrb[80].mxu0 }
 0x42a   : > { %v12446_v42 = vadd.f32 %v4884_v26, %v4595_v46  ;;  %v8697_v50 = vpop.f32.mrb[110].mxu1  ;;  %v4597_v29 = vpop.f32.mrb[81].mxu0 }
 0x42b   : > { %v4903_v34 = vpop.f32.mrb[111].mxu1  ;;  %v4598_v15 = vpop.f32.mrb[82].mxu0 }
 0x42c   : > { %14298 = vst [vmem:[#allocation60_spill] sm:$0xff] %v12446_v42  ;;  %v12448_v14 = vadd.f32 %v4887_v57, %v4598_v15  ;;  %v4600_v39 = vpop.f32.mrb[83].mxu0  ;;  %v14304_v15 = vld [vmem:[#allocation73_spill] sm:$0xff] }
 0x42e   : > { %14299 = vst [vmem:[#allocation31_spill] sm:$0xff] %v12448_v14  ;;  %5308 = vmatmul.mubr.bf16.gmra.mrb[204].mxu1 %v14300_v45  ;;  %8791 = vmatmul.mubr.bf16.gmra.mrb[188].mxu0 %v12098_v55  ;;  %v14305_v14 = vld [vmem:[#allocation40_spill] sm:$0xff]  ;;  %v14308_v55 = vld [vmem:[#allocation95_spill] sm:$0xff] }
 0x42f   : > { %8030 = vmatprep.mubr.msk.bf16.mxu1 %vm11204_vm9, %v14301_v2  ;;  %8066 = vmatprep.mubr.msk.bf16.mxu0 %vm11204_vm9, %v11271_v9 }
 0x431   : > { %v4603_v46 = vpop.f32.mrb[84].mxu0 }
 0x432   : > { %v12458_v26 = vadd.f32 %v8692_v17, %v4603_v46  ;;  %v4605_v29 = vpop.f32.mrb[85].mxu0 }
 0x433   : > { %v4606_v42 = vpop.f32.mrb[86].mxu0 }
 0x434   : > { %14302 = vst [vmem:[#allocation64_spill] sm:$0xff] %v12458_v26  ;;  %v12460_v57 = vadd.f32 %v8693_v60, %v4606_v42  ;;  %v4608_v39 = vpop.f32.mrb[87].mxu0 }
 0x436   : > { %14303 = vst [vmem:[#allocation35_spill] sm:$0xff] %v12460_v57  ;;  %5316 = vmatmul.mubr.bf16.gmra.mrb[208].mxu1 %v14304_v15  ;;  %5927 = vmatmul.mubr.bf16.vlgmr.msra.gmra.mrb[192].mxu0 %v11309_v38 }
 0x437   : > { %8033 = vmatprep.mubr.msk.bf16.mxu1 %vm11247_vm10, %v14305_v14  ;;  %8069 = vmatprep.mubr.msk.bf16.mxu0 %vm11247_vm10, %v11356_v35 }
 0x438   : > { %v8700_v9 = vpop.f32.mrb[112].mxu1 }
 0x439   : > { %v4916_v17 = vpop.f32.mrb[113].mxu1  ;;  %v4611_v46 = vpop.f32.mrb[88].mxu0 }
 0x43a   : > { %v12470_v29 = vadd.f32 %v4900_v40, %v4611_v46  ;;  %v8701_v60 = vpop.f32.mrb[114].mxu1  ;;  %v4613_v42 = vpop.f32.mrb[89].mxu0 }
 0x43b   : > { %v4919_v39 = vpop.f32.mrb[115].mxu1  ;;  %v4614_v57 = vpop.f32.mrb[90].mxu0 }
 0x43c   : > { %14306 = vst [vmem:[#allocation34_spill] sm:$0xff] %v12470_v29  ;;  %v12472_v26 = vadd.f32 %v4903_v34, %v4614_v57  ;;  %v4616_v38 = vpop.f32.mrb[91].mxu0  ;;  %v14326_v29 = vld [vmem:[#allocation74_spill] sm:$0xff] }
 0x43d   : > { %v14311_v38 = vld [vmem:[#allocation71_spill] sm:$0xff] }
 0x43e   : > { %14307 = vst [vmem:[#allocation46_spill] sm:$0xff] %v12472_v26  ;;  %5324 = vmatmul.mubr.bf16.gmra.mrb[212].mxu1 %v11834_v23  ;;  %5935 = vmatmul.mubr.bf16.gmra.mrb[196].mxu0 %v11329_v56  ;;  %v14312_v56 = vld [vmem:[#allocation88_spill] sm:$0xff] }
 0x43f   : > { %8036 = vmatprep.mubr.msk.bf16.mxu1 %vm11204_vm9, %v14308_v55  ;;  %8072 = vmatprep.mubr.msk.bf16.mxu0 %vm11204_vm9, %v11337_v43  ;;  %v14315_v26 = vld [vmem:[#allocation76_spill] sm:$0xff] }
 0x441   : > { %v4619_v35 = vpop.f32.mrb[92].mxu0 }
 0x442   : > { %v12482_v40 = vadd.f32 %v8696_v12, %v4619_v35  ;;  %v4621_v46 = vpop.f32.mrb[93].mxu0 }
 0x443   : > { %v4622_v42 = vpop.f32.mrb[94].mxu0 }
 0x444   : > { %14309 = vst [vmem:[#allocation37_spill] sm:$0xff] %v12482_v40  ;;  %v12484_v34 = vadd.f32 %v8697_v50, %v4622_v42  ;;  %v4624_v57 = vpop.f32.mrb[95].mxu0 }
 0x446   : > { %14310 = vst [vmem:[#allocation63_spill] sm:$0xff] %v12484_v34  ;;  %5332 = vmatmul.mubr.bf16.gmra.mrb[216].mxu1 %v14311_v38  ;;  %5943 = vmatmul.mubr.bf16.gmra.mrb[200].mxu0 %v11363_v18 }
 0x447   : > { %8039 = vmatprep.mubr.msk.bf16.mxu1 %vm11247_vm10, %v14312_v56  ;;  %8075 = vmatprep.mubr.msk.bf16.mxu0 %vm11247_vm10, %v11449_v1 }
 0x448   : > { %v8704_v43 = vpop.f32.mrb[116].mxu1 }
 0x449   : > { %v4932_v12 = vpop.f32.mrb[117].mxu1  ;;  %v4627_v35 = vpop.f32.mrb[96].mxu0 }
 0x44a   : > { %v12494_v46 = vadd.f32 %v4916_v17, %v4627_v35  ;;  %v8705_v50 = vpop.f32.mrb[118].mxu1  ;;  %v4629_v42 = vpop.f32.mrb[97].mxu0 }
 0x44b   : > { %v4935_v57 = vpop.f32.mrb[119].mxu1  ;;  %v4630_v34 = vpop.f32.mrb[98].mxu0 }
 0x44c   : > { %14313 = vst [vmem:[#allocation94_spill] sm:$0xff] %v12494_v46  ;;  %v12496_v40 = vadd.f32 %v4919_v39, %v4630_v34  ;;  %v4632_v18 = vpop.f32.mrb[99].mxu0  ;;  %v14325_v46 = vld [vmem:[#allocation44_spill] sm:$0xff] }
 0x44d   : > { %v14318_v18 = vld [vmem:[#allocation80_spill] sm:$0xff] }
 0x44e   : > { %14314 = vst [vmem:[#allocation73_spill] sm:$0xff] %v12496_v40  ;;  %5340 = vmatmul.mubr.bf16.gmra.mrb[220].mxu1 %v11888_v10  ;;  %5951 = vmatmul.mubr.bf16.gmra.mrb[204].mxu0 %v14242_v59  ;;  %v14319_v59 = vld [vmem:[#allocation3_spill] sm:$0xff]  ;;  %v14322_v40 = vld [vmem:[#allocation85_spill] sm:$0xff] }
 0x44f   : > { %8042 = vmatprep.mubr.msk.bf16.mxu1 %vm11204_vm9, %v14315_v26  ;;  %8078 = vmatprep.mubr.msk.bf16.mxu0 %vm11204_vm9, %v14244_v41 }
 0x451   : > { %v4635_v1 = vpop.f32.mrb[100].mxu0 }
 0x452   : > { %v12506_v17 = vadd.f32 %v8700_v9, %v4635_v1  ;;  %v4637_v35 = vpop.f32.mrb[101].mxu0 }
 0x453   : > { %v4638_v42 = vpop.f32.mrb[102].mxu0 }
 0x454   : > { %14316 = vst [vmem:[#allocation40_spill] sm:$0xff] %v12506_v17  ;;  %v12508_v39 = vadd.f32 %v8701_v60, %v4638_v42  ;;  %v4640_v34 = vpop.f32.mrb[103].mxu0 }
 0x456   : > { %14317 = vst [vmem:[#allocation95_spill] sm:$0xff] %v12508_v39  ;;  %5348 = vmatmul.mubr.bf16.gmra.mrb[224].mxu1 %v14318_v18  ;;  %5959 = vmatmul.mubr.bf16.gmra.mrb[208].mxu0 %v14248_v51 }
 0x457   : > { %8045 = vmatprep.mubr.msk.bf16.mxu1 %vm11247_vm10, %v14319_v59  ;;  %8081 = vmatprep.mubr.msk.bf16.mxu0 %vm11247_vm10, %v14250_v31 }
 0x458   : > { %v8708_v41 = vpop.f32.mrb[120].mxu1 }
 0x459   : > { %v4948_v9 = vpop.f32.mrb[121].mxu1  ;;  %v4643_v1 = vpop.f32.mrb[104].mxu0 }
 0x45a   : > { %v12518_v35 = vadd.f32 %v4932_v12, %v4643_v1  ;;  %v8709_v60 = vpop.f32.mrb[122].mxu1  ;;  %v4645_v42 = vpop.f32.mrb[105].mxu0 }
 0x45b   : > { %v4951_v34 = vpop.f32.mrb[123].mxu1  ;;  %v4646_v39 = vpop.f32.mrb[106].mxu0 }
 0x45c   : > { %14320 = vst [vmem:[#allocation71_spill] sm:$0xff] %v12518_v35  ;;  %v12520_v17 = vadd.f32 %v4935_v57, %v4646_v39  ;;  %v4648_v51 = vpop.f32.mrb[107].mxu0 }
 0x45e   : > { %14321 = vst [vmem:[#allocation88_spill] sm:$0xff] %v12520_v17  ;;  %5356 = vmatmul.mubr.bf16.gmra.mrb[228].mxu1 %v11936_v52  ;;  %5967 = vmatmul.mubr.bf16.gmra.mrb[212].mxu0 %v14254_v24 }
 0x45f   : > { %8048 = vmatprep.mubr.msk.bf16.mxu1 %vm11204_vm9, %v14322_v40  ;;  %8084 = vmatprep.mubr.msk.bf16.mxu0 %vm11204_vm9, %v14256_v13 }
 0x461   : > { %v12530_v31 = vpop.f32.mrb[124].mxu1  ;;  %v4651_v12 = vpop.f32.mrb[108].mxu0 }
 0x462   : > { %v12532_v1 = vadd.f32 %v8704_v43, %v4651_v12  ;;  %v4964_v57 = vpop.f32.mrb[125].mxu1  ;;  %v4653_v39 = vpop.f32.mrb[109].mxu0 }
 0x463   : > { %v12534_v42 = vpop.f32.mrb[126].mxu1  ;;  %v4654_v51 = vpop.f32.mrb[110].mxu0 }
 0x464   : > { %14323 = vst [vmem:[#allocation76_spill] sm:$0xff] %v12532_v1  ;;  %v12536_v17 = vadd.f32 %v8705_v50, %v4654_v51  ;;  %v4967_v24 = vpop.f32.mrb[127].mxu1  ;;  %v4656_v35 = vpop.f32.mrb[111].mxu0 }
 0x466   : > { %14324 = vst [vmem:[#allocation80_spill] sm:$0xff] %v12536_v17  ;;  %5364 = vmatmul.mubr.bf16.gmra.mrb[232].mxu1 %v14325_v46  ;;  %5975 = vmatmul.mubr.bf16.gmra.mrb[216].mxu0 %v14260_v28 }
 0x467   : > { %8051 = vmatprep.mubr.msk.bf16.mxu1 %vm11247_vm10, %v14326_v29  ;;  %8087 = vmatprep.mubr.msk.bf16.mxu0 %vm11247_vm10, %v14262_v5 }
 0x469   : > { %v5157_v13 = vpop.f32.mrb[128].mxu1  ;;  %v4659_v43 = vpop.f32.mrb[112].mxu0 }
 0x46a   : > { %v12547_v12 = vadd.f32 %v5157_v13, %v12137_v0  ;;  %v12549_v50 = vadd.f32 %v4948_v9, %v4659_v43  ;;  %v5159_v35 = vpop.f32.mrb[129].mxu1  ;;  %v4661_v39 = vpop.f32.mrb[113].mxu0 }
 0x46b   : > { %v5160_v51 = vpop.f32.mrb[130].mxu1  ;;  %v4662_v17 = vpop.f32.mrb[114].mxu0 }
 0x46c   : > { %v12552_v28 = vadd.f32 %v5160_v51, %v12144_v19  ;;  %v12554_v1 = vadd.f32 %v4951_v34, %v4662_v17  ;;  %v4664_v37 = vpop.f32.mrb[115].mxu0  ;;  %v5162_v29 = vpop.f32.mrb[131].mxu1 }
 0x46e   : > { %5372 = vmatmul.mubr.bf16.gmra.mrb[236].mxu1 %v11984_v63  ;;  %5983 = vmatmul.mubr.bf16.gmra.mrb[220].mxu0 %v14266_v7 }
 0x46f   : > { %8054 = vmatprep.mubr.msk.bf16.mxu1 %vm11204_vm9, %v11988_v48  ;;  %8090 = vmatprep.mubr.msk.bf16.mxu0 %vm11204_vm9, %v14268_v27 }
 0x471   : > { %v5165_v0 = vpop.f32.mrb[132].mxu1  ;;  %v4667_v5 = vpop.f32.mrb[116].mxu0 }
 0x472   : > { %v5166_v19 = vadd.f32 %v5165_v0, %v12139_v8  ;;  %v12565_v17 = vadd.f32 %v8708_v41, %v4667_v5  ;;  %v5167_v37 = vpop.f32.mrb[133].mxu1  ;;  %v4669_v29 = vpop.f32.mrb[117].mxu0  ;;  %v14327_v41 = vld [vmem:[#allocation90_spill] sm:$0xff] }
 0x473   : > { %v5168_v9 = vpop.f32.mrb[134].mxu1  ;;  %v4670_v34 = vpop.f32.mrb[118].mxu0  ;;  %v14329_v37 = vld [vmem:[#allocation66_spill] sm:$0xff] }
 0x474   : > { %v5169_v7 = vadd.f32 %v5168_v9, %v12146_v30  ;;  %v12568_v13 = vadd.f32 %v8709_v60, %v4670_v34  ;;  %v4672_v43 = vpop.f32.mrb[119].mxu0  ;;  %v5170_v35 = vpop.f32.mrb[135].mxu1 }
 0x475   : > { %v14331_v43 = vld [vmem:[#allocation36_spill] sm:$0xff] }
 0x476   : > { %5380 = vmatmul.mubr.bf16.gmra.mrb[240].mxu1 %v12016_v6  ;;  %5991 = vmatmul.mubr.bf16.gmra.mrb[224].mxu0 %v14272_v36 }
 0x477   : > { %8057 = vmatprep.mubr.msk.bf16.mxu1 %vm11247_vm10, %v12104_v22  ;;  %8093 = vmatprep.mubr.msk.bf16.mxu0 %vm11247_vm10, %v14274_v33  ;;  %v14332_v33 = vld [vmem:[#allocation65_spill] sm:$0xff] }
 0x479   : > { %v5173_v8 = vpop.f32.mrb[136].mxu1  ;;  %v4675_v27 = vpop.f32.mrb[120].mxu0 }
 0x47a   : > { %v5174_v30 = vadd.f32 %v5173_v8, %v14327_v41  ;;  %v12579_v60 = vadd.f32 %v4964_v57, %v4675_v27  ;;  %v5175_v39 = vpop.f32.mrb[137].mxu1  ;;  %v4677_v51 = vpop.f32.mrb[121].mxu0  ;;  %v14333_v8 = vld [vmem:[#allocation89_spill] sm:$0xff] }
 0x47b   : > { %v5176_v0 = vpop.f32.mrb[138].mxu1  ;;  %v4678_v5 = vpop.f32.mrb[122].mxu0 }
 0x47c   : > { %14328 = vst [vmem:[#allocation3_spill] sm:$0xff] %v12579_v60  ;;  %v5177_v36 = vadd.f32 %v5176_v0, %v14329_v37  ;;  %v12582_v29 = vadd.f32 %v4967_v24, %v4678_v5  ;;  %v5178_v9 = vpop.f32.mrb[139].mxu1  ;;  %v4680_v34 = vpop.f32.mrb[123].mxu0  ;;  %v14342_v60 = vld [vmem:[#allocation99_spill] sm:$0xff] }
 0x47e   : > { %14330 = vst [vmem:[#allocation85_spill] sm:$0xff] %v12582_v29  ;;  %5388 = vmatmul.mubr.bf16.gmra.mrb[244].mxu1 %v14331_v43  ;;  %5999 = vmatmul.mubr.bf16.gmra.mrb[228].mxu0 %v14277_v61  ;;  %v14335_v61 = vld [vmem:[#allocation92_spill] sm:$0xff]  ;;  %v14337_v29 = vld [vmem:[#allocation97_spill] sm:$0xff] }
 0x47f   : > { %8060 = vmatprep.mubr.msk.bf16.mxu1 %vm11204_vm9, %v14332_v33  ;;  %8096 = vmatprep.mubr.msk.bf16.mxu0 %vm11204_vm9, %v14278_v4  ;;  %v14338_v4 = vld [vmem:[#allocation86_spill] sm:$0xff] }
 0x481   : > { %v5181_v57 = vpop.f32.mrb[140].mxu1  ;;  %v4683_v35 = vpop.f32.mrb[124].mxu0 }
 0x482   : > { %v5182_v27 = vadd.f32 %v5181_v57, %v14333_v8  ;;  %v12594_v24 = vadd.f32 %v12530_v31, %v4683_v35  ;;  %v5183_v41 = vpop.f32.mrb[141].mxu1  ;;  %v4685_v39 = vpop.f32.mrb[125].mxu0  ;;  %v14339_v35 = vld [vmem:[#allocation10_spill] sm:$0xff] }
 0x483   : > { %v5184_v51 = vpop.f32.mrb[142].mxu1  ;;  %v4686_v0 = vpop.f32.mrb[126].mxu0 }
 0x484   : > { %14334 = vst [vmem:[#allocation44_spill] sm:$0xff] %v12594_v24  ;;  %v5185_v5 = vadd.f32 %v5184_v51, %v14335_v61  ;;  %v12598_v37 = vadd.f32 %v12534_v42, %v4686_v0  ;;  %v5186_v9 = vpop.f32.mrb[143].mxu1  ;;  %v4688_v34 = vpop.f32.mrb[127].mxu0  ;;  %v14340_v61 = vld [vmem:[#allocation75_spill] sm:$0xff] }
 0x486   : > { %14336 = vst [vmem:[#allocation90_spill] sm:$0xff] %v12598_v37  ;;  %5396 = vmatmul.mubr.bf16.gmra.mrb[248].mxu1 %v14337_v29  ;;  %6007 = vmatmul.mubr.bf16.gmra.mrb[232].mxu0 %v14281_v62 }
 0x487   : > { %8063 = vmatprep.mubr.msk.bf16.mxu1 %vm11247_vm10, %v14338_v4  ;;  %8099 = vmatprep.mubr.msk.bf16.mxu0 %vm11247_vm10, %v14282_v3 }
 0x489   : > { %v5189_v31 = vpop.f32.mrb[144].mxu1  ;;  %v8732_v57 = vpop.f32.mrb[128].mxu0 }
 0x48a   : > { %v5190_v8 = vadd.f32 %v5189_v31, %v14339_v35  ;;  %v5191_v42 = vpop.f32.mrb[145].mxu1  ;;  %v12609_v41 = vadd.f32 %v8732_v57, %v5166_v19  ;;  %v5446_v39 = vpop.f32.mrb[129].mxu0  ;;  %v14343_v19 = vld [vmem:[#allocation16_spill] sm:$0xff]  ;;  %v14344_v57 = vld [vmem:[#allocation14_spill] sm:$0xff] }
 0x48b   : > { %v5192_v51 = vpop.f32.mrb[146].mxu1  ;;  %v12612_v0 = vadd.f32 %v5446_v39, %v12547_v12  ;;  %v8733_v62 = vpop.f32.mrb[130].mxu0 }
 0x48c   : > { %v5193_v9 = vadd.f32 %v5192_v51, %v14340_v61  ;;  %v5194_v34 = vpop.f32.mrb[147].mxu1  ;;  %v12615_v37 = vadd.f32 %v8733_v62, %v5169_v7  ;;  %v5449_v24 = vpop.f32.mrb[131].mxu0  ;;  %v14345_v62 = vld [vmem:[#allocation11_spill] sm:$0xff] }
 0x48d   : > { %v12618_v3 = vadd.f32 %v5449_v24, %v12552_v28 }
 0x48e   : > { %5404 = vmatmul.mubr.bf16.gmra.mrb[252].mxu1 %v14342_v60  ;;  %6015 = vmatmul.mubr.bf16.gmra.mrb[236].mxu0 %v14285_v58 }
 0x48f   : > { %14341 = vst [vmem:[#allocation66_spill] sm:$0xff] %v12618_v3  ;;  %8810 = vmatprep.mubr.bf16.mxu1 %v14343_v19  ;;  %8102 = vmatprep.mubr.msk.bf16.mxu0 %vm11204_vm9, %v14286_v54  ;;  %v14346_v54 = vld [vmem:[#allocation52_spill] sm:$0xff] }
 0x491   : > { %v5197_v12 = vpop.f32.mrb[148].mxu1  ;;  %v8736_v31 = vpop.f32.mrb[132].mxu0 }
 0x492   : > { %v5198_v35 = vadd.f32 %v5197_v12, %v14344_v57  ;;  %v5199_v7 = vpop.f32.mrb[149].mxu1  ;;  %v12627_v42 = vadd.f32 %v8736_v31, %v5182_v27  ;;  %v5462_v39 = vpop.f32.mrb[133].mxu0  ;;  %v14347_v12 = vld [vmem:[#allocation22_spill] sm:$0xff]  ;;  %v14348_v31 = vld [vmem:[#allocation15_spill] sm:$0xff] }
 0x493   : > { %v5200_v28 = vpop.f32.mrb[150].mxu1  ;;  %v12629_v24 = vadd.f32 %v5462_v39, %v5174_v30  ;;  %v8737_v51 = vpop.f32.mrb[134].mxu0 }
 0x494   : > { %v5201_v58 = vadd.f32 %v5200_v28, %v14345_v62  ;;  %v5202_v61 = vpop.f32.mrb[151].mxu1  ;;  %v12632_v34 = vadd.f32 %v8737_v51, %v5185_v5  ;;  %v5465_v19 = vpop.f32.mrb[135].mxu0  ;;  %v14349_v62 = vld [vmem:[#allocation84_spill] sm:$0xff] }
 0x495   : > { %v12634_v3 = vadd.f32 %v5465_v19, %v5177_v36 }
 0x496   : > { %8811 = vmatmul.mubr.bf16.vlgmr.msra.gmra.mrb[0].mxu1 %v14346_v54  ;;  %6023 = vmatmul.mubr.bf16.gmra.mrb[240].mxu0 %v14289_v16 }
 0x497   : > { %8814 = vmatprep.mubr.bf16.mxu1 %v14347_v12  ;;  %8105 = vmatprep.mubr.msk.bf16.mxu0 %vm11247_vm10, %v14290_v44  ;;  %v14350_v44 = vld [vmem:[#allocation23_spill] sm:$0xff] }
 0x499   : > { %v5205_v30 = vpop.f32.mrb[152].mxu1  ;;  %v8740_v27 = vpop.f32.mrb[136].mxu0 }
 0x49a   : > { %v5206_v57 = vadd.f32 %v5205_v30, %v14348_v31  ;;  %v5207_v7 = vpop.f32.mrb[153].mxu1  ;;  %v12643_v5 = vadd.f32 %v8740_v27, %v5198_v35  ;;  %v5478_v39 = vpop.f32.mrb[137].mxu0  ;;  %v14351_v30 = vld [vmem:[#allocation25_spill] sm:$0xff]  ;;  %v14352_v27 = vld [vmem:[#allocation79_spill] sm:$0xff] }
 0x49b   : > { %v5208_v36 = vpop.f32.mrb[154].mxu1  ;;  %v12645_v28 = vadd.f32 %v5478_v39, %v5190_v8  ;;  %v8741_v51 = vpop.f32.mrb[138].mxu0 }
 0x49c   : > { %v5209_v16 = vadd.f32 %v5208_v36, %v14349_v62  ;;  %v5210_v61 = vpop.f32.mrb[155].mxu1  ;;  %v12648_v19 = vadd.f32 %v8741_v51, %v5201_v58  ;;  %v5481_v54 = vpop.f32.mrb[139].mxu0  ;;  %v14353_v62 = vld [vmem:[#allocation7_spill] sm:$0xff] }
 0x49d   : > { %v12650_v12 = vadd.f32 %v5481_v54, %v5193_v9 }
 0x49e   : > { %8815 = vmatmul.mubr.bf16.gmra.mrb[4].mxu1 %v14350_v44  ;;  %6031 = vmatmul.mubr.bf16.gmra.mrb[244].mxu0 %v11708_v11 }
 0x49f   : > { %8818 = vmatprep.mubr.bf16.mxu1 %v14351_v30  ;;  %8108 = vmatprep.mubr.msk.bf16.mxu0 %vm11204_vm9, %v14293_v21  ;;  %v14354_v21 = vld [vmem:[#allocation18_spill] sm:$0xff] }
 0x4a1   : > { %v5213_v8 = vpop.f32.mrb[156].mxu1  ;;  %v8744_v35 = vpop.f32.mrb[140].mxu0 }
 0x4a2   : > { %v5214_v31 = vadd.f32 %v5213_v8, %v14352_v27  ;;  %v5215_v7 = vpop.f32.mrb[157].mxu1  ;;  %v5494_v58 = vpop.f32.mrb[141].mxu0  ;;  %v14355_v8 = vld [vmem:[#allocation28_spill] sm:$0xff]  ;;  %v14356_v27 = vld [vmem:[#allocation9_spill] sm:$0xff] }
 0x4a3   : > { %v5216_v39 = vpop.f32.mrb[158].mxu1  ;;  %v12659_v36 = vadd.f32 %v5494_v58, %v5206_v57  ;;  %v8745_v9 = vpop.f32.mrb[142].mxu0 }
 0x4a4   : > { %v12661_v51 = vadd.f32 %v8744_v35, %v5214_v31  ;;  %v5217_v11 = vadd.f32 %v5216_v39, %v14353_v62  ;;  %v5218_v61 = vpop.f32.mrb[159].mxu1  ;;  %v5497_v54 = vpop.f32.mrb[143].mxu0 }
 0x4a5   : > { %v12664_v44 = vadd.f32 %v5497_v54, %v5209_v16 }
 0x4a6   : > { %v12666_v30 = vadd.f32 %v8745_v9, %v5217_v11  ;;  %8819 = vmatmul.mubr.bf16.gmra.mrb[8].mxu1 %v14354_v21  ;;  %6039 = vmatmul.mubr.bf16.gmra.mrb[248].mxu0 %v14296_v49  ;;  %v14357_v9 = vld [vmem:[#allocation17_spill] sm:$0xff]  ;;  %v14360_v21 = vld [vmem:[#allocation78_spill] sm:$0xff] }
 0x4a7   : > { %8822 = vmatprep.mubr.bf16.mxu1 %v14355_v8  ;;  %8111 = vmatprep.mubr.msk.bf16.mxu0 %vm11247_vm10, %v14297_v53  ;;  %v14361_v53 = vld [vmem:[#allocation32_spill] sm:$0xff] }
 0x4a9   : > { %v5221_v57 = vpop.f32.mrb[160].mxu1  ;;  %v8748_v35 = vpop.f32.mrb[144].mxu0 }
 0x4aa   : > { %v5222_v31 = vadd.f32 %v5221_v57, %v14356_v27  ;;  %v5223_v7 = vpop.f32.mrb[161].mxu1  ;;  %v5510_v58 = vpop.f32.mrb[145].mxu0  ;;  %v14362_v27 = vld [vmem:[#allocation96_spill] sm:$0xff] }
 0x4ab   : > { %v5224_v16 = vpop.f32.mrb[162].mxu1  ;;  %v8749_v39 = vpop.f32.mrb[146].mxu0 }
 0x4ac   : > { %v5225_v62 = vadd.f32 %v5224_v16, %v14357_v9  ;;  %v12676_v11 = vadd.f32 %v5510_v58, %v5222_v31  ;;  %v5226_v61 = vpop.f32.mrb[163].mxu1  ;;  %v5513_v49 = vpop.f32.mrb[147].mxu0 }
 0x4ad   : > { %v14363_v61 = vld [vmem:[#allocation45_spill] sm:$0xff] }
 0x4ae   : > { %14358 = vst [vmem:[#allocation36_spill] sm:$0xff] %v12676_v11  ;;  %v12678_v54 = vadd.f32 %v5513_v49, %v5225_v62  ;;  %8823 = vmatmul.mubr.bf16.gmra.mrb[12].mxu1 %v14360_v21  ;;  %6047 = vmatmul.mubr.bf16.gmra.mrb[252].mxu0 %v14300_v45 }
 0x4af   : > { %8826 = vmatprep.mubr.bf16.mxu1 %v14361_v53  ;;  %8114 = vmatprep.mubr.msk.bf16.mxu0 %vm11204_vm9, %v14301_v2  ;;  %v14365_v53 = vld [vmem:[#allocation49_spill] sm:$0xff]  ;;  %v14366_v2 = vld [vmem:[#allocation87_spill] sm:$0xff] }
 0x4b0   : > { %14359 = vst [vmem:[#allocation65_spill] sm:$0xff] %v12678_v54 }
 0x4b1   : > { %v5229_v8 = vpop.f32.mrb[164].mxu1  ;;  %v8752_v57 = vpop.f32.mrb[148].mxu0 }
 0x4b2   : > { %v5230_v7 = vadd.f32 %v5229_v8, %v14362_v27  ;;  %v5231_v31 = vpop.f32.mrb[165].mxu1  ;;  %v5526_v58 = vpop.f32.mrb[149].mxu0 }
 0x4b3   : > { %v5232_v16 = vpop.f32.mrb[166].mxu1  ;;  %v8753_v9 = vpop.f32.mrb[150].mxu0 }
 0x4b4   : > { %v12687_v62 = vadd.f32 %v8748_v35, %v5230_v7  ;;  %v5233_v49 = vadd.f32 %v5232_v16, %v14363_v61  ;;  %v5234_v21 = vpop.f32.mrb[167].mxu1  ;;  %v5529_v45 = vpop.f32.mrb[151].mxu0  ;;  %v14367_v35 = vld [vmem:[#allocation21_spill] sm:$0xff] }
 0x4b6   : > { %v12690_v54 = vadd.f32 %v8749_v39, %v5233_v49  ;;  %8827 = vmatmul.mubr.bf16.gmra.mrb[16].mxu1 %v14365_v53  ;;  %6055 = vmatmul.mubr.bf16.gmra.mrb[0].mxu0 %v14304_v15  ;;  %v14369_v49 = vld [vmem:[#allocation47_spill] sm:$0xff] }
 0x4b7   : > { %8830 = vmatprep.mubr.bf16.mxu1 %v14366_v2  ;;  %8117 = vmatprep.mubr.msk.bf16.mxu0 %vm11247_vm10, %v14305_v14  ;;  %v14371_v2 = vld [vmem:[#allocation68_spill] sm:$0xff]  ;;  %v14372_v14 = vld [vmem:[#allocation62_spill] sm:$0xff] }
 0x4b8   : > { %14364 = vst [vmem:[#allocation89_spill] sm:$0xff] %v12690_v54 }
 0x4b9   : > { %v5237_v8 = vpop.f32.mrb[168].mxu1  ;;  %v8756_v27 = vpop.f32.mrb[152].mxu0 }
 0x4ba   : > { %v5238_v7 = vadd.f32 %v5237_v8, %v14367_v35  ;;  %v5239_v31 = vpop.f32.mrb[169].mxu1  ;;  %v5542_v16 = vpop.f32.mrb[153].mxu0 }
 0x4bb   : > { %v5240_v61 = vpop.f32.mrb[170].mxu1  ;;  %v8757_v21 = vpop.f32.mrb[154].mxu0 }
 0x4bc   : > { %v12699_v39 = vadd.f32 %v5526_v58, %v5238_v7  ;;  %v5241_v53 = vadd.f32 %v5240_v61, %v14369_v49  ;;  %v5242_v54 = vpop.f32.mrb[171].mxu1  ;;  %v5545_v15 = vpop.f32.mrb[155].mxu0  ;;  %v14373_v58 = vld [vmem:[#allocation19_spill] sm:$0xff] }
 0x4be   : > { %14368 = vst [vmem:[#allocation92_spill] sm:$0xff] %v12699_v39  ;;  %v12702_v11 = vadd.f32 %v5529_v45, %v5241_v53  ;;  %8831 = vmatmul.mubr.bf16.gmra.mrb[20].mxu1 %v14371_v2  ;;  %6063 = vmatmul.mubr.bf16.gmra.mrb[4].mxu0 %v11834_v23  ;;  %v14375_v53 = vld [vmem:[#allocation13_spill] sm:$0xff]  ;;  %v14377_v39 = vld [vmem:[#allocation72_spill] sm:$0xff] }
 0x4bf   : > { %8834 = vmatprep.mubr.bf16.mxu1 %v14372_v14  ;;  %8120 = vmatprep.mubr.msk.bf16.mxu0 %vm11204_vm9, %v14308_v55  ;;  %v14378_v55 = vld [vmem:[#allocation93_spill] sm:$0xff] }
 0x4c0   : > { %14370 = vst [vmem:[#allocation97_spill] sm:$0xff] %v12702_v11 }
 0x4c1   : > { %v5245_v8 = vpop.f32.mrb[172].mxu1  ;;  %v12710_v35 = vpop.f32.mrb[156].mxu0 }
 0x4c2   : > { %v5246_v7 = vadd.f32 %v5245_v8, %v14373_v58  ;;  %v5247_v31 = vpop.f32.mrb[173].mxu1  ;;  %v5558_v54 = vpop.f32.mrb[157].mxu0 }
 0x4c3   : > { %v5248_v61 = vpop.f32.mrb[174].mxu1  ;;  %v12713_v45 = vpop.f32.mrb[158].mxu0 }
 0x4c4   : > { %v12715_v49 = vadd.f32 %v8752_v57, %v5246_v7  ;;  %v5249_v23 = vadd.f32 %v5248_v61, %v14375_v53  ;;  %v5250_v2 = vpop.f32.mrb[175].mxu1  ;;  %v5561_v14 = vpop.f32.mrb[159].mxu0  ;;  %v14379_v57 = vld [vmem:[#allocation12_spill] sm:$0xff] }
 0x4c6   : > { %14374 = vst [vmem:[#allocation86_spill] sm:$0xff] %v12715_v49  ;;  %v12718_v11 = vadd.f32 %v8753_v9, %v5249_v23  ;;  %8835 = vmatmul.mubr.bf16.gmra.mrb[24].mxu1 %v14377_v39  ;;  %6071 = vmatmul.mubr.bf16.gmra.mrb[8].mxu0 %v14311_v38  ;;  %v14381_v38 = vld [vmem:[#allocation55_spill] sm:$0xff] }
 0x4c7   : > { %8838 = vmatprep.mubr.bf16.mxu1 %v14378_v55  ;;  %8123 = vmatprep.mubr.msk.bf16.mxu0 %vm11247_vm10, %v14312_v56  ;;  %v14383_v56 = vld [vmem:[#allocation77_spill] sm:$0xff] }
 0x4c8   : > { %14376 = vst [vmem:[#allocation10_spill] sm:$0xff] %v12718_v11 }
 0x4c9   : > { %v5253_v8 = vpop.f32.mrb[176].mxu1  ;;  %v12726_v58 = vpop.f32.mrb[160].mxu0 }
 0x4ca   : > { %v5254_v7 = vadd.f32 %v5253_v8, %v14379_v57  ;;  %v5255_v31 = vpop.f32.mrb[177].mxu1  ;;  %v12729_v61 = vpop.f32.mrb[161].mxu0  ;;  %v14384_v57 = vld [vmem:[#allocation26_spill] sm:$0xff] }
 0x4cb   : > { %v5256_v9 = vpop.f32.mrb[178].mxu1  ;;  %v12731_v53 = vpop.f32.mrb[162].mxu0 }
 0x4cc   : > { %v12733_v39 = vadd.f32 %v5542_v16, %v5254_v7  ;;  %v5257_v23 = vadd.f32 %v5256_v9, %v14381_v38  ;;  %v5258_v2 = vpop.f32.mrb[179].mxu1  ;;  %v12736_v55 = vpop.f32.mrb[163].mxu0 }
 0x4ce   : > { %14380 = vst [vmem:[#allocation75_spill] sm:$0xff] %v12733_v39  ;;  %v12738_v11 = vadd.f32 %v5545_v15, %v5257_v23  ;;  %8839 = vmatmul.mubr.bf16.gmra.mrb[28].mxu1 %v11805_v20  ;;  %6079 = vmatmul.mubr.bf16.gmra.mrb[12].mxu0 %v11888_v10  ;;  %v14386_v10 = vld [vmem:[#allocation58_spill] sm:$0xff] }
 0x4cf   : > { %8842 = vmatprep.mubr.bf16.mxu1 %v14383_v56  ;;  %8126 = vmatprep.mubr.msk.bf16.mxu0 %vm11204_vm9, %v14315_v26  ;;  %v14388_v26 = vld [vmem:[#allocation67_spill] sm:$0xff] }
 0x4d0   : > { %14382 = vst [vmem:[#allocation99_spill] sm:$0xff] %v12738_v11 }
 0x4d1   : > { %v5261_v8 = vpop.f32.mrb[180].mxu1  ;;  %v12746_v16 = vpop.f32.mrb[164].mxu0 }
 0x4d2   : > { %v5262_v7 = vadd.f32 %v5261_v8, %v14384_v57  ;;  %v5263_v31 = vpop.f32.mrb[181].mxu1  ;;  %v12749_v9 = vpop.f32.mrb[165].mxu0  ;;  %v14389_v8 = vld [vmem:[#allocation38_spill] sm:$0xff] }
 0x4d3   : > { %v5264_v15 = vpop.f32.mrb[182].mxu1  ;;  %v12751_v38 = vpop.f32.mrb[166].mxu0 }
 0x4d4   : > { %v12753_v20 = vadd.f32 %v8756_v27, %v5262_v7  ;;  %v5265_v23 = vadd.f32 %v5264_v15, %v14386_v10  ;;  %v5266_v2 = vpop.f32.mrb[183].mxu1  ;;  %v12756_v56 = vpop.f32.mrb[167].mxu0  ;;  %v14390_v7 = vld [vmem:[#allocation56_spill] sm:$0xff] }
 0x4d6   : > { %14385 = vst [vmem:[#allocation16_spill] sm:$0xff] %v12753_v20  ;;  %v12758_v11 = vadd.f32 %v8757_v21, %v5265_v23  ;;  %8843 = vmatmul.mubr.bf16.gmra.mrb[32].mxu1 %v14388_v26  ;;  %6087 = vmatmul.mubr.bf16.gmra.mrb[16].mxu0 %v14318_v18  ;;  %v14392_v18 = vld [vmem:[#allocation24_spill] sm:$0xff] }
 0x4d7   : > { %8846 = vmatprep.mubr.bf16.mxu1 %v14389_v8  ;;  %8129 = vmatprep.mubr.msk.bf16.mxu0 %vm11247_vm10, %v14319_v59  ;;  %v14394_v59 = vld [vmem:[#allocation41_spill] sm:$0xff] }
 0x4d8   : > { %14387 = vst [vmem:[#allocation14_spill] sm:$0xff] %v12758_v11 }
 0x4d9   : > { %v5269_v57 = vpop.f32.mrb[184].mxu1  ;;  %v12766_v27 = vpop.f32.mrb[168].mxu0 }
 0x4da   : > { %v5270_v31 = vadd.f32 %v5269_v57, %v14390_v7  ;;  %v5271_v15 = vpop.f32.mrb[185].mxu1  ;;  %v12769_v10 = vpop.f32.mrb[169].mxu0  ;;  %v14395_v7 = vld [vmem:[#allocation57_spill] sm:$0xff] }
 0x4db   : > { %v5272_v21 = vpop.f32.mrb[186].mxu1  ;;  %v12771_v23 = vpop.f32.mrb[170].mxu0 }
 0x4dc   : > { %v12773_v2 = vadd.f32 %v5558_v54, %v5270_v31  ;;  %v5273_v26 = vadd.f32 %v5272_v21, %v14392_v18  ;;  %v5274_v8 = vpop.f32.mrb[187].mxu1  ;;  %v12776_v11 = vpop.f32.mrb[171].mxu0 }
 0x4de   : > { %14391 = vst [vmem:[#allocation11_spill] sm:$0xff] %v12773_v2  ;;  %v12778_v39 = vadd.f32 %v5561_v14, %v5273_v26  ;;  %8847 = vmatmul.mubr.bf16.gmra.mrb[36].mxu1 %v11907_v47  ;;  %6095 = vmatmul.mubr.bf16.gmra.mrb[20].mxu0 %v11936_v52  ;;  %v14397_v52 = vld [vmem:[#allocation42_spill] sm:$0xff] }
 0x4df   : > { %8850 = vmatprep.mubr.bf16.mxu1 %v14394_v59  ;;  %8132 = vmatprep.mubr.msk.bf16.mxu0 %vm11204_vm9, %v14322_v40 }
 0x4e0   : > { %14393 = vst [vmem:[#allocation52_spill] sm:$0xff] %v12778_v39  ;;  %v14399_v39 = vld [vmem:[#allocation43_spill] sm:$0xff] }
 0x4e1   : > { %v5277_v57 = vpop.f32.mrb[188].mxu1  ;;  %v12786_v54 = vpop.f32.mrb[172].mxu0 }
 0x4e2   : > { %v5278_v31 = vadd.f32 %v5277_v57, %v14395_v7  ;;  %v5279_v15 = vpop.f32.mrb[189].mxu1  ;;  %v12789_v21 = vpop.f32.mrb[173].mxu0  ;;  %v14400_v57 = vld [vmem:[#allocation27_spill] sm:$0xff]  ;;  %v14401_v7 = vld [vmem:[#allocation74_spill] sm:$0xff] }
 0x4e3   : > { %v5280_v14 = vpop.f32.mrb[190].mxu1  ;;  %v12791_v18 = vpop.f32.mrb[174].mxu0  ;;  %v14402_v15 = vld [vmem:[#allocation33_spill] sm:$0xff] }
 0x4e4   : > { %v12794_v47 = vadd.f32 %v12710_v35, %v5278_v31  ;;  %v5281_v26 = vadd.f32 %v5280_v14, %v14397_v52  ;;  %v5282_v8 = vpop.f32.mrb[191].mxu1  ;;  %v12797_v59 = vpop.f32.mrb[175].mxu0 }
 0x4e6   : > { %14396 = vst [vmem:[#allocation22_spill] sm:$0xff] %v12794_v47  ;;  %v12800_v40 = vadd.f32 %v12713_v45, %v5281_v26  ;;  %8851 = vmatmul.mubr.bf16.gmra.mrb[40].mxu1 %v14399_v39  ;;  %6103 = vmatmul.mubr.bf16.gmra.mrb[24].mxu0 %v14325_v46  ;;  %v14404_v46 = vld [vmem:[#allocation39_spill] sm:$0xff]  ;;  %v14406_v47 = vld [vmem:[#allocation50_spill] sm:$0xff] }
 0x4e7   : > { %8854 = vmatprep.mubr.bf16.mxu1 %v14400_v57  ;;  %8135 = vmatprep.mubr.msk.bf16.mxu0 %vm11247_vm10, %v14401_v7 }
 0x4e8   : > { %14398 = vst [vmem:[#allocation15_spill] sm:$0xff] %v12800_v40 }
 0x4e9   : > { %v5285_v35 = vpop.f32.mrb[192].mxu1  ;;  %v12808_v31 = vpop.f32.mrb[176].mxu0 }
 0x4ea   : > { %v5286_v14 = vadd.f32 %v5285_v35, %v14402_v15  ;;  %v5287_v52 = vpop.f32.mrb[193].mxu1  ;;  %v12811_v8 = vpop.f32.mrb[177].mxu0  ;;  %v14407_v35 = vld [vmem:[#allocation51_spill] sm:$0xff] }
 0x4eb   : > { %v5288_v45 = vpop.f32.mrb[194].mxu1  ;;  %v12813_v26 = vpop.f32.mrb[178].mxu0 }
 0x4ec   : > { %v12816_v39 = vadd.f32 %v12729_v61, %v5286_v14  ;;  %v5289_v57 = vadd.f32 %v5288_v45, %v14404_v46  ;;  %v5290_v40 = vpop.f32.mrb[195].mxu1  ;;  %v12819_v2 = vpop.f32.mrb[179].mxu0  ;;  %v14408_v14 = vld [vmem:[#allocation29_spill] sm:$0xff] }
 0x4ee   : > { %14403 = vst [vmem:[#allocation84_spill] sm:$0xff] %v12816_v39  ;;  %v12822_v7 = vadd.f32 %v12736_v55, %v5289_v57  ;;  %8855 = vmatmul.mubr.bf16.gmra.mrb[44].mxu1 %v14406_v47  ;;  %6111 = vmatmul.mubr.bf16.gmra.mrb[28].mxu0 %v11984_v63  ;;  %v14410_v63 = vld [vmem:[#allocation54_spill] sm:$0xff]  ;;  %v14412_v39 = vld [vmem:[#allocation4_spill] sm:$0xff] }
 0x4ef   : > { %8858 = vmatprep.mubr.bf16.mxu1 %v14407_v35  ;;  %8138 = vmatprep.mubr.msk.bf16.mxu0 %vm11204_vm9, %v11988_v48 }
 0x4f0   : > { %14405 = vst [vmem:[#allocation23_spill] sm:$0xff] %v12822_v7 }
 0x4f1   : > { %v5293_v61 = vpop.f32.mrb[196].mxu1  ;;  %v12830_v15 = vpop.f32.mrb[180].mxu0 }
 0x4f2   : > { %v5294_v40 = vadd.f32 %v5293_v61, %v14408_v14  ;;  %v5295_v52 = vpop.f32.mrb[197].mxu1  ;;  %v12833_v45 = vpop.f32.mrb[181].mxu0  ;;  %v14413_v61 = vld [vmem:[#allocation83_spill] sm:$0xff] }
 0x4f3   : > { %v5296_v55 = vpop.f32.mrb[198].mxu1  ;;  %v12835_v46 = vpop.f32.mrb[182].mxu0 }
 0x4f4   : > { %v12838_v47 = vadd.f32 %v12726_v58, %v5294_v40  ;;  %v5297_v57 = vadd.f32 %v5296_v55, %v14410_v63  ;;  %v5298_v35 = vpop.f32.mrb[199].mxu1  ;;  %v12841_v7 = vpop.f32.mrb[183].mxu0  ;;  %v14414_v40 = vld [vmem:[#allocation59_spill] sm:$0xff] }
 0x4f6   : > { %14409 = vst [vmem:[#allocation25_spill] sm:$0xff] %v12838_v47  ;;  %v12844_v48 = vadd.f32 %v12731_v53, %v5297_v57  ;;  %8859 = vmatmul.mubr.bf16.gmra.mrb[48].mxu1 %v14412_v39  ;;  %6119 = vmatmul.mubr.bf16.gmra.mrb[32].mxu0 %v12016_v6  ;;  %v14416_v6 = vld [vmem:[#allocation30_spill] sm:$0xff] }
 0x4f7   : > { %8862 = vmatprep.mubr.bf16.mxu1 %v14413_v61  ;;  %8141 = vmatprep.mubr.msk.bf16.mxu0 %vm11247_vm10, %v12104_v22  ;;  %v14418_v47 = vld [vmem:[#allocation98_spill] sm:$0xff] }
 0x4f8   : > { %14411 = vst [vmem:[#allocation79_spill] sm:$0xff] %v12844_v48 }
 0x4f9   : > { %v5301_v58 = vpop.f32.mrb[200].mxu1  ;;  %v12852_v14 = vpop.f32.mrb[184].mxu0 }
 0x4fa   : > { %v5302_v52 = vadd.f32 %v5301_v58, %v14414_v40  ;;  %v5303_v55 = vpop.f32.mrb[201].mxu1  ;;  %v12855_v63 = vpop.f32.mrb[185].mxu0  ;;  %v14419_v58 = vld [vmem:[#allocation53_spill] sm:$0xff] }
 0x4fb   : > { %v5304_v53 = vpop.f32.mrb[202].mxu1  ;;  %v12857_v57 = vpop.f32.mrb[186].mxu0 }
 0x4fc   : > { %v12860_v39 = vadd.f32 %v12749_v9, %v5302_v52  ;;  %v5305_v35 = vadd.f32 %v5304_v53, %v14416_v6  ;;  %v5306_v61 = vpop.f32.mrb[203].mxu1  ;;  %v12863_v48 = vpop.f32.mrb[187].mxu0  ;;  %v14420_v52 = vld [vmem:[#allocation48_spill] sm:$0xff] }
 0x4fe   : > { %14415 = vst [vmem:[#allocation7_spill] sm:$0xff] %v12860_v39  ;;  %v12866_v22 = vadd.f32 %v12756_v56, %v5305_v35  ;;  %8863 = vmatmul.mubr.bf16.gmra.mrb[52].mxu1 %v14418_v47  ;;  %6127 = vmatmul.mubr.bf16.gmra.mrb[36].mxu0 %v14331_v43  ;;  %v14422_v43 = vld [vmem:[#allocation69_spill] sm:$0xff] }
 0x4ff   : > { %8866 = vmatprep.mubr.bf16.mxu1 %v14419_v58  ;;  %8144 = vmatprep.mubr.msk.bf16.mxu0 %vm11204_vm9, %v14332_v33  ;;  %v14424_v39 = vld [vmem:[#allocation61_spill] sm:$0xff] }
 0x500   : > { %14417 = vst [vmem:[#allocation18_spill] sm:$0xff] %v12866_v22 }
 0x501   : > { %v5309_v9 = vpop.f32.mrb[204].mxu1  ;;  %v12874_v40 = vpop.f32.mrb[188].mxu0 }
 0x502   : > { %v5310_v55 = vadd.f32 %v5309_v9, %v14420_v52  ;;  %v5311_v53 = vpop.f32.mrb[205].mxu1  ;;  %v12877_v6 = vpop.f32.mrb[189].mxu0  ;;  %v14425_v9 = vld [vmem:[#allocation82_spill] sm:$0xff] }
 0x503   : > { %v5312_v56 = vpop.f32.mrb[206].mxu1  ;;  %v12879_v35 = vpop.f32.mrb[190].mxu0 }
 0x504   : > { %v12882_v47 = vadd.f32 %v12746_v16, %v5310_v55  ;;  %v5313_v61 = vadd.f32 %v5312_v56, %v14422_v43  ;;  %v5314_v58 = vpop.f32.mrb[207].mxu1  ;;  %v12885_v22 = vpop.f32.mrb[191].mxu0  ;;  %v14426_v55 = vld [vmem:[#allocation60_spill] sm:$0xff] }
 0x506   : > { %14421 = vst [vmem:[#allocation28_spill] sm:$0xff] %v12882_v47  ;;  %v12888_v33 = vadd.f32 %v12751_v38, %v5313_v61  ;;  %8867 = vmatmul.mubr.bf16.gmra.mrb[56].mxu1 %v14424_v39  ;;  %6135 = vmatmul.mubr.bf16.gmra.mrb[40].mxu0 %v14337_v29  ;;  %v4159_v61 = vsel %vm10986_vm5, %v14425_v9, 0 }
 0x507   : > { %8147 = vmatprep.mubr.msk.bf16.mxu0 %vm11247_vm10, %v14338_v4  ;;  %8870 = vmatprep.mubr.bf16.mxu1 %v14425_v9  ;;  %v14429_v4 = vld [vmem:[#allocation31_spill] sm:$0xff] }
 0x508   : > { %14423 = vst [vmem:[#allocation9_spill] sm:$0xff] %v12888_v33 }
 0x509   : > { %v5317_v16 = vpop.f32.mrb[208].mxu1  ;;  %v12896_v52 = vpop.f32.mrb[192].mxu0 }
 0x50a   : > { %v5318_v53 = vadd.f32 %v5317_v16, %v14426_v55  ;;  %v5319_v56 = vpop.f32.mrb[209].mxu1  ;;  %v5930_v43 = vpop.f32.mrb[193].mxu0  ;;  %v14431_v16 = vld [vmem:[#allocation91_spill] sm:$0xff] }
 0x50b   : > { %v5320_v39 = vpop.f32.mrb[210].mxu1  ;;  %v12902_v58 = vpop.f32.mrb[194].mxu0  ;;  %v14432_v56 = vld [vmem:[#allocation64_spill] sm:$0xff] }
 0x50c   : > { %v12905_v29 = vadd.f32 %v12769_v10, %v5318_v53  ;;  %v5321_v33 = vadd.f32 %v5320_v39, %v14429_v4  ;;  %v5322_v47 = vpop.f32.mrb[211].mxu1  ;;  %v5933_v20 = vpop.f32.mrb[195].mxu0  ;;  %v14435_v39 = vld [vmem:[#allocation5_spill] sm:$0xff]  ;;  %v14436_v4 = vld [vmem:[#allocation70_spill] sm:$0xff] }
 0x50d   : > { %v14433_v20 = vld [vmem:[#allocation35_spill] sm:$0xff] }
 0x50e   : > { %14428 = vst [vmem:[#allocation17_spill] sm:$0xff] %v12905_v29  ;;  %v12909_v49 = vadd.f32 %v12776_v11, %v5321_v33  ;;  %6143 = vmatmul.mubr.bf16.gmra.mrb[44].mxu0 %v14342_v60  ;;  %8871 = vmatmul.mubr.bf16.gmra.mrb[60].mxu1 %v4159_v61 }
 0x50f   : > { %8150 = vmatprep.mubr.msk.bf16.mxu0 %vm11204_vm9, %v14431_v16 }
 0x510   : > { %14430 = vst [vmem:[#allocation78_spill] sm:$0xff] %v12909_v49 }
 0x511   : > { %v5325_v9 = vpop.f32.mrb[212].mxu1  ;;  %v12915_v55 = vpop.f32.mrb[196].mxu0 }
 0x512   : > { %v5326_v10 = vadd.f32 %v5325_v9, %v14432_v56  ;;  %v5327_v53 = vpop.f32.mrb[213].mxu1  ;;  %v5938_v43 = vpop.f32.mrb[197].mxu0  ;;  %v14437_v56 = vld [vmem:[#allocation34_spill] sm:$0xff] }
 0x513   : > { %v5328_v38 = vpop.f32.mrb[214].mxu1  ;;  %v12918_v47 = vpop.f32.mrb[198].mxu0 }
 0x514   : > { %v12921_v11 = vadd.f32 %v12766_v27, %v5326_v10  ;;  %v5329_v60 = vadd.f32 %v5328_v38, %v14433_v20  ;;  %v5330_v33 = vpop.f32.mrb[215].mxu1  ;;  %v5941_v61 = vpop.f32.mrb[199].mxu0 }
 0x516   : > { %v12925_v25 = vadd.f32 %v12771_v23, %v5329_v60  ;;  %6151 = vmatmul.mubr.bf16.gmra.mrb[48].mxu0 %v14435_v39  ;;  %v14439_v23 = vld [vmem:[#allocation46_spill] sm:$0xff]  ;;  %v14441_v39 = vld [vmem:[#allocation8_spill] sm:$0xff] }
 0x517   : > { %8153 = vmatprep.mubr.msk.bf16.mxu0 %vm11247_vm10, %v14436_v4  ;;  %v14442_v4 = vmov 0  }
 0x518   : > { %14434 = vst [vmem:[#allocation32_spill] sm:$0xff] %v12925_v25 }
 0x519   : > { %v5333_v16 = vpop.f32.mrb[216].mxu1  ;;  %v12931_v9 = vpop.f32.mrb[200].mxu0 }
 0x51a   : > { %v5334_v53 = vadd.f32 %v5333_v16, %v14437_v56  ;;  %v5335_v27 = vpop.f32.mrb[217].mxu1  ;;  %v5946_v10 = vpop.f32.mrb[201].mxu0 }
 0x51b   : > { %v5336_v43 = vpop.f32.mrb[218].mxu1  ;;  %v12934_v38 = vpop.f32.mrb[202].mxu0  ;;  %v14443_v27 = vld [vmem:[#allocation37_spill] sm:$0xff] }
 0x51c   : > { %v12937_v20 = vadd.f32 %v12789_v21, %v5334_v53  ;;  %v5337_v60 = vadd.f32 %v5336_v43, %v14439_v23  ;;  %v5338_v33 = vpop.f32.mrb[219].mxu1  ;;  %v5949_v61 = vpop.f32.mrb[203].mxu0  ;;  %v14445_v23 = vld [vmem:[#allocation63_spill] sm:$0xff] }
 0x51d   : > { %v14446_v61 = vld [vmem:[#allocation20_spill] sm:$0xff] }
 0x51e   : > { %14438 = vst [vmem:[#allocation96_spill] sm:$0xff] %v12937_v20  ;;  %v12941_v32 = vadd.f32 %v12797_v59, %v5337_v60  ;;  %6159 = vmatmul.mubr.bf16.gmra.mrb[52].mxu0 %v14441_v39  ;;  %v14447_v39 = vld [vmem:[#allocation81_spill] sm:$0xff] }
 0x51f   : > { %6166 = vmatprep.mubr.bf16.mxu0 %v14442_v4 }
 0x520   : > { %14440 = vst [vmem:[#allocation45_spill] sm:$0xff] %v12941_v32  ;;  %v3970_v32 = vsel %vm478_vm1, %v14447_v39, %v14446_v61 }
 0x521   : > { %v5341_v16 = vpop.f32.mrb[220].mxu1  ;;  %v12945_v56 = vpop.f32.mrb[204].mxu0 }
 0x522   : > { %v5342_v10 = vadd.f32 %v5341_v16, %v14443_v27  ;;  %v5343_v49 = vpop.f32.mrb[221].mxu1  ;;  %v5954_v25 = vpop.f32.mrb[205].mxu0  ;;  %v14449_v16 = vld [vmem:[#allocation94_spill] sm:$0xff] }
 0x523   : > { %v5344_v21 = vpop.f32.mrb[222].mxu1  ;;  %v12948_v53 = vpop.f32.mrb[206].mxu0 }
 0x524   : > { %v12951_v43 = vadd.f32 %v12786_v54, %v5342_v10  ;;  %v5345_v59 = vadd.f32 %v5344_v21, %v14445_v23  ;;  %v5346_v60 = vpop.f32.mrb[223].mxu1  ;;  %v5957_v33 = vpop.f32.mrb[207].mxu0 }
 0x525   : > { %v14450_v33 = vld [vmem:[#allocation73_spill] sm:$0xff] }
 0x526   : > { %14444 = vst [vmem:[#allocation49_spill] sm:$0xff] %v12951_v43  ;;  %v12958_v20 = vadd.f32 %v12791_v18, %v5345_v59  ;;  %6167 = vmatmul.mubr.bf16.gmra.mrb[56].mxu0 %v3970_v32 }
 0x527   : > { %6174 = vmatprep.mubr.bf16.mxu0 %v14442_v4 }
 0x528   : > { %14448 = vst [vmem:[#allocation87_spill] sm:$0xff] %v12958_v20 }
 0x529   : > { %v5349_v49 = vpop.f32.mrb[224].mxu1  ;;  %v12961_v25 = vpop.f32.mrb[208].mxu0 }
 0x52a   : > { %v5350_v54 = vadd.f32 %v5349_v49, %v14449_v16  ;;  %v5351_v27 = vpop.f32.mrb[225].mxu1  ;;  %v5962_v10 = vpop.f32.mrb[209].mxu0  ;;  %v14452_v49 = vld [vmem:[#allocation40_spill] sm:$0xff] }
 0x52b   : > { %v5352_v21 = vpop.f32.mrb[226].mxu1  ;;  %v12964_v23 = vpop.f32.mrb[210].mxu0 }
 0x52c   : > { %v12967_v60 = vadd.f32 %v12811_v8, %v5350_v54  ;;  %v5353_v39 = vadd.f32 %v5352_v21, %v14450_v33  ;;  %v5354_v18 = vpop.f32.mrb[227].mxu1  ;;  %v5965_v59 = vpop.f32.mrb[211].mxu0  ;;  %v14454_v54 = vld [vmem:[#allocation95_spill] sm:$0xff] }
 0x52d   : > { %v14456_v59 = vld [vmem:[#allocation71_spill] sm:$0xff] }
 0x52e   : > { %v12971_v32 = vadd.f32 %v12819_v2, %v5353_v39  ;;  %6175 = vmatmul.mubr.bf16.gmra.mrb[60].mxu0 %v14446_v61 }
 0x530   : > { %14451 = vst [vmem:[#allocation21_spill] sm:$0xff] %v12971_v32 }
 0x531   : > { %v5357_v4 = vpop.f32.mrb[228].mxu1  ;;  %v12974_v20 = vpop.f32.mrb[212].mxu0 }
 0x532   : > { %v5358_v16 = vadd.f32 %v5357_v4, %v14452_v49  ;;  %v5359_v27 = vpop.f32.mrb[229].mxu1  ;;  %v5970_v10 = vpop.f32.mrb[213].mxu0 }
 0x533   : > { %v5360_v43 = vpop.f32.mrb[230].mxu1  ;;  %v12977_v29 = vpop.f32.mrb[214].mxu0 }
 0x534   : > { %v12980_v8 = vadd.f32 %v12808_v31, %v5358_v16  ;;  %v5361_v21 = vadd.f32 %v5360_v43, %v14454_v54  ;;  %v5362_v33 = vpop.f32.mrb[231].mxu1  ;;  %v5973_v2 = vpop.f32.mrb[215].mxu0  ;;  %v14457_v16 = vld [vmem:[#allocation88_spill] sm:$0xff] }
 0x536   : > { %14453 = vst [vmem:[#allocation47_spill] sm:$0xff] %v12980_v8  ;;  %v12984_v39 = vadd.f32 %v12813_v26, %v5361_v21 }
 0x538   : > { %14455 = vst [vmem:[#allocation68_spill] sm:$0xff] %v12984_v39  ;;  %v14459_v39 = vld [vmem:[#allocation76_spill] sm:$0xff] }
 0x539   : > { %v5365_v61 = vpop.f32.mrb[232].mxu1  ;;  %v12986_v18 = vpop.f32.mrb[216].mxu0 }
 0x53a   : > { %v5366_v4 = vadd.f32 %v5365_v61, %v14456_v59  ;;  %v5367_v49 = vpop.f32.mrb[233].mxu1  ;;  %v5978_v27 = vpop.f32.mrb[217].mxu0 }
 0x53b   : > { %v5368_v10 = vpop.f32.mrb[234].mxu1  ;;  %v12989_v32 = vpop.f32.mrb[218].mxu0 }
 0x53c   : > { %v12992_v31 = vadd.f32 %v12833_v45, %v5366_v4  ;;  %v5369_v43 = vadd.f32 %v5368_v10, %v14457_v16  ;;  %v5370_v54 = vpop.f32.mrb[235].mxu1  ;;  %v5981_v33 = vpop.f32.mrb[219].mxu0  ;;  %v14460_v4 = vld [vmem:[#allocation80_spill] sm:$0xff] }
 0x53e   : > { %v12996_v26 = vadd.f32 %v12841_v7, %v5369_v43 }
 0x540   : > { %14458 = vst [vmem:[#allocation62_spill] sm:$0xff] %v12996_v26 }
 0x541   : > { %v5373_v21 = vpop.f32.mrb[236].mxu1  ;;  %v12998_v2 = vpop.f32.mrb[220].mxu0 }
 0x542   : > { %v5374_v61 = vadd.f32 %v5373_v21, %v14459_v39  ;;  %v5375_v59 = vpop.f32.mrb[237].mxu1  ;;  %v5986_v49 = vpop.f32.mrb[221].mxu0 }
 0x543   : > { %v5376_v27 = vpop.f32.mrb[238].mxu1  ;;  %v13001_v8 = vpop.f32.mrb[222].mxu0 }
 0x544   : > { %v13004_v45 = vadd.f32 %v12830_v15, %v5374_v61  ;;  %v5377_v10 = vadd.f32 %v5376_v27, %v14460_v4  ;;  %v5378_v16 = vpop.f32.mrb[239].mxu1  ;;  %v5989_v54 = vpop.f32.mrb[223].mxu0 }
 0x546   : > { %v13008_v7 = vadd.f32 %v12835_v46, %v5377_v10 }
 0x549   : > { %v5381_v43 = vpop.f32.mrb[240].mxu1  ;;  %v13010_v33 = vpop.f32.mrb[224].mxu0 }
 0x54a   : > { %v5382_v39 = vadd.f32 %v5381_v43, %v12549_v50  ;;  %v5383_v21 = vpop.f32.mrb[241].mxu1  ;;  %v5994_v59 = vpop.f32.mrb[225].mxu0 }
 0x54b   : > { %v5384_v49 = vpop.f32.mrb[242].mxu1  ;;  %v13013_v26 = vpop.f32.mrb[226].mxu0 }
 0x54c   : > { %v13016_v15 = vadd.f32 %v12855_v63, %v5382_v39  ;;  %v5385_v61 = vadd.f32 %v5384_v49, %v12554_v1  ;;  %v5386_v27 = vpop.f32.mrb[243].mxu1  ;;  %v5997_v4 = vpop.f32.mrb[227].mxu0 }
 0x54d   : > { %v14465_v4 = vld [vmem:[#allocation3_spill] sm:$0xff] }
 0x54e   : > { %14461 = vst [vmem:[#allocation19_spill] sm:$0xff] %v13016_v15  ;;  %v13020_v46 = vadd.f32 %v12863_v48, %v5385_v61 }
 0x550   : > { %14462 = vst [vmem:[#allocation13_spill] sm:$0xff] %v13020_v46 }
 0x551   : > { %v5389_v10 = vpop.f32.mrb[244].mxu1  ;;  %v13022_v16 = vpop.f32.mrb[228].mxu0 }
 0x552   : > { %v5390_v50 = vadd.f32 %v5389_v10, %v12565_v17  ;;  %v5391_v54 = vpop.f32.mrb[245].mxu1  ;;  %v6002_v43 = vpop.f32.mrb[229].mxu0 }
 0x553   : > { %v5392_v21 = vpop.f32.mrb[246].mxu1  ;;  %v13025_v59 = vpop.f32.mrb[230].mxu0 }
 0x554   : > { %v13028_v63 = vadd.f32 %v12852_v14, %v5390_v50  ;;  %v5393_v1 = vadd.f32 %v5392_v21, %v12568_v13  ;;  %v5394_v39 = vpop.f32.mrb[247].mxu1  ;;  %v6005_v49 = vpop.f32.mrb[231].mxu0  ;;  %v14467_v50 = vld [vmem:[#allocation85_spill] sm:$0xff] }
 0x556   : > { %14463 = vst [vmem:[#allocation72_spill] sm:$0xff] %v13028_v63  ;;  %v13032_v48 = vadd.f32 %v12857_v57, %v5393_v1 }
 0x558   : > { %14464 = vst [vmem:[#allocation93_spill] sm:$0xff] %v13032_v48  ;;  %v14469_v48 = vld [vmem:[#allocation44_spill] sm:$0xff] }
 0x559   : > { %v5397_v61 = vpop.f32.mrb[248].mxu1  ;;  %v13034_v27 = vpop.f32.mrb[232].mxu0 }
 0x55a   : > { %v5398_v17 = vadd.f32 %v5397_v61, %v14465_v4  ;;  %v5399_v10 = vpop.f32.mrb[249].mxu1  ;;  %v6010_v54 = vpop.f32.mrb[233].mxu0 }
 0x55b   : > { %v5400_v43 = vpop.f32.mrb[250].mxu1  ;;  %v13037_v46 = vpop.f32.mrb[234].mxu0 }
 0x55c   : > { %v13040_v14 = vadd.f32 %v12877_v6, %v5398_v17  ;;  %v5401_v13 = vadd.f32 %v5400_v43, %v14467_v50  ;;  %v5402_v21 = vpop.f32.mrb[251].mxu1  ;;  %v6013_v39 = vpop.f32.mrb[235].mxu0  ;;  %v14471_v17 = vld [vmem:[#allocation90_spill] sm:$0xff] }
 0x55e   : > { %14466 = vst [vmem:[#allocation12_spill] sm:$0xff] %v13040_v14  ;;  %v13044_v57 = vadd.f32 %v12885_v22, %v5401_v13 }
 0x560   : > { %14468 = vst [vmem:[#allocation55_spill] sm:$0xff] %v13044_v57 }
 0x561   : > { %v5405_v1 = vpop.f32.mrb[252].mxu1  ;;  %v13046_v49 = vpop.f32.mrb[236].mxu0 }
 0x562   : > { %v5406_v61 = vadd.f32 %v5405_v1, %v14469_v48  ;;  %v5407_v4 = vpop.f32.mrb[253].mxu1  ;;  %v6018_v10 = vpop.f32.mrb[237].mxu0 }
 0x563   : > { %v5408_v54 = vpop.f32.mrb[254].mxu1  ;;  %v13049_v63 = vpop.f32.mrb[238].mxu0 }
 0x564   : > { %v13052_v6 = vadd.f32 %v12874_v40, %v5406_v61  ;;  %v5409_v43 = vadd.f32 %v5408_v54, %v14471_v17  ;;  %v5410_v50 = vpop.f32.mrb[255].mxu1  ;;  %v6021_v21 = vpop.f32.mrb[239].mxu0  ;;  %v13064_v40 = vld [vmem:[%s13363_s4] ss:$0 sm:$0xff]  ;;  %v9101_v17 = vld [vmem:[%s9220_s16 + $0x18] sm:$0xff]  }
 0x565   : > { %v6610_v57 = vunpack.c.h.bf16 %v9101_v17 }
 0x566   : > { %14470 = vst [vmem:[#allocation77_spill] sm:$0xff] %v13052_v6  ;;  %v13056_v22 = vadd.f32 %v12879_v35, %v5409_v43  ;;  %v6609_v43 = vunpack.c.l.bf16 %v9101_v17 }
 0x568   : > { %14472 = vst [vmem:[#allocation26_spill] sm:$0xff] %v13056_v22 }
 0x569   : > { %v8812_v13 = vpop.f32.mrb[0].mxu1  ;;  %v13058_v39 = vpop.f32.mrb[240].mxu0 }
 0x56a   : > { %v6226_v48 = vadd.f32 %v8812_v13, %v12915_v55  ;;  %v6217_v1 = vpop.f32.mrb[1].mxu1  ;;  %v6026_v4 = vpop.f32.mrb[241].mxu0 }
 0x56b   : > { %v6218_v61 = vadd.f32 %v6217_v1, %v12896_v52  ;;  %v8813_v10 = vpop.f32.mrb[2].mxu1  ;;  %v13067_v54 = vpop.f32.mrb[242].mxu0  ;;  %v9102_v4 = vld [vmem:[%s9220_s16 + $0x10] sm:$0xff]  }
 0x56c   : > { %v6474_v35 = vadd.f32 %v6226_v48, %v12609_v41  ;;  %v6229_v50 = vadd.f32 %v8813_v10, %v12918_v47  ;;  %v6220_v21 = vpop.f32.mrb[3].mxu1  ;;  %v6029_v55 = vpop.f32.mrb[243].mxu0  ;;  %v6607_v22 = vunpack.c.l.bf16 %v9102_v4  ;;  %v14473_v48 = vld [vmem:[#allocation66_spill] sm:$0xff]  ;;  %v6608_v47 = vunpack.c.h.bf16 %v9102_v4 }
 0x56d   : > { %v6472_v13 = vadd.f32 %v6218_v61, %v12612_v0  ;;  %v6221_v6 = vadd.f32 %v6220_v21, %v12902_v58 }
 0x56e   : > { %v6545_v52 = vadd.f32 %v13064_v40, %v6474_v35  ;;  %v6475_v1 = vadd.f32 %v6229_v50, %v12615_v37 }
 0x56f   : > { %v6543_v41 = vadd.f32 %v13064_v40, %v6472_v13  ;;  %v6473_v14 = vadd.f32 %v6221_v6, %v14473_v48  ;;  %v9103_v13 = vld [vmem:[%s9220_s16 + $0x28] sm:$0xff]  }
 0x570   : > { %v6673_v10 = vadd.f32 %v6609_v43, %v6545_v52  ;;  %v6546_v0 = vadd.f32 %v13064_v40, %v6475_v1  ;;  %v6613_v6 = vunpack.c.l.bf16 %v9103_v13  ;;  %v9104_v43 = vld [vmem:[%s9220_s16 + $0x20] sm:$0xff]  }
 0x571   : > { %v6671_v61 = vadd.f32 %v6607_v22, %v6543_v41  ;;  %v6544_v55 = vadd.f32 %v13064_v40, %v6473_v14  ;;  %v8816_v15 = vpop.f32.mrb[4].mxu1  ;;  %v13081_v58 = vpop.f32.mrb[244].mxu0  ;;  %v6611_v52 = vunpack.c.l.bf16 %v9104_v43 }
 0x572   : > { %v6674_v35 = vadd.f32 %v6610_v57, %v6546_v0  ;;  %v6242_v37 = vadd.f32 %v8816_v15, %v12945_v56  ;;  %v6233_v17 = vpop.f32.mrb[5].mxu1  ;;  %v6034_v50 = vpop.f32.mrb[245].mxu0  ;;  %v6737_v14 = vmax.f32 %v6673_v10, 0.0 }
 0x573   : > { %v6672_v21 = vadd.f32 %v6608_v47, %v6544_v55  ;;  %v6234_v4 = vadd.f32 %v6233_v17, %v12931_v9  ;;  %v8817_v1 = vpop.f32.mrb[6].mxu1  ;;  %v13088_v22 = vpop.f32.mrb[246].mxu0  ;;  %v6735_v15 = vmax.f32 %v6671_v61, 0.0  ;;  %v6612_v50 = vunpack.c.h.bf16 %v9104_v43 }
 0x574   : > { %v6738_v41 = vmax.f32 %v6674_v35, 0.0  ;;  %v6478_v48 = vadd.f32 %v6242_v37, %v12627_v42  ;;  %v6245_v57 = vadd.f32 %v8817_v1, %v12948_v53  ;;  %v6236_v0 = vpop.f32.mrb[7].mxu1  ;;  %v6037_v56 = vpop.f32.mrb[247].mxu0  ;;  %v6614_v35 = vunpack.c.h.bf16 %v9103_v13 }
 0x575   : > { %v6736_v9 = vmax.f32 %v6672_v21, 0.0  ;;  %v6476_v47 = vadd.f32 %v6234_v4, %v12629_v24  ;;  %v6237_v10 = vadd.f32 %v6236_v0, %v12934_v38 }
 0x576   : > { %v7695_v55 = vpack.c.bf16 %v6738_v41, %v6737_v14  ;;  %v6549_v42 = vadd.f32 %v13064_v40, %v6478_v48  ;;  %v6479_v53 = vadd.f32 %v6245_v57, %v12632_v34 }
 0x577   : > { %v7690_v37 = vpack.c.bf16 %v6736_v9, %v6735_v15  ;;  %v6547_v61 = vadd.f32 %v13064_v40, %v6476_v47  ;;  %v6477_v17 = vadd.f32 %v6237_v10, %v12634_v3  ;;  %v9105_v3 = vld [vmem:[%s9220_s16 + $0x38] sm:$0xff]  }
 0x578   : > { %7847 = vst [vmem:[%s13095_s8 + $0x8] sm:$0xff] %v7695_v55   ;;  %v6677_v21 = vadd.f32 %v6613_v6, %v6549_v42  ;;  %v6550_v24 = vadd.f32 %v13064_v40, %v6479_v53  ;;  %v6617_v43 = vunpack.c.l.bf16 %v9105_v3  ;;  %v9106_v6 = vld [vmem:[%s9220_s16 + $0x30] sm:$0xff]  }
 0x579   : > { %7691 = vst [vmem:[%s13095_s8] sm:$0xff] %v7690_v37   ;;  %v6675_v38 = vadd.f32 %v6611_v52, %v6547_v61  ;;  %v6548_v4 = vadd.f32 %v13064_v40, %v6477_v17  ;;  %v8820_v1 = vpop.f32.mrb[8].mxu1  ;;  %v13107_v14 = vpop.f32.mrb[248].mxu0  ;;  %v6615_v56 = vunpack.c.l.bf16 %v9106_v6 }
 0x57a   : > { %v6678_v34 = vadd.f32 %v6614_v35, %v6550_v24  ;;  %v6258_v13 = vadd.f32 %v8820_v1, %v12974_v20  ;;  %v6249_v41 = vpop.f32.mrb[9].mxu1  ;;  %v6042_v48 = vpop.f32.mrb[249].mxu0  ;;  %v6741_v52 = vmax.f32 %v6677_v21, 0.0  ;;  %v6618_v21 = vunpack.c.h.bf16 %v9105_v3 }
 0x57b   : > { %v6676_v57 = vadd.f32 %v6612_v50, %v6548_v4  ;;  %v6250_v0 = vadd.f32 %v6249_v41, %v12961_v25  ;;  %v8821_v15 = vpop.f32.mrb[10].mxu1  ;;  %v13113_v9 = vpop.f32.mrb[250].mxu0  ;;  %v6739_v53 = vmax.f32 %v6675_v38, 0.0  ;;  %v6616_v4 = vunpack.c.h.bf16 %v9106_v6 }
 0x57c   : > { %v6742_v47 = vmax.f32 %v6678_v34, 0.0  ;;  %v6482_v10 = vadd.f32 %v6258_v13, %v12643_v5  ;;  %v6261_v55 = vadd.f32 %v8821_v15, %v12977_v29  ;;  %v6252_v20 = vpop.f32.mrb[11].mxu1  ;;  %v6045_v42 = vpop.f32.mrb[251].mxu0 }
 0x57d   : > { %v6740_v35 = vmax.f32 %v6676_v57, 0.0  ;;  %v6480_v37 = vadd.f32 %v6250_v0, %v12645_v28  ;;  %v6253_v25 = vadd.f32 %v6252_v20, %v12964_v23 }
 0x57e   : > { %v7705_v61 = vpack.c.bf16 %v6742_v47, %v6741_v52  ;;  %v6553_v17 = vadd.f32 %v13064_v40, %v6482_v10  ;;  %v6483_v50 = vadd.f32 %v6261_v55, %v12648_v19 }
 0x57f   : > { %v7700_v24 = vpack.c.bf16 %v6740_v35, %v6739_v53  ;;  %v6551_v5 = vadd.f32 %v13064_v40, %v6480_v37  ;;  %v6481_v29 = vadd.f32 %v6253_v25, %v12650_v12  ;;  %v9107_v12 = vld [vmem:[%s9220_s16 + $0x48] sm:$0xff]  }
 0x580   : > { %7849 = vst [vmem:[%s13095_s8 + $0x18] sm:$0xff] %v7705_v61   ;;  %v6681_v38 = vadd.f32 %v6617_v43, %v6553_v17  ;;  %v6554_v28 = vadd.f32 %v13064_v40, %v6483_v50  ;;  %v6621_v0 = vunpack.c.l.bf16 %v9107_v12  ;;  %v9108_v43 = vld [vmem:[%s9220_s16 + $0x40] sm:$0xff]   ;;  %v6622_v50 = vunpack.c.h.bf16 %v9107_v12 }
 0x581   : > { %7848 = vst [vmem:[%s13095_s8 + $0x10] sm:$0xff] %v7700_v24   ;;  %v6679_v23 = vadd.f32 %v6615_v56, %v6551_v5  ;;  %v6552_v1 = vadd.f32 %v13064_v40, %v6481_v29  ;;  %v8824_v34 = vpop.f32.mrb[12].mxu1  ;;  %v13127_v13 = vpop.f32.mrb[252].mxu0  ;;  %v6619_v15 = vunpack.c.l.bf16 %v9108_v43  ;;  %v6620_v24 = vunpack.c.h.bf16 %v9108_v43 }
 0x582   : > { %v6682_v19 = vadd.f32 %v6618_v21, %v6554_v28  ;;  %v6274_v41 = vadd.f32 %v8824_v34, %v12998_v2  ;;  %v6265_v48 = vpop.f32.mrb[13].mxu1  ;;  %v6050_v57 = vpop.f32.mrb[253].mxu0  ;;  %v6745_v56 = vmax.f32 %v6681_v38, 0.0 }
 0x583   : > { %v6680_v3 = vadd.f32 %v6616_v4, %v6552_v1  ;;  %v6266_v6 = vadd.f32 %v6265_v48, %v12986_v18  ;;  %v8825_v52 = vpop.f32.mrb[14].mxu1  ;;  %v13133_v47 = vpop.f32.mrb[254].mxu0  ;;  %v6743_v53 = vmax.f32 %v6679_v23, 0.0  ;;  %v9110_v48 = vld [vmem:[%s9220_s16 + $0x50] sm:$0xff]  }
 0x584   : > { %v6746_v10 = vmax.f32 %v6682_v19, 0.0  ;;  %v6486_v55 = vadd.f32 %v6274_v41, %v12661_v51  ;;  %v6277_v20 = vadd.f32 %v8825_v52, %v13001_v8  ;;  %v6268_v2 = vpop.f32.mrb[15].mxu1  ;;  %v6053_v42 = vpop.f32.mrb[255].mxu0  ;;  %v6623_v57 = vunpack.c.l.bf16 %v9110_v48 }
 0x585   : > { %v6744_v35 = vmax.f32 %v6680_v3, 0.0  ;;  %v6484_v37 = vadd.f32 %v6266_v6, %v12659_v36  ;;  %v6269_v18 = vadd.f32 %v6268_v2, %v12989_v32 }
 0x586   : > { %v7715_v25 = vpack.c.bf16 %v6746_v10, %v6745_v56  ;;  %v6557_v61 = vadd.f32 %v13064_v40, %v6486_v55  ;;  %v6487_v17 = vadd.f32 %v6277_v20, %v12666_v30  ;;  %v14474_v55 = vld [vmem:[#allocation36_spill] sm:$0xff] }
 0x587   : > { %v7710_v21 = vpack.c.bf16 %v6744_v35, %v6743_v53  ;;  %v6555_v51 = vadd.f32 %v13064_v40, %v6484_v37  ;;  %v6485_v8 = vadd.f32 %v6269_v18, %v12664_v44  ;;  %v9109_v44 = vld [vmem:[%s9220_s16 + $0x58] sm:$0xff]   ;;  %v14475_v53 = vld [vmem:[#allocation89_spill] sm:$0xff] }
 0x588   : > { %7851 = vst [vmem:[%s13095_s8 + $0x28] sm:$0xff] %v7715_v25   ;;  %v6685_v5 = vadd.f32 %v6621_v0, %v6557_v61  ;;  %v6558_v36 = vadd.f32 %v13064_v40, %v6487_v17  ;;  %v6625_v19 = vunpack.c.l.bf16 %v9109_v44  ;;  %v6626_v37 = vunpack.c.h.bf16 %v9109_v44  ;;  %v14476_v25 = vld [vmem:[#allocation65_spill] sm:$0xff] }
 0x589   : > { %7850 = vst [vmem:[%s13095_s8 + $0x20] sm:$0xff] %v7710_v21   ;;  %v6683_v32 = vadd.f32 %v6619_v15, %v6555_v51  ;;  %v6556_v29 = vadd.f32 %v13064_v40, %v6485_v8  ;;  %v8828_v4 = vpop.f32.mrb[16].mxu1  ;;  %v13147_v38 = vpop.f32.mrb[0].mxu0  ;;  %v6624_v61 = vunpack.c.h.bf16 %v9110_v48  ;;  %v14477_v48 = vld [vmem:[#allocation86_spill] sm:$0xff] }
 0x58a   : > { %v6686_v30 = vadd.f32 %v6622_v50, %v6558_v36  ;;  %v6290_v28 = vadd.f32 %v8828_v4, %v13022_v16  ;;  %v6281_v23 = vpop.f32.mrb[17].mxu1  ;;  %v6058_v1 = vpop.f32.mrb[1].mxu0  ;;  %v6749_v0 = vmax.f32 %v6685_v5, 0.0  ;;  %v9111_v4 = vld [vmem:[%s9220_s16 + $0x68] sm:$0xff]  }
 0x58b   : > { %v6684_v34 = vadd.f32 %v6620_v24, %v6556_v29  ;;  %v6282_v41 = vadd.f32 %v6281_v23, %v13010_v33  ;;  %v8829_v3 = vpop.f32.mrb[18].mxu1  ;;  %v13153_v12 = vpop.f32.mrb[2].mxu0  ;;  %v6747_v56 = vmax.f32 %v6683_v32, 0.0  ;;  %v9112_v23 = vld [vmem:[%s9220_s16 + $0x60] sm:$0xff]  }
 0x58c   : > { %v6750_v6 = vmax.f32 %v6686_v30, 0.0  ;;  %v6490_v43 = vadd.f32 %v6290_v28, %v12687_v62  ;;  %v6293_v15 = vadd.f32 %v8829_v3, %v13025_v59  ;;  %v6284_v16 = vpop.f32.mrb[19].mxu1  ;;  %v6061_v52 = vpop.f32.mrb[3].mxu0  ;;  %v6629_v30 = vunpack.c.l.bf16 %v9111_v4 }
 0x58d   : > { %v6748_v10 = vmax.f32 %v6684_v34, 0.0  ;;  %v6488_v20 = vadd.f32 %v6282_v41, %v14474_v55  ;;  %v6285_v33 = vadd.f32 %v6284_v16, %v13013_v26  ;;  %v6627_v1 = vunpack.c.l.bf16 %v9112_v23 }
 0x58e   : > { %v7725_v2 = vpack.c.bf16 %v6750_v6, %v6749_v0  ;;  %v6561_v42 = vadd.f32 %v13064_v40, %v6490_v43  ;;  %v6491_v35 = vadd.f32 %v6293_v15, %v14475_v53  ;;  %v14478_v15 = vld [vmem:[#allocation92_spill] sm:$0xff]  ;;  %v6628_v53 = vunpack.c.h.bf16 %v9112_v23 }
 0x58f   : > { %v7720_v18 = vpack.c.bf16 %v6748_v10, %v6747_v56  ;;  %v6559_v62 = vadd.f32 %v13064_v40, %v6488_v20  ;;  %v6489_v59 = vadd.f32 %v6285_v33, %v14476_v25  ;;  %v14479_v10 = vld [vmem:[#allocation10_spill] sm:$0xff]  ;;  %v6630_v20 = vunpack.c.h.bf16 %v9111_v4 }
 0x590   : > { %7853 = vst [vmem:[%s13095_s8 + $0x38] sm:$0xff] %v7725_v2   ;;  %v6689_v17 = vadd.f32 %v6625_v19, %v6561_v42  ;;  %v6562_v50 = vadd.f32 %v13064_v40, %v6491_v35  ;;  %v14480_v42 = vld [vmem:[#allocation97_spill] sm:$0xff] }
 0x591   : > { %7852 = vst [vmem:[%s13095_s8 + $0x30] sm:$0xff] %v7720_v18   ;;  %v6687_v26 = vadd.f32 %v6623_v57, %v6559_v62  ;;  %v6560_v21 = vadd.f32 %v13064_v40, %v6489_v59  ;;  %v8832_v51 = vpop.f32.mrb[20].mxu1  ;;  %v13167_v8 = vpop.f32.mrb[4].mxu0 }
 0x592   : > { %v6690_v24 = vadd.f32 %v6626_v37, %v6562_v50  ;;  %v6306_v5 = vadd.f32 %v8832_v51, %v13046_v49  ;;  %v6297_v36 = vpop.f32.mrb[21].mxu1  ;;  %v6066_v32 = vpop.f32.mrb[5].mxu0  ;;  %v6753_v19 = vmax.f32 %v6689_v17, 0.0 }
 0x593   : > { %v6688_v29 = vadd.f32 %v6624_v61, %v6560_v21  ;;  %v6298_v28 = vadd.f32 %v6297_v36, %v13034_v27  ;;  %v8833_v34 = vpop.f32.mrb[22].mxu1  ;;  %v13173_v44 = vpop.f32.mrb[6].mxu0  ;;  %v6751_v6 = vmax.f32 %v6687_v26, 0.0  ;;  %v9113_v21 = vld [vmem:[%s9220_s16 + $0x78] sm:$0xff]  }
 0x594   : > { %v6754_v41 = vmax.f32 %v6690_v24, 0.0  ;;  %v6494_v57 = vadd.f32 %v6306_v5, %v14477_v48  ;;  %v6309_v3 = vadd.f32 %v8833_v34, %v13049_v63  ;;  %v6300_v49 = vpop.f32.mrb[23].mxu1  ;;  %v6069_v0 = vpop.f32.mrb[7].mxu0  ;;  %v6633_v51 = vunpack.c.l.bf16 %v9113_v21  ;;  %v9114_v5 = vld [vmem:[%s9220_s16 + $0x70] sm:$0xff]   ;;  %v14482_v48 = vld [vmem:[#allocation75_spill] sm:$0xff] }
 0x595   : > { %v6752_v43 = vmax.f32 %v6688_v29, 0.0  ;;  %v6492_v16 = vadd.f32 %v6298_v28, %v14478_v15  ;;  %v6301_v27 = vadd.f32 %v6300_v49, %v13037_v46  ;;  %v6631_v36 = vunpack.c.l.bf16 %v9114_v5  ;;  %v14481_v28 = vld [vmem:[#allocation16_spill] sm:$0xff]  ;;  %v14483_v0 = vld [vmem:[#allocation14_spill] sm:$0xff] }
 0x596   : > { %v7735_v52 = vpack.c.bf16 %v6754_v41, %v6753_v19  ;;  %v6565_v56 = vadd.f32 %v13064_v40, %v6494_v57  ;;  %v6495_v55 = vadd.f32 %v6309_v3, %v14479_v10 }
 0x597   : > { %v7730_v33 = vpack.c.bf16 %v6752_v43, %v6751_v6  ;;  %v6563_v2 = vadd.f32 %v13064_v40, %v6492_v16  ;;  %v6493_v63 = vadd.f32 %v6301_v27, %v14480_v42  ;;  %v6634_v43 = vunpack.c.h.bf16 %v9113_v21  ;;  %v14484_v27 = vld [vmem:[#allocation99_spill] sm:$0xff]  ;;  %v14485_v21 = vld [vmem:[#allocation22_spill] sm:$0xff] }
 0x598   : > { %7855 = vst [vmem:[%s13095_s8 + $0x48] sm:$0xff] %v7735_v52   ;;  %v6693_v35 = vadd.f32 %v6629_v30, %v6565_v56  ;;  %v6566_v37 = vadd.f32 %v13064_v40, %v6495_v55  ;;  %v6632_v52 = vunpack.c.h.bf16 %v9114_v5 }
 0x599   : > { %7854 = vst [vmem:[%s13095_s8 + $0x40] sm:$0xff] %v7730_v33   ;;  %v6691_v46 = vadd.f32 %v6627_v1, %v6563_v2  ;;  %v6564_v18 = vadd.f32 %v13064_v40, %v6493_v63  ;;  %v8836_v62 = vpop.f32.mrb[24].mxu1  ;;  %v13187_v25 = vpop.f32.mrb[8].mxu0 }
 0x59a   : > { %v6694_v59 = vadd.f32 %v6630_v20, %v6566_v37  ;;  %v6322_v61 = vadd.f32 %v8836_v62, %v13081_v58  ;;  %v6313_v17 = vpop.f32.mrb[25].mxu1  ;;  %v6074_v50 = vpop.f32.mrb[9].mxu0  ;;  %v6757_v4 = vmax.f32 %v6693_v35, 0.0  ;;  %v9115_v37 = vld [vmem:[%s9220_s16 + $0x88] sm:$0xff]   ;;  %v9116_v62 = vld [vmem:[%s9220_s16 + $0x80] sm:$0xff]  }
 0x59b   : > { %v6692_v26 = vadd.f32 %v6628_v53, %v6564_v18  ;;  %v6314_v24 = vadd.f32 %v6313_v17, %v13058_v39  ;;  %v8837_v32 = vpop.f32.mrb[26].mxu1  ;;  %v13193_v29 = vpop.f32.mrb[10].mxu0  ;;  %v6755_v19 = vmax.f32 %v6691_v46, 0.0  ;;  %v6637_v46 = vunpack.c.l.bf16 %v9115_v37 }
 0x59c   : > { %v6758_v30 = vmax.f32 %v6694_v59, 0.0  ;;  %v6498_v23 = vadd.f32 %v6322_v61, %v14481_v28  ;;  %v6325_v1 = vadd.f32 %v8837_v32, %v13088_v22  ;;  %v6316_v58 = vpop.f32.mrb[27].mxu1  ;;  %v6077_v34 = vpop.f32.mrb[11].mxu0  ;;  %v6635_v59 = vunpack.c.l.bf16 %v9116_v62 }
 0x59d   : > { %v6756_v41 = vmax.f32 %v6692_v26, 0.0  ;;  %v6496_v57 = vadd.f32 %v6314_v24, %v14482_v48  ;;  %v6317_v39 = vadd.f32 %v6316_v58, %v13067_v54  ;;  %v6638_v34 = vunpack.c.h.bf16 %v9115_v37  ;;  %v14488_v48 = vld [vmem:[#allocation52_spill] sm:$0xff] }
 0x59e   : > { %v7745_v3 = vpack.c.bf16 %v6758_v30, %v6757_v4  ;;  %v6569_v49 = vadd.f32 %v13064_v40, %v6498_v23  ;;  %v6499_v6 = vadd.f32 %v6325_v1, %v14483_v0  ;;  %v14486_v4 = vld [vmem:[#allocation11_spill] sm:$0xff] }
 0x59f   : > { %v7740_v15 = vpack.c.bf16 %v6756_v41, %v6755_v19  ;;  %v6567_v16 = vadd.f32 %v13064_v40, %v6496_v57  ;;  %v6497_v22 = vadd.f32 %v6317_v39, %v14484_v27  ;;  %v14487_v1 = vld [vmem:[#allocation15_spill] sm:$0xff]  ;;  %v6636_v57 = vunpack.c.h.bf16 %v9116_v62 }
 0x5a0   : > { %7857 = vst [vmem:[%s13095_s8 + $0x58] sm:$0xff] %v7745_v3   ;;  %v6697_v56 = vadd.f32 %v6633_v51, %v6569_v49  ;;  %v6570_v10 = vadd.f32 %v13064_v40, %v6499_v6 }
 0x5a1   : > { %7856 = vst [vmem:[%s13095_s8 + $0x50] sm:$0xff] %v7740_v15   ;;  %v6695_v54 = vadd.f32 %v6631_v36, %v6567_v16  ;;  %v6568_v55 = vadd.f32 %v13064_v40, %v6497_v22  ;;  %v8840_v20 = vpop.f32.mrb[28].mxu1  ;;  %v13207_v33 = vpop.f32.mrb[12].mxu0 }
 0x5a2   : > { %v6698_v2 = vadd.f32 %v6634_v43, %v6570_v10  ;;  %v6338_v42 = vadd.f32 %v8840_v20, %v13127_v13  ;;  %v6329_v63 = vpop.f32.mrb[29].mxu1  ;;  %v6082_v53 = vpop.f32.mrb[13].mxu0  ;;  %v6761_v50 = vmax.f32 %v6697_v56, 0.0 }
 0x5a3   : > { %v6696_v35 = vadd.f32 %v6632_v52, %v6568_v55  ;;  %v6330_v18 = vadd.f32 %v6329_v63, %v13107_v14  ;;  %v8841_v61 = vpop.f32.mrb[30].mxu1  ;;  %v13213_v17 = vpop.f32.mrb[14].mxu0  ;;  %v6759_v36 = vmax.f32 %v6695_v54, 0.0  ;;  %v9117_v52 = vld [vmem:[%s9220_s16 + $0x98] sm:$0xff]   ;;  %v9118_v54 = vld [vmem:[%s9220_s16 + $0x90] sm:$0xff]  }
 0x5a4   : > { %v6762_v26 = vmax.f32 %v6698_v2, 0.0  ;;  %v6502_v51 = vadd.f32 %v6338_v42, %v14485_v21  ;;  %v6341_v24 = vadd.f32 %v8841_v61, %v13133_v47  ;;  %v6332_v13 = vpop.f32.mrb[31].mxu1  ;;  %v6085_v5 = vpop.f32.mrb[15].mxu0  ;;  %v6641_v56 = vunpack.c.l.bf16 %v9117_v52  ;;  %v14489_v53 = vld [vmem:[#allocation25_spill] sm:$0xff]  ;;  %v14491_v21 = vld [vmem:[#allocation79_spill] sm:$0xff] }
 0x5a5   : > { %v6760_v32 = vmax.f32 %v6696_v35, 0.0  ;;  %v6500_v30 = vadd.f32 %v6330_v18, %v14486_v4  ;;  %v6333_v14 = vadd.f32 %v6332_v13, %v13113_v9  ;;  %v6639_v55 = vunpack.c.l.bf16 %v9118_v54 }
 0x5a6   : > { %v7755_v28 = vpack.c.bf16 %v6762_v26, %v6761_v50  ;;  %v6573_v23 = vadd.f32 %v13064_v40, %v6502_v51  ;;  %v6503_v58 = vadd.f32 %v6341_v24, %v14487_v1  ;;  %v6642_v24 = vunpack.c.h.bf16 %v9117_v52 }
 0x5a7   : > { %v7750_v19 = vpack.c.bf16 %v6760_v32, %v6759_v36  ;;  %v6571_v41 = vadd.f32 %v13064_v40, %v6500_v30  ;;  %v6501_v47 = vadd.f32 %v6333_v14, %v14488_v48  ;;  %v14492_v36 = vld [vmem:[#allocation23_spill] sm:$0xff]  ;;  %v6640_v32 = vunpack.c.h.bf16 %v9118_v54  ;;  %v9119_v48 = vld [vmem:[%s9220_s16 + $0xa8] sm:$0xff]  }
 0x5a8   : > { %7859 = vst [vmem:[%s13095_s8 + $0x68] sm:$0xff] %v7755_v28   ;;  %v6701_v39 = vadd.f32 %v6637_v46, %v6573_v23  ;;  %v6574_v3 = vadd.f32 %v13064_v40, %v6503_v58 }
 0x5a9   : > { %7858 = vst [vmem:[%s13095_s8 + $0x60] sm:$0xff] %v7750_v19   ;;  %v6699_v9 = vadd.f32 %v6635_v59, %v6571_v41  ;;  %v6572_v49 = vadd.f32 %v13064_v40, %v6501_v47  ;;  %v8844_v0 = vpop.f32.mrb[32].mxu1  ;;  %v13227_v6 = vpop.f32.mrb[16].mxu0  ;;  %v14490_v59 = vld [vmem:[#allocation84_spill] sm:$0xff]  ;;  %v6645_v47 = vunpack.c.l.bf16 %v9119_v48 }
 0x5aa   : > { %v6702_v43 = vadd.f32 %v6638_v34, %v6574_v3  ;;  %v6354_v15 = vadd.f32 %v8844_v0, %v13167_v8  ;;  %v6345_v16 = vpop.f32.mrb[33].mxu1  ;;  %v6090_v27 = vpop.f32.mrb[17].mxu0  ;;  %v6765_v42 = vmax.f32 %v6701_v39, 0.0  ;;  %v9120_v39 = vld [vmem:[%s9220_s16 + $0xa0] sm:$0xff]  }
 0x5ab   : > { %v6700_v22 = vadd.f32 %v6636_v57, %v6572_v49  ;;  %v6346_v10 = vadd.f32 %v6345_v16, %v13147_v38  ;;  %v8845_v20 = vpop.f32.mrb[34].mxu1  ;;  %v13233_v2 = vpop.f32.mrb[18].mxu0  ;;  %v6763_v18 = vmax.f32 %v6699_v9, 0.0  ;;  %v6643_v3 = vunpack.c.l.bf16 %v9120_v39 }
 0x5ac   : > { %v6766_v63 = vmax.f32 %v6702_v43, 0.0  ;;  %v6506_v35 = vadd.f32 %v6354_v15, %v14489_v53  ;;  %v6357_v37 = vadd.f32 %v8845_v20, %v13173_v44  ;;  %v6348_v8 = vpop.f32.mrb[35].mxu1  ;;  %v6093_v46 = vpop.f32.mrb[19].mxu0  ;;  %v14493_v15 = vld [vmem:[#allocation28_spill] sm:$0xff]  ;;  %v6646_v53 = vunpack.c.h.bf16 %v9119_v48 }
 0x5ad   : > { %v6764_v62 = vmax.f32 %v6700_v22, 0.0  ;;  %v6504_v61 = vadd.f32 %v6346_v10, %v14490_v59  ;;  %v6349_v38 = vadd.f32 %v6348_v8, %v13153_v12  ;;  %v14494_v10 = vld [vmem:[#allocation7_spill] sm:$0xff]  ;;  %v14496_v8 = vld [vmem:[#allocation18_spill] sm:$0xff]  ;;  %v6644_v46 = vunpack.c.h.bf16 %v9120_v39  ;;  %v14498_v39 = vld [vmem:[#allocation32_spill] sm:$0xff] }
 0x5ae   : > { %v7765_v50 = vpack.c.bf16 %v6766_v63, %v6765_v42  ;;  %v6577_v26 = vadd.f32 %v13064_v40, %v6506_v35  ;;  %v6507_v51 = vadd.f32 %v6357_v37, %v14491_v21  ;;  %v14495_v42 = vld [vmem:[#allocation9_spill] sm:$0xff] }
 0x5af   : > { %v7760_v13 = vpack.c.bf16 %v6764_v62, %v6763_v18  ;;  %v6575_v5 = vadd.f32 %v13064_v40, %v6504_v61  ;;  %v6505_v44 = vadd.f32 %v6349_v38, %v14492_v36 }
 0x5b0   : > { %7861 = vst [vmem:[%s13095_s8 + $0x78] sm:$0xff] %v7765_v50   ;;  %v6705_v4 = vadd.f32 %v6641_v56, %v6577_v26  ;;  %v6578_v30 = vadd.f32 %v13064_v40, %v6507_v51 }
 0x5b1   : > { %7860 = vst [vmem:[%s13095_s8 + $0x70] sm:$0xff] %v7760_v13   ;;  %v6703_v12 = vadd.f32 %v6639_v55, %v6575_v5  ;;  %v6576_v14 = vadd.f32 %v13064_v40, %v6505_v44  ;;  %v8848_v28 = vpop.f32.mrb[36].mxu1  ;;  %v6096_v23 = vpop.f32.mrb[20].mxu0  ;;  %v9121_v13 = vld [vmem:[%s9220_s16 + $0xb8] sm:$0xff]   ;;  %v9122_v44 = vld [vmem:[%s9220_s16 + $0xb0] sm:$0xff]  }
 0x5b2   : > { %v6706_v1 = vadd.f32 %v6642_v24, %v6578_v30  ;;  %v6370_v58 = vadd.f32 %v8848_v28, %v13207_v33  ;;  %v6361_v34 = vpop.f32.mrb[37].mxu1  ;;  %v6098_v19 = vpop.f32.mrb[21].mxu0  ;;  %v6769_v0 = vmax.f32 %v6705_v4, 0.0  ;;  %v6649_v5 = vunpack.c.l.bf16 %v9121_v13 }
 0x5b3   : > { %v6704_v41 = vadd.f32 %v6640_v32, %v6576_v14  ;;  %v6362_v57 = vadd.f32 %v6361_v34, %v13187_v25  ;;  %v8849_v9 = vpop.f32.mrb[38].mxu1  ;;  %v6099_v49 = vpop.f32.mrb[22].mxu0  ;;  %v6767_v52 = vmax.f32 %v6703_v12, 0.0  ;;  %v6647_v32 = vunpack.c.l.bf16 %v9122_v44 }
 0x5b4   : > { %v6770_v43 = vmax.f32 %v6706_v1, 0.0  ;;  %v6510_v16 = vadd.f32 %v6370_v58, %v14493_v15  ;;  %v6373_v27 = vadd.f32 %v8849_v9, %v13213_v17  ;;  %v6364_v22 = vpop.f32.mrb[39].mxu1  ;;  %v6101_v33 = vpop.f32.mrb[23].mxu0  ;;  %v6650_v9 = vunpack.c.h.bf16 %v9121_v13 }
 0x5b5   : > { %v6768_v56 = vmax.f32 %v6704_v41, 0.0  ;;  %v6508_v54 = vadd.f32 %v6362_v57, %v14494_v10  ;;  %v6365_v25 = vadd.f32 %v6364_v22, %v13193_v29  ;;  %v14497_v41 = vld [vmem:[#allocation17_spill] sm:$0xff]  ;;  %v6648_v15 = vunpack.c.h.bf16 %v9122_v44 }
 0x5b6   : > { %v7775_v55 = vpack.c.bf16 %v6770_v43, %v6769_v0  ;;  %v6581_v20 = vadd.f32 %v13064_v40, %v6510_v16  ;;  %v6511_v63 = vadd.f32 %v6373_v27, %v14495_v42  ;;  %v14499_v43 = vld [vmem:[#allocation78_spill] sm:$0xff] }
 0x5b7   : > { %v7770_v35 = vpack.c.bf16 %v6768_v56, %v6767_v52  ;;  %v6579_v37 = vadd.f32 %v13064_v40, %v6508_v54  ;;  %v6509_v17 = vadd.f32 %v6365_v25, %v14496_v8 }
 0x5b8   : > { %7863 = vst [vmem:[%s13095_s8 + $0x88] sm:$0xff] %v7775_v55   ;;  %v6709_v18 = vadd.f32 %v6645_v47, %v6581_v20  ;;  %v6582_v62 = vadd.f32 %v13064_v40, %v6511_v63  ;;  %v9123_v20 = vld [vmem:[%s9220_s16 + $0xc8] sm:$0xff]  }
 0x5b9   : > { %7862 = vst [vmem:[%s13095_s8 + $0x80] sm:$0xff] %v7770_v35   ;;  %v6707_v29 = vadd.f32 %v6643_v3, %v6579_v37  ;;  %v6580_v59 = vadd.f32 %v13064_v40, %v6509_v17  ;;  %v8852_v61 = vpop.f32.mrb[40].mxu1  ;;  %v6104_v38 = vpop.f32.mrb[24].mxu0  ;;  %v6653_v42 = vunpack.c.l.bf16 %v9123_v20  ;;  %v6654_v44 = vunpack.c.h.bf16 %v9123_v20 }
 0x5ba   : > { %v6710_v50 = vadd.f32 %v6646_v53, %v6582_v62  ;;  %v6386_v26 = vadd.f32 %v8852_v61, %v6096_v23  ;;  %v6377_v21 = vpop.f32.mrb[41].mxu1  ;;  %v6106_v51 = vpop.f32.mrb[25].mxu0  ;;  %v6773_v12 = vmax.f32 %v6709_v18, 0.0  ;;  %v9124_v53 = vld [vmem:[%s9220_s16 + $0xc0] sm:$0xff]   ;;  %v14500_v18 = vld [vmem:[#allocation49_spill] sm:$0xff] }
 0x5bb   : > { %v6708_v24 = vadd.f32 %v6644_v46, %v6580_v59  ;;  %v6378_v36 = vadd.f32 %v6377_v21, %v13227_v6  ;;  %v8853_v4 = vpop.f32.mrb[42].mxu1  ;;  %v6107_v30 = vpop.f32.mrb[26].mxu0  ;;  %v6771_v23 = vmax.f32 %v6707_v29, 0.0  ;;  %v6651_v35 = vunpack.c.l.bf16 %v9124_v53  ;;  %v14501_v21 = vld [vmem:[#allocation96_spill] sm:$0xff] }
 0x5bc   : > { %v6774_v14 = vmax.f32 %v6710_v50, 0.0  ;;  %v6514_v28 = vadd.f32 %v6386_v26, %v12921_v11  ;;  %v6389_v1 = vadd.f32 %v8853_v4, %v6099_v49  ;;  %v6380_v58 = vpop.f32.mrb[43].mxu1  ;;  %v6109_v34 = vpop.f32.mrb[27].mxu0 }
 0x5bd   : > { %v6772_v19 = vmax.f32 %v6708_v24, 0.0  ;;  %v6512_v48 = vadd.f32 %v6378_v36, %v14497_v41  ;;  %v6381_v47 = vadd.f32 %v6380_v58, %v13233_v2 }
 0x5be   : > { %v7785_v6 = vpack.c.bf16 %v6774_v14, %v6773_v12  ;;  %v6585_v57 = vadd.f32 %v13064_v40, %v6514_v28  ;;  %v6515_v3 = vadd.f32 %v6389_v1, %v14498_v39  ;;  %v14503_v12 = vld [vmem:[#allocation45_spill] sm:$0xff]  ;;  %v6652_v28 = vunpack.c.h.bf16 %v9124_v53 }
 0x5bf   : > { %v7780_v0 = vpack.c.bf16 %v6772_v19, %v6771_v23  ;;  %v6583_v11 = vadd.f32 %v13064_v40, %v6512_v48  ;;  %v6513_v49 = vadd.f32 %v6381_v47, %v14499_v43 }
 0x5c0   : > { %7865 = vst [vmem:[%s13095_s8 + $0x98] sm:$0xff] %v7785_v6   ;;  %v6713_v16 = vadd.f32 %v6649_v5, %v6585_v57  ;;  %v6586_v27 = vadd.f32 %v13064_v40, %v6515_v3  ;;  %v14502_v5 = vld [vmem:[#allocation87_spill] sm:$0xff] }
 0x5c1   : > { %7864 = vst [vmem:[%s13095_s8 + $0x90] sm:$0xff] %v7780_v0   ;;  %v6711_v2 = vadd.f32 %v6647_v32, %v6583_v11  ;;  %v6584_v22 = vadd.f32 %v13064_v40, %v6513_v49  ;;  %v8856_v33 = vpop.f32.mrb[44].mxu1  ;;  %v6112_v52 = vpop.f32.mrb[28].mxu0  ;;  %v9125_v11 = vld [vmem:[%s9220_s16 + $0xd0] sm:$0xff]  }
 0x5c2   : > { %v6714_v56 = vadd.f32 %v6650_v9, %v6586_v27  ;;  %v6402_v10 = vadd.f32 %v8856_v33, %v6112_v52  ;;  %v6393_v54 = vpop.f32.mrb[45].mxu1  ;;  %v6114_v25 = vpop.f32.mrb[29].mxu0  ;;  %v6777_v17 = vmax.f32 %v6713_v16, 0.0  ;;  %v6655_v43 = vunpack.c.l.bf16 %v9125_v11 }
 0x5c3   : > { %v6712_v55 = vadd.f32 %v6648_v15, %v6584_v22  ;;  %v6394_v63 = vadd.f32 %v6393_v54, %v6104_v38  ;;  %v8857_v37 = vpop.f32.mrb[46].mxu1  ;;  %v6115_v8 = vpop.f32.mrb[30].mxu0  ;;  %v6775_v50 = vmax.f32 %v6711_v2, 0.0  ;;  %v6656_v25 = vunpack.c.h.bf16 %v9125_v11 }
 0x5c4   : > { %v6778_v46 = vmax.f32 %v6714_v56, 0.0  ;;  %v6518_v62 = vadd.f32 %v6402_v10, %v14500_v18  ;;  %v6405_v29 = vadd.f32 %v8857_v37, %v6115_v8  ;;  %v6396_v59 = vpop.f32.mrb[47].mxu1  ;;  %v6117_v61 = vpop.f32.mrb[31].mxu0  ;;  %v14504_v10 = vld [vmem:[#allocation21_spill] sm:$0xff] }
 0x5c5   : > { %v6776_v26 = vmax.f32 %v6712_v55, 0.0  ;;  %v6516_v51 = vadd.f32 %v6394_v63, %v14501_v21  ;;  %v6397_v24 = vadd.f32 %v6396_v59, %v6107_v30 }
 0x5c6   : > { %v7795_v13 = vpack.c.bf16 %v6778_v46, %v6777_v17  ;;  %v6589_v38 = vadd.f32 %v13064_v40, %v6518_v62  ;;  %v6519_v36 = vadd.f32 %v6405_v29, %v14502_v5  ;;  %v14505_v46 = vld [vmem:[#allocation47_spill] sm:$0xff]  ;;  %v9126_v62 = vld [vmem:[%s9220_s16 + $0xd8] sm:$0xff]  }
 0x5c7   : > { %v7790_v32 = vpack.c.bf16 %v6776_v26, %v6775_v50  ;;  %v6587_v4 = vadd.f32 %v13064_v40, %v6516_v51  ;;  %v6517_v14 = vadd.f32 %v6397_v24, %v14503_v12  ;;  %v6657_v29 = vunpack.c.l.bf16 %v9126_v62  ;;  %v14506_v24 = vld [vmem:[#allocation68_spill] sm:$0xff] }
 0x5c8   : > { %7867 = vst [vmem:[%s13095_s8 + $0xa8] sm:$0xff] %v7795_v13   ;;  %v6717_v1 = vadd.f32 %v6653_v42, %v6589_v38  ;;  %v6590_v58 = vadd.f32 %v13064_v40, %v6519_v36  ;;  %v6658_v38 = vunpack.c.h.bf16 %v9126_v62 }
 0x5c9   : > { %7866 = vst [vmem:[%s13095_s8 + $0xa0] sm:$0xff] %v7790_v32   ;;  %v6715_v34 = vadd.f32 %v6651_v35, %v6587_v4  ;;  %v6588_v30 = vadd.f32 %v13064_v40, %v6517_v14  ;;  %v8860_v23 = vpop.f32.mrb[48].mxu1  ;;  %v6120_v19 = vpop.f32.mrb[32].mxu0 }
 0x5ca   : > { %v6718_v41 = vadd.f32 %v6654_v44, %v6590_v58  ;;  %v6409_v48 = vpop.f32.mrb[49].mxu1  ;;  %v6122_v47 = vpop.f32.mrb[33].mxu0  ;;  %v6781_v9 = vmax.f32 %v6717_v1, 0.0  ;;  %v9127_v58 = vld [vmem:[%s9220_s16 + $0xe0] sm:$0xff]  }
 0x5cb   : > { %v6716_v6 = vadd.f32 %v6652_v28, %v6588_v30  ;;  %v6410_v57 = vadd.f32 %v6409_v48, %v6120_v19  ;;  %v8861_v39 = vpop.f32.mrb[50].mxu1  ;;  %v6123_v3 = vpop.f32.mrb[34].mxu0  ;;  %v6779_v16 = vmax.f32 %v6715_v34, 0.0  ;;  %v6659_v34 = vunpack.c.l.bf16 %v9127_v58 }
 0x5cc   : > { %v6782_v0 = vmax.f32 %v6718_v41, 0.0  ;;  %v6412_v49 = vpop.f32.mrb[51].mxu1  ;;  %v6125_v15 = vpop.f32.mrb[35].mxu0  ;;  %v6660_v11 = vunpack.c.h.bf16 %v9127_v58 }
 0x5cd   : > { %v6780_v27 = vmax.f32 %v6716_v6, 0.0  ;;  %v6520_v2 = vadd.f32 %v6410_v57, %v12967_v60  ;;  %v6413_v22 = vadd.f32 %v6412_v49, %v6123_v3 }
 0x5ce   : > { %v7805_v33 = vpack.c.bf16 %v6782_v0, %v6781_v9  ;;  %v14507_v9 = vld [vmem:[#allocation62_spill] sm:$0xff] }
 0x5cf   : > { %v7800_v52 = vpack.c.bf16 %v6780_v27, %v6779_v16  ;;  %v6591_v56 = vadd.f32 %v13064_v40, %v6520_v2  ;;  %v6521_v54 = vadd.f32 %v6413_v22, %v14504_v10 }
 0x5d0   : > { %7869 = vst [vmem:[%s13095_s8 + $0xb8] sm:$0xff] %v7805_v33   ;;  %v9128_v33 = vld [vmem:[%s9220_s16 + $0xe8] sm:$0xff]  }
 0x5d1   : > { %7868 = vst [vmem:[%s13095_s8 + $0xb0] sm:$0xff] %v7800_v52   ;;  %v6719_v55 = vadd.f32 %v6655_v43, %v6591_v56  ;;  %v6592_v20 = vadd.f32 %v13064_v40, %v6521_v54  ;;  %v8864_v42 = vpop.f32.mrb[52].mxu1  ;;  %v6128_v63 = vpop.f32.mrb[36].mxu0  ;;  %v6661_v52 = vunpack.c.l.bf16 %v9128_v33 }
 0x5d2   : > { %v6418_v53 = vadd.f32 %v8860_v23, %v6128_v63  ;;  %v6425_v35 = vpop.f32.mrb[53].mxu1  ;;  %v6130_v37 = vpop.f32.mrb[37].mxu0 }
 0x5d3   : > { %v6720_v60 = vadd.f32 %v6656_v25, %v6592_v20  ;;  %v8865_v8 = vpop.f32.mrb[54].mxu1  ;;  %v6131_v17 = vpop.f32.mrb[38].mxu0  ;;  %v6783_v26 = vmax.f32 %v6719_v55, 0.0 }
 0x5d4   : > { %v6522_v18 = vadd.f32 %v6418_v53, %v14505_v46  ;;  %v6421_v59 = vadd.f32 %v8861_v39, %v6131_v17  ;;  %v6428_v61 = vpop.f32.mrb[55].mxu1  ;;  %v6133_v50 = vpop.f32.mrb[39].mxu0  ;;  %v13324_v46 = vld [vmem:[%s13363_s4] ss:$0 sm:$0xff] }
 0x5d5   : > { %v6784_v21 = vmax.f32 %v6720_v60, 0.0  ;;  %v6662_v60 = vunpack.c.h.bf16 %v9128_v33  ;;  %v9132_v33 = vld [vmem:[%s9220_s16 + $0x100] sm:$0xff]  }
 0x5d6   : > { %v6593_v51 = vadd.f32 %v13064_v40, %v6522_v18  ;;  %v6523_v13 = vadd.f32 %v6421_v59, %v14506_v24  ;;  %v9130_v59 = vld [vmem:[%s9220_s16 + $0xf0] sm:$0xff]  }
 0x5d7   : > { %v7810_v5 = vpack.c.bf16 %v6784_v21, %v6783_v26  ;;  %v14508_v26 = vld [vmem:[#allocation19_spill] sm:$0xff] }
 0x5d8   : > { %v6721_v36 = vadd.f32 %v6657_v29, %v6593_v51  ;;  %v6594_v44 = vadd.f32 %v13064_v40, %v6523_v13 }
 0x5d9   : > { %7870 = vst [vmem:[%s13095_s8 + $0xc0] sm:$0xff] %v7810_v5   ;;  %v13302_v32 = vpop.f32.mrb[56].mxu1  ;;  %v6136_v4 = vpop.f32.mrb[40].mxu0  ;;  %v14509_v5 = vld [vmem:[#allocation13_spill] sm:$0xff] }
 0x5da   : > { %v6722_v12 = vadd.f32 %v6658_v38, %v6594_v44  ;;  %v6426_v14 = vadd.f32 %v6425_v35, %v6136_v4  ;;  %v6441_v28 = vpop.f32.mrb[57].mxu1  ;;  %v6138_v1 = vpop.f32.mrb[41].mxu0  ;;  %v6785_v19 = vmax.f32 %v6721_v36, 0.0  ;;  %v6664_v44 = vunpack.c.h.bf16 %v9130_v59 }
 0x5db   : > { %v13305_v30 = vpop.f32.mrb[58].mxu1  ;;  %v6139_v23 = vpop.f32.mrb[42].mxu0 }
 0x5dc   : > { %v6786_v41 = vmax.f32 %v6722_v12, 0.0  ;;  %v6524_v48 = vadd.f32 %v6426_v14, %v12992_v31  ;;  %v6429_v47 = vadd.f32 %v6428_v61, %v6139_v23  ;;  %v6444_v6 = vpop.f32.mrb[59].mxu1  ;;  %v6141_v57 = vpop.f32.mrb[43].mxu0  ;;  %v6663_v61 = vunpack.c.l.bf16 %v9130_v59  ;;  %v9133_v59 = vld [vmem:[%s9220_s16 + $0x108] sm:$0xff]  }
 0x5de   : > { %v7815_v39 = vpack.c.bf16 %v6786_v41, %v6785_v19  ;;  %v6595_v3 = vadd.f32 %v13064_v40, %v6524_v48  ;;  %v6525_v0 = vadd.f32 %v6429_v47, %v14507_v9  ;;  %v14510_v47 = vld [vmem:[#allocation72_spill] sm:$0xff] }
 0x5e0   : > { %7871 = vst [vmem:[%s13095_s8 + $0xc8] sm:$0xff] %v7815_v39   ;;  %v6723_v43 = vadd.f32 %v6659_v34, %v6595_v3  ;;  %v6596_v49 = vadd.f32 %v13064_v40, %v6525_v0  ;;  %v9131_v34 = vld [vmem:[%s9220_s16 + $0xf8] sm:$0xff]   ;;  %v14511_v0 = vld [vmem:[#allocation93_spill] sm:$0xff] }
 0x5e1   : > { %v6144_v15 = vpop.f32.mrb[44].mxu0  ;;  %v13312_v16 = vpop.f32.mrb[60].mxu1  ;;  %v6665_v23 = vunpack.c.l.bf16 %v9131_v34 }
 0x5e2   : > { %v6724_v27 = vadd.f32 %v6660_v11, %v6596_v49  ;;  %v6434_v2 = vadd.f32 %v8864_v42, %v6144_v15  ;;  %v6146_v31 = vpop.f32.mrb[45].mxu0  ;;  %v6457_v22 = vpop.f32.mrb[61].mxu1  ;;  %v6787_v54 = vmax.f32 %v6723_v43, 0.0  ;;  %v6666_v43 = vunpack.c.h.bf16 %v9131_v34 }
 0x5e3   : > { %v6147_v56 = vpop.f32.mrb[46].mxu0  ;;  %v13315_v10 = vpop.f32.mrb[62].mxu1 }
 0x5e4   : > { %v6788_v25 = vmax.f32 %v6724_v27, 0.0  ;;  %v6526_v55 = vadd.f32 %v6434_v2, %v13004_v45  ;;  %v6437_v20 = vadd.f32 %v8865_v8, %v6147_v56  ;;  %v6149_v63 = vpop.f32.mrb[47].mxu0  ;;  %v6460_v53 = vpop.f32.mrb[63].mxu1 }
 0x5e6   : > { %v7820_v35 = vpack.c.bf16 %v6788_v25, %v6787_v54  ;;  %v6597_v37 = vadd.f32 %v13064_v40, %v6526_v55  ;;  %v6527_v42 = vadd.f32 %v6437_v20, %v13008_v7  ;;  %v14512_v25 = vld [vmem:[#allocation12_spill] sm:$0xff] }
 0x5e8   : > { %7872 = vst [vmem:[%s13095_s8 + $0xd0] sm:$0xff] %v7820_v35   ;;  %v6725_v17 = vadd.f32 %v6661_v52, %v6597_v37  ;;  %v6598_v18 = vadd.f32 %v13324_v46, %v6527_v42  ;;  %v6667_v52 = vunpack.c.l.bf16 %v9132_v33  ;;  %v14513_v42 = vld [vmem:[#allocation55_spill] sm:$0xff] }
 0x5e9   : > { %v6152_v45 = vpop.f32.mrb[48].mxu0 }
 0x5ea   : > { %v6726_v8 = vadd.f32 %v6662_v60, %v6598_v18  ;;  %v6442_v62 = vadd.f32 %v6441_v28, %v6152_v45  ;;  %v6154_v29 = vpop.f32.mrb[49].mxu0  ;;  %v6789_v50 = vmax.f32 %v6725_v17, 0.0  ;;  %v6668_v17 = vunpack.c.h.bf16 %v9132_v33 }
 0x5eb   : > { %v6155_v40 = vpop.f32.mrb[50].mxu0 }
 0x5ec   : > { %v6790_v7 = vmax.f32 %v6726_v8, 0.0  ;;  %v6528_v21 = vadd.f32 %v6442_v62, %v14508_v26  ;;  %v6445_v51 = vadd.f32 %v6444_v6, %v6155_v40  ;;  %v6157_v24 = vpop.f32.mrb[51].mxu0 }
 0x5ee   : > { %v7825_v13 = vpack.c.bf16 %v6790_v7, %v6789_v50  ;;  %v6599_v38 = vadd.f32 %v13324_v46, %v6528_v21  ;;  %v6529_v36 = vadd.f32 %v6445_v51, %v14509_v5  ;;  %v14514_v7 = vld [vmem:[#allocation77_spill] sm:$0xff] }
 0x5f0   : > { %7873 = vst [vmem:[%s13095_s8 + $0xd8] sm:$0xff] %v7825_v13   ;;  %v6727_v4 = vadd.f32 %v6663_v61, %v6599_v38  ;;  %v6600_v12 = vadd.f32 %v13324_v46, %v6529_v36  ;;  %v6669_v61 = vunpack.c.l.bf16 %v9133_v59  ;;  %v14515_v38 = vld [vmem:[#allocation26_spill] sm:$0xff]  ;;  %v6670_v36 = vunpack.c.h.bf16 %v9133_v59 }
 0x5f1   : > { %v6160_v14 = vpop.f32.mrb[52].mxu0 }
 0x5f2   : > { %v6728_v28 = vadd.f32 %v6664_v44, %v6600_v12  ;;  %v6450_v1 = vadd.f32 %v13302_v32, %v6160_v14  ;;  %v6162_v58 = vpop.f32.mrb[53].mxu0  ;;  %v6791_v41 = vmax.f32 %v6727_v4, 0.0 }
 0x5f3   : > { %v6163_v19 = vpop.f32.mrb[54].mxu0 }
 0x5f4   : > { %v6792_v48 = vmax.f32 %v6728_v28, 0.0  ;;  %v6530_v6 = vadd.f32 %v6450_v1, %v14510_v47  ;;  %v6453_v57 = vadd.f32 %v13305_v30, %v6163_v19  ;;  %v6165_v39 = vpop.f32.mrb[55].mxu0 }
 0x5f6   : > { %v7830_v3 = vpack.c.bf16 %v6792_v48, %v6791_v41  ;;  %v6601_v9 = vadd.f32 %v13324_v46, %v6530_v6  ;;  %v6531_v11 = vadd.f32 %v6453_v57, %v14511_v0 }
 0x5f8   : > { %7874 = vst [vmem:[%s13095_s8 + $0xe0] sm:$0xff] %v7830_v3   ;;  %v6729_v32 = vadd.f32 %v6665_v23, %v6601_v9  ;;  %v6602_v49 = vadd.f32 %v13324_v46, %v6531_v11 }
 0x5f9   : > { %v6168_v15 = vpop.f32.mrb[56].mxu0 }
 0x5fa   : > { %v6730_v27 = vadd.f32 %v6666_v43, %v6602_v49  ;;  %v6458_v2 = vadd.f32 %v6457_v22, %v6168_v15  ;;  %v6170_v31 = vpop.f32.mrb[57].mxu0  ;;  %v6793_v30 = vmax.f32 %v6729_v32, 0.0 }
 0x5fb   : > { %v6171_v56 = vpop.f32.mrb[58].mxu0 }
 0x5fc   : > { %v6794_v54 = vmax.f32 %v6730_v27, 0.0  ;;  %v6532_v55 = vadd.f32 %v6458_v2, %v14512_v25  ;;  %v6461_v20 = vadd.f32 %v6460_v53, %v6171_v56  ;;  %v6173_v63 = vpop.f32.mrb[59].mxu0 }
 0x5fe   : > { %v7835_v35 = vpack.c.bf16 %v6794_v54, %v6793_v30  ;;  %v6603_v37 = vadd.f32 %v13324_v46, %v6532_v55  ;;  %v6533_v60 = vadd.f32 %v6461_v20, %v14513_v42 }
 0x600   : > { %7875 = vst [vmem:[%s13095_s8 + $0xe8] sm:$0xff] %v7835_v35   ;;  %v6731_v18 = vadd.f32 %v6667_v52, %v6603_v37  ;;  %v6604_v22 = vadd.f32 %v13324_v46, %v6533_v60 }
 0x601   : > { %v6176_v45 = vpop.f32.mrb[60].mxu0 }
 0x602   : > { %v6732_v8 = vadd.f32 %v6668_v17, %v6604_v22  ;;  %v6466_v62 = vadd.f32 %v13312_v16, %v6176_v45  ;;  %v6178_v29 = vpop.f32.mrb[61].mxu0  ;;  %v6795_v40 = vmax.f32 %v6731_v18, 0.0 }
 0x603   : > { %v6179_v53 = vpop.f32.mrb[62].mxu0 }
 0x604   : > { %v6796_v50 = vmax.f32 %v6732_v8, 0.0  ;;  %v6534_v26 = vadd.f32 %v6466_v62, %v14514_v7  ;;  %v6469_v21 = vadd.f32 %v13315_v10, %v6179_v53  ;;  %v6181_v51 = vpop.f32.mrb[63].mxu0 }
 0x606   : > { %v7840_v24 = vpack.c.bf16 %v6796_v50, %v6795_v40  ;;  %v6605_v13 = vadd.f32 %v13324_v46, %v6534_v26  ;;  %v6535_v5 = vadd.f32 %v6469_v21, %v14515_v38 }
 0x608   : > { %7876 = vst [vmem:[%s13095_s8 + $0xf0] sm:$0xff] %v7840_v24   ;;  %v6733_v16 = vadd.f32 %v6669_v61, %v6605_v13  ;;  %v6606_v44 = vadd.f32 %v13324_v46, %v6535_v5 }
 0x60a   : > { %v6734_v4 = vadd.f32 %v6670_v36, %v6606_v44  ;;  %v6797_v12 = vmax.f32 %v6733_v16, 0.0 }
 0x60c   : > { %v6798_v14 = vmax.f32 %v6734_v4, 0.0 }
 0x60e   : > { %v7845_v28 = vpack.c.bf16 %v6798_v14, %v6797_v12 }
 0x610   : > { %7877 = vst [vmem:[%s13095_s8 + $0xf8] sm:$0xff] %v7845_v28  }
 0x611 PF: > { %s15_s18 = sadd.s32 1, %s9140_s18  }
 0x612   : > { %p12_p4 = scmp.ge.s32.totalorder %s15_s18, 4  }
 0x614   :  { %14 = sbr.rel (!%p12_p4) target bundleno = 1 (0x1), region = 74 }

</bundles_post_ra>
